<compile_context>
chip_gen: v6e
topology: v6e:2x2x1
jax: 0.10.0
libtpu: 0.0.40
codegen_flags: <defaults>
</compile_context>

<pallas_src>
import functools
import numpy as np
import jax
import jax.numpy as jnp
from jax import lax
from jax.experimental import pallas as pl
from jax.experimental.pallas import tpu as pltpu


_SOUT = 56    # 49 pixels of a 7x7 map, padded to a sublane multiple of 8
_S0 = 200     # 196 pixels of a 14x14 map, padded to a sublane multiple of 8


# ----------------------------------------------------------------------------
# Kernel: both discriminators + adversarial BCE, single invocation, scalar out.
# ----------------------------------------------------------------------------
def _double_disc_kernel(p0_ref, g1_ref, g2_ref,
                        w0_ref, b0_ref, w1_ref, b1_ref, w2_ref, b2_ref,
                        w3_ref, b3_ref, w4_ref, b4_ref,
                        out_ref, *, n, label):
    f32 = jnp.float32

    def lrelu(v):                       # nn.LeakyReLU() default slope = 0.01
        return jnp.where(v > 0, v, 0.01 * v)

    g1 = g1_ref[...].astype(f32)        # (504, 200)  0/1 gather (bf16 exact)
    g2 = g2_ref[...].astype(f32)        # (504, 56)

    # ---- d0: Conv2d(1,16,3,s2,p1).  patches: (n*200, 18), lanes = model*9+tap.
    a0 = lrelu(jnp.dot(p0_ref[...], w0_ref[...], preferred_element_type=f32)
               + b0_ref[...])                                    # (n*200, 32)
    a0 = a0.reshape(n, _S0, 32)

    def conv3x3(act, g_mat, w_taps, b_row):
        """act: (n, S_in, 32); g_mat: (504, S_in); w_taps: (9, 32, 32)."""
        pieces = []
        for i in range(n):                       # O(N) gathers, shared constant
            gi = jnp.dot(g_mat, act[i], preferred_element_type=f32)   # (504,32)
            pieces.append(gi.reshape(9, _SOUT, 32))                   # aligned
        gat = jnp.concatenate(pieces, axis=1)     # (9, n*56, 32), tap-major
        acc = jnp.zeros((n * _SOUT, 32), f32)
        for t in range(9):                        # block-diag-over-model weights
            acc = acc + jnp.dot(gat[t], w_taps[t], preferred_element_type=f32)
        return lrelu(acc + b_row)

    # ---- d1: Conv2d(16,16,3,s2,p1);  d2: Conv2d(16,16,3,s1,p1).
    a1 = conv3x3(a0, g1, w1_ref[...], b1_ref[...])                # (n*56, 32)
    a2 = conv3x3(a1.reshape(n, _SOUT, 32), g2, w2_ref[...], b2_ref[...])

    # ---- d3: ConvTranspose2d(16,16,4,s4): all 16 spatial taps stacked on lanes.
    h = lrelu(jnp.dot(a2, w3_ref[...], preferred_element_type=f32)
              + b3_ref[...])                                      # (n*56, 512)
    # ---- d4: Conv2d(16,1,1) folded per tap (block-diag): logits (n*56, 32),
    #          lanes = model*16 + tap; each valid (row, lane) is exactly one of
    #          the 2 * n * 28 * 28 output pixels (deconv scatter = permutation).
    z = jnp.dot(h, w4_ref[...], preferred_element_type=f32) + b4_ref[...]

    # ---- sigmoid + F.binary_cross_entropy vs constant ones/zeros, in stable
    #      logits form (exact for 0/1 targets), with PyTorch's -100 log clamp.
    zz = -z if label else z
    per = jnp.maximum(zz, 0.0) + jnp.log1p(jnp.exp(-jnp.abs(zz)))
    per = jnp.minimum(per, 100.0)
    row = lax.broadcasted_iota(jnp.int32, z.shape, 0)
    per = jnp.where((row % _SOUT) < 49, per, 0.0)   # drop the 49->56 pad rows
    # Each model's mean is over n*784 pixels; the two per-model means add.
    out_ref[...] = (jnp.sum(per) * (1.0 / (n * 784.0))).reshape(1, 1)


def _run_fused(params, patches, n, label):
    kernel = functools.partial(_double_disc_kernel, n=n, label=bool(label))
    out = pl.pallas_call(
        kernel,
        out_shape=jax.ShapeDtypeStruct((1, 1), jnp.float32),
        compiler_params=pltpu.CompilerParams(vmem_limit_bytes=32 * 1024 * 1024),
    )(patches, params["g1"], params["g2"],
      params["w0"], params["b0"], params["w1"], params["b1"],
      params["w2"], params["b2"], params["w3"], params["b3"],
      params["w4"], params["b4"])
    return out[0, 0]


# ----------------------------------------------------------------------------
# Batch-independent 0/1 gather constants (built once at init, no per-N rebuild).
# ----------------------------------------------------------------------------
def _build_gather(h_in, w_in, h_out, w_out, stride, pad, cols):
    g = np.zeros((9 * _SOUT, cols), np.float32)
    for di in range(3):
        for dj in range(3):
            t = di * 3 + dj
            for oi in range(h_out):
                ii = stride * oi + di - pad
                if ii < 0 or ii >= h_in:
                    continue
                for oj in range(w_out):
                    ij = stride * oj + dj - pad
                    if ij < 0 or ij >= w_in:
                        continue
                    g[t * _SOUT + oi * w_out + oj, ii * w_in + ij] = 1.0
    return g


# ----------------------------------------------------------------------------
# Parameter init (PyTorch layouts) + matmul-ready packing (all hoisted to init).
# ----------------------------------------------------------------------------
def _uniform(key, shape, bound):
    return jax.random.uniform(key, shape, jnp.float32, -bound, bound)


def init_discriminator_raw(key):
    ks = jax.random.split(key, 10)
    p = {}
    b = 1.0 / np.sqrt(1 * 3 * 3)
    p["w0"], p["b0"] = _uniform(ks[0], (16, 1, 3, 3), b), _uniform(ks[1], (16,), b)
    b = 1.0 / np.sqrt(16 * 3 * 3)
    p["w1"], p["b1"] = _uniform(ks[2], (16, 16, 3, 3), b), _uniform(ks[3], (16,), b)
    p["w2"], p["b2"] = _uniform(ks[4], (16, 16, 3, 3), b), _uniform(ks[5], (16,), b)
    b = 1.0 / np.sqrt(16 * 4 * 4)
    p["w3"], p["b3"] = _uniform(ks[6], (16, 16, 4, 4), b), _uniform(ks[7], (16,), b)  # ConvT: (in,out,kh,kw)
    b = 1.0 / np.sqrt(16)
    p["w4"], p["b4"] = _uniform(ks[8], (1, 16, 1, 1), b), _uniform(ks[9], (1,), b)
    return p


def _bdiag2(a, b):
    za = jnp.zeros((a.shape[0], b.shape[1]), a.dtype)
    zb = jnp.zeros((b.shape[0], a.shape[1]), a.dtype)
    return jnp.concatenate(
        [jnp.concatenate([a, za], axis=1), jnp.concatenate([zb, b], axis=1)], axis=0)


def init_double_masks_params(key):
    k_vis, k_amo = jax.random.split(key)
    raw_vis, raw_amo = init_discriminator_raw(k_vis), init_discriminator_raw(k_amo)

    def per_model(p):
        m = {}
        m["w0"] = jnp.transpose(p["w0"][:, 0], (1, 2, 0)).reshape(9, 16)         # (tap, co)
        m["w1"] = jnp.transpose(p["w1"], (2, 3, 1, 0)).reshape(9, 16, 16)        # (tap, ci, co)
        m["w2"] = jnp.transpose(p["w2"], (2, 3, 1, 0)).reshape(9, 16, 16)
        m["w3"] = jnp.transpose(p["w3"], (0, 2, 3, 1)).reshape(16, 256)          # (ci, tap*16+co)
        m["w4"] = jnp.kron(jnp.eye(16, dtype=jnp.float32), p["w4"].reshape(16, 1))  # (256, 16)
        m["b0"], m["b1"], m["b2"] = p["b0"], p["b1"], p["b2"]
        m["b3"] = jnp.tile(p["b3"], 16)                                          # (256,)
        m["b4"] = jnp.tile(p["b4"], 16)                                          # (16,)
        return m

    mv, ma = per_model(raw_vis), per_model(raw_amo)
    return {
        # Weights block-diagonal over the 2 sub-models only (O(1) in batch size).
        "w0": _bdiag2(mv["w0"], ma["w0"]),                                       # (18, 32)
        "w1": jnp.stack([_bdiag2(mv["w1"][t], ma["w1"][t]) for t in range(9)]),  # (9, 32, 32)
        "w2": jnp.stack([_bdiag2(mv["w2"][t], ma["w2"][t]) for t in range(9)]),
        "w3": _bdiag2(mv["w3"], ma["w3"]),                                       # (32, 512)
        "w4": _bdiag2(mv["w4"], ma["w4"]),                                       # (512, 32)
        "b0": jnp.concatenate([mv["b0"], ma["b0"]]).reshape(1, 32),
        "b1": jnp.concatenate([mv["b1"], ma["b1"]]).reshape(1, 32),
        "b2": jnp.concatenate([mv["b2"], ma["b2"]]).reshape(1, 32),
        "b3": jnp.concatenate([mv["b3"], ma["b3"]]).reshape(1, 512),
        "b4": jnp.concatenate([mv["b4"], ma["b4"]]).reshape(1, 32),
        # Batch-independent 0/1 gather constants (exact in bf16), built once.
        "g1": jnp.asarray(_build_gather(14, 14, 7, 7, 2, 1, _S0), jnp.bfloat16),   # (504, 200)
        "g2": jnp.asarray(_build_gather(7, 7, 7, 7, 1, 1, _SOUT), jnp.bfloat16),   # (504, 56)
    }


# ----------------------------------------------------------------------------
# AdaptSegNetModule_DoubleMasks.forward
# ----------------------------------------------------------------------------
@functools.partial(jax.jit, static_argnames=("label",))
def adapt_seg_net_double_masks_forward(params, vis_mask, amo_mask, label):
    """Both sub-models use input_type='output_mask': predictor is identity and
    prediction_loss = 0, so the result is the sum of the two adversarial BCEs."""
    assert isinstance(label, bool)
    n = vis_mask.shape[0]
    if n == 0:
        return jnp.float32(0.0)      # mirrors the module's empty-batch early-out
    for m in (vis_mask, amo_mask):
        assert m.shape[1:] == (1, 28, 28), f"Output mask shape received: {m.shape}"

    # TODO(synk): GradReverse only negates gradients; the forward pass is identity.
    x = jnp.stack([vis_mask[:, 0], amo_mask[:, 0]], axis=-1).astype(jnp.float32)  # (N,28,28,2)

    # im2col for d0 (3x3, stride 2, pad 1) -> (N*200, 18), lanes = model*9 + tap.
    xp = jnp.pad(x, ((0, 0), (1, 1), (1, 1), (0, 0)))
    taps = [xp[:, di:di + 28:2, dj:dj + 28:2, :] for di in range(3) for dj in range(3)]
    pat = jnp.stack(taps, axis=-1)                    # (N, 14, 14, 2, 9)
    pat = pat.reshape(n, 196, 18)
    pat = jnp.pad(pat, ((0, 0), (0, _S0 - 196), (0, 0))).reshape(n * _S0, 18)

    return _run_fused(params, pat, n, label)


if __name__ == "__main__":
    key = jax.random.PRNGKey(0)
    k_vis, k_amo, k_par = jax.random.split(key, 3)

    N = 2
    vis_mask = jax.random.normal(k_vis, (N, 1, 28, 28), jnp.float32)
    amo_mask = jax.random.normal(k_amo, (N, 1, 28, 28), jnp.float32)
    params = init_double_masks_params(k_par)

    loss = adapt_seg_net_double_masks_forward(params, vis_mask, amo_mask, label=True)
    loss = jax.block_until_ready(loss)
    assert loss.shape == () and bool(jnp.isfinite(loss))
    print("KERNEL_OK")
</pallas_src>

<mosaic_0001>
module attributes {stable_mosaic.version = 11 : i64} {
  func.func @_double_disc_kernel(%arg0: memref<400x18xf32, #tpu.memory_space<vmem>>, %arg1: memref<504x200xbf16, #tpu.memory_space<vmem>>, %arg2: memref<504x56xbf16, #tpu.memory_space<vmem>>, %arg3: memref<18x32xf32, #tpu.memory_space<vmem>>, %arg4: memref<1x32xf32, #tpu.memory_space<vmem>>, %arg5: memref<9x32x32xf32, #tpu.memory_space<vmem>>, %arg6: memref<1x32xf32, #tpu.memory_space<vmem>>, %arg7: memref<9x32x32xf32, #tpu.memory_space<vmem>>, %arg8: memref<1x32xf32, #tpu.memory_space<vmem>>, %arg9: memref<32x512xf32, #tpu.memory_space<vmem>>, %arg10: memref<1x512xf32, #tpu.memory_space<vmem>>, %arg11: memref<512x32xf32, #tpu.memory_space<vmem>>, %arg12: memref<1x32xf32, #tpu.memory_space<vmem>>, %arg13: memref<1x1xf32, #tpu.memory_space<vmem>>) attributes {dimension_semantics = [], scalar_prefetch = 0 : i64, scratch_operands = 0 : i64, tpu.core_type = #tpu.core_type<tc>} {
    %c0 = arith.constant 0 : index
    %c0_0 = arith.constant 0 : index
    %0 = vector.load %arg1[%c0, %c0_0] : memref<504x200xbf16, #tpu.memory_space<vmem>>, vector<504x200xbf16>
    %1 = arith.extf %0 : vector<504x200xbf16> to vector<504x200xf32>
    %c0_1 = arith.constant 0 : index
    %c0_2 = arith.constant 0 : index
    %2 = vector.load %arg2[%c0_1, %c0_2] : memref<504x56xbf16, #tpu.memory_space<vmem>>, vector<504x56xbf16>
    %3 = arith.extf %2 : vector<504x56xbf16> to vector<504x56xf32>
    %c0_3 = arith.constant 0 : index
    %c0_4 = arith.constant 0 : index
    %4 = vector.load %arg0[%c0_3, %c0_4] : memref<400x18xf32, #tpu.memory_space<vmem>>, vector<400x18xf32>
    %c0_5 = arith.constant 0 : index
    %c0_6 = arith.constant 0 : index
    %5 = vector.load %arg3[%c0_5, %c0_6] : memref<18x32xf32, #tpu.memory_space<vmem>>, vector<18x32xf32>
    %cst = arith.constant dense<0.000000e+00> : vector<400x32xf32>
    %6 = tpu.matmul %4, %5, %cst {dimension_numbers = #tpu.dot_dimension_numbers<[1], [0], [0], [1], [0, 0, 1, 1], [], []>} : vector<400x18xf32>, vector<18x32xf32>, vector<400x32xf32> -> vector<400x32xf32>
    %c0_7 = arith.constant 0 : index
    %c0_8 = arith.constant 0 : index
    %7 = vector.load %arg4[%c0_7, %c0_8] : memref<1x32xf32, #tpu.memory_space<vmem>>, vector<1x32xf32>
    %8 = vector.broadcast %7 : vector<1x32xf32> to vector<400x32xf32>
    %9 = arith.addf %6, %8 : vector<400x32xf32>
    %cst_9 = arith.constant 0.000000e+00 : f32
    %10 = vector.broadcast %cst_9 : f32 to vector<400x32xf32>
    %11 = arith.cmpf ogt, %9, %10 : vector<400x32xf32>
    %cst_10 = arith.constant 0.00999999977 : f32
    %12 = vector.broadcast %cst_10 : f32 to vector<400x32xf32>
    %13 = arith.mulf %12, %9 : vector<400x32xf32>
    %14 = arith.select %11, %9, %13 : vector<400x32xi1>, vector<400x32xf32>
    %15 = vector.shape_cast %14 : vector<400x32xf32> to vector<2x200x32xf32>
    %c0_11 = arith.constant 0 : index
    %c0_12 = arith.constant 0 : index
    %c0_13 = arith.constant 0 : index
    %16 = vector.load %arg5[%c0_11, %c0_12, %c0_13] : memref<9x32x32xf32, #tpu.memory_space<vmem>>, vector<9x32x32xf32>
    %c0_14 = arith.constant 0 : index
    %c0_15 = arith.constant 0 : index
    %17 = vector.load %arg6[%c0_14, %c0_15] : memref<1x32xf32, #tpu.memory_space<vmem>>, vector<1x32xf32>
    %18 = vector.extract_strided_slice %15 {offsets = [0, 0, 0], sizes = [1, 200, 32], strides = [1, 1, 1]} : vector<2x200x32xf32> to vector<1x200x32xf32>
    %19 = vector.shape_cast %18 : vector<1x200x32xf32> to vector<200x32xf32>
    %cst_16 = arith.constant dense<0.000000e+00> : vector<504x32xf32>
    %20 = tpu.matmul %1, %19, %cst_16 {dimension_numbers = #tpu.dot_dimension_numbers<[1], [0], [0], [1], [0, 0, 1, 1], [], []>} : vector<504x200xf32>, vector<200x32xf32>, vector<504x32xf32> -> vector<504x32xf32>
    %21 = vector.shape_cast %20 : vector<504x32xf32> to vector<9x56x32xf32>
    %22 = vector.extract_strided_slice %15 {offsets = [1, 0, 0], sizes = [1, 200, 32], strides = [1, 1, 1]} : vector<2x200x32xf32> to vector<1x200x32xf32>
    %23 = vector.shape_cast %22 : vector<1x200x32xf32> to vector<200x32xf32>
    %cst_17 = arith.constant dense<0.000000e+00> : vector<504x32xf32>
    %24 = tpu.matmul %1, %23, %cst_17 {dimension_numbers = #tpu.dot_dimension_numbers<[1], [0], [0], [1], [0, 0, 1, 1], [], []>} : vector<504x200xf32>, vector<200x32xf32>, vector<504x32xf32> -> vector<504x32xf32>
    %25 = vector.shape_cast %24 : vector<504x32xf32> to vector<9x56x32xf32>
    %26 = tpu.concatenate %21, %25 in 1 : vector<9x56x32xf32>, vector<9x56x32xf32> -> vector<9x112x32xf32>
    %cst_18 = arith.constant 0.000000e+00 : f32
    %27 = vector.broadcast %cst_18 : f32 to vector<112x32xf32>
    %28 = vector.extract_strided_slice %26 {offsets = [0, 0, 0], sizes = [1, 112, 32], strides = [1, 1, 1]} : vector<9x112x32xf32> to vector<1x112x32xf32>
    %29 = vector.shape_cast %28 : vector<1x112x32xf32> to vector<112x32xf32>
    %30 = vector.extract_strided_slice %16 {offsets = [0, 0, 0], sizes = [1, 32, 32], strides = [1, 1, 1]} : vector<9x32x32xf32> to vector<1x32x32xf32>
    %31 = vector.shape_cast %30 : vector<1x32x32xf32> to vector<32x32xf32>
    %cst_19 = arith.constant dense<0.000000e+00> : vector<112x32xf32>
    %32 = tpu.matmul %29, %31, %cst_19 {dimension_numbers = #tpu.dot_dimension_numbers<[1], [0], [0], [1], [0, 0, 1, 1], [], []>} : vector<112x32xf32>, vector<32x32xf32>, vector<112x32xf32> -> vector<112x32xf32>
    %33 = arith.addf %27, %32 : vector<112x32xf32>
    %34 = vector.extract_strided_slice %26 {offsets = [1, 0, 0], sizes = [1, 112, 32], strides = [1, 1, 1]} : vector<9x112x32xf32> to vector<1x112x32xf32>
    %35 = vector.shape_cast %34 : vector<1x112x32xf32> to vector<112x32xf32>
    %36 = vector.extract_strided_slice %16 {offsets = [1, 0, 0], sizes = [1, 32, 32], strides = [1, 1, 1]} : vector<9x32x32xf32> to vector<1x32x32xf32>
    %37 = vector.shape_cast %36 : vector<1x32x32xf32> to vector<32x32xf32>
    %cst_20 = arith.constant dense<0.000000e+00> : vector<112x32xf32>
    %38 = tpu.matmul %35, %37, %cst_20 {dimension_numbers = #tpu.dot_dimension_numbers<[1], [0], [0], [1], [0, 0, 1, 1], [], []>} : vector<112x32xf32>, vector<32x32xf32>, vector<112x32xf32> -> vector<112x32xf32>
    %39 = arith.addf %33, %38 : vector<112x32xf32>
    %40 = vector.extract_strided_slice %26 {offsets = [2, 0, 0], sizes = [1, 112, 32], strides = [1, 1, 1]} : vector<9x112x32xf32> to vector<1x112x32xf32>
    %41 = vector.shape_cast %40 : vector<1x112x32xf32> to vector<112x32xf32>
    %42 = vector.extract_strided_slice %16 {offsets = [2, 0, 0], sizes = [1, 32, 32], strides = [1, 1, 1]} : vector<9x32x32xf32> to vector<1x32x32xf32>
    %43 = vector.shape_cast %42 : vector<1x32x32xf32> to vector<32x32xf32>
    %cst_21 = arith.constant dense<0.000000e+00> : vector<112x32xf32>
    %44 = tpu.matmul %41, %43, %cst_21 {dimension_numbers = #tpu.dot_dimension_numbers<[1], [0], [0], [1], [0, 0, 1, 1], [], []>} : vector<112x32xf32>, vector<32x32xf32>, vector<112x32xf32> -> vector<112x32xf32>
    %45 = arith.addf %39, %44 : vector<112x32xf32>
    %46 = vector.extract_strided_slice %26 {offsets = [3, 0, 0], sizes = [1, 112, 32], strides = [1, 1, 1]} : vector<9x112x32xf32> to vector<1x112x32xf32>
    %47 = vector.shape_cast %46 : vector<1x112x32xf32> to vector<112x32xf32>
    %48 = vector.extract_strided_slice %16 {offsets = [3, 0, 0], sizes = [1, 32, 32], strides = [1, 1, 1]} : vector<9x32x32xf32> to vector<1x32x32xf32>
    %49 = vector.shape_cast %48 : vector<1x32x32xf32> to vector<32x32xf32>
    %cst_22 = arith.constant dense<0.000000e+00> : vector<112x32xf32>
    %50 = tpu.matmul %47, %49, %cst_22 {dimension_numbers = #tpu.dot_dimension_numbers<[1], [0], [0], [1], [0, 0, 1, 1], [], []>} : vector<112x32xf32>, vector<32x32xf32>, vector<112x32xf32> -> vector<112x32xf32>
    %51 = arith.addf %45, %50 : vector<112x32xf32>
    %52 = vector.extract_strided_slice %26 {offsets = [4, 0, 0], sizes = [1, 112, 32], strides = [1, 1, 1]} : vector<9x112x32xf32> to vector<1x112x32xf32>
    %53 = vector.shape_cast %52 : vector<1x112x32xf32> to vector<112x32xf32>
    %54 = vector.extract_strided_slice %16 {offsets = [4, 0, 0], sizes = [1, 32, 32], strides = [1, 1, 1]} : vector<9x32x32xf32> to vector<1x32x32xf32>
    %55 = vector.shape_cast %54 : vector<1x32x32xf32> to vector<32x32xf32>
    %cst_23 = arith.constant dense<0.000000e+00> : vector<112x32xf32>
    %56 = tpu.matmul %53, %55, %cst_23 {dimension_numbers = #tpu.dot_dimension_numbers<[1], [0], [0], [1], [0, 0, 1, 1], [], []>} : vector<112x32xf32>, vector<32x32xf32>, vector<112x32xf32> -> vector<112x32xf32>
    %57 = arith.addf %51, %56 : vector<112x32xf32>
    %58 = vector.extract_strided_slice %26 {offsets = [5, 0, 0], sizes = [1, 112, 32], strides = [1, 1, 1]} : vector<9x112x32xf32> to vector<1x112x32xf32>
    %59 = vector.shape_cast %58 : vector<1x112x32xf32> to vector<112x32xf32>
    %60 = vector.extract_strided_slice %16 {offsets = [5, 0, 0], sizes = [1, 32, 32], strides = [1, 1, 1]} : vector<9x32x32xf32> to vector<1x32x32xf32>
    %61 = vector.shape_cast %60 : vector<1x32x32xf32> to vector<32x32xf32>
    %cst_24 = arith.constant dense<0.000000e+00> : vector<112x32xf32>
    %62 = tpu.matmul %59, %61, %cst_24 {dimension_numbers = #tpu.dot_dimension_numbers<[1], [0], [0], [1], [0, 0, 1, 1], [], []>} : vector<112x32xf32>, vector<32x32xf32>, vector<112x32xf32> -> vector<112x32xf32>
    %63 = arith.addf %57, %62 : vector<112x32xf32>
    %64 = vector.extract_strided_slice %26 {offsets = [6, 0, 0], sizes = [1, 112, 32], strides = [1, 1, 1]} : vector<9x112x32xf32> to vector<1x112x32xf32>
    %65 = vector.shape_cast %64 : vector<1x112x32xf32> to vector<112x32xf32>
    %66 = vector.extract_strided_slice %16 {offsets = [6, 0, 0], sizes = [1, 32, 32], strides = [1, 1, 1]} : vector<9x32x32xf32> to vector<1x32x32xf32>
    %67 = vector.shape_cast %66 : vector<1x32x32xf32> to vector<32x32xf32>
    %cst_25 = arith.constant dense<0.000000e+00> : vector<112x32xf32>
    %68 = tpu.matmul %65, %67, %cst_25 {dimension_numbers = #tpu.dot_dimension_numbers<[1], [0], [0], [1], [0, 0, 1, 1], [], []>} : vector<112x32xf32>, vector<32x32xf32>, vector<112x32xf32> -> vector<112x32xf32>
    %69 = arith.addf %63, %68 : vector<112x32xf32>
    %70 = vector.extract_strided_slice %26 {offsets = [7, 0, 0], sizes = [1, 112, 32], strides = [1, 1, 1]} : vector<9x112x32xf32> to vector<1x112x32xf32>
    %71 = vector.shape_cast %70 : vector<1x112x32xf32> to vector<112x32xf32>
    %72 = vector.extract_strided_slice %16 {offsets = [7, 0, 0], sizes = [1, 32, 32], strides = [1, 1, 1]} : vector<9x32x32xf32> to vector<1x32x32xf32>
    %73 = vector.shape_cast %72 : vector<1x32x32xf32> to vector<32x32xf32>
    %cst_26 = arith.constant dense<0.000000e+00> : vector<112x32xf32>
    %74 = tpu.matmul %71, %73, %cst_26 {dimension_numbers = #tpu.dot_dimension_numbers<[1], [0], [0], [1], [0, 0, 1, 1], [], []>} : vector<112x32xf32>, vector<32x32xf32>, vector<112x32xf32> -> vector<112x32xf32>
    %75 = arith.addf %69, %74 : vector<112x32xf32>
    %76 = vector.extract_strided_slice %26 {offsets = [8, 0, 0], sizes = [1, 112, 32], strides = [1, 1, 1]} : vector<9x112x32xf32> to vector<1x112x32xf32>
    %77 = vector.shape_cast %76 : vector<1x112x32xf32> to vector<112x32xf32>
    %78 = vector.extract_strided_slice %16 {offsets = [8, 0, 0], sizes = [1, 32, 32], strides = [1, 1, 1]} : vector<9x32x32xf32> to vector<1x32x32xf32>
    %79 = vector.shape_cast %78 : vector<1x32x32xf32> to vector<32x32xf32>
    %cst_27 = arith.constant dense<0.000000e+00> : vector<112x32xf32>
    %80 = tpu.matmul %77, %79, %cst_27 {dimension_numbers = #tpu.dot_dimension_numbers<[1], [0], [0], [1], [0, 0, 1, 1], [], []>} : vector<112x32xf32>, vector<32x32xf32>, vector<112x32xf32> -> vector<112x32xf32>
    %81 = arith.addf %75, %80 : vector<112x32xf32>
    %82 = vector.broadcast %17 : vector<1x32xf32> to vector<112x32xf32>
    %83 = arith.addf %81, %82 : vector<112x32xf32>
    %cst_28 = arith.constant 0.000000e+00 : f32
    %84 = vector.broadcast %cst_28 : f32 to vector<112x32xf32>
    %85 = arith.cmpf ogt, %83, %84 : vector<112x32xf32>
    %cst_29 = arith.constant 0.00999999977 : f32
    %86 = vector.broadcast %cst_29 : f32 to vector<112x32xf32>
    %87 = arith.mulf %86, %83 : vector<112x32xf32>
    %88 = arith.select %85, %83, %87 : vector<112x32xi1>, vector<112x32xf32>
    %89 = vector.shape_cast %88 : vector<112x32xf32> to vector<2x56x32xf32>
    %c0_30 = arith.constant 0 : index
    %c0_31 = arith.constant 0 : index
    %c0_32 = arith.constant 0 : index
    %90 = vector.load %arg7[%c0_30, %c0_31, %c0_32] : memref<9x32x32xf32, #tpu.memory_space<vmem>>, vector<9x32x32xf32>
    %c0_33 = arith.constant 0 : index
    %c0_34 = arith.constant 0 : index
    %91 = vector.load %arg8[%c0_33, %c0_34] : memref<1x32xf32, #tpu.memory_space<vmem>>, vector<1x32xf32>
    %92 = vector.extract_strided_slice %89 {offsets = [0, 0, 0], sizes = [1, 56, 32], strides = [1, 1, 1]} : vector<2x56x32xf32> to vector<1x56x32xf32>
    %93 = vector.shape_cast %92 : vector<1x56x32xf32> to vector<56x32xf32>
    %cst_35 = arith.constant dense<0.000000e+00> : vector<504x32xf32>
    %94 = tpu.matmul %3, %93, %cst_35 {dimension_numbers = #tpu.dot_dimension_numbers<[1], [0], [0], [1], [0, 0, 1, 1], [], []>} : vector<504x56xf32>, vector<56x32xf32>, vector<504x32xf32> -> vector<504x32xf32>
    %95 = vector.shape_cast %94 : vector<504x32xf32> to vector<9x56x32xf32>
    %96 = vector.extract_strided_slice %89 {offsets = [1, 0, 0], sizes = [1, 56, 32], strides = [1, 1, 1]} : vector<2x56x32xf32> to vector<1x56x32xf32>
    %97 = vector.shape_cast %96 : vector<1x56x32xf32> to vector<56x32xf32>
    %cst_36 = arith.constant dense<0.000000e+00> : vector<504x32xf32>
    %98 = tpu.matmul %3, %97, %cst_36 {dimension_numbers = #tpu.dot_dimension_numbers<[1], [0], [0], [1], [0, 0, 1, 1], [], []>} : vector<504x56xf32>, vector<56x32xf32>, vector<504x32xf32> -> vector<504x32xf32>
    %99 = vector.shape_cast %98 : vector<504x32xf32> to vector<9x56x32xf32>
    %100 = tpu.concatenate %95, %99 in 1 : vector<9x56x32xf32>, vector<9x56x32xf32> -> vector<9x112x32xf32>
    %cst_37 = arith.constant 0.000000e+00 : f32
    %101 = vector.broadcast %cst_37 : f32 to vector<112x32xf32>
    %102 = vector.extract_strided_slice %100 {offsets = [0, 0, 0], sizes = [1, 112, 32], strides = [1, 1, 1]} : vector<9x112x32xf32> to vector<1x112x32xf32>
    %103 = vector.shape_cast %102 : vector<1x112x32xf32> to vector<112x32xf32>
    %104 = vector.extract_strided_slice %90 {offsets = [0, 0, 0], sizes = [1, 32, 32], strides = [1, 1, 1]} : vector<9x32x32xf32> to vector<1x32x32xf32>
    %105 = vector.shape_cast %104 : vector<1x32x32xf32> to vector<32x32xf32>
    %cst_38 = arith.constant dense<0.000000e+00> : vector<112x32xf32>
    %106 = tpu.matmul %103, %105, %cst_38 {dimension_numbers = #tpu.dot_dimension_numbers<[1], [0], [0], [1], [0, 0, 1, 1], [], []>} : vector<112x32xf32>, vector<32x32xf32>, vector<112x32xf32> -> vector<112x32xf32>
    %107 = arith.addf %101, %106 : vector<112x32xf32>
    %108 = vector.extract_strided_slice %100 {offsets = [1, 0, 0], sizes = [1, 112, 32], strides = [1, 1, 1]} : vector<9x112x32xf32> to vector<1x112x32xf32>
    %109 = vector.shape_cast %108 : vector<1x112x32xf32> to vector<112x32xf32>
    %110 = vector.extract_strided_slice %90 {offsets = [1, 0, 0], sizes = [1, 32, 32], strides = [1, 1, 1]} : vector<9x32x32xf32> to vector<1x32x32xf32>
    %111 = vector.shape_cast %110 : vector<1x32x32xf32> to vector<32x32xf32>
    %cst_39 = arith.constant dense<0.000000e+00> : vector<112x32xf32>
    %112 = tpu.matmul %109, %111, %cst_39 {dimension_numbers = #tpu.dot_dimension_numbers<[1], [0], [0], [1], [0, 0, 1, 1], [], []>} : vector<112x32xf32>, vector<32x32xf32>, vector<112x32xf32> -> vector<112x32xf32>
    %113 = arith.addf %107, %112 : vector<112x32xf32>
    %114 = vector.extract_strided_slice %100 {offsets = [2, 0, 0], sizes = [1, 112, 32], strides = [1, 1, 1]} : vector<9x112x32xf32> to vector<1x112x32xf32>
    %115 = vector.shape_cast %114 : vector<1x112x32xf32> to vector<112x32xf32>
    %116 = vector.extract_strided_slice %90 {offsets = [2, 0, 0], sizes = [1, 32, 32], strides = [1, 1, 1]} : vector<9x32x32xf32> to vector<1x32x32xf32>
    %117 = vector.shape_cast %116 : vector<1x32x32xf32> to vector<32x32xf32>
    %cst_40 = arith.constant dense<0.000000e+00> : vector<112x32xf32>
    %118 = tpu.matmul %115, %117, %cst_40 {dimension_numbers = #tpu.dot_dimension_numbers<[1], [0], [0], [1], [0, 0, 1, 1], [], []>} : vector<112x32xf32>, vector<32x32xf32>, vector<112x32xf32> -> vector<112x32xf32>
    %119 = arith.addf %113, %118 : vector<112x32xf32>
    %120 = vector.extract_strided_slice %100 {offsets = [3, 0, 0], sizes = [1, 112, 32], strides = [1, 1, 1]} : vector<9x112x32xf32> to vector<1x112x32xf32>
    %121 = vector.shape_cast %120 : vector<1x112x32xf32> to vector<112x32xf32>
    %122 = vector.extract_strided_slice %90 {offsets = [3, 0, 0], sizes = [1, 32, 32], strides = [1, 1, 1]} : vector<9x32x32xf32> to vector<1x32x32xf32>
    %123 = vector.shape_cast %122 : vector<1x32x32xf32> to vector<32x32xf32>
    %cst_41 = arith.constant dense<0.000000e+00> : vector<112x32xf32>
    %124 = tpu.matmul %121, %123, %cst_41 {dimension_numbers = #tpu.dot_dimension_numbers<[1], [0], [0], [1], [0, 0, 1, 1], [], []>} : vector<112x32xf32>, vector<32x32xf32>, vector<112x32xf32> -> vector<112x32xf32>
    %125 = arith.addf %119, %124 : vector<112x32xf32>
    %126 = vector.extract_strided_slice %100 {offsets = [4, 0, 0], sizes = [1, 112, 32], strides = [1, 1, 1]} : vector<9x112x32xf32> to vector<1x112x32xf32>
    %127 = vector.shape_cast %126 : vector<1x112x32xf32> to vector<112x32xf32>
    %128 = vector.extract_strided_slice %90 {offsets = [4, 0, 0], sizes = [1, 32, 32], strides = [1, 1, 1]} : vector<9x32x32xf32> to vector<1x32x32xf32>
    %129 = vector.shape_cast %128 : vector<1x32x32xf32> to vector<32x32xf32>
    %cst_42 = arith.constant dense<0.000000e+00> : vector<112x32xf32>
    %130 = tpu.matmul %127, %129, %cst_42 {dimension_numbers = #tpu.dot_dimension_numbers<[1], [0], [0], [1], [0, 0, 1, 1], [], []>} : vector<112x32xf32>, vector<32x32xf32>, vector<112x32xf32> -> vector<112x32xf32>
    %131 = arith.addf %125, %130 : vector<112x32xf32>
    %132 = vector.extract_strided_slice %100 {offsets = [5, 0, 0], sizes = [1, 112, 32], strides = [1, 1, 1]} : vector<9x112x32xf32> to vector<1x112x32xf32>
    %133 = vector.shape_cast %132 : vector<1x112x32xf32> to vector<112x32xf32>
    %134 = vector.extract_strided_slice %90 {offsets = [5, 0, 0], sizes = [1, 32, 32], strides = [1, 1, 1]} : vector<9x32x32xf32> to vector<1x32x32xf32>
    %135 = vector.shape_cast %134 : vector<1x32x32xf32> to vector<32x32xf32>
    %cst_43 = arith.constant dense<0.000000e+00> : vector<112x32xf32>
    %136 = tpu.matmul %133, %135, %cst_43 {dimension_numbers = #tpu.dot_dimension_numbers<[1], [0], [0], [1], [0, 0, 1, 1], [], []>} : vector<112x32xf32>, vector<32x32xf32>, vector<112x32xf32> -> vector<112x32xf32>
    %137 = arith.addf %131, %136 : vector<112x32xf32>
    %138 = vector.extract_strided_slice %100 {offsets = [6, 0, 0], sizes = [1, 112, 32], strides = [1, 1, 1]} : vector<9x112x32xf32> to vector<1x112x32xf32>
    %139 = vector.shape_cast %138 : vector<1x112x32xf32> to vector<112x32xf32>
    %140 = vector.extract_strided_slice %90 {offsets = [6, 0, 0], sizes = [1, 32, 32], strides = [1, 1, 1]} : vector<9x32x32xf32> to vector<1x32x32xf32>
    %141 = vector.shape_cast %140 : vector<1x32x32xf32> to vector<32x32xf32>
    %cst_44 = arith.constant dense<0.000000e+00> : vector<112x32xf32>
    %142 = tpu.matmul %139, %141, %cst_44 {dimension_numbers = #tpu.dot_dimension_numbers<[1], [0], [0], [1], [0, 0, 1, 1], [], []>} : vector<112x32xf32>, vector<32x32xf32>, vector<112x32xf32> -> vector<112x32xf32>
    %143 = arith.addf %137, %142 : vector<112x32xf32>
    %144 = vector.extract_strided_slice %100 {offsets = [7, 0, 0], sizes = [1, 112, 32], strides = [1, 1, 1]} : vector<9x112x32xf32> to vector<1x112x32xf32>
    %145 = vector.shape_cast %144 : vector<1x112x32xf32> to vector<112x32xf32>
    %146 = vector.extract_strided_slice %90 {offsets = [7, 0, 0], sizes = [1, 32, 32], strides = [1, 1, 1]} : vector<9x32x32xf32> to vector<1x32x32xf32>
    %147 = vector.shape_cast %146 : vector<1x32x32xf32> to vector<32x32xf32>
    %cst_45 = arith.constant dense<0.000000e+00> : vector<112x32xf32>
    %148 = tpu.matmul %145, %147, %cst_45 {dimension_numbers = #tpu.dot_dimension_numbers<[1], [0], [0], [1], [0, 0, 1, 1], [], []>} : vector<112x32xf32>, vector<32x32xf32>, vector<112x32xf32> -> vector<112x32xf32>
    %149 = arith.addf %143, %148 : vector<112x32xf32>
    %150 = vector.extract_strided_slice %100 {offsets = [8, 0, 0], sizes = [1, 112, 32], strides = [1, 1, 1]} : vector<9x112x32xf32> to vector<1x112x32xf32>
    %151 = vector.shape_cast %150 : vector<1x112x32xf32> to vector<112x32xf32>
    %152 = vector.extract_strided_slice %90 {offsets = [8, 0, 0], sizes = [1, 32, 32], strides = [1, 1, 1]} : vector<9x32x32xf32> to vector<1x32x32xf32>
    %153 = vector.shape_cast %152 : vector<1x32x32xf32> to vector<32x32xf32>
    %cst_46 = arith.constant dense<0.000000e+00> : vector<112x32xf32>
    %154 = tpu.matmul %151, %153, %cst_46 {dimension_numbers = #tpu.dot_dimension_numbers<[1], [0], [0], [1], [0, 0, 1, 1], [], []>} : vector<112x32xf32>, vector<32x32xf32>, vector<112x32xf32> -> vector<112x32xf32>
    %155 = arith.addf %149, %154 : vector<112x32xf32>
    %156 = vector.broadcast %91 : vector<1x32xf32> to vector<112x32xf32>
    %157 = arith.addf %155, %156 : vector<112x32xf32>
    %cst_47 = arith.constant 0.000000e+00 : f32
    %158 = vector.broadcast %cst_47 : f32 to vector<112x32xf32>
    %159 = arith.cmpf ogt, %157, %158 : vector<112x32xf32>
    %cst_48 = arith.constant 0.00999999977 : f32
    %160 = vector.broadcast %cst_48 : f32 to vector<112x32xf32>
    %161 = arith.mulf %160, %157 : vector<112x32xf32>
    %162 = arith.select %159, %157, %161 : vector<112x32xi1>, vector<112x32xf32>
    %c0_49 = arith.constant 0 : index
    %c0_50 = arith.constant 0 : index
    %163 = vector.load %arg9[%c0_49, %c0_50] : memref<32x512xf32, #tpu.memory_space<vmem>>, vector<32x512xf32>
    %cst_51 = arith.constant dense<0.000000e+00> : vector<112x512xf32>
    %164 = tpu.matmul %162, %163, %cst_51 {dimension_numbers = #tpu.dot_dimension_numbers<[1], [0], [0], [1], [0, 0, 1, 1], [], []>} : vector<112x32xf32>, vector<32x512xf32>, vector<112x512xf32> -> vector<112x512xf32>
    %c0_52 = arith.constant 0 : index
    %c0_53 = arith.constant 0 : index
    %165 = vector.load %arg10[%c0_52, %c0_53] : memref<1x512xf32, #tpu.memory_space<vmem>>, vector<1x512xf32>
    %166 = vector.broadcast %165 : vector<1x512xf32> to vector<112x512xf32>
    %167 = arith.addf %164, %166 : vector<112x512xf32>
    %cst_54 = arith.constant 0.000000e+00 : f32
    %168 = vector.broadcast %cst_54 : f32 to vector<112x512xf32>
    %169 = arith.cmpf ogt, %167, %168 : vector<112x512xf32>
    %cst_55 = arith.constant 0.00999999977 : f32
    %170 = vector.broadcast %cst_55 : f32 to vector<112x512xf32>
    %171 = arith.mulf %170, %167 : vector<112x512xf32>
    %172 = arith.select %169, %167, %171 : vector<112x512xi1>, vector<112x512xf32>
    %c0_56 = arith.constant 0 : index
    %c0_57 = arith.constant 0 : index
    %173 = vector.load %arg11[%c0_56, %c0_57] : memref<512x32xf32, #tpu.memory_space<vmem>>, vector<512x32xf32>
    %cst_58 = arith.constant dense<0.000000e+00> : vector<112x32xf32>
    %174 = tpu.matmul %172, %173, %cst_58 {dimension_numbers = #tpu.dot_dimension_numbers<[1], [0], [0], [1], [0, 0, 1, 1], [], []>} : vector<112x512xf32>, vector<512x32xf32>, vector<112x32xf32> -> vector<112x32xf32>
    %c0_59 = arith.constant 0 : index
    %c0_60 = arith.constant 0 : index
    %175 = vector.load %arg12[%c0_59, %c0_60] : memref<1x32xf32, #tpu.memory_space<vmem>>, vector<1x32xf32>
    %176 = vector.broadcast %175 : vector<1x32xf32> to vector<112x32xf32>
    %177 = arith.addf %174, %176 : vector<112x32xf32>
    %cst_61 = arith.constant 0.000000e+00 : f32
    %178 = vector.broadcast %cst_61 : f32 to vector<112x32xf32>
    %179 = arith.subf %178, %177 : vector<112x32xf32>
    %cst_62 = arith.constant 0.000000e+00 : f32
    %180 = vector.broadcast %cst_62 : f32 to vector<112x32xf32>
    %181 = arith.maximumf %179, %180 : vector<112x32xf32>
    %182 = math.absf %179 : vector<112x32xf32>
    %cst_63 = arith.constant 0.000000e+00 : f32
    %183 = vector.broadcast %cst_63 : f32 to vector<112x32xf32>
    %184 = arith.subf %183, %182 : vector<112x32xf32>
    %185 = math.exp %184 : vector<112x32xf32>
    %186 = math.log1p %185 : vector<112x32xf32>
    %187 = arith.addf %181, %186 : vector<112x32xf32>
    %cst_64 = arith.constant 1.000000e+02 : f32
    %188 = vector.broadcast %cst_64 : f32 to vector<112x32xf32>
    %189 = arith.minimumf %187, %188 : vector<112x32xf32>
    %190 = tpu.iota {dimensions = array<i32: 0>} : vector<112x32xi32>
    %c56_i32 = arith.constant 56 : i32
    %c0_i32 = arith.constant 0 : i32
    %191 = arith.cmpi eq, %c56_i32, %c0_i32 : i32
    %c1_i32 = arith.constant 1 : i32
    %192 = arith.select %191, %c1_i32, %c56_i32 : i32
    %193 = vector.broadcast %192 : i32 to vector<112x32xi32>
    %194 = arith.remsi %190, %193 : vector<112x32xi32>
    %c0_i32_65 = arith.constant 0 : i32
    %195 = vector.broadcast %c0_i32_65 : i32 to vector<112x32xi32>
    %196 = arith.cmpi ne, %194, %195 : vector<112x32xi32>
    %c0_i32_66 = arith.constant 0 : i32
    %197 = vector.broadcast %c0_i32_66 : i32 to vector<112x32xi32>
    %198 = arith.cmpi slt, %194, %197 : vector<112x32xi32>
    %c0_i32_67 = arith.constant 0 : i32
    %199 = arith.cmpi slt, %192, %c0_i32_67 : i32
    %200 = vector.broadcast %199 : i1 to vector<112x32xi1>
    %201 = vector.broadcast %200 : vector<112x32xi1> to vector<112x32xi1>
    %202 = arith.xori %198, %201 : vector<112x32xi1>
    %203 = arith.andi %202, %196 : vector<112x32xi1>
    %204 = vector.broadcast %192 : i32 to vector<112x32xi32>
    %205 = arith.addi %194, %204 : vector<112x32xi32>
    %206 = arith.select %203, %205, %194 : vector<112x32xi1>, vector<112x32xi32>
    %c49_i32 = arith.constant 49 : i32
    %207 = vector.broadcast %c49_i32 : i32 to vector<112x32xi32>
    %208 = arith.cmpi slt, %206, %207 : vector<112x32xi32>
    %cst_68 = arith.constant 0.000000e+00 : f32
    %209 = vector.broadcast %cst_68 : f32 to vector<112x32xf32>
    %210 = arith.select %208, %189, %209 : vector<112x32xi1>, vector<112x32xf32>
    %211 = vector.shape_cast %210 : vector<112x32xf32> to vector<1x112x32xf32>
    %cst_69 = arith.constant dense<0.000000e+00> : vector<1xf32>
    %212 = vector.multi_reduction <add>, %211, %cst_69 [1, 2] : vector<1x112x32xf32> to vector<1xf32>
    %213 = vector.shape_cast %212 : vector<1xf32> to vector<1x1x1xf32>
    %214 = vector.extract %213[0, 0, 0] : f32 from vector<1x1x1xf32>
    %cst_70 = arith.constant 6.37755089E-4 : f32
    %215 = arith.mulf %214, %cst_70 : f32
    %216 = vector.broadcast %215 : f32 to vector<1x1xf32>
    %c0_71 = arith.constant 0 : index
    %c0_72 = arith.constant 0 : index
    %217 = vector.load %arg13[%c0_71, %c0_72] : memref<1x1xf32, #tpu.memory_space<vmem>>, vector<1x1xf32>
    tpu.vector_store %arg13[%c0_71, %c0_72], %216 {strides = array<i32>} : memref<1x1xf32, #tpu.memory_space<vmem>>, vector<1x1xf32>,
    return
  }
}

</mosaic_0001>

<bundles_post_ra>
// kernel: adapt_seg_net_double_masks_forward.1
= control target key start
LH: loop header
LB: loop body
LE: loop exit
PB: predicated region body
PF: predicated region fallthrough
CT: control target
= control target key end

     0   :  { %vm571_vm0 = vcmask 1041408   ;;  %vm420_vm1 = vcmask 146432   ;;  %s14967_s0 = inlined_call_operand.vmem [shape: f32[400,18], index: 0, kind: input, shape index: {}]   ;;  %s14968_s1 = inlined_call_operand.vmem [shape: bf16[504,200], index: 1, kind: input, shape index: {}]   ;;  %s14969_s2 = inlined_call_operand.vmem [shape: bf16[504,56], index: 2, kind: input, shape index: {}]   ;;  %s14970_s3 = inlined_call_operand.vmem [shape: f32[18,32], index: 3, kind: input, shape index: {}]   ;;  %s14971_s4 = inlined_call_operand.vmem [shape: f32[1,32], index: 4, kind: input, shape index: {}]   ;;  %s14972_s5 = inlined_call_operand.vmem [shape: f32[9,32,32], index: 5, kind: input, shape index: {}]   ;;  %s14973_s6 = inlined_call_operand.vmem [shape: f32[1,32], index: 6, kind: input, shape index: {}]   ;;  %s14974_s7 = inlined_call_operand.vmem [shape: f32[9,32,32], index: 7, kind: input, shape index: {}]   ;;  %s14975_s8 = inlined_call_operand.vmem [shape: f32[1,32], index: 8, kind: input, shape index: {}]   ;;  %s14976_s9 = inlined_call_operand.vmem [shape: f32[32,512], index: 9, kind: input, shape index: {}]   ;;  %s14977_s10 = inlined_call_operand.vmem [shape: f32[1,512], index: 10, kind: input, shape index: {}]   ;;  %s14978_s11 = inlined_call_operand.vmem [shape: f32[512,32], index: 11, kind: input, shape index: {}]   ;;  %s14979_s12 = inlined_call_operand.vmem [shape: f32[1,32], index: 12, kind: input, shape index: {}]   ;;  %s14980_s13 = inlined_call_operand.hbm [shape: f32[1,1], index: 13, kind: output, shape index: {}]  }
   0x1   :  { %v412_v0 = vld [vmem:[%s14970_s3 + $0x10] sm:$0x3]  ;;  %v411_v1 = vld [vmem:[%s14970_s3 + $0x8] sm:$0xff]  ;;  %v360_v2 = vld [vmem:[%s14967_s0] sm:$0xff] }
   0x2   :  { %9415 = vmatprep.subr.msk.mxu0 %vm571_vm0, %v412_v0  ;;  %v410_v3 = vld [vmem:[%s14970_s3] sm:$0xff]  ;;  %9421 = vmatprep.mubr.msk.f32.mxu0 %vm420_vm1, %v360_v2  ;;  %v361_v4 = vld [vmem:[%s14967_s0 + $0x8] sm:$0xff]  ;;  %v362_v5 = vld [vmem:[%s14967_s0 + $0x10] sm:$0xff] }
   0x3   :  { %9416 = vmatpush3.msk.msra.mxu0 %vm571_vm0, %v412_v0  ;;  %v363_v6 = vld [vmem:[%s14967_s0 + $0x18] sm:$0xff]  ;;  %v364_v7 = vld [vmem:[%s14967_s0 + $0x20] sm:$0xff]  ;;  %v365_v8 = vld [vmem:[%s14967_s0 + $0x28] sm:$0xff] }
   0x4   :  { %9417 = vmatprep.subr.mxu0 %v411_v1  ;;  %v366_v9 = vld [vmem:[%s14967_s0 + $0x30] sm:$0xff]  ;;  %v367_v10 = vld [vmem:[%s14967_s0 + $0x38] sm:$0xff]  ;;  %v368_v11 = vld [vmem:[%s14967_s0 + $0x40] sm:$0xff] }
   0x5   :  { %9418 = vmatpush3.msra.mxu0 %v411_v1 }
   0x6   :  { %9419 = vmatprep.subr.mxu0 %v410_v3 }
   0x7   :  { %9420 = vmatpush3.msra.mxu0 %v410_v3 }
   0x8   :  { %9422 = vmatmul.mubr.msk.f32.vlgmr.msra.gmra.mxu0 %vm420_vm1, %v361_v4 }
   0x9   :  { %9424 = vmatprep.mubr.msk.f32.mxu0 %vm420_vm1, %v362_v5 }
   0xc   :  { %9425 = vmatmul.mubr.msk.f32.gmra.mxu0 %vm420_vm1, %v363_v6 }
   0xd   :  { %9427 = vmatprep.mubr.msk.f32.mxu0 %vm420_vm1, %v364_v7 }
  0x10   :  { %9428 = vmatmul.mubr.msk.f32.gmra.mxu0 %vm420_vm1, %v365_v8 }
  0x11   :  { %9430 = vmatprep.mubr.msk.f32.mxu0 %vm420_vm1, %v366_v9 }
  0x12   :  { %18 = vsyncpa [#allocation3], 0  ;;  %v369_v12 = vld [vmem:[%s14967_s0 + $0x48] sm:$0xff]  ;;  %v370_v13 = vld [vmem:[%s14967_s0 + $0x50] sm:$0xff]  ;;  %v14981_v53 = vmov 0.0   ;;  %vm1077_vm2 = vcmask 588800  }
  0x13   :  { %v371_v14 = vld [vmem:[%s14967_s0 + $0x58] sm:$0xff]  ;;  %v372_v15 = vld [vmem:[%s14967_s0 + $0x60] sm:$0xff]  ;;  %v373_v16 = vld [vmem:[%s14967_s0 + $0x68] sm:$0xff]  ;;  %1267 = vmatprep.subr.mxu1 %v14981_v53  ;;  %1647 = vmatprep.subr.mxu0 %v14981_v53 }
  0x14   :  { %9431 = vmatmul.mubr.msk.f32.gmra.mxu0 %vm420_vm1, %v367_v10  ;;  %v374_v17 = vld [vmem:[%s14967_s0 + $0x70] sm:$0xff]  ;;  %v375_v18 = vld [vmem:[%s14967_s0 + $0x78] sm:$0xff]  ;;  %v376_v19 = vld [vmem:[%s14967_s0 + $0x80] sm:$0xff] }
  0x15   :  { %9433 = vmatprep.mubr.msk.f32.mxu0 %vm420_vm1, %v368_v11  ;;  %v377_v20 = vld [vmem:[%s14967_s0 + $0x88] sm:$0xff]  ;;  %v378_v21 = vld [vmem:[%s14967_s0 + $0x90] sm:$0xff]  ;;  %v379_v22 = vld [vmem:[%s14967_s0 + $0x98] sm:$0xff] }
  0x16   :  { %v380_v23 = vld [vmem:[%s14967_s0 + $0xa0] sm:$0xff]  ;;  %v381_v24 = vld [vmem:[%s14967_s0 + $0xa8] sm:$0xff]  ;;  %v382_v25 = vld [vmem:[%s14967_s0 + $0xb0] sm:$0xff] }
  0x17   :  { %v383_v26 = vld [vmem:[%s14967_s0 + $0xb8] sm:$0xff]  ;;  %v384_v27 = vld [vmem:[%s14967_s0 + $0xc0] sm:$0xff]  ;;  %v385_v28 = vld [vmem:[%s14967_s0 + $0xc8] sm:$0xff] }
  0x18   :  { %9434 = vmatmul.mubr.msk.f32.gmra.mxu0 %vm420_vm1, %v369_v12  ;;  %v386_v29 = vld [vmem:[%s14967_s0 + $0xd0] sm:$0xff]  ;;  %v387_v30 = vld [vmem:[%s14967_s0 + $0xd8] sm:$0xff]  ;;  %v388_v31 = vld [vmem:[%s14967_s0 + $0xe0] sm:$0xff] }
  0x19   :  { %9436 = vmatprep.mubr.msk.f32.mxu0 %vm420_vm1, %v370_v13  ;;  %v389_v32 = vld [vmem:[%s14967_s0 + $0xe8] sm:$0xff]  ;;  %v390_v33 = vld [vmem:[%s14967_s0 + $0xf0] sm:$0xff]  ;;  %v391_v34 = vld [vmem:[%s14967_s0 + $0xf8] sm:$0xff] }
  0x1a   :  { %v392_v35 = vld [vmem:[%s14967_s0 + $0x100] sm:$0xff]  ;;  %v393_v36 = vld [vmem:[%s14967_s0 + $0x108] sm:$0xff]  ;;  %v394_v37 = vld [vmem:[%s14967_s0 + $0x110] sm:$0xff] }
  0x1b   :  { %v395_v38 = vld [vmem:[%s14967_s0 + $0x118] sm:$0xff]  ;;  %v396_v39 = vld [vmem:[%s14967_s0 + $0x120] sm:$0xff]  ;;  %v397_v40 = vld [vmem:[%s14967_s0 + $0x128] sm:$0xff] }
  0x1c   :  { %9437 = vmatmul.mubr.msk.f32.gmra.mxu0 %vm420_vm1, %v371_v14  ;;  %v398_v41 = vld [vmem:[%s14967_s0 + $0x130] sm:$0xff]  ;;  %v399_v42 = vld [vmem:[%s14967_s0 + $0x138] sm:$0xff]  ;;  %v400_v43 = vld [vmem:[%s14967_s0 + $0x140] sm:$0xff] }
  0x1d   :  { %9439 = vmatprep.mubr.msk.f32.mxu0 %vm420_vm1, %v372_v15  ;;  %v401_v44 = vld [vmem:[%s14967_s0 + $0x148] sm:$0xff]  ;;  %v402_v45 = vld [vmem:[%s14967_s0 + $0x150] sm:$0xff]  ;;  %v403_v46 = vld [vmem:[%s14967_s0 + $0x158] sm:$0xff] }
  0x1e   :  { %v404_v47 = vld [vmem:[%s14967_s0 + $0x160] sm:$0xff]  ;;  %v405_v48 = vld [vmem:[%s14967_s0 + $0x168] sm:$0xff]  ;;  %v406_v49 = vld [vmem:[%s14967_s0 + $0x170] sm:$0xff] }
  0x1f   :  { %v407_v50 = vld [vmem:[%s14967_s0 + $0x178] sm:$0xff]  ;;  %v408_v51 = vld [vmem:[%s14967_s0 + $0x180] sm:$0xff]  ;;  %v409_v52 = vld [vmem:[%s14967_s0 + $0x188] sm:$0xff] }
  0x20   :  { %9440 = vmatmul.mubr.msk.f32.gmra.mxu0 %vm420_vm1, %v373_v16  ;;  %v10824_v54 = vld [vmem:[%s14968_s1] sm:$0xff] }
  0x21   :  { %9442 = vmatprep.mubr.msk.f32.mxu0 %vm420_vm1, %v374_v17  ;;  %v109_v55 = vunpack.c.h.bf16 %v10824_v54  ;;  %v10844_v6 = vld [vmem:[%s14971_s4] ss:$0 sm:$0xff] }
  0x23   :  { %8061 = vmatprep.mubr.msk.f32.mxu1 %vm1077_vm2, %v109_v55 }
  0x24   :  { %9443 = vmatmul.mubr.msk.f32.gmra.mxu0 %vm420_vm1, %v375_v18 }
  0x25   :  { %9445 = vmatprep.mubr.msk.f32.mxu0 %vm420_vm1, %v376_v19 }
  0x28   :  { %9446 = vmatmul.mubr.msk.f32.gmra.mxu0 %vm420_vm1, %v377_v20 }
  0x29   :  { %9448 = vmatprep.mubr.msk.f32.mxu0 %vm420_vm1, %v378_v21 }
  0x2c   :  { %9449 = vmatmul.mubr.msk.f32.gmra.mxu0 %vm420_vm1, %v379_v22 }
  0x2d   :  { %9451 = vmatprep.mubr.msk.f32.mxu0 %vm420_vm1, %v380_v23 }
  0x30   :  { %9452 = vmatmul.mubr.msk.f32.gmra.mxu0 %vm420_vm1, %v381_v24 }
  0x31   :  { %9454 = vmatprep.mubr.msk.f32.mxu0 %vm420_vm1, %v382_v25 }
  0x34   :  { %9455 = vmatmul.mubr.msk.f32.gmra.mxu0 %vm420_vm1, %v383_v26 }
  0x35   :  { %9457 = vmatprep.mubr.msk.f32.mxu0 %vm420_vm1, %v384_v27 }
  0x38   :  { %9458 = vmatmul.mubr.msk.f32.gmra.mxu0 %vm420_vm1, %v385_v28 }
  0x39   :  { %9460 = vmatprep.mubr.msk.f32.mxu0 %vm420_vm1, %v386_v29 }
  0x3c   :  { %9461 = vmatmul.mubr.msk.f32.gmra.mxu0 %vm420_vm1, %v387_v30 }
  0x3d   :  { %9463 = vmatprep.mubr.msk.f32.mxu0 %vm420_vm1, %v388_v31 }
  0x40   :  { %9464 = vmatmul.mubr.msk.f32.gmra.mxu0 %vm420_vm1, %v389_v32 }
  0x41   :  { %9466 = vmatprep.mubr.msk.f32.mxu0 %vm420_vm1, %v390_v33 }
  0x44   :  { %9467 = vmatmul.mubr.msk.f32.gmra.mxu0 %vm420_vm1, %v391_v34 }
  0x45   :  { %9469 = vmatprep.mubr.msk.f32.mxu0 %vm420_vm1, %v392_v35 }
  0x48   :  { %9470 = vmatmul.mubr.msk.f32.gmra.mxu0 %vm420_vm1, %v393_v36 }
  0x49   :  { %9472 = vmatprep.mubr.msk.f32.mxu0 %vm420_vm1, %v394_v37 }
  0x4c   :  { %9473 = vmatmul.mubr.msk.f32.gmra.mxu0 %vm420_vm1, %v395_v38 }
  0x4d   :  { %9475 = vmatprep.mubr.msk.f32.mxu0 %vm420_vm1, %v396_v39 }
  0x50   :  { %9476 = vmatmul.mubr.msk.f32.gmra.mxu0 %vm420_vm1, %v397_v40 }
  0x51   :  { %9478 = vmatprep.mubr.msk.f32.mxu0 %vm420_vm1, %v398_v41 }
  0x54   :  { %9479 = vmatmul.mubr.msk.f32.gmra.mxu0 %vm420_vm1, %v399_v42 }
  0x55   :  { %9481 = vmatprep.mubr.msk.f32.mxu0 %vm420_vm1, %v400_v43 }
  0x58   :  { %9482 = vmatmul.mubr.msk.f32.gmra.mxu0 %vm420_vm1, %v401_v44 }
  0x59   :  { %9484 = vmatprep.mubr.msk.f32.mxu0 %vm420_vm1, %v402_v45 }
  0x5c   :  { %9485 = vmatmul.mubr.msk.f32.gmra.mxu0 %vm420_vm1, %v403_v46 }
  0x5d   :  { %9487 = vmatprep.mubr.msk.f32.mxu0 %vm420_vm1, %v404_v47 }
  0x60   :  { %9488 = vmatmul.mubr.msk.f32.gmra.mxu0 %vm420_vm1, %v405_v48 }
  0x61   :  { %9490 = vmatprep.mubr.msk.f32.mxu0 %vm420_vm1, %v406_v49 }
  0x64   :  { %9491 = vmatmul.mubr.msk.f32.gmra.mxu0 %vm420_vm1, %v407_v50 }
  0x65   :  { %9493 = vmatprep.mubr.msk.f32.mxu0 %vm420_vm1, %v408_v51 }
  0x68   :  { %9494 = vmatmul.mubr.msk.f32.gmra.mxu0 %vm420_vm1, %v409_v52 }
  0x69   :  { %8124 = vmatprep.mubr.msk.f32.mxu0 %vm1077_vm2, %v109_v55 }
  0xc8   :  { %v10829_v56 = vpop.f32.mrf.mxu0 }
  0xca   :  { %v10831_v57 = vpop.f32.mrf.mxu0 }
  0xcc   :  { %v10833_v58 = vpop.f32.mrf.mxu0 }
  0xcd   :  { %v657_v48 = vadd.f32 %v10833_v58, %v10844_v6  ;;  %v647_v58 = vadd.f32 %v10829_v56, %v10844_v6 }
  0xce   :  { %v10835_v59 = vpop.f32.mrf.mxu0 }
  0xcf   :  { %v652_v52 = vadd.f32 %v10844_v6, %v10835_v59  ;;  %vm893_vm15 = vcmp.gt.f32.partialorder %v657_v48, 0.0  ;;  %v642_v59 = vadd.f32 %v10844_v6, %v10831_v57  ;;  %v941_v56 = vmul.f32 0.01, %v647_v58 }
  0xd0   :  { %v10837_v60 = vpop.f32.mrf.mxu0  ;;  %vm891_vm1 = vcmp.gt.f32.partialorder %v647_v58, 0.0 }
  0xd1   :  { %v667_v40 = vadd.f32 %v10837_v60, %v10844_v6  ;;  %vm892_vm0 = vcmp.gt.f32.partialorder %v652_v52, 0.0 }
  0xd2   :  { %v10839_v61 = vpop.f32.mrf.mxu0 }
  0xd3   :  { %v662_v44 = vadd.f32 %v10844_v6, %v10839_v61  ;;  %v945_v49 = vmul.f32 0.01, %v667_v40  ;;  %vm895_vm13 = vcmp.gt.f32.partialorder %v667_v40, 0.0 }
  0xd4   :  { %v9432_v62 = vpop.f32.mrf.mxu0 }
  0xd5   :  { %v677_v32 = vadd.f32 %v9432_v62, %v10844_v6  ;;  %v944_v60 = vmul.f32 0.01, %v662_v44  ;;  %vm894_vm14 = vcmp.gt.f32.partialorder %v662_v44, 0.0  ;;  %v943_v62 = vmul.f32 0.01, %v657_v48 }
  0xd6   :  { %v671_v63 = vpop.f32.mrf.mxu0 }
  0xd7   :  { %v672_v36 = vadd.f32 %v10844_v6, %v671_v63  ;;  %v947_v41 = vmul.f32 0.01, %v677_v32  ;;  %vm897_vm11 = vcmp.gt.f32.partialorder %v677_v32, 0.0  ;;  %v995_v63 = vsel %vm895_vm13, %v667_v40, %v945_v49 }
  0xd8   :  { %v9435_v0 = vpop.f32.mrf.mxu0 }
  0xd9   :  { %v687_v24 = vadd.f32 %v9435_v0, %v10844_v6  ;;  %v946_v46 = vmul.f32 0.01, %v672_v36  ;;  %vm896_vm12 = vcmp.gt.f32.partialorder %v672_v36, 0.0  ;;  %v997_v50 = vsel %vm897_vm11, %v677_v32, %v947_v41 }
  0xda   :  { %v681_v1 = vpop.f32.mrf.mxu0 }
  0xdb   :  { %v682_v28 = vadd.f32 %v10844_v6, %v681_v1  ;;  %v949_v33 = vmul.f32 0.01, %v687_v24  ;;  %vm899_vm9 = vcmp.gt.f32.partialorder %v687_v24, 0.0  ;;  %v996_v55 = vsel %vm896_vm12, %v672_v36, %v946_v46 }
  0xdc   :  { %v9438_v2 = vpop.f32.mrf.mxu0  ;;  %v994_v1 = vsel %vm894_vm14, %v662_v44, %v944_v60 }
  0xdd   :  { %v697_v14 = vadd.f32 %v9438_v2, %v10844_v6  ;;  %v948_v38 = vmul.f32 0.01, %v682_v28  ;;  %vm898_vm10 = vcmp.gt.f32.partialorder %v682_v28, 0.0  ;;  %v999_v42 = vsel %vm899_vm9, %v687_v24, %v949_v33 }
  0xde   :  { %v691_v3 = vpop.f32.mrf.mxu0  ;;  %v942_v2 = vmul.f32 0.01, %v652_v52 }
  0xdf   :  { %v692_v20 = vadd.f32 %v10844_v6, %v691_v3  ;;  %v951_v25 = vmul.f32 0.01, %v697_v14  ;;  %vm901_vm7 = vcmp.gt.f32.partialorder %v697_v14, 0.0  ;;  %v998_v45 = vsel %vm898_vm10, %v682_v28, %v948_v38 }
  0xe0   :  { %v9441_v4 = vpop.f32.mrf.mxu0 }
  0xe1   :  { %v707_v8 = vadd.f32 %v9441_v4, %v10844_v6  ;;  %v950_v30 = vmul.f32 0.01, %v692_v20  ;;  %vm900_vm8 = vcmp.gt.f32.partialorder %v692_v20, 0.0  ;;  %v1001_v34 = vsel %vm901_vm7, %v697_v14, %v951_v25 }
  0xe2   :  { %v701_v5 = vpop.f32.mrf.mxu0 }
  0xe3   :  { %v702_v11 = vadd.f32 %v10844_v6, %v701_v5  ;;  %v953_v16 = vmul.f32 0.01, %v707_v8  ;;  %vm903_vm5 = vcmp.gt.f32.partialorder %v707_v8, 0.0  ;;  %v1000_v37 = vsel %vm900_vm8, %v692_v20, %v950_v30 }
  0xe4   :  { %v9444_v7 = vpop.f32.mrf.mxu0  ;;  %v993_v5 = vsel %vm893_vm15, %v657_v48, %v943_v62  ;;  %v108_v48 = vunpack.c.l.bf16 %v10824_v54 }
  0xe5   :  { %v717_v9 = vadd.f32 %v9444_v7, %v10844_v6  ;;  %v952_v22 = vmul.f32 0.01, %v702_v11  ;;  %vm902_vm6 = vcmp.gt.f32.partialorder %v702_v11, 0.0  ;;  %v1003_v26 = vsel %vm903_vm5, %v707_v8, %v953_v16 }
  0xe6   :  { %v711_v10 = vpop.f32.mrf.mxu0  ;;  %v992_v8 = vsel %vm892_vm0, %v652_v52, %v942_v2 }
  0xe7   :  { %v712_v12 = vadd.f32 %v10844_v6, %v711_v10  ;;  %vm905_vm3 = vcmp.gt.f32.partialorder %v717_v9, 0.0  ;;  %v955_v13 = vmul.f32 0.01, %v717_v9  ;;  %v1002_v29 = vsel %vm902_vm6, %v702_v11, %v952_v22 }
  0xe8   :  { %v10851_v15 = vpop.f32.mrf.mxu0 }
  0xe9   :  { %v1005_v17 = vsel %vm905_vm3, %v717_v9, %v955_v13  ;;  %vm904_vm4 = vcmp.gt.f32.partialorder %v712_v12, 0.0  ;;  %v954_v18 = vmul.f32 0.01, %v712_v12  ;;  %v940_v9 = vmul.f32 0.01, %v642_v59 }
  0xea   :  { %v10853_v19 = vpop.f32.mrf.mxu0  ;;  %1268 = vmatpush1.msra.mxu1 %v1005_v17  ;;  %vm890_vm3 = vcmp.gt.f32.partialorder %v642_v59, 0.0 }
  0xeb   :  { %1269 = vmatprep.subr.mxu1 %v14981_v53  ;;  %v1004_v21 = vsel %vm904_vm4, %v712_v12, %v954_v18  ;;  %v991_v12 = vsel %vm891_vm1, %v647_v58, %v941_v56  ;;  %v990_v18 = vsel %vm890_vm3, %v642_v59, %v940_v9 }
  0xec   :  { %v10857_v23 = vpop.f32.mrf.mxu0  ;;  %1270 = vmatpush1.msra.mxu1 %v1004_v21 }
  0xed   :  { %1271 = vmatprep.subr.mxu1 %v14981_v53 }
  0xee   :  { %v10861_v27 = vpop.f32.mrf.mxu0  ;;  %1272 = vmatpush1.msra.mxu1 %v1003_v26  ;;  %v737_v26 = vadd.f32 %v10857_v23, %v10844_v6  ;;  %v727_v23 = vadd.f32 %v10851_v15, %v10844_v6 }
  0xef   :  { %1273 = vmatprep.subr.mxu1 %v14981_v53 }
  0xf0   :  { %v10865_v31 = vpop.f32.mrf.mxu0  ;;  %1274 = vmatpush1.msra.mxu1 %v1002_v29  ;;  %vm909_vm9 = vcmp.gt.f32.partialorder %v737_v26, 0.0  ;;  %v957_v41 = vmul.f32 0.01, %v727_v23  ;;  %vm907_vm11 = vcmp.gt.f32.partialorder %v727_v23, 0.0 }
  0xf1   :  { %1275 = vmatprep.subr.mxu1 %v14981_v53  ;;  %v747_v16 = vadd.f32 %v10865_v31, %v10844_v6  ;;  %v732_v31 = vadd.f32 %v10844_v6, %v10861_v27  ;;  %v722_v27 = vadd.f32 %v10844_v6, %v10853_v19  ;;  %v10942_v19 = vld [vmem:[%s14968_s1 + $0x8] sm:$0xff] }
  0xf2   :  { %v10869_v35 = vpop.f32.mrf.mxu0  ;;  %1276 = vmatpush1.msra.mxu1 %v1001_v34  ;;  %v1007_v46 = vsel %vm907_vm11, %v727_v23, %v957_v41  ;;  %v1047_v41 = vld [vmem:[%s14972_s5 + $0x38] sm:$0xff] }
  0xf3   :  { %1277 = vmatprep.subr.mxu1 %v14981_v53  ;;  %v742_v21 = vadd.f32 %v10844_v6, %v10869_v35  ;;  %v961_v28 = vmul.f32 0.01, %v747_v16  ;;  %vm911_vm7 = vcmp.gt.f32.partialorder %v747_v16, 0.0  ;;  %v959_v35 = vmul.f32 0.01, %v737_v26 }
  0xf4   :  { %v9456_v39 = vpop.f32.mrf.mxu0  ;;  %1278 = vmatpush1.msra.mxu1 %v1000_v37  ;;  %vm908_vm10 = vcmp.gt.f32.partialorder %v732_v31, 0.0  ;;  %v956_v44 = vmul.f32 0.01, %v722_v27  ;;  %vm906_vm12 = vcmp.gt.f32.partialorder %v722_v27, 0.0 }
  0xf5   :  { %1279 = vmatprep.subr.mxu1 %v14981_v53  ;;  %v757_v57 = vadd.f32 %v9456_v39, %v10844_v6  ;;  %v960_v33 = vmul.f32 0.01, %v742_v21  ;;  %vm910_vm8 = vcmp.gt.f32.partialorder %v742_v21, 0.0  ;;  %v1011_v36 = vsel %vm911_vm7, %v747_v16, %v961_v28 }
  0xf6   :  { %v751_v43 = vpop.f32.mrf.mxu0  ;;  %1280 = vmatpush1.msra.mxu1 %v999_v42  ;;  %v958_v39 = vmul.f32 0.01, %v732_v31  ;;  %v1009_v15 = vsel %vm909_vm9, %v737_v26, %v959_v35  ;;  %v1006_v52 = vsel %vm906_vm12, %v722_v27, %v956_v44 }
  0xf7   :  { %1281 = vmatprep.subr.mxu1 %v14981_v53  ;;  %v752_v11 = vadd.f32 %v10844_v6, %v751_v43  ;;  %v963_v17 = vmul.f32 0.01, %v757_v57  ;;  %vm913_vm5 = vcmp.gt.f32.partialorder %v757_v57, 0.0  ;;  %v1010_v38 = vsel %vm910_vm8, %v742_v21, %v960_v33  ;;  %v10989_v21 = vld [vmem:[%s14968_s1 + $0x20] sm:$0xff] }
  0xf8   :  { %v10879_v47 = vpop.f32.mrf.mxu0  ;;  %1282 = vmatpush1.msra.mxu1 %v998_v45  ;;  %v1008_v43 = vsel %vm908_vm10, %v732_v31, %v958_v39 }
  0xf9   :  { %1283 = vmatprep.subr.mxu1 %v14981_v53  ;;  %v962_v24 = vmul.f32 0.01, %v752_v11  ;;  %vm912_vm6 = vcmp.gt.f32.partialorder %v752_v11, 0.0  ;;  %v1013_v29 = vsel %vm913_vm5, %v757_v57, %v963_v17 }
  0xfa   :  { %v761_v51 = vpop.f32.mrf.mxu0  ;;  %1284 = vmatpush1.msra.mxu1 %v997_v50  ;;  %v111_v50 = vunpack.c.h.bf16 %v10942_v19 }
  0xfb   :  { %1285 = vmatprep.subr.mxu1 %v14981_v53  ;;  %v762_v4 = vadd.f32 %v10844_v6, %v761_v51  ;;  %v1012_v32 = vsel %vm912_vm6, %v752_v11, %v962_v24 }
  0xfc   :  { %v10887_v61 = vpop.f32.mrf.mxu0  ;;  %1286 = vmatpush1.msra.mxu1 %v996_v55  ;;  %v10954_v55 = vld [vmem:[%s14968_s1 + $0x10] sm:$0xff] }
  0xfd   :  { %1287 = vmatprep.subr.mxu1 %v14981_v53  ;;  %v964_v13 = vmul.f32 0.01, %v762_v4  ;;  %vm914_vm4 = vcmp.gt.f32.partialorder %v762_v4, 0.0 }
  0xfe   :  { %v10892_v0 = vpop.f32.mrf.mxu0  ;;  %1288 = vmatpush1.msra.mxu1 %v995_v63  ;;  %v110_v63 = vunpack.c.l.bf16 %v10942_v19 }
  0xff   :  { %1289 = vmatprep.subr.mxu1 %v14981_v53  ;;  %v1014_v22 = vsel %vm914_vm4, %v762_v4, %v964_v13 }
 0x100   :  { %v10897_v3 = vpop.f32.mrf.mxu0  ;;  %1290 = vmatpush1.msra.mxu1 %v994_v1  ;;  %v113_v1 = vunpack.c.h.bf16 %v10954_v55 }
 0x101   :  { %1291 = vmatprep.subr.mxu1 %v14981_v53 }
 0x102   :  { %v10901_v7 = vpop.f32.mrf.mxu0  ;;  %1292 = vmatpush1.msra.mxu1 %v993_v5  ;;  %v10971_v5 = vld [vmem:[%s14968_s1 + $0x18] sm:$0xff] }
 0x103   :  { %1293 = vmatprep.subr.mxu1 %v14981_v53  ;;  %v115_v13 = vunpack.c.h.bf16 %v10971_v5 }
 0x104   :  { %v10905_v10 = vpop.f32.mrf.mxu0  ;;  %1294 = vmatpush1.msra.mxu1 %v992_v8 }
 0x105   :  { %1295 = vmatprep.subr.mxu1 %v14981_v53 }
 0x106   :  { %v10909_v14 = vpop.f32.mrf.mxu0  ;;  %1296 = vmatpush1.msra.mxu1 %v991_v12  ;;  %v112_v12 = vunpack.c.l.bf16 %v10954_v55 }
 0x107   :  { %1297 = vmatprep.subr.mxu1 %v14981_v53 }
 0x108   :  { %v10914_v20 = vpop.f32.mrf.mxu0  ;;  %1298 = vmatpush1.msra.mxu1 %v990_v18 }
 0x109   :  { %1313 = vmatprep.subr.mxu1 %v14981_v53  ;;  %v807_v31 = vadd.f32 %v10914_v20, %v10844_v6 }
 0x10a   :  { %v10919_v25 = vpop.f32.mrf.mxu0  ;;  %1314 = vmatpush2.msra.mxu1 %v1014_v22 }
 0x10b   :  { %1315 = vmatprep.subr.mxu1 %v14981_v53  ;;  %v802_v35 = vadd.f32 %v10844_v6, %v10919_v25  ;;  %v797_v25 = vadd.f32 %v10905_v10, %v10844_v6  ;;  %vm923_vm5 = vcmp.gt.f32.partialorder %v807_v31, 0.0  ;;  %v792_v10 = vadd.f32 %v10844_v6, %v10909_v14 }
 0x10c   :  { %v10924_v30 = vpop.f32.mrf.mxu0  ;;  %1316 = vmatpush2.msra.mxu1 %v1013_v29  ;;  %v114_v29 = vunpack.c.l.bf16 %v10971_v5  ;;  %v787_v14 = vadd.f32 %v10897_v3, %v10844_v6 }
 0x10d   :  { %1317 = vmatprep.subr.mxu1 %v14981_v53  ;;  %v817_v16 = vadd.f32 %v10924_v30, %v10844_v6  ;;  %v117_v30 = vunpack.c.h.bf16 %v10989_v21  ;;  %vm922_vm6 = vcmp.gt.f32.partialorder %v802_v35, 0.0  ;;  %vm921_vm7 = vcmp.gt.f32.partialorder %v797_v25, 0.0 }
 0x10e   :  { %v10929_v34 = vpop.f32.mrf.mxu0  ;;  %1318 = vmatpush2.msra.mxu1 %v1012_v32  ;;  %vm920_vm8 = vcmp.gt.f32.partialorder %v792_v10, 0.0  ;;  %vm919_vm9 = vcmp.gt.f32.partialorder %v787_v14, 0.0 }
 0x10f   :  { %1319 = vmatprep.subr.mxu1 %v14981_v53  ;;  %v812_v24 = vadd.f32 %v10844_v6, %v10929_v34  ;;  %v975_v32 = vmul.f32 0.01, %v817_v16  ;;  %v11010_v34 = vld [vmem:[%s14968_s1 + $0x28] sm:$0xff]  ;;  %vm925_vm3 = vcmp.gt.f32.partialorder %v817_v16, 0.0 }
 0x110   :  { %v9477_v37 = vpop.f32.mrf.mxu0  ;;  %1320 = vmatpush2.msra.mxu1 %v1011_v36  ;;  %v119_v27 = vunpack.c.h.bf16 %v11010_v34  ;;  %v118_v44 = vunpack.c.l.bf16 %v11010_v34 }
 0x111   :  { %1321 = vmatprep.subr.mxu1 %v14981_v53  ;;  %v827_v2 = vadd.f32 %v9477_v37, %v10844_v6  ;;  %v974_v36 = vmul.f32 0.01, %v812_v24  ;;  %v116_v37 = vunpack.c.l.bf16 %v10989_v21  ;;  %vm924_vm4 = vcmp.gt.f32.partialorder %v812_v24, 0.0 }
 0x112   :  { %v821_v40 = vpop.f32.mrf.mxu0  ;;  %1322 = vmatpush2.msra.mxu1 %v1010_v38  ;;  %v973_v38 = vmul.f32 0.01, %v807_v31  ;;  %v1025_v39 = vsel %vm925_vm3, %v817_v16, %v975_v32  ;;  %v772_v16 = vadd.f32 %v10844_v6, %v10892_v0  ;;  %v767_v0 = vadd.f32 %v10879_v47, %v10844_v6 }
 0x113   :  { %1323 = vmatprep.subr.mxu1 %v14981_v53  ;;  %v822_v8 = vadd.f32 %v10844_v6, %v821_v40  ;;  %v977_v17 = vmul.f32 0.01, %v827_v2  ;;  %vm927_vm0 = vcmp.gt.f32.partialorder %v827_v2, 0.0  ;;  %v11031_v40 = vld [vmem:[%s14968_s1 + $0x30] sm:$0xff] }
 0x114   :  { %v9480_v42 = vpop.f32.mrf.mxu0  ;;  %1324 = vmatpush2.msra.mxu1 %v1009_v15  ;;  %vm916_vm12 = vcmp.gt.f32.partialorder %v772_v16, 0.0 }
 0x115   :  { %1325 = vmatprep.subr.mxu1 %v14981_v53  ;;  %v837_v51 = vadd.f32 %v9480_v42, %v10844_v6  ;;  %v976_v26 = vmul.f32 0.01, %v822_v8  ;;  %vm926_vm1 = vcmp.gt.f32.partialorder %v822_v8, 0.0  ;;  %v1027_v33 = vsel %vm927_vm0, %v827_v2, %v977_v17 }
 0x116   :  { %v831_v45 = vpop.f32.mrf.mxu0  ;;  %1326 = vmatpush2.msra.mxu1 %v1008_v43  ;;  %v972_v42 = vmul.f32 0.01, %v802_v35  ;;  %v1024_v43 = vsel %vm924_vm4, %v812_v24, %v974_v36  ;;  %v120_v2 = vunpack.c.l.bf16 %v11031_v40 }
 0x117   :  { %1327 = vmatprep.subr.mxu1 %v14981_v53  ;;  %v832_v58 = vadd.f32 %v10844_v6, %v831_v45  ;;  %v979_v56 = vmul.f32 0.01, %v837_v51  ;;  %vm929_vm14 = vcmp.gt.f32.partialorder %v837_v51, 0.0  ;;  %v1026_v20 = vsel %vm926_vm1, %v822_v8, %v976_v26 }
 0x118   :  { %v10946_v49 = vpop.f32.mrf.mxu0  ;;  %1328 = vmatpush2.msra.mxu1 %v1007_v46  ;;  %v121_v45 = vunpack.c.h.bf16 %v11031_v40  ;;  %v971_v46 = vmul.f32 0.01, %v797_v25  ;;  %v1022_v3 = vsel %vm922_vm6, %v802_v35, %v972_v42 }
 0x119   :  { %1329 = vmatprep.subr.mxu1 %v14981_v53  ;;  %v978_v9 = vmul.f32 0.01, %v832_v58  ;;  %vm928_vm15 = vcmp.gt.f32.partialorder %v832_v58, 0.0  ;;  %v1029_v18 = vsel %vm929_vm14, %v837_v51, %v979_v56  ;;  %v1023_v51 = vsel %vm923_vm5, %v807_v31, %v973_v38  ;;  %v11096_v31 = vld [vmem:[%s14968_s1 + $0x48] sm:$0xff] }
 0x11a   :  { %v841_v60 = vpop.f32.mrf.mxu0  ;;  %1330 = vmatpush2.msra.mxu1 %v1006_v52  ;;  %v11056_v52 = vld [vmem:[%s14968_s1 + $0x38] sm:$0xff]  ;;  %v1021_v8 = vsel %vm921_vm7, %v797_v25, %v971_v46  ;;  %v965_v25 = vmul.f32 0.01, %v767_v0 }
 0x11b   :  { %v842_v62 = vadd.f32 %v10844_v6, %v841_v60  ;;  %1332 = vmatmul.mubr.f32.vlgmr.msra.gmra.mxu1 %v108_v48  ;;  %v1028_v28 = vsel %vm928_vm15, %v832_v58, %v978_v9  ;;  %9496 = vmatprep.subr.mxu1 %v1047_v41  ;;  %v782_v58 = vadd.f32 %v10844_v6, %v10901_v7  ;;  %v123_v56 = vunpack.c.h.bf16 %v11056_v52  ;;  %v11077_v9 = vld [vmem:[%s14968_s1 + $0x40] sm:$0xff] }
 0x11c   :  { %8062 = vmatprep.mubr.msk.f32.mxu1 %vm1077_vm2, %v111_v50  ;;  %v10964_v59 = vpop.f32.mrf.mxu0  ;;  %9497 = vmatpush3.msra.mxu1 %v1047_v41  ;;  %v777_v7 = vadd.f32 %v10887_v61, %v10844_v6  ;;  %v125_v24 = vunpack.c.h.bf16 %v11077_v9  ;;  %v124_v47 = vunpack.c.l.bf16 %v11077_v9  ;;  %v11112_v41 = vld [vmem:[%s14968_s1 + $0x50] sm:$0xff] }
 0x11d   :  { %v980_v4 = vmul.f32 0.01, %v842_v62  ;;  %vm930_vm13 = vcmp.gt.f32.partialorder %v842_v62, 0.0  ;;  %v968_v17 = vmul.f32 0.01, %v782_v58  ;;  %vm918_vm10 = vcmp.gt.f32.partialorder %v782_v58, 0.0 }
 0x11e   :  { %v10973_v57 = vpop.f32.mrf.mxu0  ;;  %v967_v26 = vmul.f32 0.01, %v777_v7  ;;  %vm917_vm11 = vcmp.gt.f32.partialorder %v777_v7, 0.0  ;;  %v129_v46 = vunpack.c.h.bf16 %v11112_v41 }
 0x11f   :  { %v1030_v11 = vsel %vm930_vm13, %v842_v62, %v980_v4  ;;  %1337 = vmatmul.mubr.f32.gmra.mxu1 %v110_v63  ;;  %v970_v62 = vmul.f32 0.01, %v792_v10  ;;  %v969_v4 = vmul.f32 0.01, %v787_v14  ;;  %v1018_v35 = vsel %vm918_vm10, %v782_v58, %v968_v17  ;;  %v11148_v17 = vld [vmem:[%s14968_s1 + $0x60] sm:$0xff] }
 0x120   :  { %1648 = vmatpush1.msra.mxu0 %v1030_v11  ;;  %8063 = vmatprep.mubr.msk.f32.mxu1 %vm1077_vm2, %v113_v1  ;;  %v10991_v22 = vpop.f32.mrf.mxu0  ;;  %v1017_v38 = vsel %vm917_vm11, %v777_v7, %v967_v26  ;;  %vm915_vm13 = vcmp.gt.f32.partialorder %v767_v0, 0.0 }
 0x121   :  { %1649 = vmatprep.subr.mxu0 %v14981_v53  ;;  %v1020_v61 = vsel %vm920_vm8, %v792_v10, %v970_v62  ;;  %v1015_v58 = vsel %vm915_vm13, %v767_v0, %v965_v25  ;;  %v11130_v62 = vld [vmem:[%s14968_s1 + $0x58] sm:$0xff]  ;;  %vm14997_vm8 = vcmask 261120  }
 0x122   :  { %1650 = vmatpush1.msra.mxu0 %v1029_v18  ;;  %v11012_v23 = vpop.f32.mrf.mxu0  ;;  %v122_v18 = vunpack.c.l.bf16 %v11056_v52 }
 0x123   :  { %1651 = vmatprep.subr.mxu0 %v14981_v53  ;;  %1342 = vmatmul.mubr.f32.gmra.mxu1 %v112_v12 }
 0x124   :  { %1652 = vmatpush1.msra.mxu0 %v1028_v28  ;;  %8064 = vmatprep.mubr.msk.f32.mxu1 %vm1077_vm2, %v115_v13  ;;  %v11036_v15 = vpop.f32.mrf.mxu0  ;;  %v1019_v28 = vsel %vm919_vm9, %v787_v14, %v969_v4  ;;  %v126_v14 = vunpack.c.l.bf16 %v11096_v31 }
 0x125   :  { %1653 = vmatprep.subr.mxu0 %v14981_v53  ;;  %v877_v10 = vadd.f32 %v11036_v15, %v10844_v6 }
 0x126   :  { %1654 = vmatpush1.msra.mxu0 %v1027_v33  ;;  %v11058_v60 = vpop.f32.mrf.mxu0  ;;  %v966_v33 = vmul.f32 0.01, %v772_v16 }
 0x127   :  { %1655 = vmatprep.subr.mxu0 %v14981_v53  ;;  %1347 = vmatmul.mubr.f32.gmra.mxu1 %v114_v29  ;;  %v872_v15 = vadd.f32 %v10844_v6, %v11058_v60  ;;  %v987_v7 = vmul.f32 0.01, %v877_v10  ;;  %v128_v60 = vunpack.c.l.bf16 %v11112_v41  ;;  %vm937_vm0 = vcmp.gt.f32.partialorder %v877_v10, 0.0 }
 0x128   :  { %1656 = vmatpush1.msra.mxu0 %v1026_v20  ;;  %8065 = vmatprep.mubr.msk.f32.mxu1 %vm1077_vm2, %v117_v30  ;;  %v9495_v11 = vpop.f32.mrf.mxu0  ;;  %v127_v20 = vunpack.c.h.bf16 %v11096_v31 }
 0x129   :  { %1657 = vmatprep.subr.mxu0 %v14981_v53  ;;  %v887_v36 = vadd.f32 %v9495_v11, %v10844_v6  ;;  %v986_v11 = vmul.f32 0.01, %v872_v15  ;;  %vm936_vm1 = vcmp.gt.f32.partialorder %v872_v15, 0.0  ;;  %v1037_v26 = vsel %vm937_vm0, %v877_v10, %v987_v7  ;;  %v1051_v7 = vld [vmem:[%s14972_s5 + $0x58] sm:$0xff] }
 0x12a   :  { %1658 = vmatpush1.msra.mxu0 %v1025_v39  ;;  %v881_v32 = vpop.f32.mrf.mxu0  ;;  %vm3818_vm0 = vcmask 457728  }
 0x12b   :  { %1659 = vmatprep.subr.mxu0 %v14981_v53  ;;  %1352 = vmatmul.mubr.f32.gmra.mxu1 %v116_v37  ;;  %v882_v39 = vadd.f32 %v10844_v6, %v881_v32  ;;  %v989_v42 = vmul.f32 0.01, %v887_v36  ;;  %vm939_vm14 = vcmp.gt.f32.partialorder %v887_v36, 0.0 }
 0x12c   :  { %1660 = vmatpush1.msra.mxu0 %v1024_v43  ;;  %8066 = vmatprep.mubr.msk.f32.mxu1 %vm1077_vm2, %v119_v27  ;;  %v1016_v43 = vsel %vm916_vm12, %v772_v16, %v966_v33  ;;  %v1036_v33 = vsel %vm936_vm1, %v872_v15, %v986_v11 }
 0x12d   :  { %1661 = vmatprep.subr.mxu0 %v14981_v53  ;;  %vm938_vm15 = vcmp.gt.f32.partialorder %v882_v39, 0.0  ;;  %v1039_v4 = vsel %vm939_vm14, %v887_v36, %v989_v42  ;;  %v847_v36 = vadd.f32 %v10946_v49, %v10844_v6  ;;  %v11182_v49 = vld [vmem:[%s14968_s1 + $0x70] sm:$0xff] }
 0x12e   :  { %1662 = vmatpush1.msra.mxu0 %v1023_v51  ;;  %v988_v51 = vmul.f32 0.01, %v882_v39 }
 0x12f   :  { %1663 = vmatprep.subr.mxu0 %v14981_v53  ;;  %1357 = vmatmul.mubr.f32.gmra.mxu1 %v118_v44  ;;  %v981_v42 = vmul.f32 0.01, %v847_v36  ;;  %vm931_vm7 = vcmp.gt.f32.partialorder %v847_v36, 0.0 }
 0x130   :  { %1664 = vmatpush1.msra.mxu0 %v1022_v3  ;;  %8067 = vmatprep.mubr.msk.f32.mxu1 %vm1077_vm2, %v121_v45  ;;  %v867_v3 = vadd.f32 %v10991_v22, %v10844_v6  ;;  %v862_v22 = vadd.f32 %v10844_v6, %v11012_v23  ;;  %v1038_v16 = vsel %vm938_vm15, %v882_v39, %v988_v51  ;;  %v130_v23 = vunpack.c.l.bf16 %v11130_v62 }
 0x131   :  { %1665 = vmatprep.subr.mxu0 %v14981_v53  ;;  %v137_v51 = vunpack.c.h.bf16 %v11182_v49 }
 0x132   :  { %1666 = vmatpush1.msra.mxu0 %v1021_v8  ;;  %v131_v8 = vunpack.c.h.bf16 %v11130_v62  ;;  %v985_v0 = vmul.f32 0.01, %v867_v3  ;;  %vm935_vm3 = vcmp.gt.f32.partialorder %v867_v3, 0.0  ;;  %v984_v32 = vmul.f32 0.01, %v862_v22 }
 0x133   :  { %1667 = vmatprep.subr.mxu0 %v14981_v53  ;;  %1362 = vmatmul.mubr.f32.gmra.mxu1 %v120_v2  ;;  %vm934_vm4 = vcmp.gt.f32.partialorder %v862_v22, 0.0 }
 0x134   :  { %1668 = vmatpush1.msra.mxu0 %v1020_v61  ;;  %8068 = vmatprep.mubr.msk.f32.mxu1 %vm1077_vm2, %v123_v56  ;;  %v857_v61 = vadd.f32 %v10964_v59, %v10844_v6  ;;  %v852_v59 = vadd.f32 %v10844_v6, %v10973_v57  ;;  %v132_v57 = vunpack.c.l.bf16 %v11148_v17  ;;  %v1034_v6 = vsel %vm934_vm4, %v862_v22, %v984_v32 }
 0x135   :  { %1669 = vmatprep.subr.mxu0 %v14981_v53  ;;  %v136_v22 = vunpack.c.l.bf16 %v11182_v49 }
 0x136   :  { %1670 = vmatpush1.msra.mxu0 %v1019_v28  ;;  %v133_v28 = vunpack.c.h.bf16 %v11148_v17  ;;  %v983_v25 = vmul.f32 0.01, %v857_v61  ;;  %vm933_vm5 = vcmp.gt.f32.partialorder %v857_v61, 0.0  ;;  %v982_v10 = vmul.f32 0.01, %v852_v59 }
 0x137   :  { %1671 = vmatprep.subr.mxu0 %v14981_v53  ;;  %1367 = vmatmul.mubr.f32.gmra.mxu1 %v122_v18  ;;  %vm932_vm6 = vcmp.gt.f32.partialorder %v852_v59, 0.0 }
 0x138   :  { %1672 = vmatpush1.msra.mxu0 %v1018_v35  ;;  %8069 = vmatprep.mubr.msk.f32.mxu1 %vm1077_vm2, %v125_v24  ;;  %v11166_v35 = vld [vmem:[%s14968_s1 + $0x68] sm:$0xff] }
 0x139   :  { %1673 = vmatprep.subr.mxu0 %v14981_v53  ;;  %v135_v39 = vunpack.c.h.bf16 %v11166_v35  ;;  %v134_v15 = vunpack.c.l.bf16 %v11166_v35  ;;  %v11458_v35 = vld [vmem:[%s14968_s1 + $0xf0] sm:$0xff] }
 0x13a   :  { %1674 = vmatpush1.msra.mxu0 %v1017_v38  ;;  %v1035_v38 = vsel %vm935_vm3, %v867_v3, %v985_v0  ;;  %v11196_v3 = vld [vmem:[%s14968_s1 + $0x78] sm:$0xff] }
 0x13b   :  { %1675 = vmatprep.subr.mxu0 %v14981_v53  ;;  %1372 = vmatmul.mubr.f32.gmra.mxu1 %v124_v47  ;;  %v139_v11 = vunpack.c.h.bf16 %v11196_v3 }
 0x13c   :  { %1676 = vmatpush1.msra.mxu0 %v1016_v43  ;;  %8070 = vmatprep.mubr.msk.f32.mxu1 %vm1077_vm2, %v127_v20  ;;  %v1033_v43 = vsel %vm933_vm5, %v857_v61, %v983_v25  ;;  %v138_v61 = vunpack.c.l.bf16 %v11196_v3  ;;  %v169_v25 = vunpack.c.h.bf16 %v11458_v35  ;;  %v11532_v3 = vld [vmem:[%s14968_s1 + $0x110] sm:$0xff] }
 0x13d   :  { %1677 = vmatprep.subr.mxu0 %v14981_v53 }
 0x13e   :  { %1678 = vmatpush1.msra.mxu0 %v1015_v58  ;;  %v1032_v58 = vsel %vm932_vm6, %v852_v59, %v982_v10  ;;  %v1050_v59 = vld [vmem:[%s14972_s5 + $0x50] sm:$0xff]  ;;  %v11492_v10 = vld [vmem:[%s14968_s1 + $0x100] sm:$0xff] }
 0x13f   :  { %1693 = vmatprep.subr.mxu0 %v14981_v53  ;;  %1377 = vmatmul.mubr.f32.gmra.mxu1 %v126_v14 }
 0x140   :  { %1694 = vmatpush2.msra.mxu0 %v1039_v4  ;;  %8071 = vmatprep.mubr.msk.f32.mxu1 %vm1077_vm2, %v129_v46  ;;  %v1031_v4 = vsel %vm931_vm7, %v847_v36, %v981_v42  ;;  %v173_v42 = vunpack.c.h.bf16 %v11492_v10 }
 0x141   :  { %1695 = vmatprep.subr.mxu0 %v14981_v53 }
 0x142   :  { %1696 = vmatpush2.msra.mxu0 %v1038_v16  ;;  %v11214_v16 = vld [vmem:[%s14968_s1 + $0x80] sm:$0xff] }
 0x143   :  { %1697 = vmatprep.subr.mxu0 %v14981_v53  ;;  %1382 = vmatmul.mubr.f32.gmra.mxu1 %v128_v60  ;;  %v141_v54 = vunpack.c.h.bf16 %v11214_v16 }
 0x144   :  { %1698 = vmatpush2.msra.mxu0 %v1037_v26  ;;  %8072 = vmatprep.mubr.msk.f32.mxu1 %vm1077_vm2, %v131_v8  ;;  %v11421_v26 = vld [vmem:[%s14968_s1 + $0xe0] sm:$0xff] }
 0x145   :  { %1699 = vmatprep.subr.mxu0 %v14981_v53  ;;  %v165_v17 = vunpack.c.h.bf16 %v11421_v26  ;;  %v164_v32 = vunpack.c.l.bf16 %v11421_v26  ;;  %v11765_v26 = vld [vmem:[%s14968_s1 + $0x178] sm:$0xff] }
 0x146   :  { %1700 = vmatpush2.msra.mxu0 %v1036_v33 }
 0x147   :  { %1701 = vmatprep.subr.mxu0 %v14981_v53  ;;  %1387 = vmatmul.mubr.f32.gmra.mxu1 %v130_v23 }
 0x148   :  { %1702 = vmatpush2.msra.mxu0 %v1035_v38  ;;  %8073 = vmatprep.mubr.msk.f32.mxu1 %vm1077_vm2, %v133_v28  ;;  %v11475_v38 = vld [vmem:[%s14968_s1 + $0xf8] sm:$0xff] }
 0x149   :  { %1703 = vmatprep.subr.mxu0 %v14981_v53  ;;  %v170_v49 = vunpack.c.l.bf16 %v11475_v38 }
 0x14a   :  { %1704 = vmatpush2.msra.mxu0 %v1034_v6  ;;  %v1045_v6 = vld [vmem:[%s14972_s5 + $0x28] sm:$0xff] }
 0x14b   :  { %1705 = vmatprep.subr.mxu0 %v14981_v53  ;;  %1392 = vmatmul.mubr.f32.gmra.mxu1 %v132_v57 }
 0x14c   :  { %1706 = vmatpush2.msra.mxu0 %v1033_v43  ;;  %8074 = vmatprep.mubr.msk.f32.mxu1 %vm1077_vm2, %v135_v39  ;;  %v1044_v43 = vld [vmem:[%s14972_s5 + $0x20] sm:$0xff] }
 0x14d   :  { %1707 = vmatprep.subr.mxu0 %v14981_v53 }
 0x14e   :  { %1708 = vmatpush2.msra.mxu0 %v1032_v58 }
 0x14f   :  { %1709 = vmatprep.subr.mxu0 %v14981_v53  ;;  %1397 = vmatmul.mubr.f32.gmra.mxu1 %v134_v15 }
 0x150   :  { %1710 = vmatpush2.msra.mxu0 %v1031_v4  ;;  %8075 = vmatprep.mubr.msk.f32.mxu1 %vm1077_vm2, %v137_v51  ;;  %v177_v4 = vunpack.c.h.bf16 %v11532_v3 }
 0x151   :  { %1712 = vmatmul.mubr.f32.vlgmr.msra.gmra.mxu0 %v108_v48  ;;  %9554 = vmatprep.subr.mxu0 %v1051_v7  ;;  %v11231_v48 = vld [vmem:[%s14968_s1 + $0x88] sm:$0xff] }
 0x152   :  { %8125 = vmatprep.mubr.msk.f32.mxu0 %vm1077_vm2, %v111_v50  ;;  %9555 = vmatpush3.msra.mxu0 %v1051_v7  ;;  %v140_v50 = vunpack.c.l.bf16 %v11214_v16  ;;  %v143_v19 = vunpack.c.h.bf16 %v11231_v48 }
 0x153   :  { %1402 = vmatmul.mubr.f32.gmra.mxu1 %v136_v22  ;;  %9556 = vmatprep.subr.mxu0 %v1050_v59 }
 0x154   :  { %8076 = vmatprep.mubr.msk.f32.mxu1 %vm1077_vm2, %v139_v11  ;;  %9557 = vmatpush3.msra.mxu0 %v1050_v59  ;;  %v202_v59 = vunpack.c.l.bf16 %v11765_v26 }
 0x155   :  { %1717 = vmatmul.mubr.f32.gmra.mxu0 %v110_v63  ;;  %v11248_v63 = vld [vmem:[%s14968_s1 + $0x90] sm:$0xff] }
 0x156   :  { %8126 = vmatprep.mubr.msk.f32.mxu0 %vm1077_vm2, %v113_v1  ;;  %v142_v1 = vunpack.c.l.bf16 %v11231_v48  ;;  %v145_v55 = vunpack.c.h.bf16 %v11248_v63 }
 0x157   :  { %1407 = vmatmul.mubr.f32.gmra.mxu1 %v138_v61 }
 0x158   :  { %8077 = vmatprep.mubr.msk.f32.mxu1 %vm1077_vm2, %v141_v54 }
 0x159   :  { %1722 = vmatmul.mubr.f32.gmra.mxu0 %v112_v12  ;;  %v11265_v12 = vld [vmem:[%s14968_s1 + $0x98] sm:$0xff] }
 0x15a   :  { %8127 = vmatprep.mubr.msk.f32.mxu0 %vm1077_vm2, %v115_v13  ;;  %v144_v13 = vunpack.c.l.bf16 %v11248_v63  ;;  %v147_v5 = vunpack.c.h.bf16 %v11265_v12 }
 0x15b   :  { %1412 = vmatmul.mubr.f32.gmra.mxu1 %v140_v50 }
 0x15c   :  { %8078 = vmatprep.mubr.msk.f32.mxu1 %vm1077_vm2, %v143_v19 }
 0x15d   :  { %1727 = vmatmul.mubr.f32.gmra.mxu0 %v114_v29  ;;  %v11282_v29 = vld [vmem:[%s14968_s1 + $0xa0] sm:$0xff] }
 0x15e   :  { %8128 = vmatprep.mubr.msk.f32.mxu0 %vm1077_vm2, %v117_v30  ;;  %v146_v30 = vunpack.c.l.bf16 %v11265_v12  ;;  %v149_v21 = vunpack.c.h.bf16 %v11282_v29 }
 0x15f   :  { %1417 = vmatmul.mubr.f32.gmra.mxu1 %v142_v1 }
 0x160   :  { %8079 = vmatprep.mubr.msk.f32.mxu1 %vm1077_vm2, %v145_v55 }
 0x161   :  { %1732 = vmatmul.mubr.f32.gmra.mxu0 %v116_v37  ;;  %v11299_v37 = vld [vmem:[%s14968_s1 + $0xa8] sm:$0xff] }
 0x162   :  { %8129 = vmatprep.mubr.msk.f32.mxu0 %vm1077_vm2, %v119_v27  ;;  %v148_v27 = vunpack.c.l.bf16 %v11282_v29  ;;  %v151_v34 = vunpack.c.h.bf16 %v11299_v37  ;;  %v150_v40 = vunpack.c.l.bf16 %v11299_v37 }
 0x163   :  { %1422 = vmatmul.mubr.f32.gmra.mxu1 %v144_v13 }
 0x164   :  { %8080 = vmatprep.mubr.msk.f32.mxu1 %vm1077_vm2, %v147_v5 }
 0x165   :  { %1737 = vmatmul.mubr.f32.gmra.mxu0 %v118_v44  ;;  %v11316_v44 = vld [vmem:[%s14968_s1 + $0xb0] sm:$0xff] }
 0x166   :  { %8130 = vmatprep.mubr.msk.f32.mxu0 %vm1077_vm2, %v121_v45  ;;  %v1046_v45 = vld [vmem:[%s14972_s5 + $0x30] sm:$0xff]  ;;  %v152_v0 = vunpack.c.l.bf16 %v11316_v44 }
 0x167   :  { %1427 = vmatmul.mubr.f32.gmra.mxu1 %v146_v30  ;;  %9498 = vmatprep.subr.mxu1 %v1046_v45 }
 0x168   :  { %8081 = vmatprep.mubr.msk.f32.mxu1 %vm1077_vm2, %v149_v21  ;;  %9499 = vmatpush3.msra.mxu1 %v1046_v45  ;;  %v11668_v45 = vld [vmem:[%s14968_s1 + $0x150] sm:$0xff] }
 0x169   :  { %1742 = vmatmul.mubr.f32.gmra.mxu0 %v120_v2  ;;  %v153_v2 = vunpack.c.h.bf16 %v11316_v44  ;;  %9500 = vmatprep.subr.mxu1 %v1045_v6 }
 0x16a   :  { %8131 = vmatprep.mubr.msk.f32.mxu0 %vm1077_vm2, %v123_v56  ;;  %v11336_v56 = vld [vmem:[%s14968_s1 + $0xb8] sm:$0xff]  ;;  %9501 = vmatpush3.msra.mxu1 %v1045_v6 }
 0x16b   :  { %1432 = vmatmul.mubr.f32.gmra.mxu1 %v148_v27  ;;  %v155_v52 = vunpack.c.h.bf16 %v11336_v56  ;;  %9502 = vmatprep.subr.mxu1 %v1044_v43  ;;  %v11835_v6 = vld [vmem:[%s14968_s1 + $0x198] sm:$0xff] }
 0x16c   :  { %8082 = vmatprep.mubr.msk.f32.mxu1 %vm1077_vm2, %v151_v34  ;;  %9503 = vmatpush3.msra.mxu1 %v1044_v43  ;;  %v211_v43 = vunpack.c.h.bf16 %v11835_v6 }
 0x16d   :  { %1747 = vmatmul.mubr.f32.gmra.mxu0 %v122_v18  ;;  %v11353_v18 = vld [vmem:[%s14968_s1 + $0xc0] sm:$0xff] }
 0x16e   :  { %8132 = vmatprep.mubr.msk.f32.mxu0 %vm1077_vm2, %v125_v24  ;;  %v154_v24 = vunpack.c.l.bf16 %v11336_v56  ;;  %v157_v9 = vunpack.c.h.bf16 %v11353_v18  ;;  %v11685_v56 = vld [vmem:[%s14968_s1 + $0x158] sm:$0xff] }
 0x16f   :  { %1437 = vmatmul.mubr.f32.gmra.mxu1 %v150_v40 }
 0x170   :  { %8083 = vmatprep.mubr.msk.f32.mxu1 %vm1077_vm2, %v153_v2 }
 0x171   :  { %1752 = vmatmul.mubr.f32.gmra.mxu0 %v124_v47  ;;  %v11370_v47 = vld [vmem:[%s14968_s1 + $0xc8] sm:$0xff] }
 0x172   :  { %8133 = vmatprep.mubr.msk.f32.mxu0 %vm1077_vm2, %v127_v20  ;;  %v156_v20 = vunpack.c.l.bf16 %v11353_v18  ;;  %v159_v31 = vunpack.c.h.bf16 %v11370_v47  ;;  %v11702_v18 = vld [vmem:[%s14968_s1 + $0x160] sm:$0xff] }
 0x173   :  { %1442 = vmatmul.mubr.f32.gmra.mxu1 %v152_v0 }
 0x174   :  { %8084 = vmatprep.mubr.msk.f32.mxu1 %vm1077_vm2, %v155_v52 }
 0x175   :  { %1757 = vmatmul.mubr.f32.gmra.mxu0 %v126_v14  ;;  %v11387_v14 = vld [vmem:[%s14968_s1 + $0xd0] sm:$0xff] }
 0x176   :  { %8134 = vmatprep.mubr.msk.f32.mxu0 %vm1077_vm2, %v129_v46  ;;  %v158_v46 = vunpack.c.l.bf16 %v11370_v47  ;;  %v161_v41 = vunpack.c.h.bf16 %v11387_v14  ;;  %v197_v47 = vunpack.c.h.bf16 %v11702_v18 }
 0x177   :  { %1447 = vmatmul.mubr.f32.gmra.mxu1 %v154_v24 }
 0x178   :  { %8085 = vmatprep.mubr.msk.f32.mxu1 %vm1077_vm2, %v157_v9 }
 0x179   :  { %1762 = vmatmul.mubr.f32.gmra.mxu0 %v128_v60  ;;  %v11404_v60 = vld [vmem:[%s14968_s1 + $0xd8] sm:$0xff] }
 0x17a   :  { %8135 = vmatprep.mubr.msk.f32.mxu0 %vm1077_vm2, %v131_v8  ;;  %v160_v8 = vunpack.c.l.bf16 %v11387_v14  ;;  %v163_v62 = vunpack.c.h.bf16 %v11404_v60  ;;  %v196_v14 = vunpack.c.l.bf16 %v11702_v18 }
 0x17b   :  { %1452 = vmatmul.mubr.f32.gmra.mxu1 %v156_v20 }
 0x17c   :  { %8086 = vmatprep.mubr.msk.f32.mxu1 %vm1077_vm2, %v159_v31 }
 0x17d   :  { %1767 = vmatmul.mubr.f32.gmra.mxu0 %v130_v23  ;;  %v162_v23 = vunpack.c.l.bf16 %v11404_v60  ;;  %v1048_v60 = vld [vmem:[%s14972_s5 + $0x40] sm:$0xff] }
 0x17e   :  { %8136 = vmatprep.mubr.msk.f32.mxu0 %vm1077_vm2, %v133_v28  ;;  %v11438_v28 = vld [vmem:[%s14968_s1 + $0xe8] sm:$0xff] }
 0x17f   :  { %1457 = vmatmul.mubr.f32.gmra.mxu1 %v158_v46  ;;  %v167_v33 = vunpack.c.h.bf16 %v11438_v28  ;;  %v166_v36 = vunpack.c.l.bf16 %v11438_v28  ;;  %v11782_v28 = vld [vmem:[%s14968_s1 + $0x180] sm:$0xff] }
 0x180   :  { %8087 = vmatprep.mubr.msk.f32.mxu1 %vm1077_vm2, %v161_v41 }
 0x181   :  { %1772 = vmatmul.mubr.f32.gmra.mxu0 %v132_v57  ;;  %v168_v57 = vunpack.c.l.bf16 %v11458_v35  ;;  %v204_v35 = vunpack.c.l.bf16 %v11782_v28 }
 0x182   :  { %8137 = vmatprep.mubr.msk.f32.mxu0 %vm1077_vm2, %v135_v39  ;;  %v171_v39 = vunpack.c.h.bf16 %v11475_v38 }
 0x183   :  { %1462 = vmatmul.mubr.f32.gmra.mxu1 %v160_v8 }
 0x184   :  { %8088 = vmatprep.mubr.msk.f32.mxu1 %vm1077_vm2, %v163_v62 }
 0x185   :  { %1777 = vmatmul.mubr.f32.gmra.mxu0 %v134_v15  ;;  %v11515_v15 = vld [vmem:[%s14968_s1 + $0x108] sm:$0xff] }
 0x186   :  { %8138 = vmatprep.mubr.msk.f32.mxu0 %vm1077_vm2, %v137_v51  ;;  %v172_v51 = vunpack.c.l.bf16 %v11492_v10  ;;  %v175_v58 = vunpack.c.h.bf16 %v11515_v15  ;;  %v174_v7 = vunpack.c.l.bf16 %v11515_v15  ;;  %v11852_v15 = vld [vmem:[%s14972_s5 + $0x98] sm:$0xff] }
 0x187   :  { %1467 = vmatmul.mubr.f32.gmra.mxu1 %v162_v23 }
 0x188   :  { %8089 = vmatprep.mubr.msk.f32.mxu1 %vm1077_vm2, %v165_v17 }
 0x189   :  { %1782 = vmatmul.mubr.f32.gmra.mxu0 %v136_v22  ;;  %v11549_v22 = vld [vmem:[%s14968_s1 + $0x118] sm:$0xff] }
 0x18a   :  { %8139 = vmatprep.mubr.msk.f32.mxu0 %vm1077_vm2, %v139_v11  ;;  %v176_v11 = vunpack.c.l.bf16 %v11532_v3  ;;  %v179_v16 = vunpack.c.h.bf16 %v11549_v22 }
 0x18b   :  { %1472 = vmatmul.mubr.f32.gmra.mxu1 %v164_v32 }
 0x18c   :  { %8090 = vmatprep.mubr.msk.f32.mxu1 %vm1077_vm2, %v167_v33 }
 0x18d   :  { %1787 = vmatmul.mubr.f32.gmra.mxu0 %v138_v61  ;;  %v11566_v61 = vld [vmem:[%s14968_s1 + $0x120] sm:$0xff] }
 0x18e   :  { %8140 = vmatprep.mubr.msk.f32.mxu0 %vm1077_vm2, %v141_v54  ;;  %v178_v54 = vunpack.c.l.bf16 %v11549_v22  ;;  %v181_v48 = vunpack.c.h.bf16 %v11566_v61 }
 0x18f   :  { %1477 = vmatmul.mubr.f32.gmra.mxu1 %v166_v36 }
 0x190   :  { %8091 = vmatprep.mubr.msk.f32.mxu1 %vm1077_vm2, %v169_v25 }
 0x191   :  { %1792 = vmatmul.mubr.f32.gmra.mxu0 %v140_v50  ;;  %v11583_v50 = vld [vmem:[%s14968_s1 + $0x128] sm:$0xff] }
 0x192   :  { %8141 = vmatprep.mubr.msk.f32.mxu0 %vm1077_vm2, %v143_v19  ;;  %v180_v19 = vunpack.c.l.bf16 %v11566_v61  ;;  %v183_v63 = vunpack.c.h.bf16 %v11583_v50 }
 0x193   :  { %1482 = vmatmul.mubr.f32.gmra.mxu1 %v168_v57 }
 0x194   :  { %8092 = vmatprep.mubr.msk.f32.mxu1 %vm1077_vm2, %v171_v39 }
 0x195   :  { %1797 = vmatmul.mubr.f32.gmra.mxu0 %v142_v1  ;;  %v11600_v1 = vld [vmem:[%s14968_s1 + $0x130] sm:$0xff] }
 0x196   :  { %8142 = vmatprep.mubr.msk.f32.mxu0 %vm1077_vm2, %v145_v55  ;;  %v182_v55 = vunpack.c.l.bf16 %v11583_v50  ;;  %v185_v12 = vunpack.c.h.bf16 %v11600_v1  ;;  %v11898_v50 = vld [vmem:[%s14968_s1 + $0x1b0] sm:$0xff] }
 0x197   :  { %1487 = vmatmul.mubr.f32.gmra.mxu1 %v170_v49 }
 0x198   :  { %8093 = vmatprep.mubr.msk.f32.mxu1 %vm1077_vm2, %v173_v42 }
 0x199   :  { %1802 = vmatmul.mubr.f32.gmra.mxu0 %v144_v13  ;;  %v11617_v13 = vld [vmem:[%s14968_s1 + $0x138] sm:$0xff] }
 0x19a   :  { %8143 = vmatprep.mubr.msk.f32.mxu0 %vm1077_vm2, %v147_v5  ;;  %v184_v5 = vunpack.c.l.bf16 %v11600_v1  ;;  %v187_v29 = vunpack.c.h.bf16 %v11617_v13  ;;  %v217_v1 = vunpack.c.h.bf16 %v11898_v50 }
 0x19b   :  { %1492 = vmatmul.mubr.f32.gmra.mxu1 %v172_v51 }
 0x19c   :  { %8094 = vmatprep.mubr.msk.f32.mxu1 %vm1077_vm2, %v175_v58 }
 0x19d   :  { %1807 = vmatmul.mubr.f32.gmra.mxu0 %v146_v30  ;;  %v11634_v30 = vld [vmem:[%s14968_s1 + $0x140] sm:$0xff] }
 0x19e   :  { %8144 = vmatprep.mubr.msk.f32.mxu0 %vm1077_vm2, %v149_v21  ;;  %v186_v21 = vunpack.c.l.bf16 %v11617_v13  ;;  %v189_v37 = vunpack.c.h.bf16 %v11634_v30 }
 0x19f   :  { %1497 = vmatmul.mubr.f32.gmra.mxu1 %v174_v7 }
 0x1a0   :  { %8095 = vmatprep.mubr.msk.f32.mxu1 %vm1077_vm2, %v177_v4 }
 0x1a1   :  { %1812 = vmatmul.mubr.f32.gmra.mxu0 %v148_v27  ;;  %v11651_v27 = vld [vmem:[%s14968_s1 + $0x148] sm:$0xff] }
 0x1a2   :  { %8145 = vmatprep.mubr.msk.f32.mxu0 %vm1077_vm2, %v151_v34  ;;  %v188_v34 = vunpack.c.l.bf16 %v11634_v30  ;;  %v191_v44 = vunpack.c.h.bf16 %v11651_v27 }
 0x1a3   :  { %1502 = vmatmul.mubr.f32.gmra.mxu1 %v176_v11 }
 0x1a4   :  { %8096 = vmatprep.mubr.msk.f32.mxu1 %vm1077_vm2, %v179_v16 }
 0x1a5   :  { %1817 = vmatmul.mubr.f32.gmra.mxu0 %v150_v40  ;;  %v190_v40 = vunpack.c.l.bf16 %v11651_v27 }
 0x1a6   :  { %8146 = vmatprep.mubr.msk.f32.mxu0 %vm1077_vm2, %v153_v2  ;;  %v193_v2 = vunpack.c.h.bf16 %v11668_v45 }
 0x1a7   :  { %1507 = vmatmul.mubr.f32.gmra.mxu1 %v178_v54 }
 0x1a8   :  { %8097 = vmatprep.mubr.msk.f32.mxu1 %vm1077_vm2, %v181_v48 }
 0x1a9   :  { %1822 = vmatmul.mubr.f32.gmra.mxu0 %v152_v0  ;;  %v192_v0 = vunpack.c.l.bf16 %v11668_v45 }
 0x1aa   :  { %8147 = vmatprep.mubr.msk.f32.mxu0 %vm1077_vm2, %v155_v52  ;;  %v195_v52 = vunpack.c.h.bf16 %v11685_v56 }
 0x1ab   :  { %1512 = vmatmul.mubr.f32.gmra.mxu1 %v180_v19 }
 0x1ac   :  { %8098 = vmatprep.mubr.msk.f32.mxu1 %vm1077_vm2, %v183_v63 }
 0x1ad   :  { %1827 = vmatmul.mubr.f32.gmra.mxu0 %v154_v24  ;;  %v11707_v24 = vld [vmem:[%s14972_s5 + $0x18] sm:$0xff] }
 0x1ae   :  { %8148 = vmatprep.mubr.msk.f32.mxu0 %vm1077_vm2, %v157_v9  ;;  %9525 = vmatprep.subr.mxu1 %v11707_v24  ;;  %v194_v9 = vunpack.c.l.bf16 %v11685_v56 }
 0x1af   :  { %1517 = vmatmul.mubr.f32.gmra.mxu1 %v182_v55 }
 0x1b0   :  { %8099 = vmatprep.mubr.msk.f32.mxu1 %vm1077_vm2, %v185_v12 }
 0x1b1   :  { %1832 = vmatmul.mubr.f32.gmra.mxu0 %v156_v20  ;;  %v11725_v20 = vld [vmem:[%s14968_s1 + $0x168] sm:$0xff] }
 0x1b2   :  { %8149 = vmatprep.mubr.msk.f32.mxu0 %vm1077_vm2, %v159_v31  ;;  %v1049_v31 = vld [vmem:[%s14972_s5 + $0x48] sm:$0xff] }
 0x1b3   :  { %1522 = vmatmul.mubr.f32.gmra.mxu1 %v184_v5  ;;  %9558 = vmatprep.subr.mxu0 %v1049_v31 }
 0x1b4   :  { %8100 = vmatprep.mubr.msk.f32.mxu1 %vm1077_vm2, %v187_v29  ;;  %9559 = vmatpush3.msra.mxu0 %v1049_v31 }
 0x1b5   :  { %1837 = vmatmul.mubr.f32.gmra.mxu0 %v158_v46  ;;  %v199_v46 = vunpack.c.h.bf16 %v11725_v20  ;;  %9560 = vmatprep.subr.mxu0 %v1048_v60 }
 0x1b6   :  { %8150 = vmatprep.mubr.msk.f32.mxu0 %vm1077_vm2, %v161_v41  ;;  %v11745_v41 = vld [vmem:[%s14968_s1 + $0x170] sm:$0xff]  ;;  %9561 = vmatpush3.msra.mxu0 %v1048_v60 }
 0x1b7   :  { %1527 = vmatmul.mubr.f32.gmra.mxu1 %v186_v21  ;;  %9612 = vmatprep.subr.mxu0 %v11852_v15 }
 0x1b8   :  { %8101 = vmatprep.mubr.msk.f32.mxu1 %vm1077_vm2, %v189_v37 }
 0x1b9   :  { %1842 = vmatmul.mubr.f32.gmra.mxu0 %v160_v8  ;;  %v198_v8 = vunpack.c.l.bf16 %v11725_v20 }
 0x1ba   :  { %8151 = vmatprep.mubr.msk.f32.mxu0 %vm1077_vm2, %v163_v62  ;;  %v201_v62 = vunpack.c.h.bf16 %v11745_v41 }
 0x1bb   :  { %1532 = vmatmul.mubr.f32.gmra.mxu1 %v188_v34 }
 0x1bc   :  { %8102 = vmatprep.mubr.msk.f32.mxu1 %vm1077_vm2, %v191_v44 }
 0x1bd   :  { %1847 = vmatmul.mubr.f32.gmra.mxu0 %v162_v23  ;;  %v200_v23 = vunpack.c.l.bf16 %v11745_v41 }
 0x1be   :  { %8152 = vmatprep.mubr.msk.f32.mxu0 %vm1077_vm2, %v165_v17  ;;  %v203_v17 = vunpack.c.h.bf16 %v11765_v26 }
 0x1bf   :  { %1537 = vmatmul.mubr.f32.gmra.mxu1 %v190_v40 }
 0x1c0   :  { %8103 = vmatprep.mubr.msk.f32.mxu1 %vm1077_vm2, %v193_v2 }
 0x1c1   :  { %1852 = vmatmul.mubr.f32.gmra.mxu0 %v164_v32  ;;  %v205_v32 = vunpack.c.h.bf16 %v11782_v28 }
 0x1c2   :  { %8153 = vmatprep.mubr.msk.f32.mxu0 %vm1077_vm2, %v167_v33  ;;  %v11799_v33 = vld [vmem:[%s14968_s1 + $0x188] sm:$0xff] }
 0x1c3   :  { %1542 = vmatmul.mubr.f32.gmra.mxu1 %v192_v0 }
 0x1c4   :  { %8104 = vmatprep.mubr.msk.f32.mxu1 %vm1077_vm2, %v195_v52 }
 0x1c5   :  { %1857 = vmatmul.mubr.f32.gmra.mxu0 %v166_v36  ;;  %v207_v36 = vunpack.c.h.bf16 %v11799_v33 }
 0x1c6   :  { %8154 = vmatprep.mubr.msk.f32.mxu0 %vm1077_vm2, %v169_v25  ;;  %v11816_v25 = vld [vmem:[%s14968_s1 + $0x190] sm:$0xff] }
 0x1c7   :  { %1547 = vmatmul.mubr.f32.gmra.mxu1 %v194_v9 }
 0x1c8   :  { %8105 = vmatprep.mubr.msk.f32.mxu1 %vm1077_vm2, %v197_v47 }
 0x1c9   :  { %1862 = vmatmul.mubr.f32.gmra.mxu0 %v168_v57  ;;  %v206_v57 = vunpack.c.l.bf16 %v11799_v33  ;;  %v1041_v33 = vld [vmem:[%s14972_s5 + $0x8] sm:$0xff] }
 0x1ca   :  { %8155 = vmatprep.mubr.msk.f32.mxu0 %vm1077_vm2, %v171_v39  ;;  %v209_v39 = vunpack.c.h.bf16 %v11816_v25 }
 0x1cb   :  { %1552 = vmatmul.mubr.f32.gmra.mxu1 %v196_v14 }
 0x1cc   :  { %8106 = vmatprep.mubr.msk.f32.mxu1 %vm1077_vm2, %v199_v46 }
 0x1cd   :  { %1867 = vmatmul.mubr.f32.gmra.mxu0 %v170_v49 }
 0x1ce   :  { %8156 = vmatprep.mubr.msk.f32.mxu0 %vm1077_vm2, %v173_v42  ;;  %v208_v42 = vunpack.c.l.bf16 %v11816_v25  ;;  %v12116_v25 = vld [vmem:[%s14972_s5 + $0x78] sm:$0xff] }
 0x1cf   :  { %1557 = vmatmul.mubr.f32.gmra.mxu1 %v198_v8 }
 0x1d0   :  { %8107 = vmatprep.mubr.msk.f32.mxu1 %vm1077_vm2, %v201_v62 }
 0x1d1   :  { %1872 = vmatmul.mubr.f32.gmra.mxu0 %v172_v51 }
 0x1d2   :  { %8157 = vmatprep.mubr.msk.f32.mxu0 %vm1077_vm2, %v175_v58  ;;  %v11859_v58 = vld [vmem:[%s14968_s1 + $0x1a0] sm:$0xff] }
 0x1d3   :  { %1562 = vmatmul.mubr.f32.gmra.mxu1 %v200_v23  ;;  %v212_v61 = vunpack.c.l.bf16 %v11859_v58 }
 0x1d4   :  { %8108 = vmatprep.mubr.msk.f32.mxu1 %vm1077_vm2, %v203_v17 }
 0x1d5   :  { %1877 = vmatmul.mubr.f32.gmra.mxu0 %v174_v7  ;;  %v210_v7 = vunpack.c.l.bf16 %v11835_v6 }
 0x1d6   :  { %8158 = vmatprep.mubr.msk.f32.mxu0 %vm1077_vm2, %v177_v4  ;;  %v213_v4 = vunpack.c.h.bf16 %v11859_v58 }
 0x1d7   :  { %1567 = vmatmul.mubr.f32.gmra.mxu1 %v202_v59 }
 0x1d8   :  { %8109 = vmatprep.mubr.msk.f32.mxu1 %vm1077_vm2, %v205_v32 }
 0x1d9   :  { %1882 = vmatmul.mubr.f32.gmra.mxu0 %v176_v11  ;;  %v11879_v11 = vld [vmem:[%s14968_s1 + $0x1a8] sm:$0xff] }
 0x1da   :  { %8159 = vmatprep.mubr.msk.f32.mxu0 %vm1077_vm2, %v179_v16 }
 0x1db   :  { %v11821_v38 = vpop.f32.mrf.mxu1  ;;  %1572 = vmatmul.mubr.f32.gmra.mxu1 %v204_v35 }
 0x1dc   :  { %8110 = vmatprep.mubr.msk.f32.mxu1 %vm1077_vm2, %v207_v36 }
 0x1dd   :  { %1887 = vmatmul.mubr.f32.gmra.mxu0 %v178_v54  ;;  %v1335_v10 = vpop.f32.mrf.mxu1  ;;  %v215_v54 = vunpack.c.h.bf16 %v11879_v11 }
 0x1de   :  { %8160 = vmatprep.mubr.msk.f32.mxu0 %vm1077_vm2, %v181_v48 }
 0x1df   :  { %v11840_v49 = vpop.f32.mrf.mxu1  ;;  %1577 = vmatmul.mubr.f32.gmra.mxu1 %v206_v57 }
 0x1e0   :  { %8111 = vmatprep.mubr.msk.f32.mxu1 %vm1077_vm2, %v209_v39 }
 0x1e1   :  { %1892 = vmatmul.mubr.f32.gmra.mxu0 %v180_v19  ;;  %v1340_v51 = vpop.f32.mrf.mxu1 }
 0x1e2   :  { %8161 = vmatprep.mubr.msk.f32.mxu0 %vm1077_vm2, %v183_v63  ;;  %v214_v63 = vunpack.c.l.bf16 %v11879_v11 }
 0x1e3   :  { %v11865_v3 = vpop.f32.mrf.mxu1  ;;  %1582 = vmatmul.mubr.f32.gmra.mxu1 %v208_v42 }
 0x1e4   :  { %8112 = vmatprep.mubr.msk.f32.mxu1 %vm1077_vm2, %v211_v43 }
 0x1e5   :  { %1897 = vmatmul.mubr.f32.gmra.mxu0 %v182_v55  ;;  %v1345_v22 = vpop.f32.mrf.mxu1 }
 0x1e6   :  { %8162 = vmatprep.mubr.msk.f32.mxu0 %vm1077_vm2, %v185_v12  ;;  %v11917_v12 = vld [vmem:[%s14968_s1 + $0x1b8] sm:$0xff] }
 0x1e7   :  { %v11884_v16 = vpop.f32.mrf.mxu1  ;;  %1587 = vmatmul.mubr.f32.gmra.mxu1 %v210_v7  ;;  %v219_v13 = vunpack.c.h.bf16 %v11917_v12  ;;  %v218_v60 = vunpack.c.l.bf16 %v11917_v12 }
 0x1e8   :  { %8113 = vmatprep.mubr.msk.f32.mxu1 %vm1077_vm2, %v213_v4 }
 0x1e9   :  { %1902 = vmatmul.mubr.f32.gmra.mxu0 %v184_v5  ;;  %v1350_v48 = vpop.f32.mrf.mxu1 }
 0x1ea   :  { %8163 = vmatprep.mubr.msk.f32.mxu0 %vm1077_vm2, %v187_v29  ;;  %v216_v29 = vunpack.c.l.bf16 %v11898_v50 }
 0x1eb   :  { %v11903_v19 = vpop.f32.mrf.mxu1  ;;  %1592 = vmatmul.mubr.f32.gmra.mxu1 %v212_v61 }
 0x1ec   :  { %8114 = vmatprep.mubr.msk.f32.mxu1 %vm1077_vm2, %v215_v54 }
 0x1ed   :  { %1907 = vmatmul.mubr.f32.gmra.mxu0 %v186_v21  ;;  %v1355_v55 = vpop.f32.mrf.mxu1 }
 0x1ee   :  { %8164 = vmatprep.mubr.msk.f32.mxu0 %vm1077_vm2, %v189_v37  ;;  %v11936_v37 = vld [vmem:[%s14968_s1 + $0x1c0] sm:$0xff] }
 0x1ef   :  { %v11922_v5 = vpop.f32.mrf.mxu1  ;;  %1597 = vmatmul.mubr.f32.gmra.mxu1 %v214_v63  ;;  %v221_v30 = vunpack.c.h.bf16 %v11936_v37  ;;  %v220_v51 = vunpack.c.l.bf16 %v11936_v37 }
 0x1f0   :  { %8115 = vmatprep.mubr.msk.f32.mxu1 %vm1077_vm2, %v217_v1 }
 0x1f1   :  { %1912 = vmatmul.mubr.f32.gmra.mxu0 %v188_v34  ;;  %v1360_v21 = vpop.f32.mrf.mxu1 }
 0x1f2   :  { %8165 = vmatprep.mubr.msk.f32.mxu0 %vm1077_vm2, %v191_v44  ;;  %v11955_v44 = vld [vmem:[%s14968_s1 + $0x1c8] sm:$0xff] }
 0x1f3   :  { %v11941_v31 = vpop.f32.mrf.mxu1  ;;  %1602 = vmatmul.mubr.f32.gmra.mxu1 %v216_v29  ;;  %v223_v27 = vunpack.c.h.bf16 %v11955_v44  ;;  %v222_v48 = vunpack.c.l.bf16 %v11955_v44 }
 0x1f4   :  { %8116 = vmatprep.mubr.msk.f32.mxu1 %vm1077_vm2, %v219_v13 }
 0x1f5   :  { %1917 = vmatmul.mubr.f32.gmra.mxu0 %v190_v40  ;;  %v1365_v34 = vpop.f32.mrf.mxu1 }
 0x1f6   :  { %8166 = vmatprep.mubr.msk.f32.mxu0 %vm1077_vm2, %v193_v2  ;;  %v11974_v2 = vld [vmem:[%s14968_s1 + $0x1d0] sm:$0xff] }
 0x1f7   :  { %v11960_v10 = vpop.f32.mrf.mxu1  ;;  %1607 = vmatmul.mubr.f32.gmra.mxu1 %v218_v60  ;;  %v225_v45 = vunpack.c.h.bf16 %v11974_v2  ;;  %v224_v21 = vunpack.c.l.bf16 %v11974_v2 }
 0x1f8   :  { %8117 = vmatprep.mubr.msk.f32.mxu1 %vm1077_vm2, %v221_v30 }
 0x1f9   :  { %1922 = vmatmul.mubr.f32.gmra.mxu0 %v192_v0  ;;  %v1370_v40 = vpop.f32.mrf.mxu1 }
 0x1fa   :  { %8167 = vmatprep.mubr.msk.f32.mxu0 %vm1077_vm2, %v195_v52  ;;  %v11993_v52 = vld [vmem:[%s14968_s1 + $0x1d8] sm:$0xff] }
 0x1fb   :  { %v11979_v22 = vpop.f32.mrf.mxu1  ;;  %1612 = vmatmul.mubr.f32.gmra.mxu1 %v220_v51  ;;  %v227_v56 = vunpack.c.h.bf16 %v11993_v52  ;;  %v226_v40 = vunpack.c.l.bf16 %v11993_v52 }
 0x1fc   :  { %8118 = vmatprep.mubr.msk.f32.mxu1 %vm1077_vm2, %v223_v27 }
 0x1fd   :  { %1927 = vmatmul.mubr.f32.gmra.mxu0 %v194_v9  ;;  %v1375_v0 = vpop.f32.mrf.mxu1 }
 0x1fe   :  { %8168 = vmatprep.mubr.msk.f32.mxu0 %vm1077_vm2, %v197_v47  ;;  %v12010_v47 = vld [vmem:[%s14968_s1 + $0x1e0] sm:$0xff] }
 0x1ff   :  { %v1378_v55 = vpop.f32.mrf.mxu1  ;;  %1617 = vmatmul.mubr.f32.gmra.mxu1 %v222_v48  ;;  %v229_v18 = vunpack.c.h.bf16 %v12010_v47 }
 0x200   :  { %8119 = vmatprep.mubr.msk.f32.mxu1 %vm1077_vm2, %v225_v45 }
 0x201   :  { %1932 = vmatmul.mubr.f32.gmra.mxu0 %v196_v14  ;;  %v1380_v9 = vpop.f32.mrf.mxu1 }
 0x202   :  { %8169 = vmatprep.mubr.msk.f32.mxu0 %vm1077_vm2, %v199_v46  ;;  %v12027_v46 = vld [vmem:[%s14968_s1 + $0x1e8] sm:$0xff]  ;;  %v228_v9 = vunpack.c.l.bf16 %v12010_v47 }
 0x203   :  { %v1383_v34 = vpop.f32.mrf.mxu1  ;;  %1622 = vmatmul.mubr.f32.gmra.mxu1 %v224_v21  ;;  %v14983_v20 = vunpack.c.h.bf16 %v12027_v46  ;;  %v230_v53 = vunpack.c.l.bf16 %v12027_v46 }
 0x204   :  { %8120 = vmatprep.mubr.msk.f32.mxu1 %vm1077_vm2, %v227_v56 }
 0x205   :  { %1937 = vmatmul.mubr.f32.gmra.mxu0 %v198_v8  ;;  %v1385_v14 = vpop.f32.mrf.mxu1 }
 0x206   :  { %8170 = vmatprep.mubr.msk.f32.mxu0 %vm1077_vm2, %v201_v62  ;;  %v12044_v62 = vld [vmem:[%s14968_s1 + $0x1f0] sm:$0xff] }
 0x207   :  { %v1388_v0 = vpop.f32.mrf.mxu1  ;;  %1627 = vmatmul.mubr.f32.gmra.mxu1 %v226_v40  ;;  %v233_v41 = vunpack.c.h.bf16 %v12044_v62 }
 0x208   :  { %8121 = vmatprep.mubr.msk.f32.mxu1 %vm1077_vm2, %v229_v18 }
 0x209   :  { %1942 = vmatmul.mubr.f32.gmra.mxu0 %v200_v23  ;;  %v1390_v8 = vpop.f32.mrf.mxu1 }
 0x20a   :  { %8171 = vmatprep.mubr.msk.f32.mxu0 %vm1077_vm2, %v203_v17  ;;  %v232_v8 = vunpack.c.l.bf16 %v12044_v62  ;;  %v1053_v62 = vld [vmem:[%s14972_s5 + $0x68] sm:$0xff] }
 0x20b   :  { %v1393_v14 = vpop.f32.mrf.mxu1  ;;  %1632 = vmatmul.mubr.f32.gmra.mxu1 %v228_v9 }
 0x20c   :  { %8122 = vmatprep.mubr.msk.f32.mxu1 %vm1077_vm2, %v14983_v20 }
 0x20d   :  { %1947 = vmatmul.mubr.f32.gmra.mxu0 %v202_v59  ;;  %v1395_v23 = vpop.f32.mrf.mxu1 }
 0x20e   :  { %8172 = vmatprep.mubr.msk.f32.mxu0 %vm1077_vm2, %v205_v32 }
 0x20f   :  { %v1398_v17 = vpop.f32.mrf.mxu1  ;;  %1637 = vmatmul.mubr.f32.gmra.mxu1 %v230_v53 }
 0x210   :  { %8123 = vmatprep.mubr.msk.f32.mxu1 %vm1077_vm2, %v233_v41 }
 0x211   :  { %v12067_v20 = vpop.f32.mrf.mxu0  ;;  %1952 = vmatmul.mubr.f32.gmra.mxu0 %v204_v35  ;;  %v1400_v26 = vpop.f32.mrf.mxu1  ;;  %v1042_v35 = vld [vmem:[%s14972_s5 + $0x10] sm:$0xff] }
 0x212   :  { %8173 = vmatprep.mubr.msk.f32.mxu0 %vm1077_vm2, %v207_v36 }
 0x213   :  { %v1715_v59 = vpop.f32.mrf.mxu0  ;;  %v12074_v32 = vpop.f32.mrf.mxu1  ;;  %1642 = vmatmul.mubr.f32.gmra.mxu1 %v232_v8 }
 0x214   :  { %9504 = vmatprep.mubr.msk.f32.mxu1 %vm14997_vm8, %v11960_v10 }
 0x215   :  { %v12080_v23 = vpop.f32.mrf.mxu0  ;;  %1957 = vmatmul.mubr.f32.gmra.mxu0 %v206_v57  ;;  %v1405_v28 = vpop.f32.mrf.mxu1 }
 0x216   :  { %8174 = vmatprep.mubr.msk.f32.mxu0 %vm1077_vm2, %v209_v39 }
 0x217   :  { %v1720_v36 = vpop.f32.mrf.mxu0  ;;  %v12090_v26 = vpop.f32.mrf.mxu1  ;;  %9505 = vmatmul.mubr.msk.f32.vlgmr.msra.gmra.mxu1 %vm14997_vm8, %v11979_v22 }
 0x218   :  { %9507 = vmatprep.mubr.msk.f32.mxu1 %vm14997_vm8, %v1378_v55  ;;  %9526 = vmatpush3.msra.mxu1 %v11707_v24  ;;  %v1040_v24 = vld [vmem:[%s14972_s5] sm:$0xff] }
 0x219   :  { %v12099_v57 = vpop.f32.mrf.mxu0  ;;  %1962 = vmatmul.mubr.f32.gmra.mxu0 %v208_v42  ;;  %v1410_v39 = vpop.f32.mrf.mxu1  ;;  %9527 = vmatprep.subr.mxu1 %v1042_v35 }
 0x21a   :  { %8175 = vmatprep.mubr.msk.f32.mxu0 %vm1077_vm2, %v211_v43  ;;  %9528 = vmatpush3.msra.mxu1 %v1042_v35 }
 0x21b   :  { %v1725_v10 = vpop.f32.mrf.mxu0  ;;  %v12109_v22 = vpop.f32.mrf.mxu1  ;;  %9508 = vmatmul.mubr.msk.f32.gmra.mxu1 %vm14997_vm8, %v1383_v34  ;;  %9529 = vmatprep.subr.mxu1 %v1041_v33 }
 0x21c   :  { %9510 = vmatprep.mubr.msk.f32.mxu1 %vm14997_vm8, %v1388_v0  ;;  %9530 = vmatpush3.msra.mxu1 %v1041_v33  ;;  %v15014_v10 = vunpack.c.h.bf16 %v12027_v46 }
 0x21d   :  { %v12118_v42 = vpop.f32.mrf.mxu0  ;;  %1967 = vmatmul.mubr.f32.gmra.mxu0 %v210_v7  ;;  %v1415_v43 = vpop.f32.mrf.mxu1  ;;  %9531 = vmatprep.subr.mxu1 %v1040_v24 }
 0x21e   :  { %8176 = vmatprep.mubr.msk.f32.mxu0 %vm1077_vm2, %v213_v4  ;;  %9532 = vmatpush3.msra.mxu1 %v1040_v24 }
 0x21f   :  { %v1730_v55 = vpop.f32.mrf.mxu0  ;;  %v12125_v34 = vpop.f32.mrf.mxu1  ;;  %9511 = vmatmul.mubr.msk.f32.gmra.mxu1 %vm14997_vm8, %v1393_v14  ;;  %9583 = vmatprep.subr.mxu1 %v12116_v25 }
 0x220   :  { %9513 = vmatprep.mubr.msk.f32.mxu1 %vm14997_vm8, %v1398_v17 }
 0x221   :  { %v12130_v0 = vpop.f32.mrf.mxu0  ;;  %1972 = vmatmul.mubr.f32.gmra.mxu0 %v212_v61  ;;  %v1420_v6 = vpop.f32.mrf.mxu1 }
 0x222   :  { %8177 = vmatprep.mubr.msk.f32.mxu0 %vm1077_vm2, %v215_v54 }
 0x223   :  { %v1735_v7 = vpop.f32.mrf.mxu0  ;;  %v12137_v4 = vpop.f32.mrf.mxu1 }
 0x224   :  { %v1056_v7 = vld [vmem:[%s14972_s5 + $0x80] sm:$0xff] }
 0x225   :  { %v12139_v59 = vpop.f32.mrf.mxu0  ;;  %1977 = vmatmul.mubr.f32.gmra.mxu0 %v214_v63  ;;  %v1425_v14 = vpop.f32.mrf.mxu1 }
 0x226   :  { %8178 = vmatprep.mubr.msk.f32.mxu0 %vm1077_vm2, %v217_v1 }
 0x227   :  { %v1740_v58 = vpop.f32.mrf.mxu0  ;;  %v12146_v61 = vpop.f32.mrf.mxu1 }
 0x229   :  { %v12148_v17 = vpop.f32.mrf.mxu0  ;;  %1982 = vmatmul.mubr.f32.gmra.mxu0 %v216_v29  ;;  %v1430_v54 = vpop.f32.mrf.mxu1 }
 0x22a   :  { %8179 = vmatprep.mubr.msk.f32.mxu0 %vm1077_vm2, %v219_v13  ;;  %v1067_v54 = vld [vmem:[%s14972_s5 + $0xd8] sm:$0xff] }
 0x22b   :  { %v1745_v11 = vpop.f32.mrf.mxu0  ;;  %v12155_v63 = vpop.f32.mrf.mxu1 }
 0x22d   :  { %v1748_v28 = vpop.f32.mrf.mxu0  ;;  %1987 = vmatmul.mubr.f32.gmra.mxu0 %v218_v60  ;;  %v1435_v1 = vpop.f32.mrf.mxu1 }
 0x22e   :  { %8180 = vmatprep.mubr.msk.f32.mxu0 %vm1077_vm2, %v221_v30  ;;  %9514 = vmatmul.mubr.msk.f32.gmra.mxu1 %vm14997_vm8, %v1748_v28 }
 0x22f   :  { %v1750_v50 = vpop.f32.mrf.mxu0  ;;  %v12163_v29 = vpop.f32.mrf.mxu1 }
 0x231   :  { %v1753_v35 = vpop.f32.mrf.mxu0  ;;  %1992 = vmatmul.mubr.f32.gmra.mxu0 %v220_v51  ;;  %v1440_v13 = vpop.f32.mrf.mxu1 }
 0x232   :  { %8181 = vmatprep.mubr.msk.f32.mxu0 %vm1077_vm2, %v223_v27  ;;  %9516 = vmatprep.mubr.msk.f32.mxu1 %vm14997_vm8, %v1753_v35 }
 0x233   :  { %v1755_v12 = vpop.f32.mrf.mxu0  ;;  %v12171_v60 = vpop.f32.mrf.mxu1 }
 0x234   :  { %v1061_v12 = vld [vmem:[%s14972_s5 + $0xa8] sm:$0xff] }
 0x235   :  { %v1758_v30 = vpop.f32.mrf.mxu0  ;;  %1997 = vmatmul.mubr.f32.gmra.mxu0 %v222_v48  ;;  %v1445_v36 = vpop.f32.mrf.mxu1 }
 0x236   :  { %8182 = vmatprep.mubr.msk.f32.mxu0 %vm1077_vm2, %v225_v45  ;;  %9517 = vmatmul.mubr.msk.f32.gmra.mxu1 %vm14997_vm8, %v1758_v30  ;;  %v1060_v36 = vld [vmem:[%s14972_s5 + $0xa0] sm:$0xff] }
 0x237   :  { %v1760_v37 = vpop.f32.mrf.mxu0  ;;  %v12179_v51 = vpop.f32.mrf.mxu1 }
 0x239   :  { %v1763_v27 = vpop.f32.mrf.mxu0  ;;  %2002 = vmatmul.mubr.f32.gmra.mxu0 %v224_v21  ;;  %v1450_v33 = vpop.f32.mrf.mxu1 }
 0x23a   :  { %8183 = vmatprep.mubr.msk.f32.mxu0 %vm1077_vm2, %v227_v56  ;;  %9519 = vmatprep.mubr.msk.f32.mxu1 %vm14997_vm8, %v1763_v27 }
 0x23b   :  { %v1765_v44 = vpop.f32.mrf.mxu0  ;;  %v12187_v48 = vpop.f32.mrf.mxu1 }
 0x23c   :  { %v1066_v44 = vld [vmem:[%s14972_s5 + $0xd0] sm:$0xff] }
 0x23d   :  { %v1768_v45 = vpop.f32.mrf.mxu0  ;;  %2007 = vmatmul.mubr.f32.gmra.mxu0 %v226_v40  ;;  %v1455_v39 = vpop.f32.mrf.mxu1 }
 0x23e   :  { %8184 = vmatprep.mubr.msk.f32.mxu0 %vm1077_vm2, %v229_v18  ;;  %9520 = vmatmul.mubr.msk.f32.gmra.mxu1 %vm14997_vm8, %v1768_v45 }
 0x23f   :  { %v1770_v2 = vpop.f32.mrf.mxu0  ;;  %v12195_v21 = vpop.f32.mrf.mxu1 }
 0x241   :  { %v1773_v56 = vpop.f32.mrf.mxu0  ;;  %2012 = vmatmul.mubr.f32.gmra.mxu0 %v228_v9  ;;  %v1460_v24 = vpop.f32.mrf.mxu1 }
 0x242   :  { %8185 = vmatprep.mubr.msk.f32.mxu0 %vm1077_vm2, %v15014_v10  ;;  %9522 = vmatprep.mubr.msk.f32.mxu1 %vm14997_vm8, %v1773_v56  ;;  %v1065_v56 = vld [vmem:[%s14972_s5 + $0xc8] sm:$0xff] }
 0x243   :  { %v1775_v52 = vpop.f32.mrf.mxu0  ;;  %v12203_v40 = vpop.f32.mrf.mxu1 }
 0x244   :  { %v1064_v52 = vld [vmem:[%s14972_s5 + $0xc0] sm:$0xff] }
 0x245   :  { %v1778_v18 = vpop.f32.mrf.mxu0  ;;  %2017 = vmatmul.mubr.f32.gmra.mxu0 %v230_v53  ;;  %v1465_v43 = vpop.f32.mrf.mxu1  ;;  %v1054_v53 = vld [vmem:[%s14972_s5 + $0x70] sm:$0xff] }
 0x246   :  { %9523 = vmatmul.mubr.msk.f32.gmra.mxu1 %vm14997_vm8, %v1778_v18  ;;  %8186 = vmatprep.mubr.msk.f32.mxu0 %vm1077_vm2, %v233_v41  ;;  %v12345_v43 = vld [vmem:[%s14972_s5 + $0x118] sm:$0xff]  ;;  %vm10537_vm2 = vmmov 0  }
 0x247   :  { %v1780_v47 = vpop.f32.mrf.mxu0  ;;  %9533 = vmatprep.mubr.msk.f32.mxu1 %vm14997_vm8, %v11821_v38  ;;  %v12213_v9 = vpop.f32.mrf.mxu1 }
 0x249   :  { %v1783_v55 = vpop.f32.mrf.mxu0  ;;  %2022 = vmatmul.mubr.f32.gmra.mxu0 %v232_v8  ;;  %v1470_v6 = vpop.f32.mrf.mxu1 }
 0x24a   :  { %9534 = vmatmul.mubr.msk.f32.vlgmr.msra.gmra.mxu1 %vm14997_vm8, %v11840_v49  ;;  %9562 = vmatprep.mubr.msk.f32.mxu0 %vm14997_vm8, %v12074_v32 }
 0x24b   :  { %v1785_v46 = vpop.f32.mrf.mxu0  ;;  %9536 = vmatprep.mubr.msk.f32.mxu1 %vm14997_vm8, %v11865_v3  ;;  %v12226_v38 = vpop.f32.mrf.mxu1  ;;  %9584 = vmatpush3.msra.mxu1 %v12116_v25  ;;  %v1058_v3 = vld [vmem:[%s14972_s5 + $0x90] sm:$0xff] }
 0x24c   :  { %9585 = vmatprep.subr.mxu1 %v1054_v53 }
 0x24d   :  { %v1788_v41 = vpop.f32.mrf.mxu0  ;;  %9563 = vmatmul.mubr.msk.f32.vlgmr.msra.gmra.mxu0 %vm14997_vm8, %v12090_v26  ;;  %v1475_v49 = vpop.f32.mrf.mxu1  ;;  %9586 = vmatpush3.msra.mxu1 %v1054_v53 }
 0x24e   :  { %9537 = vmatmul.mubr.msk.f32.gmra.mxu1 %vm14997_vm8, %v11884_v16  ;;  %9565 = vmatprep.mubr.msk.f32.mxu0 %vm14997_vm8, %v12109_v22  ;;  %v1052_v16 = vld [vmem:[%s14972_s5 + $0x60] sm:$0xff] }
 0x24f   :  { %v1790_v8 = vpop.f32.mrf.mxu0  ;;  %9539 = vmatprep.mubr.msk.f32.mxu1 %vm14997_vm8, %v11903_v19  ;;  %v12243_v32 = vpop.f32.mrf.mxu1  ;;  %9587 = vmatprep.subr.mxu1 %v1053_v62 }
 0x250   :  { %9613 = vmatpush3.msra.mxu0 %v11852_v15  ;;  %9588 = vmatpush3.msra.mxu1 %v1053_v62  ;;  %v1057_v15 = vld [vmem:[%s14972_s5 + $0x88] sm:$0xff] }
 0x251   :  { %v1793_v26 = vpop.f32.mrf.mxu0  ;;  %9566 = vmatmul.mubr.msk.f32.gmra.mxu0 %vm14997_vm8, %v12125_v34  ;;  %v1480_v22 = vpop.f32.mrf.mxu1  ;;  %9614 = vmatprep.subr.mxu0 %v1058_v3 }
 0x252   :  { %9540 = vmatmul.mubr.msk.f32.gmra.mxu1 %vm14997_vm8, %v11922_v5  ;;  %9568 = vmatprep.mubr.msk.f32.mxu0 %vm14997_vm8, %v12137_v4  ;;  %v1063_v4 = vld [vmem:[%s14972_s5 + $0xb8] sm:$0xff]  ;;  %v1069_v22 = vld [vmem:[%s14972_s5 + $0xe8] sm:$0xff] }
 0x253   :  { %v1795_v19 = vpop.f32.mrf.mxu0  ;;  %9542 = vmatprep.mubr.msk.f32.mxu1 %vm14997_vm8, %v11941_v31  ;;  %v1483_v25 = vpop.f32.mrf.mxu1  ;;  %9589 = vmatprep.subr.mxu1 %v1052_v16 }
 0x254   :  { %9615 = vmatpush3.msra.mxu0 %v1058_v3  ;;  %9590 = vmatpush3.msra.mxu1 %v1052_v16 }
 0x255   :  { %v1798_v34 = vpop.f32.mrf.mxu0  ;;  %9569 = vmatmul.mubr.msk.f32.gmra.mxu0 %vm14997_vm8, %v12146_v61  ;;  %v1485_v5 = vpop.f32.mrf.mxu1  ;;  %9616 = vmatprep.subr.mxu0 %v1057_v15 }
 0x256   :  { %9543 = vmatmul.mubr.msk.f32.gmra.mxu1 %vm14997_vm8, %v12067_v20  ;;  %9571 = vmatprep.mubr.msk.f32.mxu0 %vm14997_vm8, %v12155_v63 }
 0x257   :  { %v1800_v31 = vpop.f32.mrf.mxu0  ;;  %9545 = vmatprep.mubr.msk.f32.mxu1 %vm14997_vm8, %v12080_v23  ;;  %v1488_v14 = vpop.f32.mrf.mxu1  ;;  %9617 = vmatpush3.msra.mxu0 %v1057_v15 }
 0x258   :  { %9618 = vmatprep.subr.mxu0 %v1056_v7  ;;  %9641 = vmatprep.subr.mxu1 %v1063_v4 }
 0x259   :  { %v1803_v58 = vpop.f32.mrf.mxu0  ;;  %9572 = vmatmul.mubr.msk.f32.gmra.mxu0 %vm14997_vm8, %v1783_v55  ;;  %v1490_v61 = vpop.f32.mrf.mxu1 }
 0x25a   :  { %9546 = vmatmul.mubr.msk.f32.gmra.mxu1 %vm14997_vm8, %v12099_v57  ;;  %9574 = vmatprep.mubr.msk.f32.mxu0 %vm14997_vm8, %v1788_v41 }
 0x25b   :  { %v1805_v20 = vpop.f32.mrf.mxu0  ;;  %9548 = vmatprep.mubr.msk.f32.mxu1 %vm14997_vm8, %v12118_v42  ;;  %9619 = vmatpush3.msra.mxu0 %v1056_v7  ;;  %v1493_v23 = vpop.f32.mrf.mxu1 }
 0x25c   :  { %9670 = vmatprep.subr.mxu0 %v1067_v54 }
 0x25d   :  { %v1808_v11 = vpop.f32.mrf.mxu0  ;;  %9575 = vmatmul.mubr.msk.f32.gmra.mxu0 %vm14997_vm8, %v1793_v26  ;;  %v1495_v63 = vpop.f32.mrf.mxu1 }
 0x25e   :  { %9549 = vmatmul.mubr.msk.f32.gmra.mxu1 %vm14997_vm8, %v12130_v0  ;;  %9577 = vmatprep.mubr.msk.f32.mxu0 %vm14997_vm8, %v1798_v34 }
 0x25f   :  { %v1810_v28 = vpop.f32.mrf.mxu0  ;;  %9551 = vmatprep.mubr.msk.f32.mxu1 %vm14997_vm8, %v12139_v59  ;;  %v1498_v57 = vpop.f32.mrf.mxu1  ;;  %v1062_v59 = vld [vmem:[%s14972_s5 + $0xb0] sm:$0xff] }
 0x261   :  { %v1813_v1 = vpop.f32.mrf.mxu0  ;;  %9578 = vmatmul.mubr.msk.f32.gmra.mxu0 %vm14997_vm8, %v1803_v58  ;;  %v1500_v42 = vpop.f32.mrf.mxu1  ;;  %v15015_v58 = vmov 0.0  }
 0x262   :  { %9552 = vmatmul.mubr.msk.f32.gmra.mxu1 %vm14997_vm8, %v12148_v17  ;;  %9580 = vmatprep.mubr.msk.f32.mxu0 %vm14997_vm8, %v1808_v11 }
 0x263   :  { %v1815_v50 = vpop.f32.mrf.mxu0  ;;  %9591 = vmatprep.mubr.msk.f32.mxu1 %vm14997_vm8, %v12163_v29  ;;  %v1503_v0 = vpop.f32.mrf.mxu1 }
 0x265   :  { %v1818_v35 = vpop.f32.mrf.mxu0  ;;  %9581 = vmatmul.mubr.msk.f32.gmra.mxu0 %vm14997_vm8, %v1813_v1  ;;  %v1505_v13 = vpop.f32.mrf.mxu1 }
 0x266   :  { %9592 = vmatmul.mubr.msk.f32.vlgmr.msra.gmra.mxu1 %vm14997_vm8, %v12171_v60  ;;  %9620 = vmatprep.mubr.msk.f32.mxu0 %vm14997_vm8, %v12226_v38 }
 0x267   :  { %v1820_v17 = vpop.f32.mrf.mxu0  ;;  %9594 = vmatprep.mubr.msk.f32.mxu1 %vm14997_vm8, %v12179_v51  ;;  %v12305_v29 = vpop.f32.mrf.mxu1  ;;  %9642 = vmatpush3.msra.mxu1 %v1063_v4 }
 0x268   :  { %9643 = vmatprep.subr.mxu1 %v1062_v59 }
 0x269   :  { %v1823_v30 = vpop.f32.mrf.mxu0  ;;  %9621 = vmatmul.mubr.msk.f32.vlgmr.msra.gmra.mxu0 %vm14997_vm8, %v12243_v32  ;;  %v1510_v60 = vpop.f32.mrf.mxu1  ;;  %9644 = vmatpush3.msra.mxu1 %v1062_v59  ;;  %v1070_v32 = vld [vmem:[%s14972_s5 + $0xf0] sm:$0xff] }
 0x26a   :  { %9595 = vmatmul.mubr.msk.f32.gmra.mxu1 %vm14997_vm8, %v12187_v48  ;;  %9623 = vmatprep.mubr.msk.f32.mxu0 %vm14997_vm8, %v1483_v25  ;;  %v1071_v48 = vld [vmem:[%s14972_s5 + $0xf8] sm:$0xff]  ;;  %v1068_v25 = vld [vmem:[%s14972_s5 + $0xe0] sm:$0xff] }
 0x26b   :  { %v1825_v37 = vpop.f32.mrf.mxu0  ;;  %9597 = vmatprep.mubr.msk.f32.mxu1 %vm14997_vm8, %v12195_v21  ;;  %v1513_v51 = vpop.f32.mrf.mxu1  ;;  %9645 = vmatprep.subr.mxu1 %v1061_v12 }
 0x26c   :  { %9646 = vmatpush3.msra.mxu1 %v1061_v12  ;;  %9671 = vmatpush3.msra.mxu0 %v1067_v54  ;;  %v1073_v37 = vld [vmem:[%s14972_s5 + $0x108] sm:$0xff] }
 0x26d   :  { %v1828_v27 = vpop.f32.mrf.mxu0  ;;  %9624 = vmatmul.mubr.msk.f32.gmra.mxu0 %vm14997_vm8, %v1488_v14  ;;  %v1515_v33 = vpop.f32.mrf.mxu1  ;;  %9647 = vmatprep.subr.mxu1 %v1060_v36 }
 0x26e   :  { %9598 = vmatmul.mubr.msk.f32.gmra.mxu1 %vm14997_vm8, %v12203_v40  ;;  %9626 = vmatprep.mubr.msk.f32.mxu0 %vm14997_vm8, %v1493_v23  ;;  %v1072_v33 = vld [vmem:[%s14972_s5 + $0x100] sm:$0xff] }
 0x26f   :  { %v1830_v45 = vpop.f32.mrf.mxu0  ;;  %9600 = vmatprep.mubr.msk.f32.mxu1 %vm14997_vm8, %v12213_v9  ;;  %v1518_v39 = vpop.f32.mrf.mxu1  ;;  %9648 = vmatpush3.msra.mxu1 %v1060_v36 }
 0x270   :  { %9672 = vmatprep.subr.mxu0 %v1066_v44  ;;  %9699 = vmatprep.subr.mxu1 %v1071_v48 }
 0x271   :  { %v1833_v2 = vpop.f32.mrf.mxu0  ;;  %9627 = vmatmul.mubr.msk.f32.gmra.mxu0 %vm14997_vm8, %v1498_v57  ;;  %v1520_v21 = vpop.f32.mrf.mxu1 }
 0x272   :  { %9601 = vmatmul.mubr.msk.f32.gmra.mxu1 %vm14997_vm8, %v1818_v35  ;;  %9629 = vmatprep.mubr.msk.f32.mxu0 %vm14997_vm8, %v1503_v0 }
 0x273   :  { %v1835_v24 = vpop.f32.mrf.mxu0  ;;  %9603 = vmatprep.mubr.msk.f32.mxu1 %vm14997_vm8, %v1823_v30  ;;  %v1523_v10 = vpop.f32.mrf.mxu1  ;;  %9673 = vmatpush3.msra.mxu0 %v1066_v44  ;;  %v1074_v30 = vld [vmem:[%s14972_s5 + $0x110] sm:$0xff] }
 0x274   :  { %9674 = vmatprep.subr.mxu0 %v1065_v56 }
 0x275   :  { %v1838_v40 = vpop.f32.mrf.mxu0  ;;  %v1525_v18 = vpop.f32.mrf.mxu1  ;;  %9675 = vmatpush3.msra.mxu0 %v1065_v56 }
 0x276   :  { %9604 = vmatmul.mubr.msk.f32.gmra.mxu1 %vm14997_vm8, %v1828_v27  ;;  %9676 = vmatprep.subr.mxu0 %v1064_v52 }
 0x277   :  { %v1840_v47 = vpop.f32.mrf.mxu0  ;;  %9606 = vmatprep.mubr.msk.f32.mxu1 %vm14997_vm8, %v1833_v2  ;;  %v1528_v9 = vpop.f32.mrf.mxu1  ;;  %9677 = vmatpush3.msra.mxu0 %v1064_v52 }
 0x278   :  { %9728 = vmatprep.subr.mxu0 %v12345_v43 }
 0x279   :  { %v1843_v55 = vpop.f32.mrf.mxu0  ;;  %v1530_v6 = vpop.f32.mrf.mxu1 }
 0x27a   :  { %9607 = vmatmul.mubr.msk.f32.gmra.mxu1 %vm14997_vm8, %v1838_v40 }
 0x27b   :  { %v1845_v53 = vpop.f32.mrf.mxu0  ;;  %9609 = vmatprep.mubr.msk.f32.mxu1 %vm14997_vm8, %v1843_v55  ;;  %v1533_v46 = vpop.f32.mrf.mxu1 }
 0x27d   :  { %v1848_v38 = vpop.f32.mrf.mxu0  ;;  %v1535_v62 = vpop.f32.mrf.mxu1 }
 0x27e   :  { %9610 = vmatmul.mubr.msk.f32.gmra.mxu1 %vm14997_vm8, %v1848_v38 }
 0x27f   :  { %v1850_v41 = vpop.f32.mrf.mxu0  ;;  %9649 = vmatprep.mubr.msk.f32.mxu1 %vm14997_vm8, %v12305_v29  ;;  %v1538_v49 = vpop.f32.mrf.mxu1 }
 0x281   :  { %v1853_v3 = vpop.f32.mrf.mxu0  ;;  %v1540_v8 = vpop.f32.mrf.mxu1 }
 0x282   :  { %9630 = vmatmul.mubr.msk.f32.gmra.mxu0 %vm14997_vm8, %v1853_v3  ;;  %9650 = vmatmul.mubr.msk.f32.vlgmr.msra.gmra.mxu1 %vm14997_vm8, %v1513_v51 }
 0x283   :  { %v1855_v16 = vpop.f32.mrf.mxu0  ;;  %9652 = vmatprep.mubr.msk.f32.mxu1 %vm14997_vm8, %v1518_v39  ;;  %v1543_v26 = vpop.f32.mrf.mxu1  ;;  %9700 = vmatpush3.msra.mxu1 %v1071_v48 }
 0x284   :  { %9701 = vmatprep.subr.mxu1 %v1070_v32 }
 0x285   :  { %v1858_v15 = vpop.f32.mrf.mxu0  ;;  %v1545_v19 = vpop.f32.mrf.mxu1  ;;  %9702 = vmatpush3.msra.mxu1 %v1070_v32 }
 0x286   :  { %9653 = vmatmul.mubr.msk.f32.gmra.mxu1 %vm14997_vm8, %v1523_v10  ;;  %9632 = vmatprep.mubr.msk.f32.mxu0 %vm14997_vm8, %v1858_v15 }
 0x287   :  { %v1860_v34 = vpop.f32.mrf.mxu0  ;;  %9655 = vmatprep.mubr.msk.f32.mxu1 %vm14997_vm8, %v1528_v9  ;;  %v1548_v5 = vpop.f32.mrf.mxu1  ;;  %9703 = vmatprep.subr.mxu1 %v1069_v22 }
 0x288   :  { %9704 = vmatpush3.msra.mxu1 %v1069_v22 }
 0x289   :  { %v1863_v7 = vpop.f32.mrf.mxu0  ;;  %v1550_v4 = vpop.f32.mrf.mxu1  ;;  %9705 = vmatprep.subr.mxu1 %v1068_v25 }
 0x28a   :  { %9633 = vmatmul.mubr.msk.f32.gmra.mxu0 %vm14997_vm8, %v1863_v7  ;;  %9656 = vmatmul.mubr.msk.f32.gmra.mxu1 %vm14997_vm8, %v1533_v46 }
 0x28b   :  { %v1865_v31 = vpop.f32.mrf.mxu0  ;;  %v1553_v14 = vpop.f32.mrf.mxu1  ;;  %9658 = vmatprep.mubr.msk.f32.mxu1 %vm14997_vm8, %v1538_v49  ;;  %9706 = vmatpush3.msra.mxu1 %v1068_v25 }
 0x28c   :  { %9757 = vmatprep.subr.mxu1 %v15015_v58 }
 0x28d   :  { %v1868_v61 = vpop.f32.mrf.mxu0  ;;  %v1555_v54 = vpop.f32.mrf.mxu1 }
 0x28e   :  { %9635 = vmatprep.mubr.msk.f32.mxu0 %vm14997_vm8, %v1868_v61 }
 0x28f   :  { %v1870_v20 = vpop.f32.mrf.mxu0  ;;  %v1558_v23 = vpop.f32.mrf.mxu1 }
 0x291   :  { %v1873_v11 = vpop.f32.mrf.mxu0  ;;  %v1560_v63 = vpop.f32.mrf.mxu1 }
 0x292   :  { %9636 = vmatmul.mubr.msk.f32.gmra.mxu0 %vm14997_vm8, %v1873_v11 }
 0x293   :  { %v1875_v28 = vpop.f32.mrf.mxu0  ;;  %v1563_v57 = vpop.f32.mrf.mxu1 }
 0x295   :  { %v1878_v1 = vpop.f32.mrf.mxu0  ;;  %v1565_v42 = vpop.f32.mrf.mxu1 }
 0x296   :  { %9638 = vmatprep.mubr.msk.f32.mxu0 %vm14997_vm8, %v1878_v1 }
 0x297   :  { %v1880_v50 = vpop.f32.mrf.mxu0  ;;  %v1568_v0 = vpop.f32.mrf.mxu1 }
 0x299   :  { %v1883_v35 = vpop.f32.mrf.mxu0  ;;  %v1570_v13 = vpop.f32.mrf.mxu1 }
 0x29a   :  { %9639 = vmatmul.mubr.msk.f32.gmra.mxu0 %vm14997_vm8, %v1883_v35 }
 0x29b   :  { %v1885_v59 = vpop.f32.mrf.mxu0  ;;  %9678 = vmatprep.mubr.msk.f32.mxu0 %vm14997_vm8, %v1543_v26  ;;  %v1573_v17 = vpop.f32.mrf.mxu1 }
 0x29d   :  { %v1888_v29 = vpop.f32.mrf.mxu0  ;;  %v1575_v12 = vpop.f32.mrf.mxu1 }
 0x29e   :  { %9659 = vmatmul.mubr.msk.f32.gmra.mxu1 %vm14997_vm8, %v1888_v29  ;;  %9679 = vmatmul.mubr.msk.f32.vlgmr.msra.gmra.mxu0 %vm14997_vm8, %v1548_v5 }
 0x29f   :  { %v1890_v60 = vpop.f32.mrf.mxu0  ;;  %9681 = vmatprep.mubr.msk.f32.mxu0 %vm14997_vm8, %v1553_v14  ;;  %v1578_v36 = vpop.f32.mrf.mxu1  ;;  %9729 = vmatpush3.msra.mxu0 %v12345_v43 }
 0x2a0   :  { %9730 = vmatprep.subr.mxu0 %v1074_v30 }
 0x2a1   :  { %v1893_v51 = vpop.f32.mrf.mxu0  ;;  %v1580_v27 = vpop.f32.mrf.mxu1  ;;  %9731 = vmatpush3.msra.mxu0 %v1074_v30 }
 0x2a2   :  { %9682 = vmatmul.mubr.msk.f32.gmra.mxu0 %vm14997_vm8, %v1558_v23  ;;  %9661 = vmatprep.mubr.msk.f32.mxu1 %vm14997_vm8, %v1893_v51 }
 0x2a3   :  { %v1895_v44 = vpop.f32.mrf.mxu0  ;;  %9684 = vmatprep.mubr.msk.f32.mxu0 %vm14997_vm8, %v1563_v57  ;;  %v1583_v48 = vpop.f32.mrf.mxu1  ;;  %9732 = vmatprep.subr.mxu0 %v1073_v37 }
 0x2a4   :  { %9733 = vmatpush3.msra.mxu0 %v1073_v37 }
 0x2a5   :  { %v1898_v45 = vpop.f32.mrf.mxu0  ;;  %v1585_v39 = vpop.f32.mrf.mxu1  ;;  %9734 = vmatprep.subr.mxu0 %v1072_v33 }
 0x2a6   :  { %9662 = vmatmul.mubr.msk.f32.gmra.mxu1 %vm14997_vm8, %v1898_v45  ;;  %9685 = vmatmul.mubr.msk.f32.gmra.mxu0 %vm14997_vm8, %v1568_v0 }
 0x2a7   :  { %v1900_v2 = vpop.f32.mrf.mxu0  ;;  %v1588_v21 = vpop.f32.mrf.mxu1  ;;  %9687 = vmatprep.mubr.msk.f32.mxu0 %vm14997_vm8, %v1573_v17  ;;  %9735 = vmatpush3.msra.mxu0 %v1072_v33 }
 0x2a8   :  { %9960 = vmatprep.subr.mxu0 %v15015_v58 }
 0x2a9   :  { %v1903_v56 = vpop.f32.mrf.mxu0  ;;  %v1590_v24 = vpop.f32.mrf.mxu1 }
 0x2aa   :  { %9664 = vmatprep.mubr.msk.f32.mxu1 %vm14997_vm8, %v1903_v56 }
 0x2ab   :  { %v1905_v10 = vpop.f32.mrf.mxu0  ;;  %v1593_v52 = vpop.f32.mrf.mxu1 }
 0x2ad   :  { %v1908_v40 = vpop.f32.mrf.mxu0  ;;  %v1595_v18 = vpop.f32.mrf.mxu1 }
 0x2ae   :  { %9665 = vmatmul.mubr.msk.f32.gmra.mxu1 %vm14997_vm8, %v1908_v40 }
 0x2af   :  { %v1910_v43 = vpop.f32.mrf.mxu0  ;;  %v1598_v47 = vpop.f32.mrf.mxu1 }
 0x2b1   :  { %v1913_v9 = vpop.f32.mrf.mxu0  ;;  %v1600_v55 = vpop.f32.mrf.mxu1 }
 0x2b2   :  { %9667 = vmatprep.mubr.msk.f32.mxu1 %vm14997_vm8, %v1913_v9 }
 0x2b3   :  { %v1915_v6 = vpop.f32.mrf.mxu0  ;;  %v1603_v53 = vpop.f32.mrf.mxu1 }
 0x2b5   :  { %v1918_v46 = vpop.f32.mrf.mxu0  ;;  %v1605_v38 = vpop.f32.mrf.mxu1 }
 0x2b6   :  { %9668 = vmatmul.mubr.msk.f32.gmra.mxu1 %vm14997_vm8, %v1918_v46 }
 0x2b7   :  { %v1920_v62 = vpop.f32.mrf.mxu0  ;;  %9707 = vmatprep.mubr.msk.f32.mxu1 %vm14997_vm8, %v1578_v36  ;;  %v1608_v41 = vpop.f32.mrf.mxu1 }
 0x2b9   :  { %v1923_v49 = vpop.f32.mrf.mxu0  ;;  %v1610_v3 = vpop.f32.mrf.mxu1 }
 0x2ba   :  { %9688 = vmatmul.mubr.msk.f32.gmra.mxu0 %vm14997_vm8, %v1923_v49  ;;  %9708 = vmatmul.mubr.msk.f32.vlgmr.msra.gmra.mxu1 %vm14997_vm8, %v1583_v48 }
 0x2bb   :  { %v1925_v8 = vpop.f32.mrf.mxu0  ;;  %9710 = vmatprep.mubr.msk.f32.mxu1 %vm14997_vm8, %v1588_v21  ;;  %v1613_v32 = vpop.f32.mrf.mxu1 }
 0x2bd   :  { %v1928_v16 = vpop.f32.mrf.mxu0  ;;  %v1615_v26 = vpop.f32.mrf.mxu1 }
 0x2be   :  { %9711 = vmatmul.mubr.msk.f32.gmra.mxu1 %vm14997_vm8, %v1593_v52  ;;  %9690 = vmatprep.mubr.msk.f32.mxu0 %vm14997_vm8, %v1928_v16 }
 0x2bf   :  { %v1930_v22 = vpop.f32.mrf.mxu0  ;;  %9713 = vmatprep.mubr.msk.f32.mxu1 %vm14997_vm8, %v1598_v47  ;;  %v1618_v15 = vpop.f32.mrf.mxu1 }
 0x2c1   :  { %v1933_v19 = vpop.f32.mrf.mxu0  ;;  %v1620_v25 = vpop.f32.mrf.mxu1 }
 0x2c2   :  { %9691 = vmatmul.mubr.msk.f32.gmra.mxu0 %vm14997_vm8, %v1933_v19  ;;  %9714 = vmatmul.mubr.msk.f32.gmra.mxu1 %vm14997_vm8, %v1603_v53 }
 0x2c3   :  { %v1935_v34 = vpop.f32.mrf.mxu0  ;;  %v1623_v5 = vpop.f32.mrf.mxu1  ;;  %9716 = vmatprep.mubr.msk.f32.mxu1 %vm14997_vm8, %v1608_v41 }
 0x2c5   :  { %v1938_v7 = vpop.f32.mrf.mxu0  ;;  %v1625_v4 = vpop.f32.mrf.mxu1 }
 0x2c6   :  { %9693 = vmatprep.mubr.msk.f32.mxu0 %vm14997_vm8, %v1938_v7 }
 0x2c7   :  { %v1940_v31 = vpop.f32.mrf.mxu0  ;;  %v1628_v14 = vpop.f32.mrf.mxu1 }
 0x2c9   :  { %v1943_v61 = vpop.f32.mrf.mxu0  ;;  %v1630_v54 = vpop.f32.mrf.mxu1 }
 0x2ca   :  { %9694 = vmatmul.mubr.msk.f32.gmra.mxu0 %vm14997_vm8, %v1943_v61 }
 0x2cb   :  { %v1945_v20 = vpop.f32.mrf.mxu0  ;;  %v1633_v23 = vpop.f32.mrf.mxu1 }
 0x2cd   :  { %v1948_v11 = vpop.f32.mrf.mxu0  ;;  %v1635_v63 = vpop.f32.mrf.mxu1 }
 0x2ce   :  { %9696 = vmatprep.mubr.msk.f32.mxu0 %vm14997_vm8, %v1948_v11 }
 0x2cf   :  { %v1950_v28 = vpop.f32.mrf.mxu0  ;;  %v1638_v57 = vpop.f32.mrf.mxu1 }
 0x2d1   :  { %v1953_v1 = vpop.f32.mrf.mxu0  ;;  %v1640_v42 = vpop.f32.mrf.mxu1 }
 0x2d2   :  { %9697 = vmatmul.mubr.msk.f32.gmra.mxu0 %vm14997_vm8, %v1953_v1 }
 0x2d3   :  { %v1955_v50 = vpop.f32.mrf.mxu0  ;;  %9736 = vmatprep.mubr.msk.f32.mxu0 %vm14997_vm8, %v1613_v32  ;;  %v1643_v0 = vpop.f32.mrf.mxu1 }
 0x2d5   :  { %v1958_v35 = vpop.f32.mrf.mxu0  ;;  %v1645_v13 = vpop.f32.mrf.mxu1 }
 0x2d6   :  { %9717 = vmatmul.mubr.msk.f32.gmra.mxu1 %vm14997_vm8, %v1958_v35  ;;  %9737 = vmatmul.mubr.msk.f32.vlgmr.msra.gmra.mxu0 %vm14997_vm8, %v1618_v15 }
 0x2d7   :  { %v1960_v59 = vpop.f32.mrf.mxu0  ;;  %9739 = vmatprep.mubr.msk.f32.mxu0 %vm14997_vm8, %v1623_v5  ;;  %v9506_v36 = vpop.f32.mrf.mxu1 }
 0x2d9   :  { %v1963_v17 = vpop.f32.mrf.mxu0  ;;  %v12429_v27 = vpop.f32.mrf.mxu1 }
 0x2da   :  { %9740 = vmatmul.mubr.msk.f32.gmra.mxu0 %vm14997_vm8, %v1628_v14  ;;  %9719 = vmatprep.mubr.msk.f32.mxu1 %vm14997_vm8, %v1963_v17 }
 0x2db   :  { %v1965_v29 = vpop.f32.mrf.mxu0  ;;  %9742 = vmatprep.mubr.msk.f32.mxu0 %vm14997_vm8, %v1633_v23  ;;  %v9509_v44 = vpop.f32.mrf.mxu1 }
 0x2dd   :  { %v1968_v12 = vpop.f32.mrf.mxu0  ;;  %v12432_v39 = vpop.f32.mrf.mxu1 }
 0x2de   :  { %9720 = vmatmul.mubr.msk.f32.gmra.mxu1 %vm14997_vm8, %v1968_v12  ;;  %9743 = vmatmul.mubr.msk.f32.gmra.mxu0 %vm14997_vm8, %v1638_v57 }
 0x2df   :  { %v1970_v30 = vpop.f32.mrf.mxu0  ;;  %9745 = vmatprep.mubr.msk.f32.mxu0 %vm14997_vm8, %v1643_v0  ;;  %v9512_v21 = vpop.f32.mrf.mxu1 }
 0x2e1   :  { %v1973_v60 = vpop.f32.mrf.mxu0  ;;  %v12436_v10 = vpop.f32.mrf.mxu1 }
 0x2e2   :  { %9722 = vmatprep.mubr.msk.f32.mxu1 %vm14997_vm8, %v1973_v60 }
 0x2e3   :  { %v1975_v37 = vpop.f32.mrf.mxu0 }
 0x2e5   :  { %v1978_v51 = vpop.f32.mrf.mxu0 }
 0x2e6   :  { %9723 = vmatmul.mubr.msk.f32.gmra.mxu1 %vm14997_vm8, %v1978_v51 }
 0x2e7   :  { %v1980_v33 = vpop.f32.mrf.mxu0 }
 0x2e9   :  { %v1983_v48 = vpop.f32.mrf.mxu0 }
 0x2ea   :  { %9725 = vmatprep.mubr.msk.f32.mxu1 %vm14997_vm8, %v1983_v48 }
 0x2eb   :  { %v1985_v45 = vpop.f32.mrf.mxu0 }
 0x2ed   :  { %v1988_v2 = vpop.f32.mrf.mxu0 }
 0x2ee   :  { %9726 = vmatmul.mubr.msk.f32.gmra.mxu1 %vm14997_vm8, %v1988_v2  ;;  %v9515_v40 = vpop.f32.mrf.mxu1 }
 0x2ef   :  { %v1990_v56 = vpop.f32.mrf.mxu0  ;;  %9771 = vmatprep.mubr.msk.f32.mxu1 %vm10537_vm2, %v15015_v58 }
 0x2f0   :  { %v12439_v47 = vpop.f32.mrf.mxu1 }
 0x2f1   :  { %v1993_v24 = vpop.f32.mrf.mxu0 }
 0x2f2   :  { %9746 = vmatmul.mubr.msk.f32.gmra.mxu0 %vm14997_vm8, %v1993_v24 }
 0x2f3   :  { %v1995_v52 = vpop.f32.mrf.mxu0 }
 0x2f5   :  { %v1998_v18 = vpop.f32.mrf.mxu0 }
 0x2f6   :  { %9748 = vmatprep.mubr.msk.f32.mxu0 %vm14997_vm8, %v1998_v18  ;;  %v9518_v55 = vpop.f32.mrf.mxu1 }
 0x2f7   :  { %v2000_v43 = vpop.f32.mrf.mxu0 }
 0x2f8   :  { %v12442_v46 = vpop.f32.mrf.mxu1 }
 0x2f9   :  { %v2003_v9 = vpop.f32.mrf.mxu0 }
 0x2fa   :  { %9749 = vmatmul.mubr.msk.f32.gmra.mxu0 %vm14997_vm8, %v2003_v9 }
 0x2fb   :  { %v2005_v6 = vpop.f32.mrf.mxu0 }
 0x2fd   :  { %v2008_v53 = vpop.f32.mrf.mxu0 }
 0x2fe   :  { %9751 = vmatprep.mubr.msk.f32.mxu0 %vm14997_vm8, %v2008_v53  ;;  %v9521_v62 = vpop.f32.mrf.mxu1 }
 0x2ff   :  { %v2010_v38 = vpop.f32.mrf.mxu0 }
 0x300   :  { %v12446_v3 = vpop.f32.mrf.mxu1 }
 0x301   :  { %v2013_v41 = vpop.f32.mrf.mxu0 }
 0x302   :  { %9752 = vmatmul.mubr.msk.f32.gmra.mxu0 %vm14997_vm8, %v2013_v41 }
 0x303   :  { %v2015_v49 = vpop.f32.mrf.mxu0 }
 0x305   :  { %v2018_v8 = vpop.f32.mrf.mxu0 }
 0x306   :  { %v9524_v32 = vpop.f32.mrf.mxu1  ;;  %9754 = vmatprep.mubr.msk.f32.mxu0 %vm14997_vm8, %v2018_v8 }
 0x307   :  { %v2020_v16 = vpop.f32.mrf.mxu0 }
 0x308   :  { %v12449_v26 = vpop.f32.mrf.mxu1 }
 0x309   :  { %v2023_v22 = vpop.f32.mrf.mxu0 }
 0x30a   :  { %v9535_v15 = vpop.f32.mrf.mxu1  ;;  %9755 = vmatmul.mubr.msk.f32.gmra.mxu0 %vm14997_vm8, %v2023_v22 }
 0x30b   :  { %v2319_v19 = vadd.f32 %v9535_v15, %v9506_v36  ;;  %v2025_v25 = vpop.f32.mrf.mxu0  ;;  %9974 = vmatprep.mubr.msk.f32.mxu0 %vm10537_vm2, %v15015_v58 }
 0x30c   :  { %v12452_v34 = vpop.f32.mrf.mxu1 }
 0x30d   :  { %v9564_v5 = vpop.f32.mrf.mxu0 }
 0x30e   :  { %v2560_v7 = vadd.f32 %v9564_v5, %v2319_v19  ;;  %v9538_v4 = vpop.f32.mrf.mxu1 }
 0x30f   :  { %v2329_v31 = vadd.f32 %v9538_v4, %v9509_v44  ;;  %v12454_v14 = vpop.f32.mrf.mxu0 }
 0x310   :  { %v12456_v61 = vpop.f32.mrf.mxu1 }
 0x311   :  { %v9567_v54 = vpop.f32.mrf.mxu0 }
 0x312   :  { %v2562_v20 = vadd.f32 %v9567_v54, %v2329_v31  ;;  %v9541_v23 = vpop.f32.mrf.mxu1 }
 0x313   :  { %v2339_v11 = vadd.f32 %v9541_v23, %v9512_v21  ;;  %v12458_v63 = vpop.f32.mrf.mxu0 }
 0x314   :  { %v12460_v28 = vpop.f32.mrf.mxu1 }
 0x315   :  { %v9570_v57 = vpop.f32.mrf.mxu0 }
 0x316   :  { %v12462_v1 = vadd.f32 %v9570_v57, %v2339_v11  ;;  %v9544_v42 = vpop.f32.mrf.mxu1 }
 0x317   :  { %v2349_v50 = vadd.f32 %v9544_v42, %v9515_v40  ;;  %v12464_v0 = vpop.f32.mrf.mxu0 }
 0x318   :  { %v12466_v35 = vpop.f32.mrf.mxu1 }
 0x319   :  { %v9573_v13 = vpop.f32.mrf.mxu0 }
 0x31a   :  { %v2566_v59 = vadd.f32 %v9573_v13, %v2349_v50  ;;  %v9547_v17 = vpop.f32.mrf.mxu1 }
 0x31b   :  { %v2359_v29 = vadd.f32 %v9547_v17, %v9518_v55  ;;  %v12468_v12 = vpop.f32.mrf.mxu0 }
 0x31c   :  { %v12470_v30 = vpop.f32.mrf.mxu1 }
 0x31d   :  { %v9576_v60 = vpop.f32.mrf.mxu0 }
 0x31e   :  { %v2568_v36 = vadd.f32 %v9576_v60, %v2359_v29  ;;  %v9550_v37 = vpop.f32.mrf.mxu1 }
 0x31f   :  { %v2369_v51 = vadd.f32 %v9550_v37, %v9521_v62  ;;  %v12472_v33 = vpop.f32.mrf.mxu0 }
 0x320   :  { %15016 = vst [vmem:[#allocation5_spill] sm:$0xff] %v12472_v33  ;;  %v12474_v44 = vpop.f32.mrf.mxu1 }
 0x321   :  { %v9579_v48 = vpop.f32.mrf.mxu0 }
 0x322   :  { %v2570_v45 = vadd.f32 %v9579_v48, %v2369_v51  ;;  %v9553_v2 = vpop.f32.mrf.mxu1 }
 0x323   :  { %v2379_v21 = vadd.f32 %v9553_v2, %v9524_v32  ;;  %v12476_v56 = vpop.f32.mrf.mxu0 }
 0x324   :  { %v12478_v24 = vpop.f32.mrf.mxu1 }
 0x325   :  { %v9582_v52 = vpop.f32.mrf.mxu0 }
 0x326   :  { %v12480_v40 = vadd.f32 %v9582_v52, %v2379_v21  ;;  %v9593_v18 = vpop.f32.mrf.mxu1 }
 0x327   :  { %v2751_v43 = vadd.f32 %v9593_v18, %v2560_v7  ;;  %v12482_v9 = vpop.f32.mrf.mxu0 }
 0x328   :  { %15017 = vst [vmem:[#allocation6_spill] sm:$0xff] %v12480_v40  ;;  %v12484_v55 = vpop.f32.mrf.mxu1  ;;  %v2314_v40 = vadd.f32 %v12452_v34, %v12429_v27 }
 0x329   :  { %v9622_v6 = vpop.f32.mrf.mxu0 }
 0x32a   :  { %v12486_v53 = vadd.f32 %v9622_v6, %v2751_v43  ;;  %v9596_v38 = vpop.f32.mrf.mxu1 }
 0x32b   :  { %v2753_v62 = vadd.f32 %v9596_v38, %v2562_v20  ;;  %v12488_v41 = vpop.f32.mrf.mxu0 }
 0x32c   :  { %v12490_v49 = vpop.f32.mrf.mxu1 }
 0x32d   :  { %v9625_v8 = vpop.f32.mrf.mxu0 }
 0x32e   :  { %v12492_v32 = vadd.f32 %v9625_v8, %v2753_v62  ;;  %v12494_v16 = vpop.f32.mrf.mxu1 }
 0x32f   :  { %v12500_v4 = vpop.f32.mrf.mxu0 }
 0x330   :  { %v12496_v22 = vpop.f32.mrf.mxu1 }
 0x331   :  { %v12504_v23 = vpop.f32.mrf.mxu0 }
 0x332   :  { %v9602_v15 = vpop.f32.mrf.mxu1 }
 0x333   :  { %v2757_v19 = vadd.f32 %v9602_v15, %v2566_v59  ;;  %v12506_v11 = vpop.f32.mrf.mxu0 }
 0x334   :  { %v12498_v25 = vpop.f32.mrf.mxu1 }
 0x336   :  { %v9605_v5 = vpop.f32.mrf.mxu1 }
 0x337   :  { %v2759_v7 = vadd.f32 %v9605_v5, %v2568_v36 }
 0x338   :  { %v12502_v31 = vpop.f32.mrf.mxu1 }
 0x339   :  { %15018 = vst [vmem:[#allocation7_spill] sm:$0xff] %v12502_v31 }
 0x33a   :  { %v9608_v54 = vpop.f32.mrf.mxu1 }
 0x33b   :  { %v2761_v20 = vadd.f32 %v9608_v54, %v2570_v45 }
 0x33c   :  { %v12522_v36 = vpop.f32.mrf.mxu1 }
 0x33e   :  { %v12524_v37 = vpop.f32.mrf.mxu1 }
 0x33f   :  { %15023 = vst [vmem:[#allocation12_spill] sm:$0xff] %v12524_v37 }
 0x340   :  { %v12526_v51 = vpop.f32.mrf.mxu1 }
 0x341   :  { %15024 = vst [vmem:[#allocation13_spill] sm:$0xff] %v12526_v51 }
 0x342   :  { %v9631_v57 = vpop.f32.mrf.mxu0  ;;  %v12532_v2 = vpop.f32.mrf.mxu1 }
 0x343   :  { %v12508_v42 = vadd.f32 %v9631_v57, %v2757_v19 }
 0x344   :  { %v12510_v50 = vpop.f32.mrf.mxu0  ;;  %v12536_v52 = vpop.f32.mrf.mxu1 }
 0x345   :  { %15019 = vst [vmem:[#allocation8_spill] sm:$0xff] %v12508_v42 }
 0x346   :  { %v9654_v43 = vpop.f32.mrf.mxu1 }
 0x348   :  { %v3073_v38 = vpop.f32.mrf.mxu1 }
 0x34a   :  { %v9634_v13 = vpop.f32.mrf.mxu0  ;;  %v9657_v8 = vpop.f32.mrf.mxu1 }
 0x34b   :  { %v12516_v59 = vadd.f32 %v9634_v13, %v2759_v7 }
 0x34c   :  { %v12518_v17 = vpop.f32.mrf.mxu0  ;;  %v3083_v19 = vpop.f32.mrf.mxu1 }
 0x34d   :  { %15020 = vst [vmem:[#allocation9_spill] sm:$0xff] %v12516_v59  ;;  %15021 = vst [vmem:[#allocation10_spill] sm:$0xff] %v12518_v17 }
 0x352   :  { %v9637_v29 = vpop.f32.mrf.mxu0 }
 0x353   :  { %v12520_v60 = vadd.f32 %v9637_v29, %v2761_v20 }
 0x354   :  { %v12528_v48 = vpop.f32.mrf.mxu0 }
 0x355   :  { %15022 = vst [vmem:[#allocation11_spill] sm:$0xff] %v12520_v60  ;;  %15025 = vst [vmem:[#allocation14_spill] sm:$0xff] %v12528_v48 }
 0x35a   :  { %v12530_v45 = vpop.f32.mrf.mxu0 }
 0x35b   :  { %15026 = vst [vmem:[#allocation15_spill] sm:$0xff] %v12530_v45 }
 0x35c   :  { %v12534_v21 = vpop.f32.mrf.mxu0 }
 0x35d   :  { %15027 = vst [vmem:[#allocation16_spill] sm:$0xff] %v12534_v21 }
 0x35e   :  { %v12538_v18 = vpop.f32.mrf.mxu0  ;;  %v12544_v5 = vpop.f32.mrf.mxu1 }
 0x35f   :  { %15028 = vst [vmem:[#allocation17_spill] sm:$0xff] %v12544_v5 }
 0x360   :  { %v12540_v6 = vpop.f32.mrf.mxu0  ;;  %v3093_v54 = vpop.f32.mrf.mxu1 }
 0x362   :  { %v9683_v62 = vpop.f32.mrf.mxu0 }
 0x364   :  { %v12542_v15 = vpop.f32.mrf.mxu0 }
 0x366   :  { %v9686_v7 = vpop.f32.mrf.mxu0  ;;  %v12546_v57 = vpop.f32.mrf.mxu1 }
 0x367   :  { %15029 = vst [vmem:[#allocation18_spill] sm:$0xff] %v12546_v57 }
 0x368   :  { %v3274_v20 = vpop.f32.mrf.mxu0  ;;  %v12550_v29 = vpop.f32.mrf.mxu1 }
 0x369   :  { %15031 = vst [vmem:[#allocation20_spill] sm:$0xff] %v12550_v29 }
 0x36e   :  { %v12552_v59 = vpop.f32.mrf.mxu1 }
 0x36f   :  { %15032 = vst [vmem:[#allocation21_spill] sm:$0xff] %v12552_v59 }
 0x370   :  { %v12556_v21 = vpop.f32.mrf.mxu1 }
 0x371   :  { %15034 = vst [vmem:[#allocation23_spill] sm:$0xff] %v12556_v21 }
 0x376   :  { %v12560_v60 = vpop.f32.mrf.mxu1 }
 0x377   :  { %15036 = vst [vmem:[#allocation25_spill] sm:$0xff] %v12560_v60 }
 0x378   :  { %v12564_v45 = vpop.f32.mrf.mxu1 }
 0x379   :  { %15038 = vst [vmem:[#allocation27_spill] sm:$0xff] %v12564_v45 }
 0x37a   :  { %v12548_v13 = vpop.f32.mrf.mxu0  ;;  %v9709_v29 = vpop.f32.mrf.mxu1 }
 0x37b   :  { %15030 = vst [vmem:[#allocation19_spill] sm:$0xff] %v12548_v13 }
 0x37c   :  { %v3284_v42 = vpop.f32.mrf.mxu0  ;;  %v3445_v59 = vpop.f32.mrf.mxu1 }
 0x382   :  { %v12554_v17 = vpop.f32.mrf.mxu0 }
 0x383   :  { %15033 = vst [vmem:[#allocation22_spill] sm:$0xff] %v12554_v17  ;;  %v9712_v17 = vpop.f32.mrf.mxu1 }
 0x384   :  { %v12558_v31 = vpop.f32.mrf.mxu0 }
 0x385   :  { %15035 = vst [vmem:[#allocation24_spill] sm:$0xff] %v12558_v31  ;;  %v2334_v31 = vadd.f32 %v12460_v28, %v12436_v10  ;;  %v3455_v60 = vpop.f32.mrf.mxu1 }
 0x387   :  { %v9715_v21 = vpop.f32.mrf.mxu1 }
 0x38a   :  { %v12562_v5 = vpop.f32.mrf.mxu0 }
 0x38b   :  { %15037 = vst [vmem:[#allocation26_spill] sm:$0xff] %v12562_v5  ;;  %v2324_v5 = vadd.f32 %v12456_v61, %v12432_v39 }
 0x38c   :  { %v12566_v57 = vpop.f32.mrf.mxu0 }
 0x38d   :  { %15039 = vst [vmem:[#allocation28_spill] sm:$0xff] %v12566_v57  ;;  %v2563_v57 = vadd.f32 %v12464_v0, %v2334_v31  ;;  %v2561_v10 = vadd.f32 %v12458_v63, %v2324_v5  ;;  %v3465_v31 = vpop.f32.mrf.mxu1 }
 0x38f   :  { %v2754_v37 = vadd.f32 %v12496_v22, %v2563_v57  ;;  %v2752_v0 = vadd.f32 %v12490_v49, %v2561_v10  ;;  %v3135_v49 = vadd.f32 %v9654_v43, %v12492_v32 }
 0x392   :  { %v12568_v13 = vpop.f32.mrf.mxu0 }
 0x393   :  { %15040 = vst [vmem:[#allocation29_spill] sm:$0xff] %v12568_v13  ;;  %v2344_v13 = vadd.f32 %v12466_v35, %v12439_v47  ;;  %v2945_v47 = vadd.f32 %v12506_v11, %v2754_v37 }
 0x394   :  { %v12570_v48 = vpop.f32.mrf.mxu0 }
 0x395   :  { %15041 = vst [vmem:[#allocation30_spill] sm:$0xff] %v12570_v48  ;;  %v2755_v48 = vadd.f32 %v12494_v16, %v12462_v1  ;;  %v2565_v39 = vadd.f32 %v12468_v12, %v2344_v13  ;;  %v2559_v16 = vadd.f32 %v12454_v14, %v2314_v40  ;;  %v3136_v63 = vadd.f32 %v3083_v19, %v2945_v47 }
 0x396   :  { %v9738_v51 = vpop.f32.mrf.mxu0  ;;  %v12593_v22 = vpop.f32.mrf.mxu1  ;;  %v3326_v14 = vadd.f32 %v9683_v62, %v3135_v49  ;;  %v3133_v19 = vadd.f32 %v12532_v2, %v12486_v53 }
 0x397   :  { %v2946_v61 = vadd.f32 %v12504_v23, %v2755_v48  ;;  %v2756_v1 = vadd.f32 %v12498_v25, %v2565_v39  ;;  %v2750_v12 = vadd.f32 %v12484_v55, %v2559_v16  ;;  %v2943_v23 = vadd.f32 %v12500_v4, %v2752_v0 }
 0x398   :  { %v12572_v33 = vpop.f32.mrf.mxu0  ;;  %v3327_v11 = vadd.f32 %v3274_v20, %v3136_v63  ;;  %v3517_v32 = vadd.f32 %v9712_v17, %v3326_v14 }
 0x399   :  { %v3137_v35 = vadd.f32 %v9657_v8, %v2946_v61  ;;  %v2947_v34 = vadd.f32 %v12510_v50, %v2756_v1  ;;  %v3134_v25 = vadd.f32 %v3073_v38, %v2943_v23  ;;  %v3475_v8 = vpop.f32.mrf.mxu1  ;;  %v2941_v50 = vadd.f32 %v12488_v41, %v2750_v12 }
 0x39a   :  { %v9741_v45 = vpop.f32.mrf.mxu0  ;;  %v3518_v13 = vadd.f32 %v3465_v31, %v3327_v11  ;;  %v3324_v38 = vadd.f32 %v12538_v18, %v3133_v19  ;;  %v15044_v11 = vld [vmem:[#allocation5_spill] sm:$0xff] }
 0x39b   :  { %v3328_v5 = vadd.f32 %v9686_v7, %v3137_v35  ;;  %v3138_v48 = vadd.f32 %v3093_v54, %v2947_v34  ;;  %v3325_v4 = vadd.f32 %v12542_v15, %v3134_v25  ;;  %v3708_v54 = vadd.f32 %v9741_v45, %v3517_v32  ;;  %v15045_v25 = vld [vmem:[#allocation13_spill] sm:$0xff] }
 0x39c   :  { %v3646_v28 = vpop.f32.mrf.mxu0  ;;  %v3515_v17 = vadd.f32 %v9709_v29, %v3324_v38  ;;  %v2364_v45 = vadd.f32 %v12474_v44, %v12446_v3 }
 0x39d   :  { %v3519_v37 = vadd.f32 %v9715_v21, %v3328_v5  ;;  %v3329_v40 = vadd.f32 %v3284_v42, %v3138_v48  ;;  %v3132_v21 = vadd.f32 %v12536_v52, %v2941_v50  ;;  %v12610_v42 = vld [vmem:[%s14973_s6] ss:$0 sm:$0xff]  ;;  %v3516_v62 = vadd.f32 %v3455_v60, %v3325_v4  ;;  %v15049_v50 = vld [vmem:[#allocation21_spill] sm:$0xff] }
 0x39e   :  { %v9744_v27 = vpop.f32.mrf.mxu0  ;;  %v3706_v61 = vadd.f32 %v9738_v51, %v3515_v17  ;;  %v12616_v0 = vpop.f32.mrf.mxu1  ;;  %v3728_v31 = vadd.f32 %v12610_v42, %v3708_v54  ;;  %v2569_v44 = vadd.f32 %v12476_v56, %v2364_v45  ;;  %v12644_v48 = vld [vmem:[%s14969_s2] sm:$0xff]   ;;  %v15058_v45 = vld [vmem:[#allocation27_spill] sm:$0xff] }
 0x39f   :  { %v3710_v10 = vadd.f32 %v9744_v27, %v3519_v37  ;;  %v3520_v43 = vadd.f32 %v3475_v8, %v3329_v40  ;;  %v3323_v15 = vadd.f32 %v12540_v6, %v3132_v21  ;;  %v3707_v20 = vadd.f32 %v3646_v28, %v3516_v62  ;;  %v15046_v8 = vld [vmem:[#allocation14_spill] sm:$0xff]  ;;  %v15047_v40 = vld [vmem:[#allocation15_spill] sm:$0xff]  ;;  %v15051_v21 = vld [vmem:[#allocation16_spill] sm:$0xff] }
 0x3a0   :  { %v3656_v57 = vpop.f32.mrf.mxu0  ;;  %v12625_v51 = vpop.f32.mrf.mxu1  ;;  %v3726_v35 = vadd.f32 %v12610_v42, %v3706_v61  ;;  %v3756_v16 = vmul.f32 0.01, %v3728_v31  ;;  %vm3742_vm12 = vcmp.gt.f32.partialorder %v3728_v31, 0.0  ;;  %v2760_v12 = vadd.f32 %v12522_v36, %v2569_v44 }
 0x3a1   :  { %v3709_v7 = vadd.f32 %v3656_v57, %v3518_v13  ;;  %v3730_v53 = vadd.f32 %v12610_v42, %v3710_v10  ;;  %v3514_v18 = vadd.f32 %v3445_v59, %v3323_v15  ;;  %v3727_v29 = vadd.f32 %v12610_v42, %v3707_v20  ;;  %v15048_v10 = vld [vmem:[#allocation11_spill] sm:$0xff]  ;;  %v15053_v15 = vld [vmem:[#allocation25_spill] sm:$0xff]  ;;  %v15054_v20 = vld [vmem:[#allocation26_spill] sm:$0xff] }
 0x3a2   :  { %v2374_v59 = vadd.f32 %v12478_v24, %v12449_v26  ;;  %v3754_v23 = vmul.f32 0.01, %v3726_v35  ;;  %v3770_v49 = vsel %vm3742_vm12, %v3728_v31, %v3756_v16  ;;  %v2951_v36 = vadd.f32 %v15046_v8, %v2760_v12  ;;  %v15056_v31 = vld [vmem:[#allocation9_spill] sm:$0xff] }
 0x3a3   :  { %v3729_v39 = vadd.f32 %v12610_v42, %v3709_v7  ;;  %v3758_v47 = vmul.f32 0.01, %v3730_v53  ;;  %vm3744_vm10 = vcmp.gt.f32.partialorder %v3730_v53, 0.0  ;;  %v3705_v6 = vadd.f32 %v12572_v33, %v3514_v18  ;;  %v15055_v18 = vld [vmem:[#allocation10_spill] sm:$0xff] }
 0x3a4   :  { %v2354_v33 = vadd.f32 %v12470_v30, %v12442_v46  ;;  %v3755_v63 = vmul.f32 0.01, %v3727_v29  ;;  %v2571_v5 = vadd.f32 %v12482_v9, %v2374_v59  ;;  %vm3741_vm13 = vcmp.gt.f32.partialorder %v3727_v29, 0.0  ;;  %v15042_v46 = vld [vmem:[#allocation6_spill] sm:$0xff]  ;;  %v15043_v30 = vld [vmem:[#allocation12_spill] sm:$0xff]  ;;  %v15060_v59 = vld [vmem:[#allocation29_spill] sm:$0xff] }
 0x3a5   :  { %v3757_v1 = vmul.f32 0.01, %v3729_v39  ;;  %vm3743_vm11 = vcmp.gt.f32.partialorder %v3729_v39, 0.0  ;;  %v3772_v3 = vsel %vm3744_vm10, %v3730_v53, %v3758_v47  ;;  %v3725_v26 = vadd.f32 %v12610_v42, %v3705_v6  ;;  %v15052_v53 = vld [vmem:[#allocation23_spill] sm:$0xff]  ;;  %v15057_v47 = vld [vmem:[#allocation18_spill] sm:$0xff] }
 0x3a6   :  { %v9724_v27 = vpop.f32.mrf.mxu1  ;;  %v2763_v56 = vadd.f32 %v15043_v30, %v15042_v46  ;;  %v2567_v37 = vadd.f32 %v15044_v11, %v2354_v33  ;;  %v2762_v9 = vadd.f32 %v15045_v25, %v2571_v5  ;;  %vm3740_vm14 = vcmp.gt.f32.partialorder %v3726_v35, 0.0  ;;  %v15061_v33 = vld [vmem:[#allocation20_spill] sm:$0xff]  ;;  %v15063_v5 = vld [vmem:[#allocation30_spill] sm:$0xff]  ;;  %v15065_v11 = vld [vmem:[#allocation17_spill] sm:$0xff] }
 0x3a7   :  { %v3771_v24 = vsel %vm3743_vm11, %v3729_v39, %v3757_v1  ;;  %v3143_v19 = vadd.f32 %v15049_v50, %v15048_v10  ;;  %v3769_v4 = vsel %vm3741_vm13, %v3727_v29, %v3755_v63  ;;  %v3753_v32 = vmul.f32 0.01, %v3725_v26  ;;  %v3788_v29 = vld [vmem:[%s14974_s7 + $0x38] sm:$0xff] }
 0x3a8   :  { %v3495_v57 = vpop.f32.mrf.mxu1  ;;  %v2954_v13 = vadd.f32 %v15047_v40, %v2763_v56  ;;  %v2953_v38 = vadd.f32 %v15051_v21, %v2762_v9  ;;  %vm3739_vm15 = vcmp.gt.f32.partialorder %v3725_v26, 0.0  ;;  %v8598_v54 = vunpack.c.l.bf16 %v12644_v48  ;;  %v15066_v25 = vld [vmem:[#allocation24_spill] sm:$0xff]  ;;  %v15067_v50 = vld [vmem:[#allocation19_spill] sm:$0xff] }
 0x3a9   :  { %v3334_v39 = vadd.f32 %v15054_v20, %v3143_v19 }
 0x3aa   :  { %v3145_v17 = vadd.f32 %v15053_v15, %v2954_v13  ;;  %v3144_v6 = vadd.f32 %v15058_v45, %v2953_v38 }
 0x3ac   :  { %v3336_v16 = vadd.f32 %v15060_v59, %v3145_v17  ;;  %v3335_v12 = vadd.f32 %v15063_v5, %v3144_v6 }
 0x3b2   :  { %v12602_v55 = vpop.f32.mrf.mxu0 }
 0x3b4   :  { %v3666_v41 = vpop.f32.mrf.mxu0 }
 0x3b5   :  { %v3711_v2 = vadd.f32 %v3666_v41, %v3520_v43  ;;  %v15050_v43 = vld [vmem:[#allocation7_spill] sm:$0xff]  ;;  %v9727_v41 = vpop.f32.mrf.mxu1 }
 0x3b6   :  { %v2758_v7 = vadd.f32 %v15050_v43, %v2567_v37 }
 0x3b7   :  { %v3731_v52 = vadd.f32 %v12610_v42, %v3711_v2  ;;  %v3142_v2 = vadd.f32 %v15052_v53, %v2951_v36  ;;  %v3505_v46 = vpop.f32.mrf.mxu1 }
 0x3b8   :  { %v2949_v61 = vadd.f32 %v15055_v18, %v2758_v7  ;;  %v3526_v40 = vadd.f32 %v3505_v46, %v3335_v12  ;;  %v8725_v12 = vld [vmem:[%s14969_s2 + $0x30] sm:$0xff]  }
 0x3b9   :  { %vm3745_vm9 = vcmp.gt.f32.partialorder %v3731_v52, 0.0  ;;  %v3759_v60 = vmul.f32 0.01, %v3731_v52  ;;  %v3787_v46 = vld [vmem:[%s14974_s7 + $0x30] sm:$0xff] }
 0x3ba   :  { %v12632_v34 = vpop.f32.mrf.mxu0  ;;  %v3140_v44 = vadd.f32 %v15061_v33, %v2949_v61 }
 0x3bb   :  { %v3773_v28 = vsel %vm3745_vm9, %v3731_v52, %v3759_v60  ;;  %v3768_v52 = vsel %vm3740_vm14, %v3726_v35, %v3754_v23  ;;  %v3141_v60 = vadd.f32 %v15057_v47, %v15056_v31  ;;  %v3767_v35 = vsel %vm3739_vm15, %v3725_v26, %v3753_v32  ;;  %v15064_v26 = vld [vmem:[#allocation8_spill] sm:$0xff] }
 0x3bc   :  { %9758 = vmatpush3.msra.mxu1 %v3773_v28  ;;  %v12649_v14 = vpop.f32.mrf.mxu0  ;;  %v15059_v28 = vld [vmem:[#allocation28_spill] sm:$0xff]  ;;  %v3527_v23 = vadd.f32 %v9727_v41, %v3336_v16  ;;  %v3139_v37 = vadd.f32 %v15065_v11, %v15064_v26  ;;  %v3331_v9 = vadd.f32 %v15066_v25, %v3140_v44  ;;  %v8728_v25 = vld [vmem:[%s14969_s2 + $0x48] sm:$0xff]  }
 0x3bd   :  { %9759 = vmatprep.subr.mxu1 %v15015_v58  ;;  %v3333_v1 = vadd.f32 %v15059_v28, %v3142_v2  ;;  %v3784_v16 = vld [vmem:[%s14974_s7 + $0x18] sm:$0xff]  ;;  %v8723_v44 = vld [vmem:[%s14969_s2 + $0x20] sm:$0xff]  }
 0x3be   :  { %9760 = vmatpush3.msra.mxu1 %v3772_v3  ;;  %v3525_v3 = vadd.f32 %v9724_v27, %v3334_v39  ;;  %v8599_v27 = vunpack.c.h.bf16 %v12644_v48  ;;  %v3330_v19 = vadd.f32 %v15067_v50, %v3139_v37  ;;  %v8615_v48 = vunpack.c.h.bf16 %v8723_v44  ;;  %v8727_v26 = vld [vmem:[%s14969_s2 + $0x40] sm:$0xff]  }
 0x3bf   :  { %9761 = vmatprep.subr.mxu1 %v15015_v58  ;;  %v3524_v56 = vadd.f32 %v3495_v57, %v3333_v1  ;;  %v12691_v57 = vld [vmem:[%s14969_s2 + $0x8] sm:$0xff]   ;;  %v8722_v1 = vld [vmem:[%s14969_s2 + $0x18] sm:$0xff]   ;;  %v8630_v11 = vunpack.c.l.bf16 %v8727_v26  ;;  %v8631_v37 = vunpack.c.h.bf16 %v8727_v26 }
 0x3c0   :  { %9762 = vmatpush3.msra.mxu1 %v3771_v24  ;;  %v15062_v24 = vld [vmem:[#allocation22_spill] sm:$0xff]  ;;  %v8602_v38 = vunpack.c.l.bf16 %v12691_v57  ;;  %v3521_v41 = vadd.f32 %v12593_v22, %v3330_v19  ;;  %v8603_v17 = vunpack.c.h.bf16 %v12691_v57  ;;  %v8611_v33 = vunpack.c.h.bf16 %v8722_v1 }
 0x3c1   :  { %9763 = vmatprep.subr.mxu1 %v15015_v58  ;;  %v3332_v63 = vadd.f32 %v15062_v24, %v3141_v60  ;;  %v8724_v24 = vld [vmem:[%s14969_s2 + $0x28] sm:$0xff]   ;;  %v8729_v57 = vld [vmem:[%s14969_s2 + $0x50] sm:$0xff]  }
 0x3c2   :  { %9764 = vmatpush3.msra.mxu1 %v3770_v49  ;;  %v9753_v62 = vpop.f32.mrf.mxu0  ;;  %v3712_v2 = vadd.f32 %v12602_v55, %v3521_v41  ;;  %v12719_v55 = vld [vmem:[%s14969_s2 + $0x10] sm:$0xff]   ;;  %v8619_v5 = vunpack.c.h.bf16 %v8724_v24 }
 0x3c3   :  { %9765 = vmatprep.subr.mxu1 %v15015_v58  ;;  %v3716_v49 = vadd.f32 %v9753_v62, %v3525_v3  ;;  %v3523_v8 = vadd.f32 %v12616_v0, %v3332_v63  ;;  %v8606_v60 = vunpack.c.l.bf16 %v12719_v55  ;;  %v8607_v28 = vunpack.c.h.bf16 %v12719_v55  ;;  %v8733_v41 = vld [vmem:[%s14969_s2 + $0x70] sm:$0xff]   ;;  %v3782_v55 = vld [vmem:[%s14974_s7 + $0x8] sm:$0xff] }
 0x3c4   :  { %9766 = vmatpush3.msra.mxu1 %v3769_v4  ;;  %v3686_v30 = vpop.f32.mrf.mxu0  ;;  %v3522_v4 = vadd.f32 %v12625_v51, %v3331_v9  ;;  %v3732_v61 = vadd.f32 %v12610_v42, %v3712_v2  ;;  %v8618_v63 = vunpack.c.l.bf16 %v8724_v24  ;;  %v8634_v9 = vunpack.c.l.bf16 %v8728_v25 }
 0x3c5   :  { %9767 = vmatprep.subr.mxu1 %v15015_v58  ;;  %v3715_v13 = vadd.f32 %v3686_v30, %v3524_v56  ;;  %v3714_v32 = vadd.f32 %v12632_v34, %v3523_v8  ;;  %v3736_v43 = vadd.f32 %v12610_v42, %v3716_v49  ;;  %v8622_v30 = vunpack.c.l.bf16 %v8725_v12  ;;  %v3783_v8 = vld [vmem:[%s14974_s7 + $0x10] sm:$0xff] }
 0x3c6   :  { %9768 = vmatpush3.msra.mxu1 %v3768_v52  ;;  %v3713_v62 = vadd.f32 %v12649_v14, %v3522_v4  ;;  %vm3746_vm9 = vcmp.gt.f32.partialorder %v3732_v61, 0.0  ;;  %v8623_v56 = vunpack.c.h.bf16 %v8725_v12  ;;  %v8731_v4 = vld [vmem:[%s14969_s2 + $0x60] sm:$0xff]  }
 0x3c7   :  { %9769 = vmatprep.subr.mxu1 %v15015_v58  ;;  %v3735_v51 = vadd.f32 %v12610_v42, %v3715_v13  ;;  %v3734_v15 = vadd.f32 %v12610_v42, %v3714_v32  ;;  %v3764_v20 = vmul.f32 0.01, %v3736_v43  ;;  %vm3750_vm4 = vcmp.gt.f32.partialorder %v3736_v43, 0.0 }
 0x3c8   :  { %9770 = vmatpush3.msra.mxu1 %v3767_v35  ;;  %v3733_v39 = vadd.f32 %v12610_v42, %v3713_v62  ;;  %v8610_v35 = vunpack.c.l.bf16 %v8722_v1  ;;  %v8639_v13 = vunpack.c.h.bf16 %v8729_v57  ;;  %v8646_v32 = vunpack.c.l.bf16 %v8731_v4 }
 0x3c9   :  { %9772 = vmatmul.mubr.msk.f32.vlgmr.msra.gmra.mxu1 %vm3818_vm0, %v8598_v54  ;;  %10163 = vmatprep.subr.mxu1 %v3788_v29  ;;  %v3763_v18 = vmul.f32 0.01, %v3735_v51  ;;  %vm3749_vm5 = vcmp.gt.f32.partialorder %v3735_v51, 0.0  ;;  %v3762_v31 = vmul.f32 0.01, %v3734_v15  ;;  %v3778_v47 = vsel %vm3750_vm4, %v3736_v43, %v3764_v20  ;;  %v8732_v43 = vld [vmem:[%s14969_s2 + $0x68] sm:$0xff]  }
 0x3ca   :  { %v9756_v36 = vpop.f32.mrf.mxu0  ;;  %9774 = vmatprep.mubr.msk.f32.mxu1 %vm10537_vm2, %v15015_v58  ;;  %10164 = vmatpush3.msra.mxu1 %v3788_v29  ;;  %vm3748_vm6 = vcmp.gt.f32.partialorder %v3734_v15, 0.0  ;;  %v3761_v6 = vmul.f32 0.01, %v3733_v39  ;;  %vm3747_vm7 = vcmp.gt.f32.partialorder %v3733_v39, 0.0  ;;  %v8654_v62 = vunpack.c.l.bf16 %v8733_v41 }
 0x3cb   :  { %v3718_v10 = vadd.f32 %v9756_v36, %v3527_v23  ;;  %v3777_v45 = vsel %vm3749_vm5, %v3735_v51, %v3763_v18  ;;  %v3776_v29 = vsel %vm3748_vm6, %v3734_v15, %v3762_v31  ;;  %10165 = vmatprep.subr.mxu1 %v3787_v46  ;;  %v8726_v23 = vld [vmem:[%s14969_s2 + $0x38] sm:$0xff]   ;;  %v8635_v36 = vunpack.c.h.bf16 %v8728_v25  ;;  %v8735_v15 = vld [vmem:[%s14969_s2 + $0x80] sm:$0xff]   ;;  %v8737_v18 = vld [vmem:[%s14969_s2 + $0x90] sm:$0xff]  }
 0x3cc   :  { %v3696_v0 = vpop.f32.mrf.mxu0  ;;  %v3775_v59 = vsel %vm3747_vm7, %v3733_v39, %v3761_v6  ;;  %10166 = vmatpush3.msra.mxu1 %v3787_v46  ;;  %v8626_v49 = vunpack.c.l.bf16 %v8726_v23  ;;  %v8655_v51 = vunpack.c.h.bf16 %v8733_v41  ;;  %v8662_v20 = vunpack.c.l.bf16 %v8735_v15  ;;  %v13139_v25 = vld [vmem:[%s14969_s2 + $0xd0] sm:$0xff]  }
 0x3cd   :  { %v3738_v7 = vadd.f32 %v12610_v42, %v3718_v10  ;;  %v3717_v21 = vadd.f32 %v3696_v0, %v3526_v40  ;;  %9775 = vmatmul.mubr.msk.f32.gmra.mxu1 %vm3818_vm0, %v8599_v27  ;;  %v8638_v40 = vunpack.c.l.bf16 %v8729_v57  ;;  %v8730_v10 = vld [vmem:[%s14969_s2 + $0x58] sm:$0xff]   ;;  %v8647_v0 = vunpack.c.h.bf16 %v8731_v4 }
 0x3ce   :  { %9777 = vmatprep.mubr.msk.f32.mxu1 %vm10537_vm2, %v15015_v58  ;;  %v8642_v50 = vunpack.c.l.bf16 %v8730_v10  ;;  %v8643_v19 = vunpack.c.h.bf16 %v8730_v10  ;;  %v8671_v31 = vunpack.c.h.bf16 %v8737_v18  ;;  %v13162_v10 = vld [vmem:[%s14969_s2 + $0xd8] sm:$0xff]  }
 0x3cf   :  { %v3766_v34 = vmul.f32 0.01, %v3738_v7  ;;  %v3737_v53 = vadd.f32 %v12610_v42, %v3717_v21  ;;  %vm3752_vm1 = vcmp.gt.f32.partialorder %v3738_v7, 0.0  ;;  %v3760_v42 = vmul.f32 0.01, %v3732_v61 }
 0x3d0   :  { %v8651_v21 = vunpack.c.h.bf16 %v8732_v43  ;;  %v8706_v4 = vunpack.c.l.bf16 %v13162_v10 }
 0x3d1   :  { %9778 = vmatmul.mubr.msk.f32.gmra.mxu1 %vm3818_vm0, %v8602_v38  ;;  %v3780_v22 = vsel %vm3752_vm1, %v3738_v7, %v3766_v34  ;;  %vm3751_vm3 = vcmp.gt.f32.partialorder %v3737_v53, 0.0  ;;  %v3765_v14 = vmul.f32 0.01, %v3737_v53  ;;  %v3774_v3 = vsel %vm3746_vm9, %v3732_v61, %v3760_v42  ;;  %v8734_v34 = vld [vmem:[%s14969_s2 + $0x78] sm:$0xff]  }
 0x3d2   :  { %9961 = vmatpush3.msra.mxu0 %v3780_v22  ;;  %9780 = vmatprep.mubr.msk.f32.mxu1 %vm10537_vm2, %v15015_v58  ;;  %v8650_v7 = vunpack.c.l.bf16 %v8732_v43  ;;  %v8659_v2 = vunpack.c.h.bf16 %v8734_v34  ;;  %v8663_v22 = vunpack.c.h.bf16 %v8735_v15  ;;  %v8670_v61 = vunpack.c.l.bf16 %v8737_v18 }
 0x3d3   :  { %9962 = vmatprep.subr.mxu0 %v15015_v58  ;;  %v3779_v52 = vsel %vm3751_vm3, %v3737_v53, %v3765_v14  ;;  %v8658_v53 = vunpack.c.l.bf16 %v8734_v34  ;;  %v8736_v14 = vld [vmem:[%s14969_s2 + $0x88] sm:$0xff]  }
 0x3d4   :  { %9963 = vmatpush3.msra.mxu0 %v3779_v52  ;;  %v8666_v39 = vunpack.c.l.bf16 %v8736_v14  ;;  %v8667_v52 = vunpack.c.h.bf16 %v8736_v14  ;;  %v13214_v14 = vld [vmem:[%s14969_s2 + $0xe8] sm:$0xff]  }
 0x3d5   :  { %9781 = vmatmul.mubr.msk.f32.gmra.mxu1 %vm3818_vm0, %v8603_v17  ;;  %9964 = vmatprep.subr.mxu0 %v15015_v58 }
 0x3d6   :  { %9965 = vmatpush3.msra.mxu0 %v3778_v47  ;;  %9783 = vmatprep.mubr.msk.f32.mxu1 %vm10537_vm2, %v15015_v58  ;;  %v3781_v47 = vld [vmem:[%s14974_s7] sm:$0xff] }
 0x3d7   :  { %9966 = vmatprep.subr.mxu0 %v15015_v58 }
 0x3d8   :  { %9967 = vmatpush3.msra.mxu0 %v3777_v45  ;;  %v8738_v45 = vld [vmem:[%s14969_s2 + $0x98] sm:$0xff]  }
 0x3d9   :  { %9784 = vmatmul.mubr.msk.f32.gmra.mxu1 %vm3818_vm0, %v8606_v60  ;;  %9968 = vmatprep.subr.mxu0 %v15015_v58  ;;  %v8674_v6 = vunpack.c.l.bf16 %v8738_v45  ;;  %v8675_v42 = vunpack.c.h.bf16 %v8738_v45 }
 0x3da   :  { %9969 = vmatpush3.msra.mxu0 %v3776_v29  ;;  %9786 = vmatprep.mubr.msk.f32.mxu1 %vm10537_vm2, %v15015_v58  ;;  %v8739_v29 = vld [vmem:[%s14969_s2 + $0xa0] sm:$0xff]  }
 0x3db   :  { %9970 = vmatprep.subr.mxu0 %v15015_v58  ;;  %v8679_v1 = vunpack.c.h.bf16 %v8739_v29 }
 0x3dc   :  { %9971 = vmatpush3.msra.mxu0 %v3775_v59  ;;  %v8740_v59 = vld [vmem:[%s14969_s2 + $0xa8] sm:$0xff]  }
 0x3dd   :  { %9787 = vmatmul.mubr.msk.f32.gmra.mxu1 %vm3818_vm0, %v8607_v28  ;;  %9972 = vmatprep.subr.mxu0 %v15015_v58 }
 0x3de   :  { %9973 = vmatpush3.msra.mxu0 %v3774_v3  ;;  %9789 = vmatprep.mubr.msk.f32.mxu1 %vm10537_vm2, %v15015_v58  ;;  %v13054_v3 = vld [vmem:[%s14974_s7 + $0x78] sm:$0xff] }
 0x3df   :  { %9975 = vmatmul.mubr.msk.f32.vlgmr.msra.gmra.mxu0 %vm3818_vm0, %v8598_v54  ;;  %10192 = vmatprep.subr.mxu0 %v3784_v16  ;;  %v8614_v54 = vunpack.c.l.bf16 %v8723_v44 }
 0x3e0   :  { %9977 = vmatprep.mubr.msk.f32.mxu0 %vm10537_vm2, %v15015_v58  ;;  %10193 = vmatpush3.msra.mxu0 %v3784_v16  ;;  %v8682_v16 = vunpack.c.l.bf16 %v8740_v59 }
 0x3e1   :  { %9790 = vmatmul.mubr.msk.f32.gmra.mxu1 %vm3818_vm0, %v8610_v35  ;;  %10194 = vmatprep.subr.mxu0 %v3783_v8 }
 0x3e2   :  { %9792 = vmatprep.mubr.msk.f32.mxu1 %vm10537_vm2, %v15015_v58  ;;  %10195 = vmatpush3.msra.mxu0 %v3783_v8 }
 0x3e3   :  { %9978 = vmatmul.mubr.msk.f32.gmra.mxu0 %vm3818_vm0, %v8599_v27  ;;  %v8627_v27 = vunpack.c.h.bf16 %v8726_v23  ;;  %10196 = vmatprep.subr.mxu0 %v3782_v55 }
 0x3e4   :  { %9980 = vmatprep.mubr.msk.f32.mxu0 %vm10537_vm2, %v15015_v58  ;;  %10197 = vmatpush3.msra.mxu0 %v3782_v55 }
 0x3e5   :  { %9793 = vmatmul.mubr.msk.f32.gmra.mxu1 %vm3818_vm0, %v8611_v33  ;;  %10198 = vmatprep.subr.mxu0 %v3781_v47 }
 0x3e6   :  { %9795 = vmatprep.mubr.msk.f32.mxu1 %vm10537_vm2, %v15015_v58  ;;  %10199 = vmatpush3.msra.mxu0 %v3781_v47 }
 0x3e7   :  { %9981 = vmatmul.mubr.msk.f32.gmra.mxu0 %vm3818_vm0, %v8602_v38  ;;  %v3786_v38 = vld [vmem:[%s14974_s7 + $0x28] sm:$0xff]  ;;  %10250 = vmatprep.subr.mxu0 %v13054_v3 }
 0x3e8   :  { %9983 = vmatprep.mubr.msk.f32.mxu0 %vm10537_vm2, %v15015_v58  ;;  %10167 = vmatprep.subr.mxu1 %v3786_v38 }
 0x3e9   :  { %9796 = vmatmul.mubr.msk.f32.gmra.mxu1 %vm3818_vm0, %v8614_v54 }
 0x3ea   :  { %9798 = vmatprep.mubr.msk.f32.mxu1 %vm10537_vm2, %v15015_v58  ;;  %10168 = vmatpush3.msra.mxu1 %v3786_v38  ;;  %v13187_v38 = vld [vmem:[%s14969_s2 + $0xe0] sm:$0xff]  }
 0x3eb   :  { %9984 = vmatmul.mubr.msk.f32.gmra.mxu0 %vm3818_vm0, %v8603_v17  ;;  %v3785_v17 = vld [vmem:[%s14974_s7 + $0x20] sm:$0xff] }
 0x3ec   :  { %9986 = vmatprep.mubr.msk.f32.mxu0 %vm10537_vm2, %v15015_v58  ;;  %10169 = vmatprep.subr.mxu1 %v3785_v17 }
 0x3ed   :  { %9799 = vmatmul.mubr.msk.f32.gmra.mxu1 %vm3818_vm0, %v8615_v48 }
 0x3ee   :  { %9801 = vmatprep.mubr.msk.f32.mxu1 %vm10537_vm2, %v15015_v58  ;;  %10170 = vmatpush3.msra.mxu1 %v3785_v17 }
 0x3ef   :  { %9987 = vmatmul.mubr.msk.f32.gmra.mxu0 %vm3818_vm0, %v8606_v60  ;;  %v13006_v60 = vld [vmem:[%s14974_s7 + $0x58] sm:$0xff] }
 0x3f0   :  { %9989 = vmatprep.mubr.msk.f32.mxu0 %vm10537_vm2, %v15015_v58  ;;  %10221 = vmatprep.subr.mxu1 %v13006_v60 }
 0x3f1   :  { %9802 = vmatmul.mubr.msk.f32.gmra.mxu1 %vm3818_vm0, %v8618_v63 }
 0x3f2   :  { %9804 = vmatprep.mubr.msk.f32.mxu1 %vm10537_vm2, %v15015_v58 }
 0x3f3   :  { %9990 = vmatmul.mubr.msk.f32.gmra.mxu0 %vm3818_vm0, %v8607_v28  ;;  %v8678_v28 = vunpack.c.l.bf16 %v8739_v29  ;;  %v13237_v29 = vld [vmem:[%s14969_s2 + $0xf0] sm:$0xff]  }
 0x3f4   :  { %9992 = vmatprep.mubr.msk.f32.mxu0 %vm10537_vm2, %v15015_v58 }
 0x3f5   :  { %9805 = vmatmul.mubr.msk.f32.gmra.mxu1 %vm3818_vm0, %v8619_v5 }
 0x3f6   :  { %9807 = vmatprep.mubr.msk.f32.mxu1 %vm10537_vm2, %v15015_v58 }
 0x3f7   :  { %9993 = vmatmul.mubr.msk.f32.gmra.mxu0 %vm3818_vm0, %v8610_v35  ;;  %v8683_v35 = vunpack.c.h.bf16 %v8740_v59 }
 0x3f8   :  { %9995 = vmatprep.mubr.msk.f32.mxu0 %vm10537_vm2, %v15015_v58 }
 0x3f9   :  { %9808 = vmatmul.mubr.msk.f32.gmra.mxu1 %vm3818_vm0, %v8622_v30 }
 0x3fa   :  { %9810 = vmatprep.mubr.msk.f32.mxu1 %vm10537_vm2, %v15015_v58 }
 0x3fb   :  { %9996 = vmatmul.mubr.msk.f32.gmra.mxu0 %vm3818_vm0, %v8611_v33  ;;  %v8741_v33 = vld [vmem:[%s14969_s2 + $0xb0] sm:$0xff]  }
 0x3fc   :  { %9998 = vmatprep.mubr.msk.f32.mxu0 %vm10537_vm2, %v15015_v58  ;;  %v8686_v44 = vunpack.c.l.bf16 %v8741_v33 }
 0x3fd   :  { %9811 = vmatmul.mubr.msk.f32.gmra.mxu1 %vm3818_vm0, %v8623_v56 }
 0x3fe   :  { %9813 = vmatprep.mubr.msk.f32.mxu1 %vm10537_vm2, %v15015_v58 }
 0x3ff   :  { %9999 = vmatmul.mubr.msk.f32.gmra.mxu0 %vm3818_vm0, %v8614_v54  ;;  %v8687_v54 = vunpack.c.h.bf16 %v8741_v33 }
 0x400   :  { %10001 = vmatprep.mubr.msk.f32.mxu0 %vm10537_vm2, %v15015_v58 }
 0x401   :  { %9814 = vmatmul.mubr.msk.f32.gmra.mxu1 %vm3818_vm0, %v8626_v49 }
 0x402   :  { %9816 = vmatprep.mubr.msk.f32.mxu1 %vm10537_vm2, %v15015_v58 }
 0x403   :  { %10002 = vmatmul.mubr.msk.f32.gmra.mxu0 %vm3818_vm0, %v8615_v48  ;;  %v8742_v48 = vld [vmem:[%s14969_s2 + $0xb8] sm:$0xff]  }
 0x404   :  { %10004 = vmatprep.mubr.msk.f32.mxu0 %vm10537_vm2, %v15015_v58  ;;  %v8690_v24 = vunpack.c.l.bf16 %v8742_v48 }
 0x405   :  { %9817 = vmatmul.mubr.msk.f32.gmra.mxu1 %vm3818_vm0, %v8627_v27 }
 0x406   :  { %9819 = vmatprep.mubr.msk.f32.mxu1 %vm10537_vm2, %v15015_v58 }
 0x407   :  { %10005 = vmatmul.mubr.msk.f32.gmra.mxu0 %vm3818_vm0, %v8618_v63  ;;  %v8691_v63 = vunpack.c.h.bf16 %v8742_v48 }
 0x408   :  { %10007 = vmatprep.mubr.msk.f32.mxu0 %vm10537_vm2, %v15015_v58 }
 0x409   :  { %9820 = vmatmul.mubr.msk.f32.gmra.mxu1 %vm3818_vm0, %v8630_v11 }
 0x40a   :  { %9822 = vmatprep.mubr.msk.f32.mxu1 %vm10537_vm2, %v15015_v58 }
 0x40b   :  { %10008 = vmatmul.mubr.msk.f32.gmra.mxu0 %vm3818_vm0, %v8619_v5  ;;  %v13095_v5 = vld [vmem:[%s14969_s2 + $0xc0] sm:$0xff]  }
 0x40c   :  { %10010 = vmatprep.mubr.msk.f32.mxu0 %vm10537_vm2, %v15015_v58  ;;  %v8694_v12 = vunpack.c.l.bf16 %v13095_v5 }
 0x40d   :  { %9823 = vmatmul.mubr.msk.f32.gmra.mxu1 %vm3818_vm0, %v8631_v37 }
 0x40e   :  { %9825 = vmatprep.mubr.msk.f32.mxu1 %vm10537_vm2, %v15015_v58 }
 0x40f   :  { %10011 = vmatmul.mubr.msk.f32.gmra.mxu0 %vm3818_vm0, %v8622_v30  ;;  %v8695_v30 = vunpack.c.h.bf16 %v13095_v5 }
 0x410   :  { %10013 = vmatprep.mubr.msk.f32.mxu0 %vm10537_vm2, %v15015_v58 }
 0x411   :  { %9826 = vmatmul.mubr.msk.f32.gmra.mxu1 %vm3818_vm0, %v8634_v9 }
 0x412   :  { %9828 = vmatprep.mubr.msk.f32.mxu1 %vm10537_vm2, %v15015_v58 }
 0x413   :  { %10014 = vmatmul.mubr.msk.f32.gmra.mxu0 %vm3818_vm0, %v8623_v56  ;;  %v13116_v56 = vld [vmem:[%s14969_s2 + $0xc8] sm:$0xff]  }
 0x414   :  { %10016 = vmatprep.mubr.msk.f32.mxu0 %vm10537_vm2, %v15015_v58 }
 0x415   :  { %9829 = vmatmul.mubr.msk.f32.gmra.mxu1 %vm3818_vm0, %v8635_v36 }
 0x416   :  { %9831 = vmatprep.mubr.msk.f32.mxu1 %vm10537_vm2, %v15015_v58 }
 0x417   :  { %10017 = vmatmul.mubr.msk.f32.gmra.mxu0 %vm3818_vm0, %v8626_v49 }
 0x418   :  { %10019 = vmatprep.mubr.msk.f32.mxu0 %vm10537_vm2, %v15015_v58 }
 0x419   :  { %9832 = vmatmul.mubr.msk.f32.gmra.mxu1 %vm3818_vm0, %v8638_v40 }
 0x41a   :  { %9834 = vmatprep.mubr.msk.f32.mxu1 %vm10537_vm2, %v15015_v58 }
 0x41b   :  { %10020 = vmatmul.mubr.msk.f32.gmra.mxu0 %vm3818_vm0, %v8627_v27  ;;  %v8698_v27 = vunpack.c.l.bf16 %v13116_v56 }
 0x41c   :  { %10022 = vmatprep.mubr.msk.f32.mxu0 %vm10537_vm2, %v15015_v58 }
 0x41d   :  { %9835 = vmatmul.mubr.msk.f32.gmra.mxu1 %vm3818_vm0, %v8639_v13 }
 0x41e   :  { %9837 = vmatprep.mubr.msk.f32.mxu1 %vm10537_vm2, %v15015_v58 }
 0x41f   :  { %10023 = vmatmul.mubr.msk.f32.gmra.mxu0 %vm3818_vm0, %v8630_v11 }
 0x420   :  { %10025 = vmatprep.mubr.msk.f32.mxu0 %vm10537_vm2, %v15015_v58 }
 0x421   :  { %9838 = vmatmul.mubr.msk.f32.gmra.mxu1 %vm3818_vm0, %v8642_v50 }
 0x422   :  { %9840 = vmatprep.mubr.msk.f32.mxu1 %vm10537_vm2, %v15015_v58 }
 0x423   :  { %10026 = vmatmul.mubr.msk.f32.gmra.mxu0 %vm3818_vm0, %v8631_v37  ;;  %v8699_v37 = vunpack.c.h.bf16 %v13116_v56 }
 0x424   :  { %10028 = vmatprep.mubr.msk.f32.mxu0 %vm10537_vm2, %v15015_v58 }
 0x425   :  { %9841 = vmatmul.mubr.msk.f32.gmra.mxu1 %vm3818_vm0, %v8643_v19 }
 0x426   :  { %9843 = vmatprep.mubr.msk.f32.mxu1 %vm10537_vm2, %v15015_v58 }
 0x427   :  { %10029 = vmatmul.mubr.msk.f32.gmra.mxu0 %vm3818_vm0, %v8634_v9 }
 0x428   :  { %10031 = vmatprep.mubr.msk.f32.mxu0 %vm10537_vm2, %v15015_v58 }
 0x429   :  { %9844 = vmatmul.mubr.msk.f32.gmra.mxu1 %vm3818_vm0, %v8646_v32 }
 0x42a   :  { %9846 = vmatprep.mubr.msk.f32.mxu1 %vm10537_vm2, %v15015_v58 }
 0x42b   :  { %10032 = vmatmul.mubr.msk.f32.gmra.mxu0 %vm3818_vm0, %v8635_v36  ;;  %v8702_v36 = vunpack.c.l.bf16 %v13139_v25 }
 0x42c   :  { %10034 = vmatprep.mubr.msk.f32.mxu0 %vm10537_vm2, %v15015_v58 }
 0x42d   :  { %9847 = vmatmul.mubr.msk.f32.gmra.mxu1 %vm3818_vm0, %v8647_v0 }
 0x42e   :  { %9849 = vmatprep.mubr.msk.f32.mxu1 %vm10537_vm2, %v15015_v58 }
 0x42f   :  { %10035 = vmatmul.mubr.msk.f32.gmra.mxu0 %vm3818_vm0, %v8638_v40 }
 0x430   :  { %10037 = vmatprep.mubr.msk.f32.mxu0 %vm10537_vm2, %v15015_v58 }
 0x431   :  { %9850 = vmatmul.mubr.msk.f32.gmra.mxu1 %vm3818_vm0, %v8650_v7 }
 0x432   :  { %9852 = vmatprep.mubr.msk.f32.mxu1 %vm10537_vm2, %v15015_v58 }
 0x433   :  { %10038 = vmatmul.mubr.msk.f32.gmra.mxu0 %vm3818_vm0, %v8639_v13  ;;  %v8703_v13 = vunpack.c.h.bf16 %v13139_v25 }
 0x434   :  { %10040 = vmatprep.mubr.msk.f32.mxu0 %vm10537_vm2, %v15015_v58 }
 0x435   :  { %9853 = vmatmul.mubr.msk.f32.gmra.mxu1 %vm3818_vm0, %v8651_v21 }
 0x436   :  { %9855 = vmatprep.mubr.msk.f32.mxu1 %vm10537_vm2, %v15015_v58 }
 0x437   :  { %10041 = vmatmul.mubr.msk.f32.gmra.mxu0 %vm3818_vm0, %v8642_v50 }
 0x438   :  { %10043 = vmatprep.mubr.msk.f32.mxu0 %vm10537_vm2, %v15015_v58 }
 0x439   :  { %9856 = vmatmul.mubr.msk.f32.gmra.mxu1 %vm3818_vm0, %v8654_v62 }
 0x43a   :  { %9858 = vmatprep.mubr.msk.f32.mxu1 %vm10537_vm2, %v15015_v58 }
 0x43b   :  { %10044 = vmatmul.mubr.msk.f32.gmra.mxu0 %vm3818_vm0, %v8643_v19 }
 0x43c   :  { %10046 = vmatprep.mubr.msk.f32.mxu0 %vm10537_vm2, %v15015_v58 }
 0x43d   :  { %9859 = vmatmul.mubr.msk.f32.gmra.mxu1 %vm3818_vm0, %v8655_v51 }
 0x43e   :  { %9861 = vmatprep.mubr.msk.f32.mxu1 %vm10537_vm2, %v15015_v58 }
 0x43f   :  { %10047 = vmatmul.mubr.msk.f32.gmra.mxu0 %vm3818_vm0, %v8646_v32 }
 0x440   :  { %10049 = vmatprep.mubr.msk.f32.mxu0 %vm10537_vm2, %v15015_v58 }
 0x441   :  { %9862 = vmatmul.mubr.msk.f32.gmra.mxu1 %vm3818_vm0, %v8658_v53 }
 0x442   :  { %9864 = vmatprep.mubr.msk.f32.mxu1 %vm10537_vm2, %v15015_v58 }
 0x443   :  { %10050 = vmatmul.mubr.msk.f32.gmra.mxu0 %vm3818_vm0, %v8647_v0 }
 0x444   :  { %10052 = vmatprep.mubr.msk.f32.mxu0 %vm10537_vm2, %v15015_v58 }
 0x445   :  { %9865 = vmatmul.mubr.msk.f32.gmra.mxu1 %vm3818_vm0, %v8659_v2 }
 0x446   :  { %9867 = vmatprep.mubr.msk.f32.mxu1 %vm10537_vm2, %v15015_v58 }
 0x447   :  { %10053 = vmatmul.mubr.msk.f32.gmra.mxu0 %vm3818_vm0, %v8650_v7 }
 0x448   :  { %10055 = vmatprep.mubr.msk.f32.mxu0 %vm10537_vm2, %v15015_v58 }
 0x449   :  { %9868 = vmatmul.mubr.msk.f32.gmra.mxu1 %vm3818_vm0, %v8662_v20 }
 0x44a   :  { %9870 = vmatprep.mubr.msk.f32.mxu1 %vm10537_vm2, %v15015_v58 }
 0x44b   :  { %10056 = vmatmul.mubr.msk.f32.gmra.mxu0 %vm3818_vm0, %v8651_v21  ;;  %v8707_v21 = vunpack.c.h.bf16 %v13162_v10 }
 0x44c   :  { %10058 = vmatprep.mubr.msk.f32.mxu0 %vm10537_vm2, %v15015_v58 }
 0x44d   :  { %9871 = vmatmul.mubr.msk.f32.gmra.mxu1 %vm3818_vm0, %v8663_v22 }
 0x44e   :  { %9873 = vmatprep.mubr.msk.f32.mxu1 %vm10537_vm2, %v15015_v58 }
 0x44f   :  { %10059 = vmatmul.mubr.msk.f32.gmra.mxu0 %vm3818_vm0, %v8654_v62 }
 0x450   :  { %10061 = vmatprep.mubr.msk.f32.mxu0 %vm10537_vm2, %v15015_v58 }
 0x451   :  { %9874 = vmatmul.mubr.msk.f32.gmra.mxu1 %vm3818_vm0, %v8666_v39 }
 0x452   :  { %9876 = vmatprep.mubr.msk.f32.mxu1 %vm10537_vm2, %v15015_v58 }
 0x453   :  { %10062 = vmatmul.mubr.msk.f32.gmra.mxu0 %vm3818_vm0, %v8655_v51 }
 0x454   :  { %10064 = vmatprep.mubr.msk.f32.mxu0 %vm10537_vm2, %v15015_v58 }
 0x455   :  { %9877 = vmatmul.mubr.msk.f32.gmra.mxu1 %vm3818_vm0, %v8667_v52 }
 0x456   :  { %9879 = vmatprep.mubr.msk.f32.mxu1 %vm10537_vm2, %v15015_v58 }
 0x457   :  { %10065 = vmatmul.mubr.msk.f32.gmra.mxu0 %vm3818_vm0, %v8658_v53  ;;  %v8710_v53 = vunpack.c.l.bf16 %v13187_v38 }
 0x458   :  { %10067 = vmatprep.mubr.msk.f32.mxu0 %vm10537_vm2, %v15015_v58 }
 0x459   :  { %9880 = vmatmul.mubr.msk.f32.gmra.mxu1 %vm3818_vm0, %v8670_v61 }
 0x45a   :  { %9882 = vmatprep.mubr.msk.f32.mxu1 %vm10537_vm2, %v15015_v58 }
 0x45b   :  { %10068 = vmatmul.mubr.msk.f32.gmra.mxu0 %vm3818_vm0, %v8659_v2 }
 0x45c   :  { %10070 = vmatprep.mubr.msk.f32.mxu0 %vm10537_vm2, %v15015_v58 }
 0x45d   :  { %9883 = vmatmul.mubr.msk.f32.gmra.mxu1 %vm3818_vm0, %v8671_v31 }
 0x45e   :  { %9885 = vmatprep.mubr.msk.f32.mxu1 %vm10537_vm2, %v15015_v58 }
 0x45f   :  { %10071 = vmatmul.mubr.msk.f32.gmra.mxu0 %vm3818_vm0, %v8662_v20 }
 0x460   :  { %10073 = vmatprep.mubr.msk.f32.mxu0 %vm10537_vm2, %v15015_v58 }
 0x461   :  { %9886 = vmatmul.mubr.msk.f32.gmra.mxu1 %vm3818_vm0, %v8674_v6 }
 0x462   :  { %9888 = vmatprep.mubr.msk.f32.mxu1 %vm10537_vm2, %v15015_v58 }
 0x463   :  { %10074 = vmatmul.mubr.msk.f32.gmra.mxu0 %vm3818_vm0, %v8663_v22  ;;  %v8711_v22 = vunpack.c.h.bf16 %v13187_v38  ;;  %v13313_v38 = vld [vmem:[%s14974_s7 + $0x98] sm:$0xff] }
 0x464   :  { %10076 = vmatprep.mubr.msk.f32.mxu0 %vm10537_vm2, %v15015_v58 }
 0x465   :  { %9889 = vmatmul.mubr.msk.f32.gmra.mxu1 %vm3818_vm0, %v8675_v42 }
 0x466   :  { %9891 = vmatprep.mubr.msk.f32.mxu1 %vm10537_vm2, %v15015_v58 }
 0x467   :  { %10077 = vmatmul.mubr.msk.f32.gmra.mxu0 %vm3818_vm0, %v8666_v39 }
 0x468   :  { %10079 = vmatprep.mubr.msk.f32.mxu0 %vm10537_vm2, %v15015_v58 }
 0x469   :  { %9892 = vmatmul.mubr.msk.f32.gmra.mxu1 %vm3818_vm0, %v8678_v28 }
 0x46a   :  { %9894 = vmatprep.mubr.msk.f32.mxu1 %vm10537_vm2, %v15015_v58 }
 0x46b   :  { %10080 = vmatmul.mubr.msk.f32.gmra.mxu0 %vm3818_vm0, %v8667_v52 }
 0x46c   :  { %10082 = vmatprep.mubr.msk.f32.mxu0 %vm10537_vm2, %v15015_v58 }
 0x46d   :  { %9895 = vmatmul.mubr.msk.f32.gmra.mxu1 %vm3818_vm0, %v8679_v1 }
 0x46e   :  { %9897 = vmatprep.mubr.msk.f32.mxu1 %vm10537_vm2, %v15015_v58 }
 0x46f   :  { %10083 = vmatmul.mubr.msk.f32.gmra.mxu0 %vm3818_vm0, %v8670_v61  ;;  %v8714_v61 = vunpack.c.l.bf16 %v13214_v14 }
 0x470   :  { %10085 = vmatprep.mubr.msk.f32.mxu0 %vm10537_vm2, %v15015_v58 }
 0x471   :  { %9898 = vmatmul.mubr.msk.f32.gmra.mxu1 %vm3818_vm0, %v8682_v16 }
 0x472   :  { %9900 = vmatprep.mubr.msk.f32.mxu1 %vm10537_vm2, %v15015_v58 }
 0x473   :  { %10086 = vmatmul.mubr.msk.f32.gmra.mxu0 %vm3818_vm0, %v8671_v31 }
 0x474   :  { %10088 = vmatprep.mubr.msk.f32.mxu0 %vm10537_vm2, %v15015_v58 }
 0x475   :  { %9901 = vmatmul.mubr.msk.f32.gmra.mxu1 %vm3818_vm0, %v8683_v35 }
 0x476   :  { %9903 = vmatprep.mubr.msk.f32.mxu1 %vm10537_vm2, %v15015_v58 }
 0x477   :  { %10089 = vmatmul.mubr.msk.f32.gmra.mxu0 %vm3818_vm0, %v8674_v6 }
 0x478   :  { %10091 = vmatprep.mubr.msk.f32.mxu0 %vm10537_vm2, %v15015_v58 }
 0x479   :  { %9904 = vmatmul.mubr.msk.f32.gmra.mxu1 %vm3818_vm0, %v8686_v44 }
 0x47a   :  { %9906 = vmatprep.mubr.msk.f32.mxu1 %vm10537_vm2, %v15015_v58 }
 0x47b   :  { %10092 = vmatmul.mubr.msk.f32.gmra.mxu0 %vm3818_vm0, %v8675_v42  ;;  %v8715_v42 = vunpack.c.h.bf16 %v13214_v14 }
 0x47c   :  { %10094 = vmatprep.mubr.msk.f32.mxu0 %vm10537_vm2, %v15015_v58 }
 0x47d   :  { %9907 = vmatmul.mubr.msk.f32.gmra.mxu1 %vm3818_vm0, %v8687_v54 }
 0x47e   :  { %9909 = vmatprep.mubr.msk.f32.mxu1 %vm10537_vm2, %v15015_v58 }
 0x47f   :  { %10095 = vmatmul.mubr.msk.f32.gmra.mxu0 %vm3818_vm0, %v8678_v28 }
 0x480   :  { %10097 = vmatprep.mubr.msk.f32.mxu0 %vm10537_vm2, %v15015_v58 }
 0x481   :  { %9910 = vmatmul.mubr.msk.f32.gmra.mxu1 %vm3818_vm0, %v8690_v24 }
 0x482   :  { %9912 = vmatprep.mubr.msk.f32.mxu1 %vm10537_vm2, %v15015_v58 }
 0x483   :  { %10098 = vmatmul.mubr.msk.f32.gmra.mxu0 %vm3818_vm0, %v8679_v1 }
 0x484   :  { %10100 = vmatprep.mubr.msk.f32.mxu0 %vm10537_vm2, %v15015_v58 }
 0x485   :  { %9913 = vmatmul.mubr.msk.f32.gmra.mxu1 %vm3818_vm0, %v8691_v63 }
 0x486   :  { %9915 = vmatprep.mubr.msk.f32.mxu1 %vm10537_vm2, %v15015_v58 }
 0x487   :  { %10101 = vmatmul.mubr.msk.f32.gmra.mxu0 %vm3818_vm0, %v8682_v16 }
 0x488   :  { %10103 = vmatprep.mubr.msk.f32.mxu0 %vm10537_vm2, %v15015_v58 }
 0x489   :  { %v13107_v46 = vpop.f32.mrf.mxu1  ;;  %9916 = vmatmul.mubr.msk.f32.gmra.mxu1 %vm3818_vm0, %v8694_v12 }
 0x48a   :  { %9918 = vmatprep.mubr.msk.f32.mxu1 %vm10537_vm2, %v15015_v58 }
 0x48b   :  { %v9773_v23 = vpop.f32.mrf.mxu1  ;;  %10104 = vmatmul.mubr.msk.f32.gmra.mxu0 %vm3818_vm0, %v8683_v35  ;;  %v8718_v35 = vunpack.c.l.bf16 %v13237_v29 }
 0x48c   :  { %10106 = vmatprep.mubr.msk.f32.mxu0 %vm10537_vm2, %v15015_v58 }
 0x48d   :  { %v13121_v49 = vpop.f32.mrf.mxu1  ;;  %9919 = vmatmul.mubr.msk.f32.gmra.mxu1 %vm3818_vm0, %v8695_v30 }
 0x48e   :  { %9921 = vmatprep.mubr.msk.f32.mxu1 %vm10537_vm2, %v15015_v58 }
 0x48f   :  { %v9776_v26 = vpop.f32.mrf.mxu1  ;;  %10107 = vmatmul.mubr.msk.f32.gmra.mxu0 %vm3818_vm0, %v8686_v44 }
 0x490   :  { %10109 = vmatprep.mubr.msk.f32.mxu0 %vm10537_vm2, %v15015_v58 }
 0x491   :  { %v13130_v11 = vpop.f32.mrf.mxu1  ;;  %9922 = vmatmul.mubr.msk.f32.gmra.mxu1 %vm3818_vm0, %v8698_v27 }
 0x492   :  { %9924 = vmatprep.mubr.msk.f32.mxu1 %vm10537_vm2, %v15015_v58 }
 0x493   :  { %v9779_v9 = vpop.f32.mrf.mxu1  ;;  %10110 = vmatmul.mubr.msk.f32.gmra.mxu0 %vm3818_vm0, %v8687_v54 }
 0x494   :  { %10112 = vmatprep.mubr.msk.f32.mxu0 %vm10537_vm2, %v15015_v58 }
 0x495   :  { %v13144_v8 = vpop.f32.mrf.mxu1  ;;  %9925 = vmatmul.mubr.msk.f32.gmra.mxu1 %vm3818_vm0, %v8699_v37 }
 0x496   :  { %9927 = vmatprep.mubr.msk.f32.mxu1 %vm10537_vm2, %v15015_v58 }
 0x497   :  { %v9782_v57 = vpop.f32.mrf.mxu1  ;;  %10113 = vmatmul.mubr.msk.f32.gmra.mxu0 %vm3818_vm0, %v8690_v24  ;;  %v8719_v24 = vunpack.c.h.bf16 %v13237_v29 }
 0x498   :  { %10115 = vmatprep.mubr.msk.f32.mxu0 %vm10537_vm2, %v15015_v58  ;;  %v3791_v57 = vld [vmem:[%s14974_s7 + $0x50] sm:$0xff] }
 0x499   :  { %v13153_v40 = vpop.f32.mrf.mxu1  ;;  %9928 = vmatmul.mubr.msk.f32.gmra.mxu1 %vm3818_vm0, %v8702_v36 }
 0x49a   :  { %9930 = vmatprep.mubr.msk.f32.mxu1 %vm10537_vm2, %v15015_v58 }
 0x49b   :  { %v9785_v50 = vpop.f32.mrf.mxu1  ;;  %10116 = vmatmul.mubr.msk.f32.gmra.mxu0 %vm3818_vm0, %v8691_v63  ;;  %v13264_v63 = vld [vmem:[%s14969_s2 + $0xf8] sm:$0xf] }
 0x49c   :  { %10118 = vmatprep.mubr.msk.f32.mxu0 %vm10537_vm2, %v15015_v58  ;;  %v359_v23 = vunpack.c.l.bf16 %v13264_v63  ;;  %v3790_v50 = vld [vmem:[%s14974_s7 + $0x48] sm:$0xff] }
 0x49d   :  { %v13167_v19 = vpop.f32.mrf.mxu1  ;;  %9931 = vmatmul.mubr.msk.f32.gmra.mxu1 %vm3818_vm0, %v8703_v13 }
 0x49e   :  { %9933 = vmatprep.mubr.msk.f32.mxu1 %vm10537_vm2, %v15015_v58 }
 0x49f   :  { %v9788_v32 = vpop.f32.mrf.mxu1  ;;  %v13173_v0 = vpop.f32.mrf.mxu0  ;;  %10119 = vmatmul.mubr.msk.f32.gmra.mxu0 %vm3818_vm0, %v8694_v12 }
 0x4a0   :  { %10121 = vmatprep.mubr.msk.f32.mxu0 %vm10537_vm2, %v15015_v58 }
 0x4a1   :  { %v13178_v43 = vpop.f32.mrf.mxu1  ;;  %9934 = vmatmul.mubr.msk.f32.gmra.mxu1 %vm3818_vm0, %v8706_v4  ;;  %v9976_v7 = vpop.f32.mrf.mxu0 }
 0x4a2   :  { %9936 = vmatprep.mubr.msk.f32.mxu1 %vm10537_vm2, %v15015_v58  ;;  %v3789_v7 = vld [vmem:[%s14974_s7 + $0x40] sm:$0xff] }
 0x4a3   :  { %v9791_v41 = vpop.f32.mrf.mxu1  ;;  %v13189_v62 = vpop.f32.mrf.mxu0  ;;  %10122 = vmatmul.mubr.msk.f32.gmra.mxu0 %vm3818_vm0, %v8695_v30 }
 0x4a4   :  { %10124 = vmatprep.mubr.msk.f32.mxu0 %vm10537_vm2, %v15015_v58 }
 0x4a5   :  { %v13194_v51 = vpop.f32.mrf.mxu1  ;;  %9937 = vmatmul.mubr.msk.f32.gmra.mxu1 %vm3818_vm0, %v8707_v21  ;;  %v9979_v34 = vpop.f32.mrf.mxu0 }
 0x4a6   :  { %9939 = vmatprep.mubr.msk.f32.mxu1 %vm10537_vm2, %v15015_v58 }
 0x4a7   :  { %v9794_v2 = vpop.f32.mrf.mxu1  ;;  %v13200_v15 = vpop.f32.mrf.mxu0  ;;  %10125 = vmatmul.mubr.msk.f32.gmra.mxu0 %vm3818_vm0, %v8698_v27 }
 0x4a8   :  { %10127 = vmatprep.mubr.msk.f32.mxu0 %vm10537_vm2, %v15015_v58 }
 0x4a9   :  { %v13205_v17 = vpop.f32.mrf.mxu1  ;;  %9940 = vmatmul.mubr.msk.f32.gmra.mxu1 %vm3818_vm0, %v8710_v53  ;;  %v9982_v20 = vpop.f32.mrf.mxu0 }
 0x4aa   :  { %9942 = vmatprep.mubr.msk.f32.mxu1 %vm10537_vm2, %v15015_v58 }
 0x4ab   :  { %v9797_v55 = vpop.f32.mrf.mxu1  ;;  %v13216_v39 = vpop.f32.mrf.mxu0  ;;  %10128 = vmatmul.mubr.msk.f32.gmra.mxu0 %vm3818_vm0, %v8699_v37 }
 0x4ac   :  { %10130 = vmatprep.mubr.msk.f32.mxu0 %vm10537_vm2, %v15015_v58 }
 0x4ad   :  { %v4119_v52 = vpop.f32.mrf.mxu1  ;;  %9943 = vmatmul.mubr.msk.f32.gmra.mxu1 %vm3818_vm0, %v8711_v22  ;;  %v9985_v18 = vpop.f32.mrf.mxu0 }
 0x4ae   :  { %9945 = vmatprep.mubr.msk.f32.mxu1 %vm10537_vm2, %v15015_v58 }
 0x4af   :  { %v9800_v31 = vpop.f32.mrf.mxu1  ;;  %v13225_v47 = vpop.f32.mrf.mxu0  ;;  %10131 = vmatmul.mubr.msk.f32.gmra.mxu0 %vm3818_vm0, %v8702_v36 }
 0x4b0   :  { %10133 = vmatprep.mubr.msk.f32.mxu0 %vm10537_vm2, %v15015_v58 }
 0x4b1   :  { %v4124_v45 = vpop.f32.mrf.mxu1  ;;  %9946 = vmatmul.mubr.msk.f32.gmra.mxu1 %vm3818_vm0, %v8714_v61  ;;  %v9988_v6 = vpop.f32.mrf.mxu0 }
 0x4b2   :  { %9948 = vmatprep.mubr.msk.f32.mxu1 %vm10537_vm2, %v15015_v58 }
 0x4b3   :  { %v9803_v28 = vpop.f32.mrf.mxu1  ;;  %v13239_v1 = vpop.f32.mrf.mxu0  ;;  %10134 = vmatmul.mubr.msk.f32.gmra.mxu0 %vm3818_vm0, %v8703_v13 }
 0x4b4   :  { %10136 = vmatprep.mubr.msk.f32.mxu0 %vm10537_vm2, %v15015_v58 }
 0x4b5   :  { %v4129_v59 = vpop.f32.mrf.mxu1  ;;  %9949 = vmatmul.mubr.msk.f32.gmra.mxu1 %vm3818_vm0, %v8715_v42  ;;  %v9991_v16 = vpop.f32.mrf.mxu0 }
 0x4b6   :  { %9951 = vmatprep.mubr.msk.f32.mxu1 %vm10537_vm2, %v15015_v58 }
 0x4b7   :  { %v9806_v33 = vpop.f32.mrf.mxu1  ;;  %v13250_v44 = vpop.f32.mrf.mxu0  ;;  %10137 = vmatmul.mubr.msk.f32.gmra.mxu0 %vm3818_vm0, %v8706_v4 }
 0x4b8   :  { %10139 = vmatprep.mubr.msk.f32.mxu0 %vm10537_vm2, %v15015_v58 }
 0x4b9   :  { %v4134_v54 = vpop.f32.mrf.mxu1  ;;  %9952 = vmatmul.mubr.msk.f32.gmra.mxu1 %vm3818_vm0, %v8718_v35  ;;  %v9994_v48 = vpop.f32.mrf.mxu0 }
 0x4ba   :  { %9954 = vmatprep.mubr.msk.f32.mxu1 %vm10537_vm2, %v15015_v58 }
 0x4bb   :  { %v9809_v5 = vpop.f32.mrf.mxu1  ;;  %v4489_v12 = vpop.f32.mrf.mxu0  ;;  %10140 = vmatmul.mubr.msk.f32.gmra.mxu0 %vm3818_vm0, %v8707_v21 }
 0x4bc   :  { %10142 = vmatprep.mubr.msk.f32.mxu0 %vm10537_vm2, %v15015_v58 }
 0x4bd   :  { %v4139_v30 = vpop.f32.mrf.mxu1  ;;  %9955 = vmatmul.mubr.msk.f32.gmra.mxu1 %vm3818_vm0, %v8719_v24  ;;  %v9997_v56 = vpop.f32.mrf.mxu0 }
 0x4be   :  { %9957 = vmatprep.mubr.msk.f32.mxu1 %vm10537_vm2, %v15015_v58 }
 0x4bf   :  { %v9812_v27 = vpop.f32.mrf.mxu1  ;;  %v4494_v26 = vpop.f32.mrf.mxu0  ;;  %10143 = vmatmul.mubr.msk.f32.gmra.mxu0 %vm3818_vm0, %v8710_v53 }
 0x4c0   :  { %10145 = vmatprep.mubr.msk.f32.mxu0 %vm10537_vm2, %v15015_v58 }
 0x4c1   :  { %v13278_v37 = vpop.f32.mrf.mxu1  ;;  %9958 = vmatmul.mubr.msk.f32.gmra.mxu1 %vm3818_vm0, %v359_v23  ;;  %v10000_v25 = vpop.f32.mrf.mxu0 }
 0x4c2   :  { %10171 = vmatprep.mubr.msk.f32.mxu1 %vm14997_vm8, %v13194_v51 }
 0x4c3   :  { %v9815_v9 = vpop.f32.mrf.mxu1  ;;  %v4499_v36 = vpop.f32.mrf.mxu0  ;;  %10146 = vmatmul.mubr.msk.f32.gmra.mxu0 %vm3818_vm0, %v8711_v22 }
 0x4c4   :  { %10148 = vmatprep.mubr.msk.f32.mxu0 %vm10537_vm2, %v15015_v58 }
 0x4c5   :  { %v13291_v13 = vpop.f32.mrf.mxu1  ;;  %v10003_v10 = vpop.f32.mrf.mxu0  ;;  %10172 = vmatmul.mubr.msk.f32.vlgmr.msra.gmra.mxu1 %vm14997_vm8, %v13205_v17 }
 0x4c6   :  { %10174 = vmatprep.mubr.msk.f32.mxu1 %vm14997_vm8, %v4119_v52  ;;  %10222 = vmatpush3.msra.mxu1 %v13006_v60 }
 0x4c7   :  { %v9818_v4 = vpop.f32.mrf.mxu1  ;;  %v4504_v32 = vpop.f32.mrf.mxu0  ;;  %10149 = vmatmul.mubr.msk.f32.gmra.mxu0 %vm3818_vm0, %v8714_v61  ;;  %10223 = vmatprep.subr.mxu1 %v3791_v57 }
 0x4c8   :  { %10151 = vmatprep.mubr.msk.f32.mxu0 %vm10537_vm2, %v15015_v58  ;;  %10224 = vmatpush3.msra.mxu1 %v3791_v57 }
 0x4c9   :  { %v13306_v21 = vpop.f32.mrf.mxu1  ;;  %v10006_v60 = vpop.f32.mrf.mxu0  ;;  %10175 = vmatmul.mubr.msk.f32.gmra.mxu1 %vm14997_vm8, %v4124_v45  ;;  %10225 = vmatprep.subr.mxu1 %v3790_v50 }
 0x4ca   :  { %10177 = vmatprep.mubr.msk.f32.mxu1 %vm14997_vm8, %v4129_v59  ;;  %10226 = vmatpush3.msra.mxu1 %v3790_v50 }
 0x4cb   :  { %v9821_v41 = vpop.f32.mrf.mxu1  ;;  %v4509_v51 = vpop.f32.mrf.mxu0  ;;  %10152 = vmatmul.mubr.msk.f32.gmra.mxu0 %vm3818_vm0, %v8715_v42  ;;  %10227 = vmatprep.subr.mxu1 %v3789_v7  ;;  %v3795_v42 = vld [vmem:[%s14974_s7 + $0x70] sm:$0xff] }
 0x4cc   :  { %10154 = vmatprep.mubr.msk.f32.mxu0 %vm10537_vm2, %v15015_v58  ;;  %10228 = vmatpush3.msra.mxu1 %v3789_v7  ;;  %v3807_v41 = vld [vmem:[%s14974_s7 + $0xd0] sm:$0xff] }
 0x4cd   :  { %v13320_v34 = vpop.f32.mrf.mxu1  ;;  %v10009_v53 = vpop.f32.mrf.mxu0  ;;  %10178 = vmatmul.mubr.msk.f32.gmra.mxu1 %vm14997_vm8, %v4134_v54  ;;  %10279 = vmatprep.subr.mxu1 %v13313_v38  ;;  %v3799_v54 = vld [vmem:[%s14974_s7 + $0x90] sm:$0xff] }
 0x4ce   :  { %10180 = vmatprep.mubr.msk.f32.mxu1 %vm14997_vm8, %v4139_v30  ;;  %v3808_v30 = vld [vmem:[%s14974_s7 + $0xd8] sm:$0xff] }
 0x4cf   :  { %v9824_v2 = vpop.f32.mrf.mxu1  ;;  %v4514_v17 = vpop.f32.mrf.mxu0  ;;  %10155 = vmatmul.mubr.msk.f32.gmra.mxu0 %vm3818_vm0, %v8718_v35 }
 0x4d0   :  { %10157 = vmatprep.mubr.msk.f32.mxu0 %vm10537_vm2, %v15015_v58  ;;  %v3806_v2 = vld [vmem:[%s14974_s7 + $0xc8] sm:$0xff] }
 0x4d1   :  { %v4164_v20 = vpop.f32.mrf.mxu1  ;;  %v10012_v22 = vpop.f32.mrf.mxu0  ;;  %10181 = vmatmul.mubr.msk.f32.gmra.mxu1 %vm14997_vm8, %v4489_v12 }
 0x4d2   :  { %10183 = vmatprep.mubr.msk.f32.mxu1 %vm14997_vm8, %v4494_v26  ;;  %v3805_v22 = vld [vmem:[%s14974_s7 + $0xc0] sm:$0xff] }
 0x4d3   :  { %v9827_v14 = vpop.f32.mrf.mxu1  ;;  %v4519_v55 = vpop.f32.mrf.mxu0  ;;  %10158 = vmatmul.mubr.msk.f32.gmra.mxu0 %vm3818_vm0, %v8719_v24  ;;  %v3798_v24 = vld [vmem:[%s14974_s7 + $0x88] sm:$0xff] }
 0x4d4   :  { %10160 = vmatprep.mubr.msk.f32.mxu0 %vm10537_vm2, %v15015_v58 }
 0x4d5   :  { %v13337_v52 = vpop.f32.mrf.mxu1  ;;  %v10015_v18 = vpop.f32.mrf.mxu0  ;;  %10184 = vmatmul.mubr.msk.f32.gmra.mxu1 %vm14997_vm8, %v4499_v36 }
 0x4d6   :  { %10186 = vmatprep.mubr.msk.f32.mxu1 %vm14997_vm8, %v4504_v32  ;;  %v3801_v32 = vld [vmem:[%s14974_s7 + $0xa0] sm:$0xff] }
 0x4d7   :  { %v9830_v61 = vpop.f32.mrf.mxu1  ;;  %v13341_v31 = vpop.f32.mrf.mxu0  ;;  %10161 = vmatmul.mubr.msk.f32.gmra.mxu0 %vm3818_vm0, %v359_v23 }
 0x4d8   :  { %10200 = vmatprep.mubr.msk.f32.mxu0 %vm14997_vm8, %v13107_v46  ;;  %v3794_v46 = vld [vmem:[%s14974_s7 + $0x68] sm:$0xff] }
 0x4d9   :  { %v4174_v45 = vpop.f32.mrf.mxu1  ;;  %v10018_v6 = vpop.f32.mrf.mxu0  ;;  %10187 = vmatmul.mubr.msk.f32.gmra.mxu1 %vm14997_vm8, %v4509_v51  ;;  %v3812_v51 = vld [vmem:[%s14974_s7 + $0xf8] sm:$0xff] }
 0x4da   :  { %10189 = vmatprep.mubr.msk.f32.mxu1 %vm14997_vm8, %v4514_v17 }
 0x4db   :  { %v9833_v29 = vpop.f32.mrf.mxu1  ;;  %v4529_v28 = vpop.f32.mrf.mxu0  ;;  %10201 = vmatmul.mubr.msk.f32.vlgmr.msra.gmra.mxu0 %vm14997_vm8, %v13121_v49  ;;  %v3793_v49 = vld [vmem:[%s14974_s7 + $0x60] sm:$0xff] }
 0x4dc   :  { %10203 = vmatprep.mubr.msk.f32.mxu0 %vm14997_vm8, %v13130_v11  ;;  %10251 = vmatpush3.msra.mxu0 %v13054_v3 }
 0x4dd   :  { %v13361_v59 = vpop.f32.mrf.mxu1  ;;  %v10021_v16 = vpop.f32.mrf.mxu0  ;;  %10190 = vmatmul.mubr.msk.f32.gmra.mxu1 %vm14997_vm8, %v4519_v55  ;;  %10252 = vmatprep.subr.mxu0 %v3795_v42 }
 0x4de   :  { %10229 = vmatprep.mubr.msk.f32.mxu1 %vm14997_vm8, %v13278_v37  ;;  %10253 = vmatpush3.msra.mxu0 %v3795_v42 }
 0x4df   :  { %v9836_v11 = vpop.f32.mrf.mxu1  ;;  %v4534_v3 = vpop.f32.mrf.mxu0  ;;  %10204 = vmatmul.mubr.msk.f32.gmra.mxu0 %vm14997_vm8, %v13144_v8  ;;  %10254 = vmatprep.subr.mxu0 %v3794_v46  ;;  %v3804_v8 = vld [vmem:[%s14974_s7 + $0xb8] sm:$0xff] }
 0x4e0   :  { %10206 = vmatprep.mubr.msk.f32.mxu0 %vm14997_vm8, %v13153_v40  ;;  %10255 = vmatpush3.msra.mxu0 %v3794_v46 }
 0x4e1   :  { %v13373_v35 = vpop.f32.mrf.mxu1  ;;  %v10024_v33 = vpop.f32.mrf.mxu0  ;;  %10230 = vmatmul.mubr.msk.f32.vlgmr.msra.gmra.mxu1 %vm14997_vm8, %v13291_v13  ;;  %10256 = vmatprep.subr.mxu0 %v3793_v49 }
 0x4e2   :  { %10232 = vmatprep.mubr.msk.f32.mxu1 %vm14997_vm8, %v13306_v21  ;;  %10257 = vmatpush3.msra.mxu0 %v3793_v49 }
 0x4e3   :  { %v9839_v40 = vpop.f32.mrf.mxu1  ;;  %v4539_v48 = vpop.f32.mrf.mxu0  ;;  %10207 = vmatmul.mubr.msk.f32.gmra.mxu0 %vm14997_vm8, %v13167_v19  ;;  %10280 = vmatpush3.msra.mxu1 %v13313_v38  ;;  %v3797_v19 = vld [vmem:[%s14974_s7 + $0x80] sm:$0xff] }
 0x4e4   :  { %10209 = vmatprep.mubr.msk.f32.mxu0 %vm14997_vm8, %v13178_v43  ;;  %10281 = vmatprep.subr.mxu1 %v3799_v54 }
 0x4e5   :  { %v4189_v63 = vpop.f32.mrf.mxu1  ;;  %v10027_v5 = vpop.f32.mrf.mxu0  ;;  %10233 = vmatmul.mubr.msk.f32.gmra.mxu1 %vm14997_vm8, %v13320_v34  ;;  %10308 = vmatprep.subr.mxu0 %v3804_v8 }
 0x4e6   :  { %10235 = vmatprep.mubr.msk.f32.mxu1 %vm14997_vm8, %v4164_v20  ;;  %10282 = vmatpush3.msra.mxu1 %v3799_v54  ;;  %v3811_v5 = vld [vmem:[%s14974_s7 + $0xf0] sm:$0xff] }
 0x4e7   :  { %v9842_v12 = vpop.f32.mrf.mxu1  ;;  %v4544_v43 = vpop.f32.mrf.mxu0  ;;  %10210 = vmatmul.mubr.msk.f32.gmra.mxu0 %vm14997_vm8, %v13173_v0  ;;  %10283 = vmatprep.subr.mxu1 %v3798_v24 }
 0x4e8   :  { %10212 = vmatprep.mubr.msk.f32.mxu0 %vm14997_vm8, %v13189_v62  ;;  %10284 = vmatpush3.msra.mxu1 %v3798_v24 }
 0x4e9   :  { %v4194_v56 = vpop.f32.mrf.mxu1  ;;  %v10030_v23 = vpop.f32.mrf.mxu0  ;;  %10236 = vmatmul.mubr.msk.f32.gmra.mxu1 %vm14997_vm8, %v13337_v52  ;;  %10285 = vmatprep.subr.mxu1 %v3797_v19  ;;  %v13464_v52 = vld [vmem:[%s14974_s7 + $0x118] sm:$0xff] }
 0x4ea   :  { %10238 = vmatprep.mubr.msk.f32.mxu1 %vm14997_vm8, %v4174_v45  ;;  %10286 = vmatpush3.msra.mxu1 %v3797_v19  ;;  %v3809_v23 = vld [vmem:[%s14974_s7 + $0xe0] sm:$0xff] }
 0x4eb   :  { %v9845_v27 = vpop.f32.mrf.mxu1  ;;  %v4549_v0 = vpop.f32.mrf.mxu0  ;;  %10213 = vmatmul.mubr.msk.f32.gmra.mxu0 %vm14997_vm8, %v13200_v15  ;;  %10337 = vmatprep.subr.mxu1 %v3808_v30 }
 0x4ec   :  { %10215 = vmatprep.mubr.msk.f32.mxu0 %vm14997_vm8, %v13216_v39 }
 0x4ed   :  { %v4199_v62 = vpop.f32.mrf.mxu1  ;;  %v10033_v26 = vpop.f32.mrf.mxu0  ;;  %10239 = vmatmul.mubr.msk.f32.gmra.mxu1 %vm14997_vm8, %v13341_v31 }
 0x4ee   :  { %10241 = vmatprep.mubr.msk.f32.mxu1 %vm14997_vm8, %v4529_v28 }
 0x4ef   :  { %v9848_v37 = vpop.f32.mrf.mxu1  ;;  %v4554_v25 = vpop.f32.mrf.mxu0  ;;  %10216 = vmatmul.mubr.msk.f32.gmra.mxu0 %vm14997_vm8, %v13225_v47  ;;  %v3803_v47 = vld [vmem:[%s14974_s7 + $0xb0] sm:$0xff] }
 0x4f0   :  { %10218 = vmatprep.mubr.msk.f32.mxu0 %vm14997_vm8, %v13239_v1 }
 0x4f1   :  { %v4204_v15 = vpop.f32.mrf.mxu1  ;;  %v10036_v9 = vpop.f32.mrf.mxu0  ;;  %10242 = vmatmul.mubr.msk.f32.gmra.mxu1 %vm14997_vm8, %v4534_v3 }
 0x4f2   :  { %10244 = vmatprep.mubr.msk.f32.mxu1 %vm14997_vm8, %v4539_v48 }
 0x4f3   :  { %v9851_v39 = vpop.f32.mrf.mxu1  ;;  %v4559_v36 = vpop.f32.mrf.mxu0  ;;  %10219 = vmatmul.mubr.msk.f32.gmra.mxu0 %vm14997_vm8, %v13250_v44  ;;  %v3802_v44 = vld [vmem:[%s14974_s7 + $0xa8] sm:$0xff] }
 0x4f4   :  { %10258 = vmatprep.mubr.msk.f32.mxu0 %vm14997_vm8, %v13361_v59 }
 0x4f5   :  { %v4209_v57 = vpop.f32.mrf.mxu1  ;;  %v10039_v13 = vpop.f32.mrf.mxu0  ;;  %10245 = vmatmul.mubr.msk.f32.gmra.mxu1 %vm14997_vm8, %v4544_v43  ;;  %v3810_v43 = vld [vmem:[%s14974_s7 + $0xe8] sm:$0xff] }
 0x4f6   :  { %10247 = vmatprep.mubr.msk.f32.mxu1 %vm14997_vm8, %v4549_v0 }
 0x4f7   :  { %v9854_v1 = vpop.f32.mrf.mxu1  ;;  %v4564_v10 = vpop.f32.mrf.mxu0  ;;  %10259 = vmatmul.mubr.msk.f32.vlgmr.msra.gmra.mxu0 %vm14997_vm8, %v13373_v35 }
 0x4f8   :  { %10261 = vmatprep.mubr.msk.f32.mxu0 %vm14997_vm8, %v4189_v63  ;;  %10309 = vmatpush3.msra.mxu0 %v3804_v8 }
 0x4f9   :  { %v4214_v50 = vpop.f32.mrf.mxu1  ;;  %v10042_v4 = vpop.f32.mrf.mxu0  ;;  %10248 = vmatmul.mubr.msk.f32.gmra.mxu1 %vm14997_vm8, %v4554_v25  ;;  %10310 = vmatprep.subr.mxu0 %v3803_v47 }
 0x4fa   :  { %10287 = vmatprep.mubr.msk.f32.mxu1 %vm14997_vm8, %v4214_v50  ;;  %10311 = vmatpush3.msra.mxu0 %v3803_v47 }
 0x4fb   :  { %v9857_v7 = vpop.f32.mrf.mxu1  ;;  %v4569_v21 = vpop.f32.mrf.mxu0  ;;  %10262 = vmatmul.mubr.msk.f32.gmra.mxu0 %vm14997_vm8, %v4194_v56  ;;  %10312 = vmatprep.subr.mxu0 %v3802_v44 }
 0x4fc   :  { %10264 = vmatprep.mubr.msk.f32.mxu0 %vm14997_vm8, %v4199_v62  ;;  %10313 = vmatpush3.msra.mxu0 %v3802_v44 }
 0x4fd   :  { %v4219_v60 = vpop.f32.mrf.mxu1  ;;  %v10045_v38 = vpop.f32.mrf.mxu0  ;;  %10314 = vmatprep.subr.mxu0 %v3801_v32 }
 0x4fe   :  { %10288 = vmatmul.mubr.msk.f32.vlgmr.msra.gmra.mxu1 %vm14997_vm8, %v4219_v60  ;;  %10315 = vmatpush3.msra.mxu0 %v3801_v32 }
 0x4ff   :  { %v9860_v34 = vpop.f32.mrf.mxu1  ;;  %v4574_v53 = vpop.f32.mrf.mxu0  ;;  %10265 = vmatmul.mubr.msk.f32.gmra.mxu0 %vm14997_vm8, %v4204_v15  ;;  %10338 = vmatpush3.msra.mxu1 %v3808_v30 }
 0x500   :  { %10267 = vmatprep.mubr.msk.f32.mxu0 %vm14997_vm8, %v4209_v57  ;;  %10339 = vmatprep.subr.mxu1 %v3807_v41 }
 0x501   :  { %v4224_v17 = vpop.f32.mrf.mxu1  ;;  %v10048_v20 = vpop.f32.mrf.mxu0  ;;  %10340 = vmatpush3.msra.mxu1 %v3807_v41  ;;  %10366 = vmatprep.subr.mxu0 %v3812_v51 }
 0x502   :  { %10290 = vmatprep.mubr.msk.f32.mxu1 %vm14997_vm8, %v4224_v17  ;;  %10341 = vmatprep.subr.mxu1 %v3806_v2 }
 0x503   :  { %v9863_v14 = vpop.f32.mrf.mxu1  ;;  %v4579_v55 = vpop.f32.mrf.mxu0  ;;  %10268 = vmatmul.mubr.msk.f32.gmra.mxu0 %vm14997_vm8, %v4559_v36  ;;  %10342 = vmatpush3.msra.mxu1 %v3806_v2  ;;  %v3814_v2 = vld [vmem:[%s14974_s7 + $0x108] sm:$0xff] }
 0x504   :  { %10270 = vmatprep.mubr.msk.f32.mxu0 %vm14997_vm8, %v4564_v10  ;;  %10343 = vmatprep.subr.mxu1 %v3805_v22 }
 0x505   :  { %v4229_v18 = vpop.f32.mrf.mxu1  ;;  %v10051_v61 = vpop.f32.mrf.mxu0  ;;  %10344 = vmatpush3.msra.mxu1 %v3805_v22  ;;  %v3813_v22 = vld [vmem:[%s14974_s7 + $0x100] sm:$0xff] }
 0x506   :  { %10291 = vmatmul.mubr.msk.f32.gmra.mxu1 %vm14997_vm8, %v4229_v18  ;;  %10395 = vmatprep.subr.mxu1 %v13464_v52 }
 0x507   :  { %v9866_v31 = vpop.f32.mrf.mxu1  ;;  %v4584_v45 = vpop.f32.mrf.mxu0  ;;  %10271 = vmatmul.mubr.msk.f32.gmra.mxu0 %vm14997_vm8, %v4569_v21 }
 0x508   :  { %10273 = vmatprep.mubr.msk.f32.mxu0 %vm14997_vm8, %v4574_v53 }
 0x509   :  { %v4234_v6 = vpop.f32.mrf.mxu1  ;;  %v10054_v42 = vpop.f32.mrf.mxu0 }
 0x50a   :  { %10293 = vmatprep.mubr.msk.f32.mxu1 %vm14997_vm8, %v4234_v6 }
 0x50b   :  { %v9869_v29 = vpop.f32.mrf.mxu1  ;;  %v4589_v28 = vpop.f32.mrf.mxu0  ;;  %10274 = vmatmul.mubr.msk.f32.gmra.mxu0 %vm14997_vm8, %v4579_v55 }
 0x50c   :  { %10276 = vmatprep.mubr.msk.f32.mxu0 %vm14997_vm8, %v4584_v45 }
 0x50d   :  { %v4239_v46 = vpop.f32.mrf.mxu1  ;;  %v10057_v59 = vpop.f32.mrf.mxu0 }
 0x50e   :  { %10294 = vmatmul.mubr.msk.f32.gmra.mxu1 %vm14997_vm8, %v4239_v46 }
 0x50f   :  { %v9872_v16 = vpop.f32.mrf.mxu1  ;;  %v4594_v49 = vpop.f32.mrf.mxu0  ;;  %10277 = vmatmul.mubr.msk.f32.gmra.mxu0 %vm14997_vm8, %v4589_v28 }
 0x511   :  { %v4244_v11 = vpop.f32.mrf.mxu1  ;;  %v10060_v3 = vpop.f32.mrf.mxu0 }
 0x512   :  { %10296 = vmatprep.mubr.msk.f32.mxu1 %vm14997_vm8, %v4244_v11 }
 0x513   :  { %v9875_v35 = vpop.f32.mrf.mxu1  ;;  %v4599_v33 = vpop.f32.mrf.mxu0  ;;  %10297 = vmatmul.mubr.msk.f32.gmra.mxu1 %vm14997_vm8, %v4594_v49 }
 0x514   :  { %10299 = vmatprep.mubr.msk.f32.mxu1 %vm14997_vm8, %v4599_v33 }
 0x515   :  { %v4249_v54 = vpop.f32.mrf.mxu1  ;;  %v10063_v8 = vpop.f32.mrf.mxu0 }
 0x516   :  { %10316 = vmatprep.mubr.msk.f32.mxu0 %vm14997_vm8, %v4249_v54 }
 0x517   :  { %v9878_v40 = vpop.f32.mrf.mxu1  ;;  %v4604_v48 = vpop.f32.mrf.mxu0 }
 0x518   :  { %10300 = vmatmul.mubr.msk.f32.gmra.mxu1 %vm14997_vm8, %v4604_v48 }
 0x519   :  { %v4254_v24 = vpop.f32.mrf.mxu1  ;;  %v10066_v63 = vpop.f32.mrf.mxu0 }
 0x51a   :  { %10317 = vmatmul.mubr.msk.f32.vlgmr.msra.gmra.mxu0 %vm14997_vm8, %v4254_v24 }
 0x51b   :  { %v9881_v19 = vpop.f32.mrf.mxu1  ;;  %v4609_v12 = vpop.f32.mrf.mxu0  ;;  %10367 = vmatpush3.msra.mxu0 %v3812_v51  ;;  %v3815_v51 = vld [vmem:[%s14974_s7 + $0x110] sm:$0xff] }
 0x51c   :  { %10302 = vmatprep.mubr.msk.f32.mxu1 %vm14997_vm8, %v4609_v12  ;;  %10368 = vmatprep.subr.mxu0 %v3811_v5 }
 0x51d   :  { %v4259_v30 = vpop.f32.mrf.mxu1  ;;  %v10069_v56 = vpop.f32.mrf.mxu0  ;;  %10369 = vmatpush3.msra.mxu0 %v3811_v5 }
 0x51e   :  { %10319 = vmatprep.mubr.msk.f32.mxu0 %vm14997_vm8, %v4259_v30  ;;  %10370 = vmatprep.subr.mxu0 %v3810_v43 }
 0x51f   :  { %v9884_v27 = vpop.f32.mrf.mxu1  ;;  %v4614_v0 = vpop.f32.mrf.mxu0  ;;  %10371 = vmatpush3.msra.mxu0 %v3810_v43 }
 0x520   :  { %10303 = vmatmul.mubr.msk.f32.gmra.mxu1 %vm14997_vm8, %v4614_v0  ;;  %10372 = vmatprep.subr.mxu0 %v3809_v23 }
 0x521   :  { %v4264_v62 = vpop.f32.mrf.mxu1  ;;  %v10072_v26 = vpop.f32.mrf.mxu0  ;;  %10373 = vmatpush3.msra.mxu0 %v3809_v23 }
 0x522   :  { %10320 = vmatmul.mubr.msk.f32.gmra.mxu0 %vm14997_vm8, %v4264_v62 }
 0x523   :  { %v9887_v37 = vpop.f32.mrf.mxu1  ;;  %v4619_v25 = vpop.f32.mrf.mxu0 }
 0x524   :  { %10305 = vmatprep.mubr.msk.f32.mxu1 %vm14997_vm8, %v4619_v25 }
 0x525   :  { %v4269_v15 = vpop.f32.mrf.mxu1  ;;  %v10075_v9 = vpop.f32.mrf.mxu0 }
 0x526   :  { %10322 = vmatprep.mubr.msk.f32.mxu0 %vm14997_vm8, %v4269_v15 }
 0x527   :  { %v9890_v39 = vpop.f32.mrf.mxu1  ;;  %v4624_v36 = vpop.f32.mrf.mxu0 }
 0x528   :  { %10306 = vmatmul.mubr.msk.f32.gmra.mxu1 %vm14997_vm8, %v4624_v36 }
 0x529   :  { %v4274_v57 = vpop.f32.mrf.mxu1  ;;  %v10078_v13 = vpop.f32.mrf.mxu0 }
 0x52a   :  { %10323 = vmatmul.mubr.msk.f32.gmra.mxu0 %vm14997_vm8, %v4274_v57 }
 0x52b   :  { %v9893_v47 = vpop.f32.mrf.mxu1  ;;  %v4629_v1 = vpop.f32.mrf.mxu0 }
 0x52d   :  { %v4279_v10 = vpop.f32.mrf.mxu1  ;;  %v10081_v44 = vpop.f32.mrf.mxu0 }
 0x52e   :  { %10325 = vmatprep.mubr.msk.f32.mxu0 %vm14997_vm8, %v4279_v10 }
 0x52f   :  { %v9896_v50 = vpop.f32.mrf.mxu1  ;;  %v4634_v4 = vpop.f32.mrf.mxu0  ;;  %10326 = vmatmul.mubr.msk.f32.gmra.mxu0 %vm14997_vm8, %v4629_v1 }
 0x530   :  { %10328 = vmatprep.mubr.msk.f32.mxu0 %vm14997_vm8, %v4634_v4 }
 0x531   :  { %v4284_v32 = vpop.f32.mrf.mxu1  ;;  %v10084_v7 = vpop.f32.mrf.mxu0 }
 0x532   :  { %10345 = vmatprep.mubr.msk.f32.mxu1 %vm14997_vm8, %v4284_v32 }
 0x533   :  { %v9899_v21 = vpop.f32.mrf.mxu1  ;;  %v4639_v60 = vpop.f32.mrf.mxu0 }
 0x534   :  { %10329 = vmatmul.mubr.msk.f32.gmra.mxu0 %vm14997_vm8, %v4639_v60 }
 0x535   :  { %v4289_v38 = vpop.f32.mrf.mxu1  ;;  %v10087_v41 = vpop.f32.mrf.mxu0 }
 0x536   :  { %10346 = vmatmul.mubr.msk.f32.vlgmr.msra.gmra.mxu1 %vm14997_vm8, %v4289_v38 }
 0x537   :  { %v9902_v34 = vpop.f32.mrf.mxu1  ;;  %v4644_v53 = vpop.f32.mrf.mxu0  ;;  %10396 = vmatpush3.msra.mxu1 %v13464_v52 }
 0x538   :  { %10331 = vmatprep.mubr.msk.f32.mxu0 %vm14997_vm8, %v4644_v53  ;;  %10397 = vmatprep.subr.mxu1 %v3815_v51 }
 0x539   :  { %v4294_v17 = vpop.f32.mrf.mxu1  ;;  %v10090_v20 = vpop.f32.mrf.mxu0  ;;  %10398 = vmatpush3.msra.mxu1 %v3815_v51 }
 0x53a   :  { %10348 = vmatprep.mubr.msk.f32.mxu1 %vm14997_vm8, %v4294_v17  ;;  %10399 = vmatprep.subr.mxu1 %v3814_v2 }
 0x53b   :  { %v9905_v14 = vpop.f32.mrf.mxu1  ;;  %v4649_v55 = vpop.f32.mrf.mxu0  ;;  %10400 = vmatpush3.msra.mxu1 %v3814_v2 }
 0x53c   :  { %10332 = vmatmul.mubr.msk.f32.gmra.mxu0 %vm14997_vm8, %v4649_v55  ;;  %10401 = vmatprep.subr.mxu1 %v3813_v22 }
 0x53d   :  { %v4299_v52 = vpop.f32.mrf.mxu1  ;;  %v10093_v18 = vpop.f32.mrf.mxu0  ;;  %10402 = vmatpush3.msra.mxu1 %v3813_v22 }
 0x53e   :  { %10349 = vmatmul.mubr.msk.f32.gmra.mxu1 %vm14997_vm8, %v4299_v52 }
 0x53f   :  { %v9908_v61 = vpop.f32.mrf.mxu1  ;;  %v4654_v31 = vpop.f32.mrf.mxu0 }
 0x540   :  { %10334 = vmatprep.mubr.msk.f32.mxu0 %vm14997_vm8, %v4654_v31 }
 0x541   :  { %v4304_v45 = vpop.f32.mrf.mxu1  ;;  %v10096_v6 = vpop.f32.mrf.mxu0 }
 0x542   :  { %10351 = vmatprep.mubr.msk.f32.mxu1 %vm14997_vm8, %v4304_v45 }
 0x543   :  { %v9911_v42 = vpop.f32.mrf.mxu1  ;;  %v4659_v29 = vpop.f32.mrf.mxu0 }
 0x544   :  { %10335 = vmatmul.mubr.msk.f32.gmra.mxu0 %vm14997_vm8, %v4659_v29 }
 0x545   :  { %v4309_v28 = vpop.f32.mrf.mxu1  ;;  %v10099_v46 = vpop.f32.mrf.mxu0 }
 0x546   :  { %10352 = vmatmul.mubr.msk.f32.gmra.mxu1 %vm14997_vm8, %v4309_v28 }
 0x547   :  { %v9914_v59 = vpop.f32.mrf.mxu1  ;;  %v4664_v16 = vpop.f32.mrf.mxu0 }
 0x549   :  { %v4314_v49 = vpop.f32.mrf.mxu1  ;;  %v10102_v11 = vpop.f32.mrf.mxu0 }
 0x54a   :  { %10354 = vmatprep.mubr.msk.f32.mxu1 %vm14997_vm8, %v4314_v49 }
 0x54b   :  { %v9917_v3 = vpop.f32.mrf.mxu1  ;;  %v4669_v35 = vpop.f32.mrf.mxu0  ;;  %10355 = vmatmul.mubr.msk.f32.gmra.mxu1 %vm14997_vm8, %v4664_v16 }
 0x54c   :  { %10357 = vmatprep.mubr.msk.f32.mxu1 %vm14997_vm8, %v4669_v35 }
 0x54d   :  { %v4319_v33 = vpop.f32.mrf.mxu1  ;;  %v10105_v54 = vpop.f32.mrf.mxu0 }
 0x54e   :  { %10374 = vmatprep.mubr.msk.f32.mxu0 %vm14997_vm8, %v4319_v33 }
 0x54f   :  { %v9920_v8 = vpop.f32.mrf.mxu1  ;;  %v4674_v40 = vpop.f32.mrf.mxu0 }
 0x550   :  { %10358 = vmatmul.mubr.msk.f32.gmra.mxu1 %vm14997_vm8, %v4674_v40 }
 0x551   :  { %v4324_v48 = vpop.f32.mrf.mxu1  ;;  %v10108_v24 = vpop.f32.mrf.mxu0 }
 0x552   :  { %10375 = vmatmul.mubr.msk.f32.vlgmr.msra.gmra.mxu0 %vm14997_vm8, %v4324_v48 }
 0x553   :  { %v9923_v63 = vpop.f32.mrf.mxu1  ;;  %v4679_v5 = vpop.f32.mrf.mxu0 }
 0x554   :  { %10360 = vmatprep.mubr.msk.f32.mxu1 %vm14997_vm8, %v4679_v5 }
 0x555   :  { %v4329_v19 = vpop.f32.mrf.mxu1  ;;  %v10111_v12 = vpop.f32.mrf.mxu0 }
 0x556   :  { %10377 = vmatprep.mubr.msk.f32.mxu0 %vm14997_vm8, %v4329_v19 }
 0x557   :  { %v9926_v43 = vpop.f32.mrf.mxu1  ;;  %v4684_v30 = vpop.f32.mrf.mxu0 }
 0x558   :  { %10361 = vmatmul.mubr.msk.f32.gmra.mxu1 %vm14997_vm8, %v4684_v30 }
 0x559   :  { %v4334_v56 = vpop.f32.mrf.mxu1  ;;  %v10114_v23 = vpop.f32.mrf.mxu0 }
 0x55a   :  { %10378 = vmatmul.mubr.msk.f32.gmra.mxu0 %vm14997_vm8, %v4334_v56 }
 0x55b   :  { %v9929_v27 = vpop.f32.mrf.mxu1  ;;  %v4689_v0 = vpop.f32.mrf.mxu0 }
 0x55c   :  { %10363 = vmatprep.mubr.msk.f32.mxu1 %vm14997_vm8, %v4689_v0 }
 0x55d   :  { %v4339_v62 = vpop.f32.mrf.mxu1  ;;  %v10117_v26 = vpop.f32.mrf.mxu0 }
 0x55e   :  { %10380 = vmatprep.mubr.msk.f32.mxu0 %vm14997_vm8, %v4339_v62 }
 0x55f   :  { %v9932_v37 = vpop.f32.mrf.mxu1  ;;  %v4694_v25 = vpop.f32.mrf.mxu0 }
 0x560   :  { %10364 = vmatmul.mubr.msk.f32.gmra.mxu1 %vm14997_vm8, %v4694_v25 }
 0x561   :  { %v4344_v15 = vpop.f32.mrf.mxu1  ;;  %v10120_v9 = vpop.f32.mrf.mxu0 }
 0x562   :  { %10381 = vmatmul.mubr.msk.f32.gmra.mxu0 %vm14997_vm8, %v4344_v15 }
 0x563   :  { %v9935_v39 = vpop.f32.mrf.mxu1  ;;  %v4699_v36 = vpop.f32.mrf.mxu0 }
 0x565   :  { %v4349_v57 = vpop.f32.mrf.mxu1  ;;  %v10123_v13 = vpop.f32.mrf.mxu0 }
 0x566   :  { %10383 = vmatprep.mubr.msk.f32.mxu0 %vm14997_vm8, %v4349_v57 }
 0x567   :  { %v9938_v47 = vpop.f32.mrf.mxu1  ;;  %v4704_v1 = vpop.f32.mrf.mxu0  ;;  %10384 = vmatmul.mubr.msk.f32.gmra.mxu0 %vm14997_vm8, %v4699_v36 }
 0x568   :  { %10386 = vmatprep.mubr.msk.f32.mxu0 %vm14997_vm8, %v4704_v1 }
 0x569   :  { %v4354_v10 = vpop.f32.mrf.mxu1  ;;  %v10126_v44 = vpop.f32.mrf.mxu0 }
 0x56a   :  { %10403 = vmatprep.mubr.msk.f32.mxu1 %vm14997_vm8, %v4354_v10 }
 0x56b   :  { %v9941_v50 = vpop.f32.mrf.mxu1  ;;  %v4709_v4 = vpop.f32.mrf.mxu0 }
 0x56c   :  { %10387 = vmatmul.mubr.msk.f32.gmra.mxu0 %vm14997_vm8, %v4709_v4 }
 0x56d   :  { %v4359_v32 = vpop.f32.mrf.mxu1  ;;  %v10129_v7 = vpop.f32.mrf.mxu0 }
 0x56e   :  { %10404 = vmatmul.mubr.msk.f32.vlgmr.msra.gmra.mxu1 %vm14997_vm8, %v4359_v32 }
 0x56f   :  { %v9944_v21 = vpop.f32.mrf.mxu1  ;;  %v4714_v60 = vpop.f32.mrf.mxu0 }
 0x570   :  { %10389 = vmatprep.mubr.msk.f32.mxu0 %vm14997_vm8, %v4714_v60 }
 0x571   :  { %v4364_v38 = vpop.f32.mrf.mxu1  ;;  %v10132_v41 = vpop.f32.mrf.mxu0 }
 0x572   :  { %10406 = vmatprep.mubr.msk.f32.mxu1 %vm14997_vm8, %v4364_v38 }
 0x573   :  { %v9947_v51 = vpop.f32.mrf.mxu1  ;;  %v4719_v34 = vpop.f32.mrf.mxu0 }
 0x574   :  { %10390 = vmatmul.mubr.msk.f32.gmra.mxu0 %vm14997_vm8, %v4719_v34 }
 0x575   :  { %v4369_v53 = vpop.f32.mrf.mxu1  ;;  %v10135_v2 = vpop.f32.mrf.mxu0 }
 0x576   :  { %10407 = vmatmul.mubr.msk.f32.gmra.mxu1 %vm14997_vm8, %v4369_v53 }
 0x577   :  { %v9950_v17 = vpop.f32.mrf.mxu1  ;;  %v4724_v20 = vpop.f32.mrf.mxu0 }
 0x578   :  { %10392 = vmatprep.mubr.msk.f32.mxu0 %vm14997_vm8, %v4724_v20 }
 0x579   :  { %v4374_v22 = vpop.f32.mrf.mxu1  ;;  %v10138_v14 = vpop.f32.mrf.mxu0 }
 0x57a   :  { %10409 = vmatprep.mubr.msk.f32.mxu1 %vm14997_vm8, %v4374_v22 }
 0x57b   :  { %v9953_v55 = vpop.f32.mrf.mxu1  ;;  %v4729_v52 = vpop.f32.mrf.mxu0 }
 0x57c   :  { %10393 = vmatmul.mubr.msk.f32.gmra.mxu0 %vm14997_vm8, %v4729_v52 }
 0x57d   :  { %v4379_v18 = vpop.f32.mrf.mxu1  ;;  %v10141_v61 = vpop.f32.mrf.mxu0  ;;  %6665 = vmatprep.mubr.f32.mxu0 %v15015_v58 }
 0x57e   :  { %10410 = vmatmul.mubr.msk.f32.gmra.mxu1 %vm14997_vm8, %v4379_v18 }
 0x57f   :  { %v9956_v31 = vpop.f32.mrf.mxu1  ;;  %v4734_v45 = vpop.f32.mrf.mxu0 }
 0x581   :  { %v4384_v6 = vpop.f32.mrf.mxu1  ;;  %v10144_v42 = vpop.f32.mrf.mxu0 }
 0x582   :  { %10412 = vmatprep.mubr.msk.f32.mxu1 %vm14997_vm8, %v4384_v6 }
 0x583   :  { %v9959_v29 = vpop.f32.mrf.mxu1  ;;  %v4739_v28 = vpop.f32.mrf.mxu0  ;;  %10413 = vmatmul.mubr.msk.f32.gmra.mxu1 %vm14997_vm8, %v4734_v45 }
 0x584   :  { %10415 = vmatprep.mubr.msk.f32.mxu1 %vm14997_vm8, %v4739_v28  ;;  %v6534_v28 = vld [vmem:[%s14976_s9 + $0x68] sm:$0xff] }
 0x585   :  { %v10147_v46 = vpop.f32.mrf.mxu0  ;;  %v10173_v59 = vpop.f32.mrf.mxu1  ;;  %6625 = vmatprep.subr.mxu0 %v6534_v28 }
 0x586   :  { %v6536_v46 = vld [vmem:[%s14976_s9 + $0x78] sm:$0xff] }
 0x587   :  { %v4744_v16 = vpop.f32.mrf.mxu0  ;;  %v4876_v49 = vpop.f32.mrf.mxu1  ;;  %6774 = vmatprep.subr.mxu1 %v6536_v46 }
 0x588   :  { %10416 = vmatmul.mubr.msk.f32.gmra.mxu1 %vm14997_vm8, %v4744_v16 }
 0x589   :  { %v10150_v11 = vpop.f32.mrf.mxu0  ;;  %v10176_v3 = vpop.f32.mrf.mxu1 }
 0x58a   :  { %v6535_v11 = vld [vmem:[%s14976_s9 + $0x70] sm:$0xff] }
 0x58b   :  { %v4749_v35 = vpop.f32.mrf.mxu0  ;;  %v4886_v33 = vpop.f32.mrf.mxu1  ;;  %6775 = vmatpush1.msra.mxu1 %v6535_v11 }
 0x58c   :  { %10418 = vmatprep.mubr.msk.f32.mxu1 %vm14997_vm8, %v4749_v35 }
 0x58d   :  { %v10153_v54 = vpop.f32.mrf.mxu0  ;;  %v10179_v8 = vpop.f32.mrf.mxu1 }
 0x58e   :  { %v6532_v54 = vld [vmem:[%s14976_s9 + $0x58] sm:$0xff] }
 0x58f   :  { %v4754_v40 = vpop.f32.mrf.mxu0  ;;  %v4896_v48 = vpop.f32.mrf.mxu1  ;;  %6776 = vmatprep.subr.mxu1 %v6532_v54 }
 0x590   :  { %10419 = vmatmul.mubr.msk.f32.gmra.mxu1 %vm14997_vm8, %v4754_v40 }
 0x591   :  { %v10156_v24 = vpop.f32.mrf.mxu0  ;;  %v10182_v63 = vpop.f32.mrf.mxu1 }
 0x592   :  { %v6531_v24 = vld [vmem:[%s14976_s9 + $0x50] sm:$0xff] }
 0x593   :  { %v4759_v5 = vpop.f32.mrf.mxu0  ;;  %v4906_v19 = vpop.f32.mrf.mxu1  ;;  %6777 = vmatpush1.msra.mxu1 %v6531_v24 }
 0x594   :  { %10421 = vmatprep.mubr.msk.f32.mxu1 %vm14997_vm8, %v4759_v5 }
 0x595   :  { %v10159_v12 = vpop.f32.mrf.mxu0  ;;  %v10185_v43 = vpop.f32.mrf.mxu1 }
 0x596   :  { %v6528_v12 = vld [vmem:[%s14976_s9 + $0x38] sm:$0xff] }
 0x597   :  { %v4764_v30 = vpop.f32.mrf.mxu0  ;;  %v4916_v56 = vpop.f32.mrf.mxu1  ;;  %6778 = vmatprep.subr.mxu1 %v6528_v12 }
 0x598   :  { %10422 = vmatmul.mubr.msk.f32.gmra.mxu1 %vm14997_vm8, %v4764_v30 }
 0x599   :  { %v10162_v23 = vpop.f32.mrf.mxu0  ;;  %v10188_v27 = vpop.f32.mrf.mxu1  ;;  %6814 = vmatprep.mubr.f32.mxu1 %v15015_v58 }
 0x59a   :  { %v6527_v23 = vld [vmem:[%s14976_s9 + $0x30] sm:$0xff] }
 0x59b   :  { %v13561_v0 = vpop.f32.mrf.mxu1  ;;  %v10202_v62 = vpop.f32.mrf.mxu0  ;;  %6779 = vmatpush1.msra.mxu1 %v6527_v23  ;;  %v7098_v23 = vld [vmem:[%s14978_s11 + $0xf8] sm:$0xff] }
 0x59c   :  { %v5059_v26 = vadd.f32 %v10202_v62, %v10173_v59 }
 0x59d   :  { %v10191_v37 = vpop.f32.mrf.mxu1  ;;  %v5053_v25 = vpop.f32.mrf.mxu0 }
 0x59e   :  { %v5054_v13 = vadd.f32 %v5053_v25, %v4876_v49  ;;  %v6533_v49 = vld [vmem:[%s14976_s9 + $0x60] sm:$0xff] }
 0x59f   :  { %v13563_v15 = vpop.f32.mrf.mxu1  ;;  %v10205_v9 = vpop.f32.mrf.mxu0  ;;  %6626 = vmatpush1.msra.mxu0 %v6533_v49 }
 0x5a0   :  { %v5069_v39 = vadd.f32 %v10205_v9, %v10176_v3 }
 0x5a1   :  { %v5063_v36 = vpop.f32.mrf.mxu0  ;;  %v10231_v57 = vpop.f32.mrf.mxu1 }
 0x5a2   :  { %v13565_v47 = vadd.f32 %v10231_v57, %v5059_v26  ;;  %v5064_v7 = vadd.f32 %v5063_v36, %v4886_v33  ;;  %v6530_v33 = vld [vmem:[%s14976_s9 + $0x48] sm:$0xff] }
 0x5a3   :  { %v10208_v1 = vpop.f32.mrf.mxu0  ;;  %v5230_v10 = vpop.f32.mrf.mxu1  ;;  %6627 = vmatprep.subr.mxu0 %v6530_v33  ;;  %v6522_v26 = vld [vmem:[%s14976_s9 + $0x8] sm:$0xff] }
 0x5a4   :  { %v5079_v44 = vadd.f32 %v10208_v1, %v10179_v8  ;;  %v13567_v50 = vadd.f32 %v5230_v10, %v5054_v13 }
 0x5a5   :  { %v5073_v4 = vpop.f32.mrf.mxu0  ;;  %v10234_v32 = vpop.f32.mrf.mxu1 }
 0x5a6   :  { %v13569_v21 = vadd.f32 %v10234_v32, %v5069_v39  ;;  %v5074_v2 = vadd.f32 %v5073_v4, %v4896_v48  ;;  %v6529_v48 = vld [vmem:[%s14976_s9 + $0x40] sm:$0xff]  ;;  %v6523_v39 = vld [vmem:[%s14976_s9 + $0x10] sm:$0xff] }
 0x5a7   :  { %v10211_v60 = vpop.f32.mrf.mxu0  ;;  %v5240_v38 = vpop.f32.mrf.mxu1  ;;  %6628 = vmatpush1.msra.mxu0 %v6529_v48 }
 0x5a8   :  { %v5089_v41 = vadd.f32 %v10211_v60, %v10182_v63  ;;  %v13571_v51 = vadd.f32 %v5240_v38, %v5064_v7 }
 0x5a9   :  { %v5083_v34 = vpop.f32.mrf.mxu0  ;;  %v10237_v53 = vpop.f32.mrf.mxu1 }
 0x5aa   :  { %v13573_v17 = vadd.f32 %v10237_v53, %v5079_v44  ;;  %v5084_v61 = vadd.f32 %v5083_v34, %v4906_v19  ;;  %v6526_v19 = vld [vmem:[%s14976_s9 + $0x28] sm:$0xff] }
 0x5ab   :  { %v10214_v20 = vpop.f32.mrf.mxu0  ;;  %v5250_v22 = vpop.f32.mrf.mxu1  ;;  %6629 = vmatprep.subr.mxu0 %v6526_v19 }
 0x5ac   :  { %v5099_v14 = vadd.f32 %v10214_v20, %v10185_v43  ;;  %v13575_v55 = vadd.f32 %v5250_v22, %v5074_v2 }
 0x5ad   :  { %v5093_v52 = vpop.f32.mrf.mxu0  ;;  %v10240_v18 = vpop.f32.mrf.mxu1 }
 0x5ae   :  { %v13577_v31 = vadd.f32 %v10240_v18, %v5089_v41  ;;  %v5094_v3 = vadd.f32 %v5093_v52, %v4916_v56  ;;  %v6525_v56 = vld [vmem:[%s14976_s9 + $0x20] sm:$0xff] }
 0x5af   :  { %v10217_v45 = vpop.f32.mrf.mxu0  ;;  %v5260_v6 = vpop.f32.mrf.mxu1  ;;  %6630 = vmatpush1.msra.mxu0 %v6525_v56 }
 0x5b0   :  { %v5109_v42 = vadd.f32 %v10217_v45, %v10188_v27  ;;  %v13579_v29 = vadd.f32 %v5260_v6, %v5084_v61  ;;  %6631 = vmatprep.subr.mxu0 %v6522_v26 }
 0x5b1   :  { %v5103_v59 = vpop.f32.mrf.mxu0  ;;  %v10243_v16 = vpop.f32.mrf.mxu1 }
 0x5b2   :  { %v5308_v35 = vadd.f32 %v10243_v16, %v5099_v14  ;;  %v5104_v27 = vadd.f32 %v5103_v59, %v13561_v0  ;;  %v6521_v0 = vld [vmem:[%s14976_s9] sm:$0xff] }
 0x5b3   :  { %v10220_v8 = vpop.f32.mrf.mxu0  ;;  %v5270_v40 = vpop.f32.mrf.mxu1  ;;  %6632 = vmatpush1.msra.mxu0 %v6521_v0 }
 0x5b4   :  { %v5119_v63 = vadd.f32 %v10220_v8, %v10191_v37  ;;  %v5307_v5 = vadd.f32 %v5270_v40, %v5094_v3  ;;  %v6524_v37 = vld [vmem:[%s14976_s9 + $0x18] sm:$0xff]  ;;  %9267 = vmatprep.subr.mxu0 %v7098_v23 }
 0x5b5   :  { %v5113_v43 = vpop.f32.mrf.mxu0  ;;  %v10246_v30 = vpop.f32.mrf.mxu1  ;;  %6780 = vmatprep.subr.mxu1 %v6524_v37 }
 0x5b6   :  { %v5310_v62 = vadd.f32 %v10246_v30, %v5109_v42  ;;  %6781 = vmatpush1.msra.mxu1 %v6523_v39  ;;  %v5114_v1 = vadd.f32 %v5113_v43, %v13563_v15 }
 0x5b7   :  { %v5280_v25 = vpop.f32.mrf.mxu1  ;;  %v13624_v9 = vpop.f32.mrf.mxu0 }
 0x5b8   :  { %v5309_v36 = vadd.f32 %v5280_v25, %v5104_v27  ;;  %v7130_v27 = vld [vmem:[%s14978_s11 + $0x1f8] sm:$0xff] }
 0x5b9   :  { %v10249_v57 = vpop.f32.mrf.mxu1  ;;  %v13632_v13 = vpop.f32.mrf.mxu0  ;;  %9341 = vmatprep.subr.mxu1 %v7130_v27 }
 0x5ba   :  { %v5312_v10 = vadd.f32 %v10249_v57, %v5119_v63 }
 0x5bb   :  { %v5290_v44 = vpop.f32.mrf.mxu1  ;;  %v13635_v4 = vpop.f32.mrf.mxu0 }
 0x5bc   :  { %v5311_v32 = vadd.f32 %v5290_v44, %v5114_v1 }
 0x5bd   :  { %v13637_v7 = vpop.f32.mrf.mxu0 }
 0x5be   :  { %v13643_v41 = vpop.f32.mrf.mxu1 }
 0x5bf   :  { %v13639_v60 = vpop.f32.mrf.mxu0 }
 0x5c0   :  { %v13648_v20 = vpop.f32.mrf.mxu1 }
 0x5c1   :  { %v13641_v38 = vpop.f32.mrf.mxu0 }
 0x5c3   :  { %v10269_v34 = vpop.f32.mrf.mxu0 }
 0x5c4   :  { %v5497_v53 = vadd.f32 %v10269_v34, %v13577_v31 }
 0x5c5   :  { %v13646_v2 = vpop.f32.mrf.mxu0 }
 0x5c6   :  { %v13650_v22 = vpop.f32.mrf.mxu1 }
 0x5c7   :  { %v10272_v15 = vpop.f32.mrf.mxu0 }
 0x5c8   :  { %v5499_v14 = vadd.f32 %v10272_v15, %v5308_v35  ;;  %v13652_v45 = vpop.f32.mrf.mxu1 }
 0x5c9   :  { %v5461_v52 = vpop.f32.mrf.mxu0 }
 0x5ca   :  { %v5498_v18 = vadd.f32 %v5461_v52, %v5307_v5 }
 0x5cb   :  { %v10275_v61 = vpop.f32.mrf.mxu0 }
 0x5cc   :  { %v5501_v6 = vadd.f32 %v10275_v61, %v5310_v62 }
 0x5cd   :  { %v5471_v42 = vpop.f32.mrf.mxu0 }
 0x5ce   :  { %v5500_v28 = vadd.f32 %v5471_v42, %v5309_v36  ;;  %v13654_v46 = vpop.f32.mrf.mxu1 }
 0x5cf   :  { %v10278_v59 = vpop.f32.mrf.mxu0 }
 0x5d0   :  { %v5503_v31 = vadd.f32 %v10278_v59, %v5312_v10  ;;  %v13656_v16 = vpop.f32.mrf.mxu1 }
 0x5d1   :  { %v5481_v49 = vpop.f32.mrf.mxu0 }
 0x5d2   :  { %v5502_v11 = vadd.f32 %v5481_v49, %v5311_v32 }
 0x5d3   :  { %v10298_v3 = vpop.f32.mrf.mxu1 }
 0x5d4   :  { %v13658_v33 = vadd.f32 %v10298_v3, %v5497_v53 }
 0x5d5   :  { %v13660_v35 = vpop.f32.mrf.mxu1 }
 0x5d8   :  { %v10301_v54 = vpop.f32.mrf.mxu1 }
 0x5d9   :  { %v13662_v8 = vadd.f32 %v10301_v54, %v5499_v14 }
 0x5da   :  { %v5652_v40 = vpop.f32.mrf.mxu1  ;;  %v10318_v62 = vpop.f32.mrf.mxu0 }
 0x5db   :  { %v13664_v48 = vadd.f32 %v5652_v40, %v5498_v18  ;;  %v5490_v40 = vadd.f32 %v13632_v13, %v13567_v50  ;;  %v5492_v50 = vadd.f32 %v13637_v7, %v13571_v51 }
 0x5dc   :  { %v5803_v26 = vpop.f32.mrf.mxu0 }
 0x5e0   :  { %v10304_v24 = vpop.f32.mrf.mxu1 }
 0x5e1   :  { %v13666_v63 = vadd.f32 %v10304_v24, %v5501_v6 }
 0x5e2   :  { %v5662_v5 = vpop.f32.mrf.mxu1  ;;  %v10321_v37 = vpop.f32.mrf.mxu0 }
 0x5e3   :  { %v13668_v19 = vadd.f32 %v5662_v5, %v5500_v28 }
 0x5e4   :  { %v5813_v0 = vpop.f32.mrf.mxu0 }
 0x5e8   :  { %v10307_v12 = vpop.f32.mrf.mxu1 }
 0x5e9   :  { %v13670_v43 = vadd.f32 %v10307_v12, %v5503_v31  ;;  %v5681_v12 = vadd.f32 %v13648_v20, %v5490_v40 }
 0x5ea   :  { %v5672_v30 = vpop.f32.mrf.mxu1  ;;  %v13680_v39 = vpop.f32.mrf.mxu0 }
 0x5eb   :  { %15068 = vst [vmem:[#allocation6_spill] sm:$0xff] %v13670_v43  ;;  %v13672_v56 = vadd.f32 %v5672_v30, %v5502_v11  ;;  %v5491_v11 = vadd.f32 %v13624_v9, %v13565_v47  ;;  %v5872_v27 = vadd.f32 %v5803_v26, %v5681_v12  ;;  %v5493_v47 = vadd.f32 %v13635_v4, %v13569_v21  ;;  %v13734_v26 = vld [vmem:[%s14975_s8] ss:$0 sm:$0xff] }
 0x5ec   :  { %v13682_v1 = vpop.f32.mrf.mxu0 }
 0x5ed   :  { %15069 = vst [vmem:[#allocation12_spill] sm:$0xff] %v13672_v56  ;;  %v5682_v24 = vadd.f32 %v13643_v41, %v5491_v11  ;;  %v5684_v13 = vadd.f32 %v13650_v22, %v5493_v47  ;;  %v5683_v11 = vadd.f32 %v13652_v45, %v5492_v50  ;;  %v5495_v22 = vadd.f32 %v13639_v60, %v13573_v17  ;;  %v7114_v17 = vld [vmem:[%s14978_s11 + $0x178] sm:$0xff] }
 0x5ef   :  { %v13684_v44 = vpop.f32.mrf.mxu0  ;;  %v5873_v30 = vadd.f32 %v10318_v62, %v5682_v24  ;;  %v5875_v21 = vadd.f32 %v10321_v37, %v5684_v13  ;;  %v5494_v24 = vadd.f32 %v13641_v38, %v13575_v55  ;;  %v5686_v45 = vadd.f32 %v13654_v46, %v5495_v22  ;;  %v7097_v46 = vld [vmem:[%s14978_s11 + $0xf0] sm:$0xff] }
 0x5f1   :  { %v13688_v34 = vpop.f32.mrf.mxu0  ;;  %v5685_v60 = vadd.f32 %v13656_v16, %v5494_v24  ;;  %v5877_v55 = vadd.f32 %v13680_v39, %v5686_v45 }
 0x5f3   :  { %v5876_v16 = vadd.f32 %v13682_v1, %v5685_v60  ;;  %v7113_v1 = vld [vmem:[%s14978_s11 + $0x170] sm:$0xff] }
 0x5f4   :  { %v13692_v15 = vpop.f32.mrf.mxu0 }
 0x5f6   :  { %v10347_v25 = vpop.f32.mrf.mxu1  ;;  %v13696_v52 = vpop.f32.mrf.mxu0 }
 0x5f8   :  { %v5994_v36 = vpop.f32.mrf.mxu1 }
 0x5f9   :  { %v6063_v9 = vadd.f32 %v5994_v36, %v5872_v27  ;;  %v7082_v27 = vld [vmem:[%s14978_s11 + $0x78] sm:$0xff] }
 0x5fc   :  { %v13700_v61 = vpop.f32.mrf.mxu0 }
 0x5fe   :  { %v10350_v57 = vpop.f32.mrf.mxu1  ;;  %v13704_v42 = vpop.f32.mrf.mxu0 }
 0x600   :  { %v6004_v10 = vpop.f32.mrf.mxu1 }
 0x604   :  { %v13706_v28 = vpop.f32.mrf.mxu0 }
 0x605   :  { %15070 = vst [vmem:[#allocation5_spill] sm:$0xff] %v13706_v28  ;;  %v6064_v28 = vadd.f32 %v10347_v25, %v5873_v30 }
 0x606   :  { %v13686_v32 = vpop.f32.mrf.mxu1  ;;  %v13712_v49 = vpop.f32.mrf.mxu0 }
 0x607   :  { %15072 = vst [vmem:[#allocation14_spill] sm:$0xff] %v13712_v49  ;;  %v6068_v39 = vadd.f32 %v13686_v32, %v5877_v55  ;;  %v5496_v32 = vadd.f32 %v13646_v2, %v13579_v29 }
 0x608   :  { %v13690_v53 = vpop.f32.mrf.mxu1 }
 0x609   :  { %v5687_v29 = vadd.f32 %v13660_v35, %v5496_v32  ;;  %v5879_v35 = vadd.f32 %v13684_v44, %v13658_v33 }
 0x60b   :  { %v13694_v14 = vpop.f32.mrf.mxu1  ;;  %v5878_v22 = vadd.f32 %v13688_v34, %v5687_v29  ;;  %v7092_v29 = vld [vmem:[%s14978_s11 + $0xc8] sm:$0xff] }
 0x60c   :  { %v6070_v33 = vadd.f32 %v13694_v14, %v5879_v35  ;;  %v7111_v14 = vld [vmem:[%s14978_s11 + $0x160] sm:$0xff] }
 0x60d   :  { %v13698_v18 = vpop.f32.mrf.mxu1 }
 0x60e   :  { %v6069_v44 = vadd.f32 %v13698_v18, %v5878_v22  ;;  %v7091_v22 = vld [vmem:[%s14978_s11 + $0xc0] sm:$0xff] }
 0x610   :  { %v13702_v6 = vpop.f32.mrf.mxu1 }
 0x612   :  { %v13708_v59 = vpop.f32.mrf.mxu1  ;;  %v10376_v3 = vpop.f32.mrf.mxu0 }
 0x613   :  { %v6255_v56 = vadd.f32 %v10376_v3, %v6064_v28  ;;  %v5874_v28 = vadd.f32 %v5813_v0, %v5683_v11  ;;  %v6066_v3 = vadd.f32 %v10350_v57, %v5875_v21 }
 0x614   :  { %v6185_v23 = vpop.f32.mrf.mxu0 }
 0x615   :  { %v6254_v41 = vadd.f32 %v6185_v23, %v6063_v9 }
 0x618   :  { %v13710_v31 = vpop.f32.mrf.mxu1 }
 0x619   :  { %15071 = vst [vmem:[#allocation13_spill] sm:$0xff] %v13710_v31 }
 0x61a   :  { %v13716_v54 = vpop.f32.mrf.mxu1  ;;  %v10379_v43 = vpop.f32.mrf.mxu0 }
 0x61c   :  { %v6195_v62 = vpop.f32.mrf.mxu0 }
 0x620   :  { %v13721_v5 = vpop.f32.mrf.mxu1 }
 0x622   :  { %v13724_v49 = vpop.f32.mrf.mxu1  ;;  %v10382_v36 = vpop.f32.mrf.mxu0 }
 0x623   :  { %v6259_v11 = vadd.f32 %v10382_v36, %v6068_v39  ;;  %v7112_v36 = vld [vmem:[%s14978_s11 + $0x168] sm:$0xff] }
 0x624   :  { %v6205_v37 = vpop.f32.mrf.mxu0 }
 0x627   :  { %v13764_v47 = vpop.f32.mrf.mxu0 }
 0x629   :  { %v6215_v2 = vpop.f32.mrf.mxu0 }
 0x62a   :  { %v6260_v18 = vadd.f32 %v6215_v2, %v6069_v44  ;;  %v7124_v2 = vld [vmem:[%s14978_s11 + $0x1c8] sm:$0xff] }
 0x62c   :  { %v13810_v34 = vpop.f32.mrf.mxu0 }
 0x62e   :  { %v10405_v31 = vpop.f32.mrf.mxu1 }
 0x62f   :  { %v6446_v20 = vadd.f32 %v10405_v31, %v6255_v56  ;;  %v6065_v56 = vadd.f32 %v6004_v10, %v5874_v28  ;;  %v6257_v31 = vadd.f32 %v10379_v43, %v6066_v3  ;;  %v7129_v43 = vld [vmem:[%s14978_s11 + $0x1f0] sm:$0xff] }
 0x630   :  { %v6376_v25 = vpop.f32.mrf.mxu1 }
 0x631   :  { %v6445_v4 = vadd.f32 %v6376_v25, %v6254_v41  ;;  %v6466_v51 = vadd.f32 %v13734_v26, %v6446_v20  ;;  %v6256_v0 = vadd.f32 %v6195_v62, %v6065_v56  ;;  %v7081_v41 = vld [vmem:[%s14978_s11 + $0x70] sm:$0xff]  ;;  %v7096_v20 = vld [vmem:[%s14978_s11 + $0xe8] sm:$0xff]  ;;  %v6067_v25 = vadd.f32 %v13690_v53, %v5876_v16 }
 0x632   :  { %v7128_v62 = vld [vmem:[%s14978_s11 + $0x1e8] sm:$0xff] }
 0x633   :  { %v6465_v7 = vadd.f32 %v13734_v26, %v6445_v4  ;;  %v6494_v57 = vmul.f32 0.01, %v6466_v51  ;;  %vm6480_vm10 = vcmp.gt.f32.partialorder %v6466_v51, 0.0  ;;  %v6258_v28 = vadd.f32 %v6205_v37, %v6067_v25  ;;  %v7080_v53 = vld [vmem:[%s14978_s11 + $0x68] sm:$0xff] }
 0x635   :  { %vm6479_vm2 = vcmp.gt.f32.partialorder %v6465_v7, 0.0  ;;  %v6493_v40 = vmul.f32 0.01, %v6465_v7  ;;  %v6508_v13 = vsel %vm6480_vm10, %v6466_v51, %v6494_v57  ;;  %v7079_v57 = vld [vmem:[%s14978_s11 + $0x60] sm:$0xff] }
 0x636   :  { %v10408_v12 = vpop.f32.mrf.mxu1 }
 0x637   :  { %v6507_v30 = vsel %vm6479_vm2, %v6465_v7, %v6493_v40  ;;  %v6448_v23 = vadd.f32 %v10408_v12, %v6257_v31  ;;  %v7095_v31 = vld [vmem:[%s14978_s11 + $0xe0] sm:$0xff] }
 0x638   :  { %v6386_v38 = vpop.f32.mrf.mxu1  ;;  %8567 = vmatmul.mubr.msk.f32.vlgmr.msra.gmra.mxu0 %vm14997_vm8, %v6507_v30  ;;  %8581 = vmatmul.mubr.msk.f32.vlgmr.msra.gmra.mxu1 %vm14997_vm8, %v6507_v30  ;;  %v7127_v40 = vld [vmem:[%s14978_s11 + $0x1e0] sm:$0xff]  ;;  %v7094_v30 = vld [vmem:[%s14978_s11 + $0xd8] sm:$0xff] }
 0x639   :  { %v6447_v10 = vadd.f32 %v6386_v38, %v6256_v0  ;;  %6671 = vmatprep.mubr.f32.mxu0 %v15015_v58  ;;  %6820 = vmatprep.mubr.f32.mxu1 %v15015_v58  ;;  %v6468_v9 = vadd.f32 %v13734_v26, %v6448_v23  ;;  %v7126_v23 = vld [vmem:[%s14978_s11 + $0x1d8] sm:$0xff]  ;;  %v6225_v38 = vpop.f32.mrf.mxu0 }
 0x63a   :  { %9268 = vmatpush3.msra.mxu0 %v7082_v27  ;;  %9342 = vmatpush3.msra.mxu1 %v7114_v17  ;;  %v5880_v27 = vadd.f32 %v13696_v52, %v13664_v48  ;;  %v6261_v17 = vadd.f32 %v13764_v47, %v6070_v33  ;;  %v7078_v48 = vld [vmem:[%s14978_s11 + $0x58] sm:$0xff]  ;;  %v5881_v47 = vadd.f32 %v13692_v15, %v13662_v8 }
 0x63b   :  { %v6467_v50 = vadd.f32 %v13734_v26, %v6447_v10  ;;  %9269 = vmatprep.subr.mxu0 %v7097_v46  ;;  %9343 = vmatprep.subr.mxu1 %v7129_v43  ;;  %v6496_v3 = vmul.f32 0.01, %v6468_v9  ;;  %vm6482_vm12 = vcmp.gt.f32.partialorder %v6468_v9, 0.0  ;;  %v7110_v52 = vld [vmem:[%s14978_s11 + $0x158] sm:$0xff]  ;;  %v10391_v15 = vpop.f32.mrf.mxu0 }
 0x63c   :  { %8568 = vmatmul.mubr.msk.f32.gmra.mxu0 %vm14997_vm8, %v6508_v13  ;;  %8582 = vmatmul.mubr.msk.f32.gmra.mxu1 %vm14997_vm8, %v6508_v13  ;;  %v6071_v43 = vadd.f32 %v13708_v59, %v5880_v27  ;;  %v7125_v13 = vld [vmem:[%s14978_s11 + $0x1d0] sm:$0xff]  ;;  %v6072_v8 = vadd.f32 %v13702_v6, %v5881_v47 }
 0x63d   :  { %vm6481_vm11 = vcmp.gt.f32.partialorder %v6467_v50, 0.0  ;;  %v6495_v21 = vmul.f32 0.01, %v6467_v50  ;;  %6677 = vmatprep.mubr.f32.mxu0 %v15015_v58  ;;  %6826 = vmatprep.mubr.f32.mxu1 %v15015_v58  ;;  %v6510_v0 = vsel %vm6482_vm12, %v6468_v9, %v6496_v3  ;;  %v7109_v6 = vld [vmem:[%s14978_s11 + $0x150] sm:$0xff] }
 0x63e   :  { %v10411_v4 = vpop.f32.mrf.mxu1  ;;  %9270 = vmatpush3.msra.mxu0 %v7081_v41  ;;  %9344 = vmatpush3.msra.mxu1 %v7113_v1  ;;  %v6262_v41 = vadd.f32 %v6225_v38, %v6071_v43  ;;  %v7074_v43 = vld [vmem:[%s14978_s11 + $0x38] sm:$0xff]  ;;  %v7121_v47 = vld [vmem:[%s14978_s11 + $0x1b0] sm:$0xff] }
 0x63f   :  { %v6450_v51 = vadd.f32 %v10411_v4, %v6259_v11  ;;  %v6509_v7 = vsel %vm6481_vm11, %v6467_v50, %v6495_v21  ;;  %9271 = vmatprep.subr.mxu0 %v7096_v20  ;;  %9345 = vmatprep.subr.mxu1 %v7128_v62  ;;  %v7093_v50 = vld [vmem:[%s14978_s11 + $0xd0] sm:$0xff]  ;;  %v5882_v21 = vadd.f32 %v13704_v42, %v13668_v19  ;;  %v6235_v42 = vpop.f32.mrf.mxu0 }
 0x640   :  { %v6396_v56 = vpop.f32.mrf.mxu1  ;;  %8569 = vmatmul.mubr.msk.f32.gmra.mxu0 %vm14997_vm8, %v6509_v7  ;;  %8583 = vmatmul.mubr.msk.f32.gmra.mxu1 %vm14997_vm8, %v6509_v7  ;;  %v7077_v11 = vld [vmem:[%s14978_s11 + $0x50] sm:$0xff]  ;;  %v6263_v4 = vadd.f32 %v13810_v34, %v6072_v8 }
 0x641   :  { %v6449_v24 = vadd.f32 %v6396_v56, %v6258_v28  ;;  %6683 = vmatprep.mubr.f32.mxu0 %v15015_v58  ;;  %6832 = vmatprep.mubr.f32.mxu1 %v15015_v58  ;;  %v6470_v45 = vadd.f32 %v13734_v26, %v6450_v51  ;;  %v6073_v19 = vadd.f32 %v13716_v54, %v5882_v21  ;;  %v7123_v56 = vld [vmem:[%s14978_s11 + $0x1c0] sm:$0xff] }
 0x642   :  { %9272 = vmatpush3.msra.mxu0 %v7080_v53  ;;  %9346 = vmatpush3.msra.mxu1 %v7112_v36  ;;  %v7076_v53 = vld [vmem:[%s14978_s11 + $0x48] sm:$0xff]  ;;  %v5883_v54 = vadd.f32 %v13700_v61, %v13666_v63 }
 0x643   :  { %v6469_v37 = vadd.f32 %v13734_v26, %v6449_v24  ;;  %v10414_v12 = vpop.f32.mrf.mxu1  ;;  %9273 = vmatprep.subr.mxu0 %v7095_v31  ;;  %9347 = vmatprep.subr.mxu1 %v7127_v40  ;;  %v6498_v10 = vmul.f32 0.01, %v6470_v45  ;;  %vm6484_vm14 = vcmp.gt.f32.partialorder %v6470_v45, 0.0  ;;  %v7108_v36 = vld [vmem:[%s14978_s11 + $0x148] sm:$0xff]  ;;  %v6264_v31 = vadd.f32 %v6235_v42, %v6073_v19  ;;  %v10394_v40 = vpop.f32.mrf.mxu0  ;;  %v7119_v19 = vld [vmem:[%s14978_s11 + $0x1a0] sm:$0xff] }
 0x644   :  { %8570 = vmatmul.mubr.msk.f32.gmra.mxu0 %vm14997_vm8, %v6510_v0  ;;  %8584 = vmatmul.mubr.msk.f32.gmra.mxu1 %vm14997_vm8, %v6510_v0  ;;  %v6452_v16 = vadd.f32 %v10414_v12, %v6261_v17  ;;  %v15073_v63 = vld [vmem:[#allocation13_spill] sm:$0xff]  ;;  %v15074_v0 = vld [vmem:[#allocation12_spill] sm:$0xff] }
 0x645   :  { %vm6483_vm13 = vcmp.gt.f32.partialorder %v6469_v37, 0.0  ;;  %v6497_v60 = vmul.f32 0.01, %v6469_v37  ;;  %v6406_v55 = vpop.f32.mrf.mxu1  ;;  %6689 = vmatprep.mubr.f32.mxu0 %v15015_v58  ;;  %6838 = vmatprep.mubr.f32.mxu1 %v15015_v58  ;;  %v6512_v25 = vsel %vm6484_vm14, %v6470_v45, %v6498_v10  ;;  %v6074_v61 = vadd.f32 %v15073_v63, %v5883_v54  ;;  %v7107_v12 = vld [vmem:[%s14978_s11 + $0x140] sm:$0xff]  ;;  %v6245_v17 = vpop.f32.mrf.mxu0  ;;  %v7106_v10 = vld [vmem:[%s14978_s11 + $0x138] sm:$0xff]  ;;  %v7069_v63 = vld [vmem:[%s14978_s11 + $0x10] sm:$0xff] }
 0x646   :  { %v6451_v46 = vadd.f32 %v6406_v55, %v6260_v18  ;;  %9274 = vmatpush3.msra.mxu0 %v7079_v57  ;;  %9348 = vmatpush3.msra.mxu1 %v7111_v14  ;;  %v6472_v32 = vadd.f32 %v13734_v26, %v6452_v16  ;;  %v15075_v57 = vld [vmem:[#allocation14_spill] sm:$0xff]  ;;  %v7090_v18 = vld [vmem:[%s14978_s11 + $0xb8] sm:$0xff] }
 0x647   :  { %v6511_v39 = vsel %vm6483_vm13, %v6469_v37, %v6497_v60  ;;  %9275 = vmatprep.subr.mxu0 %v7094_v30  ;;  %9349 = vmatprep.subr.mxu1 %v7126_v23  ;;  %v7075_v37 = vld [vmem:[%s14978_s11 + $0x40] sm:$0xff]  ;;  %v5884_v14 = vadd.f32 %v15075_v57, %v15074_v0  ;;  %v7122_v30 = vld [vmem:[%s14978_s11 + $0x1b8] sm:$0xff]  ;;  %v6265_v23 = vadd.f32 %v10391_v15, %v6074_v61  ;;  %v15076_v16 = vld [vmem:[#allocation6_spill] sm:$0xff]  ;;  %v6539_v0 = vlaneseq }
 0x648   :  { %v6471_v9 = vadd.f32 %v13734_v26, %v6451_v46  ;;  %v10417_v59 = vpop.f32.mrf.mxu1  ;;  %8571 = vmatmul.mubr.msk.f32.gmra.mxu0 %vm14997_vm8, %v6511_v39  ;;  %8585 = vmatmul.mubr.msk.f32.gmra.mxu1 %vm14997_vm8, %v6511_v39  ;;  %v6500_v28 = vmul.f32 0.01, %v6472_v32  ;;  %vm6486_vm0 = vcmp.gt.f32.partialorder %v6472_v32, 0.0  ;;  %v7086_v54 = vld [vmem:[%s14978_s11 + $0x98] sm:$0xff]  ;;  %v7101_v61 = vld [vmem:[%s14978_s11 + $0x110] sm:$0xff] }
 0x649   :  { %6695 = vmatprep.mubr.f32.mxu0 %v15015_v58  ;;  %6844 = vmatprep.mubr.f32.mxu1 %v15015_v58  ;;  %v6454_v3 = vadd.f32 %v10417_v59, %v6263_v4  ;;  %v6075_v27 = vadd.f32 %v13724_v49, %v5884_v14  ;;  %v15077_v49 = vld [vmem:[#allocation5_spill] sm:$0xff]  ;;  %v14038_v57 = vshrl.u32 %v6539_v0, 7 }
 0x64a   :  { %v6416_v1 = vpop.f32.mrf.mxu1  ;;  %9276 = vmatpush3.msra.mxu0 %v7078_v48  ;;  %9350 = vmatpush3.msra.mxu1 %v7110_v52  ;;  %v6499_v20 = vmul.f32 0.01, %v6471_v9  ;;  %vm6485_vm15 = vcmp.gt.f32.partialorder %v6471_v9, 0.0  ;;  %v6514_v45 = vsel %vm6486_vm0, %v6472_v32, %v6500_v28  ;;  %v5885_v39 = vadd.f32 %v15077_v49, %v15076_v16  ;;  %v7089_v52 = vld [vmem:[%s14978_s11 + $0xb0] sm:$0xff]  ;;  %v7087_v4 = vld [vmem:[%s14978_s11 + $0xa0] sm:$0xff] }
 0x64b   :  { %v6453_v62 = vadd.f32 %v6416_v1, %v6262_v41  ;;  %9277 = vmatprep.subr.mxu0 %v7093_v50  ;;  %9351 = vmatprep.subr.mxu1 %v7125_v13  ;;  %v6474_v33 = vadd.f32 %v13734_v26, %v6454_v3  ;;  %v7073_v1 = vld [vmem:[%s14978_s11 + $0x30] sm:$0xff]  ;;  %v6541_v14 = vsub.s32 0, %v14038_v57 }
 0x64c   :  { %8572 = vmatmul.mubr.msk.f32.gmra.mxu0 %vm14997_vm8, %v6512_v25  ;;  %8586 = vmatmul.mubr.msk.f32.gmra.mxu1 %vm14997_vm8, %v6512_v25  ;;  %v6513_v7 = vsel %vm6485_vm15, %v6471_v9, %v6499_v20  ;;  %v6266_v9 = vadd.f32 %v6245_v17, %v6075_v27  ;;  %v6076_v59 = vadd.f32 %v13721_v5, %v5885_v39  ;;  %v7105_v32 = vld [vmem:[%s14978_s11 + $0x130] sm:$0xff]  ;;  %v7088_v5 = vld [vmem:[%s14978_s11 + $0xa8] sm:$0xff]  ;;  %v6553_v27 = vsub.s32 3, %v14038_v57 }
 0x64d   :  { %6701 = vmatprep.mubr.f32.mxu0 %v15015_v58  ;;  %6850 = vmatprep.mubr.f32.mxu1 %v15015_v58  ;;  %v6473_v51 = vadd.f32 %v13734_v26, %v6453_v62  ;;  %v6502_v60 = vmul.f32 0.01, %v6474_v33  ;;  %vm6488_vm3 = vcmp.gt.f32.partialorder %v6474_v33, 0.0  ;;  %v7120_v20 = vld [vmem:[%s14978_s11 + $0x1a8] sm:$0xff] }
 0x64e   :  { %9278 = vmatpush3.msra.mxu0 %v7077_v11  ;;  %9352 = vmatpush3.msra.mxu1 %v7109_v6  ;;  %v6267_v62 = vadd.f32 %v10394_v40, %v6076_v59  ;;  %v7084_v40 = vld [vmem:[%s14978_s11 + $0x88] sm:$0xff] }
 0x64f   :  { %9279 = vmatprep.subr.mxu0 %v7092_v29  ;;  %9353 = vmatprep.subr.mxu1 %v7124_v2  ;;  %v6501_v44 = vmul.f32 0.01, %v6473_v51  ;;  %vm6487_vm1 = vcmp.gt.f32.partialorder %v6473_v51, 0.0  ;;  %v6516_v15 = vsel %vm6488_vm3, %v6474_v33, %v6502_v60  ;;  %v7072_v29 = vld [vmem:[%s14978_s11 + $0x28] sm:$0xff] }
 0x650   :  { %v10420_v35 = vpop.f32.mrf.mxu1  ;;  %8573 = vmatmul.mubr.msk.f32.gmra.mxu0 %vm14997_vm8, %v6513_v7  ;;  %8587 = vmatmul.mubr.msk.f32.gmra.mxu1 %vm14997_vm8, %v6513_v7  ;;  %v7104_v2 = vld [vmem:[%s14978_s11 + $0x128] sm:$0xff] }
 0x651   :  { %6707 = vmatprep.mubr.f32.mxu0 %v15015_v58  ;;  %6856 = vmatprep.mubr.f32.mxu1 %v15015_v58  ;;  %v6456_v55 = vadd.f32 %v10420_v35, %v6265_v23  ;;  %v6515_v46 = vsel %vm6487_vm1, %v6473_v51, %v6501_v44  ;;  %v7070_v35 = vld [vmem:[%s14978_s11 + $0x18] sm:$0xff]  ;;  %v7068_v33 = vld [vmem:[%s14978_s11 + $0x8] sm:$0xff]  ;;  %v6545_v23 = vsub.s32 1, %v14038_v57 }
 0x652   :  { %v6426_v24 = vpop.f32.mrf.mxu1  ;;  %9280 = vmatpush3.msra.mxu0 %v7076_v53  ;;  %9354 = vmatpush3.msra.mxu1 %v7108_v36  ;;  %v7071_v53 = vld [vmem:[%s14978_s11 + $0x20] sm:$0xff]  ;;  %v7100_v44 = vld [vmem:[%s14978_s11 + $0x108] sm:$0xff] }
 0x653   :  { %v6455_v34 = vadd.f32 %v6426_v24, %v6264_v31  ;;  %9281 = vmatprep.subr.mxu0 %v7091_v22  ;;  %9355 = vmatprep.subr.mxu1 %v7123_v56  ;;  %v6476_v13 = vadd.f32 %v13734_v26, %v6456_v55  ;;  %v7103_v36 = vld [vmem:[%s14978_s11 + $0x120] sm:$0xff]  ;;  %v7102_v22 = vld [vmem:[%s14978_s11 + $0x118] sm:$0xff]  ;;  %v7085_v56 = vld [vmem:[%s14978_s11 + $0x90] sm:$0xff] }
 0x654   :  { %8574 = vmatmul.mubr.msk.f32.gmra.mxu0 %vm14997_vm8, %v6514_v45  ;;  %8588 = vmatmul.mubr.msk.f32.gmra.mxu1 %vm14997_vm8, %v6514_v45  ;;  %v7117_v31 = vld [vmem:[%s14978_s11 + $0x190] sm:$0xff]  ;;  %v7116_v24 = vld [vmem:[%s14978_s11 + $0x188] sm:$0xff]  ;;  %v7115_v45 = vld [vmem:[%s14978_s11 + $0x180] sm:$0xff] }
 0x655   :  { %6713 = vmatprep.mubr.f32.mxu0 %v15015_v58  ;;  %6862 = vmatprep.mubr.f32.mxu1 %v15015_v58  ;;  %v6475_v38 = vadd.f32 %v13734_v26, %v6455_v34  ;;  %v6504_v25 = vmul.f32 0.01, %v6476_v13  ;;  %vm6490_vm5 = vcmp.gt.f32.partialorder %v6476_v13, 0.0  ;;  %v7083_v34 = vld [vmem:[%s14978_s11 + $0x80] sm:$0xff] }
 0x656   :  { %9282 = vmatpush3.msra.mxu0 %v7075_v37  ;;  %9356 = vmatpush3.msra.mxu1 %v7107_v12  ;;  %v7067_v37 = vld [vmem:[%s14978_s11] sm:$0xff] }
 0x657   :  { %9283 = vmatprep.subr.mxu0 %v7090_v18  ;;  %9357 = vmatprep.subr.mxu1 %v7122_v30  ;;  %v6503_v41 = vmul.f32 0.01, %v6475_v38  ;;  %vm6489_vm4 = vcmp.gt.f32.partialorder %v6475_v38, 0.0  ;;  %v6518_v3 = vsel %vm6490_vm5, %v6476_v13, %v6504_v25  ;;  %v7099_v12 = vld [vmem:[%s14978_s11 + $0x100] sm:$0xff]  ;;  %v6549_v18 = vsub.s32 2, %v14038_v57 }
 0x658   :  { %v10423_v48 = vpop.f32.mrf.mxu1  ;;  %8575 = vmatmul.mubr.msk.f32.gmra.mxu0 %vm14997_vm8, %v6515_v46  ;;  %8589 = vmatmul.mubr.msk.f32.gmra.mxu1 %vm14997_vm8, %v6515_v46  ;;  %v6537_v30 = vld [vmem:[%s14977_s10] sm:$0xf] }
 0x659   :  { %6719 = vmatprep.mubr.f32.mxu0 %v15015_v58  ;;  %6868 = vmatprep.mubr.f32.mxu1 %v15015_v58  ;;  %v6458_v11 = vadd.f32 %v10423_v48, %v6267_v62  ;;  %v6517_v21 = vsel %vm6489_vm4, %v6475_v38, %v6503_v41  ;;  %v14047_v17 = vrot.slane %v6537_v30, %v6541_v14 }
 0x65a   :  { %v6436_v50 = vpop.f32.mrf.mxu1  ;;  %9284 = vmatpush3.msra.mxu0 %v7074_v43  ;;  %9358 = vmatpush3.msra.mxu1 %v7106_v10  ;;  %v14049_v60 = vrot.slane %v6537_v30, %v6549_v18  ;;  %v14051_v46 = vrot.slane %v6537_v30, %v6545_v23  ;;  %v14053_v43 = vrot.slane %v6537_v30, %v6553_v27 }
 0x65b   :  { %v6457_v8 = vadd.f32 %v6436_v50, %v6266_v9  ;;  %9285 = vmatprep.subr.mxu0 %v7089_v52  ;;  %9359 = vmatprep.subr.mxu1 %v7121_v47  ;;  %v6478_v42 = vadd.f32 %v13734_v26, %v6458_v11 }
 0x65c   :  { %8576 = vmatmul.mubr.msk.f32.gmra.mxu0 %vm14997_vm8, %v6516_v15  ;;  %8590 = vmatmul.mubr.msk.f32.gmra.mxu1 %vm14997_vm8, %v6516_v15 }
 0x65d   :  { %6725 = vmatprep.mubr.f32.mxu0 %v15015_v58  ;;  %6874 = vmatprep.mubr.f32.mxu1 %v15015_v58  ;;  %v6477_v6 = vadd.f32 %v13734_v26, %v6457_v8  ;;  %v6506_v51 = vmul.f32 0.01, %v6478_v42  ;;  %vm6492_vm7 = vcmp.gt.f32.partialorder %v6478_v42, 0.0 }
 0x65e   :  { %9286 = vmatpush3.msra.mxu0 %v7073_v1  ;;  %9360 = vmatpush3.msra.mxu1 %v7105_v32 }
 0x65f   :  { %9287 = vmatprep.subr.mxu0 %v7088_v5  ;;  %9361 = vmatprep.subr.mxu1 %v7120_v20  ;;  %v6505_v28 = vmul.f32 0.01, %v6477_v6  ;;  %vm6491_vm6 = vcmp.gt.f32.partialorder %v6477_v6, 0.0  ;;  %v6520_v26 = vsel %vm6492_vm7, %v6478_v42, %v6506_v51 }
 0x660   :  { %8577 = vmatmul.mubr.msk.f32.gmra.mxu0 %vm14997_vm8, %v6517_v21  ;;  %8591 = vmatmul.mubr.msk.f32.gmra.mxu1 %vm14997_vm8, %v6517_v21 }
 0x661   :  { %6731 = vmatprep.mubr.f32.mxu0 %v15015_v58  ;;  %6880 = vmatprep.mubr.f32.mxu1 %v15015_v58  ;;  %v6519_v7 = vsel %vm6491_vm6, %v6477_v6, %v6505_v28 }
 0x662   :  { %9288 = vmatpush3.msra.mxu0 %v7072_v29  ;;  %9362 = vmatpush3.msra.mxu1 %v7104_v2 }
 0x663   :  { %9289 = vmatprep.subr.mxu0 %v7087_v4  ;;  %9363 = vmatprep.subr.mxu1 %v7119_v19 }
 0x664   :  { %8578 = vmatmul.mubr.msk.f32.gmra.mxu0 %vm14997_vm8, %v6518_v3  ;;  %8592 = vmatmul.mubr.msk.f32.gmra.mxu1 %vm14997_vm8, %v6518_v3 }
 0x665   :  { %6737 = vmatprep.mubr.f32.mxu0 %v15015_v58  ;;  %6886 = vmatprep.mubr.f32.mxu1 %v15015_v58 }
 0x666   :  { %9290 = vmatpush3.msra.mxu0 %v7071_v53  ;;  %9364 = vmatpush3.msra.mxu1 %v7103_v36 }
 0x667   :  { %9291 = vmatprep.subr.mxu0 %v7086_v54 }
 0x668   :  { %8579 = vmatmul.mubr.msk.f32.gmra.mxu0 %vm14997_vm8, %v6519_v7  ;;  %8593 = vmatmul.mubr.msk.f32.gmra.mxu1 %vm14997_vm8, %v6519_v7 }
 0x669   :  { %6743 = vmatprep.mubr.f32.mxu0 %v15015_v58  ;;  %6892 = vmatprep.mubr.f32.mxu1 %v15015_v58  ;;  %v7118_v58 = vld [vmem:[%s14978_s11 + $0x198] sm:$0xff] }
 0x66a   :  { %9365 = vmatprep.subr.mxu1 %v7118_v58  ;;  %9292 = vmatpush3.msra.mxu0 %v7070_v35 }
 0x66b   :  { %9366 = vmatpush3.msra.mxu1 %v7102_v22  ;;  %9293 = vmatprep.subr.mxu0 %v7085_v56 }
 0x66c   :  { %8580 = vmatmul.mubr.msk.f32.gmra.mxu0 %vm14997_vm8, %v6520_v26  ;;  %8594 = vmatmul.mubr.msk.f32.gmra.mxu1 %vm14997_vm8, %v6520_v26 }
 0x66d   :  { %9367 = vmatprep.subr.mxu1 %v7117_v31  ;;  %9294 = vmatpush3.msra.mxu0 %v7069_v63 }
 0x66e   :  { %9368 = vmatpush3.msra.mxu1 %v7101_v61  ;;  %9295 = vmatprep.subr.mxu0 %v7084_v40 }
 0x66f   :  { %9369 = vmatprep.subr.mxu1 %v7116_v24  ;;  %9296 = vmatpush3.msra.mxu0 %v7068_v33 }
 0x670   :  { %9370 = vmatpush3.msra.mxu1 %v7100_v44  ;;  %9297 = vmatprep.subr.mxu0 %v7083_v34 }
 0x671   :  { %9371 = vmatprep.subr.mxu1 %v7115_v45  ;;  %9298 = vmatpush3.msra.mxu0 %v7067_v37 }
 0x672   :  { %9372 = vmatpush3.msra.mxu1 %v7099_v12 }
 0x6f8   :  { %v6667_v55 = vpop.f32.mrf.mxu0  ;;  %v6816_v38 = vpop.f32.mrf.mxu1 }
 0x6f9   :  { %v6668_v10 = vadd.f32 %v6667_v55, %v14047_v17  ;;  %v6817_v16 = vadd.f32 %v6816_v38, %v14049_v60 }
 0x6fa   :  { %v6669_v49 = vpop.f32.mrf.mxu0  ;;  %v6818_v39 = vpop.f32.mrf.mxu1 }
 0x6fb   :  { %v6955_v48 = vmul.f32 0.01, %v6668_v10  ;;  %v6957_v52 = vmul.f32 0.01, %v6817_v16  ;;  %vm6899_vm9 = vcmp.gt.f32.partialorder %v6668_v10, 0.0  ;;  %vm6901_vm2 = vcmp.gt.f32.partialorder %v6817_v16, 0.0 }
 0x6fc   :  { %v6670_v47 = vadd.f32 %v6669_v49, %v14051_v46  ;;  %v6819_v9 = vadd.f32 %v6818_v39, %v14053_v43  ;;  %v6673_v59 = vpop.f32.mrf.mxu0  ;;  %v6822_v50 = vpop.f32.mrf.mxu1 }
 0x6fd   :  { %v6674_v13 = vadd.f32 %v6673_v59, %v14047_v17  ;;  %v6823_v41 = vadd.f32 %v6822_v50, %v14049_v60  ;;  %v7011_v5 = vsel %vm6899_vm9, %v6668_v10, %v6955_v48  ;;  %v7013_v20 = vsel %vm6901_vm2, %v6817_v16, %v6957_v52 }
 0x6fe   :  { %v6956_v8 = vmul.f32 0.01, %v6670_v47  ;;  %v6958_v15 = vmul.f32 0.01, %v6819_v9  ;;  %v6675_v1 = vpop.f32.mrf.mxu0  ;;  %v6824_v32 = vpop.f32.mrf.mxu1  ;;  %vm6900_vm10 = vcmp.gt.f32.partialorder %v6670_v47, 0.0  ;;  %vm6902_vm11 = vcmp.gt.f32.partialorder %v6819_v9, 0.0 }
 0x6ff   :  { %vm6903_vm12 = vcmp.gt.f32.partialorder %v6674_v13, 0.0  ;;  %v6959_v62 = vmul.f32 0.01, %v6674_v13  ;;  %v6676_v25 = vadd.f32 %v6675_v1, %v14051_v46  ;;  %v6825_v11 = vadd.f32 %v6824_v32, %v14053_v43 }
 0x700   :  { %v6679_v6 = vpop.f32.mrf.mxu0  ;;  %v6828_v21 = vpop.f32.mrf.mxu1  ;;  %v7012_v29 = vsel %vm6900_vm10, %v6670_v47, %v6956_v8  ;;  %v7014_v2 = vsel %vm6902_vm11, %v6819_v9, %v6958_v15  ;;  %vm6905_vm13 = vcmp.gt.f32.partialorder %v6823_v41, 0.0  ;;  %v6961_v4 = vmul.f32 0.01, %v6823_v41 }
 0x701   :  { %v6680_v19 = vadd.f32 %v6679_v6, %v14047_v17  ;;  %v6829_v42 = vadd.f32 %v6828_v21, %v14049_v60  ;;  %7202 = vmatprep.mubr.f32.mxu0 %v7012_v29  ;;  %7337 = vmatprep.mubr.f32.mxu1 %v7014_v2  ;;  %v6960_v28 = vmul.f32 0.01, %v6676_v25  ;;  %v6962_v3 = vmul.f32 0.01, %v6825_v11 }
 0x702   :  { %7203 = vmatmul.mubr.f32.vlgmr.msra.gmra.mxu0 %v7011_v5  ;;  %7338 = vmatmul.mubr.f32.vlgmr.msra.gmra.mxu1 %v7013_v20  ;;  %v6681_v51 = vpop.f32.mrf.mxu0  ;;  %v6830_v7 = vpop.f32.mrf.mxu1  ;;  %vm6904_vm14 = vcmp.gt.f32.partialorder %v6676_v25, 0.0  ;;  %vm6906_vm15 = vcmp.gt.f32.partialorder %v6825_v11, 0.0  ;;  %v7015_v53 = vsel %vm6903_vm12, %v6674_v13, %v6959_v62  ;;  %v7017_v40 = vsel %vm6905_vm13, %v6823_v41, %v6961_v4 }
 0x703   :  { %vm6907_vm0 = vcmp.gt.f32.partialorder %v6680_v19, 0.0  ;;  %v6963_v26 = vmul.f32 0.01, %v6680_v19  ;;  %v6682_v36 = vadd.f32 %v6681_v51, %v14051_v46  ;;  %v6831_v54 = vadd.f32 %v6830_v7, %v14053_v43 }
 0x704   :  { %v6685_v58 = vpop.f32.mrf.mxu0  ;;  %v6834_v35 = vpop.f32.mrf.mxu1  ;;  %v7016_v22 = vsel %vm6904_vm14, %v6676_v25, %v6960_v28  ;;  %v7018_v56 = vsel %vm6906_vm15, %v6825_v11, %v6962_v3  ;;  %v6965_v31 = vmul.f32 0.01, %v6829_v42  ;;  %vm6909_vm4 = vcmp.gt.f32.partialorder %v6829_v42, 0.0 }
 0x705   :  { %v6686_v63 = vadd.f32 %v6685_v58, %v14047_v17  ;;  %v6835_v61 = vadd.f32 %v6834_v35, %v14049_v60  ;;  %7207 = vmatprep.mubr.f32.mxu0 %v7016_v22  ;;  %7342 = vmatprep.mubr.f32.mxu1 %v7018_v56  ;;  %v6964_v24 = vmul.f32 0.01, %v6682_v36  ;;  %v6966_v33 = vmul.f32 0.01, %v6831_v54 }
 0x706   :  { %7208 = vmatmul.mubr.f32.gmra.mxu0 %v7015_v53  ;;  %7343 = vmatmul.mubr.f32.gmra.mxu1 %v7017_v40  ;;  %v6687_v44 = vpop.f32.mrf.mxu0  ;;  %v6836_v34 = vpop.f32.mrf.mxu1  ;;  %vm6908_vm1 = vcmp.gt.f32.partialorder %v6682_v36, 0.0  ;;  %vm6910_vm3 = vcmp.gt.f32.partialorder %v6831_v54, 0.0  ;;  %v7019_v38 = vsel %vm6907_vm0, %v6680_v19, %v6963_v26  ;;  %v7021_v49 = vsel %vm6909_vm4, %v6829_v42, %v6965_v31 }
 0x707   :  { %vm6911_vm5 = vcmp.gt.f32.partialorder %v6686_v63, 0.0  ;;  %v6967_v45 = vmul.f32 0.01, %v6686_v63  ;;  %vm6913_vm6 = vcmp.gt.f32.partialorder %v6835_v61, 0.0  ;;  %v6688_v37 = vadd.f32 %v6687_v44, %v14051_v46 }
 0x708   :  { %v6837_v12 = vadd.f32 %v6836_v34, %v14053_v43  ;;  %v6691_v0 = vpop.f32.mrf.mxu0  ;;  %v6840_v14 = vpop.f32.mrf.mxu1  ;;  %v7020_v18 = vsel %vm6908_vm1, %v6682_v36, %v6964_v24  ;;  %v7022_v30 = vsel %vm6910_vm3, %v6831_v54, %v6966_v33  ;;  %v6969_v23 = vmul.f32 0.01, %v6835_v61 }
 0x709   :  { %v6692_v27 = vadd.f32 %v6691_v0, %v14047_v17  ;;  %v6841_v55 = vadd.f32 %v6840_v14, %v14049_v60  ;;  %7212 = vmatprep.mubr.f32.mxu0 %v7020_v18  ;;  %7347 = vmatprep.mubr.f32.mxu1 %v7022_v30  ;;  %v6968_v10 = vmul.f32 0.01, %v6688_v37  ;;  %vm6912_vm7 = vcmp.gt.f32.partialorder %v6688_v37, 0.0 }
 0x70a   :  { %v6970_v16 = vmul.f32 0.01, %v6837_v12  ;;  %7213 = vmatmul.mubr.f32.gmra.mxu0 %v7019_v38  ;;  %v6693_v39 = vpop.f32.mrf.mxu0  ;;  %v6842_v48 = vpop.f32.mrf.mxu1  ;;  %7348 = vmatmul.mubr.f32.gmra.mxu1 %v7021_v49  ;;  %vm6914_vm10 = vcmp.gt.f32.partialorder %v6837_v12, 0.0  ;;  %v7023_v32 = vsel %vm6911_vm5, %v6686_v63, %v6967_v45  ;;  %v7025_v62 = vsel %vm6913_vm6, %v6835_v61, %v6969_v23 }
 0x70b   :  { %vm6915_vm9 = vcmp.gt.f32.partialorder %v6692_v27, 0.0  ;;  %v6971_v52 = vmul.f32 0.01, %v6692_v27  ;;  %vm6917_vm2 = vcmp.gt.f32.partialorder %v6841_v55, 0.0  ;;  %v6973_v47 = vmul.f32 0.01, %v6841_v55 }
 0x70c   :  { %v6694_v9 = vadd.f32 %v6693_v39, %v14051_v46  ;;  %v6843_v59 = vadd.f32 %v6842_v48, %v14053_v43  ;;  %v6697_v50 = vpop.f32.mrf.mxu0  ;;  %v6846_v13 = vpop.f32.mrf.mxu1  ;;  %v7024_v41 = vsel %vm6912_vm7, %v6688_v37, %v6968_v10  ;;  %v7026_v1 = vsel %vm6914_vm10, %v6837_v12, %v6970_v16 }
 0x70d   :  { %v6698_v8 = vadd.f32 %v6697_v50, %v14047_v17  ;;  %v6847_v15 = vadd.f32 %v6846_v13, %v14049_v60  ;;  %7217 = vmatprep.mubr.f32.mxu0 %v7024_v41  ;;  %7352 = vmatprep.mubr.f32.mxu1 %v7026_v1  ;;  %v7027_v7 = vsel %vm6915_vm9, %v6692_v27, %v6971_v52 }
 0x70e   :  { %v6972_v5 = vmul.f32 0.01, %v6694_v9  ;;  %v6974_v20 = vmul.f32 0.01, %v6843_v59  ;;  %7218 = vmatmul.mubr.f32.gmra.mxu0 %v7023_v32  ;;  %v6699_v25 = vpop.f32.mrf.mxu0  ;;  %v6848_v11 = vpop.f32.mrf.mxu1  ;;  %vm6916_vm11 = vcmp.gt.f32.partialorder %v6694_v9, 0.0  ;;  %7353 = vmatmul.mubr.f32.gmra.mxu1 %v7025_v62  ;;  %vm6918_vm14 = vcmp.gt.f32.partialorder %v6843_v59, 0.0 }
 0x70f   :  { %vm6919_vm12 = vcmp.gt.f32.partialorder %v6698_v8, 0.0  ;;  %v6975_v6 = vmul.f32 0.01, %v6698_v8  ;;  %vm6921_vm13 = vcmp.gt.f32.partialorder %v6847_v15, 0.0  ;;  %v6977_v21 = vmul.f32 0.01, %v6847_v15 }
 0x710   :  { %v6700_v29 = vadd.f32 %v6699_v25, %v14051_v46  ;;  %v6849_v2 = vadd.f32 %v6848_v11, %v14053_v43  ;;  %v6703_v4 = vpop.f32.mrf.mxu0  ;;  %v6852_v19 = vpop.f32.mrf.mxu1  ;;  %v7028_v42 = vsel %vm6916_vm11, %v6694_v9, %v6972_v5  ;;  %v7030_v51 = vsel %vm6918_vm14, %v6843_v59, %v6974_v20 }
 0x711   :  { %v6704_v28 = vadd.f32 %v6703_v4, %v14047_v17  ;;  %v6853_v3 = vadd.f32 %v6852_v19, %v14049_v60  ;;  %7222 = vmatprep.mubr.f32.mxu0 %v7028_v42  ;;  %7357 = vmatprep.mubr.f32.mxu1 %v7030_v51  ;;  %v7029_v36 = vsel %vm6917_vm2, %v6841_v55, %v6973_v47 }
 0x712   :  { %v6976_v26 = vmul.f32 0.01, %v6700_v29  ;;  %v6978_v53 = vmul.f32 0.01, %v6849_v2  ;;  %7223 = vmatmul.mubr.f32.gmra.mxu0 %v7027_v7  ;;  %v6705_v54 = vpop.f32.mrf.mxu0  ;;  %v6854_v58 = vpop.f32.mrf.mxu1  ;;  %vm6920_vm15 = vcmp.gt.f32.partialorder %v6700_v29, 0.0  ;;  %7358 = vmatmul.mubr.f32.gmra.mxu1 %v7029_v36  ;;  %vm6922_vm3 = vcmp.gt.f32.partialorder %v6849_v2, 0.0 }
 0x713   :  { %vm6923_vm0 = vcmp.gt.f32.partialorder %v6704_v28, 0.0  ;;  %v6979_v35 = vmul.f32 0.01, %v6704_v28  ;;  %vm6925_vm1 = vcmp.gt.f32.partialorder %v6853_v3, 0.0  ;;  %v6981_v22 = vmul.f32 0.01, %v6853_v3 }
 0x714   :  { %v6706_v56 = vadd.f32 %v6705_v54, %v14051_v46  ;;  %v6855_v31 = vadd.f32 %v6854_v58, %v14053_v43  ;;  %v6709_v63 = vpop.f32.mrf.mxu0  ;;  %v6858_v61 = vpop.f32.mrf.mxu1  ;;  %v7032_v40 = vsel %vm6920_vm15, %v6700_v29, %v6976_v26  ;;  %v7034_v44 = vsel %vm6922_vm3, %v6849_v2, %v6978_v53 }
 0x715   :  { %v6710_v24 = vadd.f32 %v6709_v63, %v14047_v17  ;;  %v6859_v33 = vadd.f32 %v6858_v61, %v14049_v60  ;;  %7227 = vmatprep.mubr.f32.mxu0 %v7032_v40  ;;  %v7031_v34 = vsel %vm6919_vm12, %v6698_v8, %v6975_v6  ;;  %7362 = vmatprep.mubr.f32.mxu1 %v7034_v44 }
 0x716   :  { %v6980_v45 = vmul.f32 0.01, %v6706_v56  ;;  %v6982_v37 = vmul.f32 0.01, %v6855_v31  ;;  %7228 = vmatmul.mubr.f32.gmra.mxu0 %v7031_v34  ;;  %v7033_v12 = vsel %vm6921_vm13, %v6847_v15, %v6977_v21  ;;  %v6711_v0 = vpop.f32.mrf.mxu0  ;;  %v6860_v14 = vpop.f32.mrf.mxu1  ;;  %vm6924_vm4 = vcmp.gt.f32.partialorder %v6706_v56, 0.0 }
 0x717   :  { %vm6927_vm5 = vcmp.gt.f32.partialorder %v6710_v24, 0.0  ;;  %v6983_v18 = vmul.f32 0.01, %v6710_v24  ;;  %vm6929_vm6 = vcmp.gt.f32.partialorder %v6859_v33, 0.0  ;;  %v6985_v30 = vmul.f32 0.01, %v6859_v33  ;;  %7363 = vmatmul.mubr.f32.gmra.mxu1 %v7033_v12 }
 0x718   :  { %v6712_v23 = vadd.f32 %v6711_v0, %v14051_v46  ;;  %v6861_v27 = vadd.f32 %v6860_v14, %v14053_v43  ;;  %v6715_v55 = vpop.f32.mrf.mxu0  ;;  %v6864_v38 = vpop.f32.mrf.mxu1  ;;  %v7036_v10 = vsel %vm6924_vm4, %v6706_v56, %v6980_v45  ;;  %vm6926_vm7 = vcmp.gt.f32.partialorder %v6855_v31, 0.0 }
 0x719   :  { %v6716_v16 = vadd.f32 %v6715_v55, %v14047_v17  ;;  %v6865_v49 = vadd.f32 %v6864_v38, %v14049_v60  ;;  %7232 = vmatprep.mubr.f32.mxu0 %v7036_v10  ;;  %v7038_v39 = vsel %vm6926_vm7, %v6855_v31, %v6982_v37  ;;  %v7035_v48 = vsel %vm6923_vm0, %v6704_v28, %v6979_v35 }
 0x71a   :  { %v6984_v52 = vmul.f32 0.01, %v6712_v23  ;;  %v6986_v47 = vmul.f32 0.01, %v6861_v27  ;;  %7367 = vmatprep.mubr.f32.mxu1 %v7038_v39  ;;  %7233 = vmatmul.mubr.f32.gmra.mxu0 %v7035_v48  ;;  %v7037_v9 = vsel %vm6925_vm1, %v6853_v3, %v6981_v22  ;;  %v6717_v59 = vpop.f32.mrf.mxu0  ;;  %v6866_v50 = vpop.f32.mrf.mxu1  ;;  %vm6928_vm9 = vcmp.gt.f32.partialorder %v6712_v23, 0.0 }
 0x71b   :  { %vm6931_vm2 = vcmp.gt.f32.partialorder %v6716_v16, 0.0  ;;  %v6987_v13 = vmul.f32 0.01, %v6716_v16  ;;  %vm6933_vm10 = vcmp.gt.f32.partialorder %v6865_v49, 0.0  ;;  %v6989_v41 = vmul.f32 0.01, %v6865_v49  ;;  %7368 = vmatmul.mubr.f32.gmra.mxu1 %v7037_v9 }
 0x71c   :  { %v6718_v8 = vadd.f32 %v6717_v59, %v14051_v46  ;;  %v6867_v15 = vadd.f32 %v6866_v50, %v14053_v43  ;;  %v6721_v1 = vpop.f32.mrf.mxu0  ;;  %v6870_v32 = vpop.f32.mrf.mxu1  ;;  %v7040_v5 = vsel %vm6928_vm9, %v6712_v23, %v6984_v52  ;;  %vm6930_vm11 = vcmp.gt.f32.partialorder %v6861_v27, 0.0 }
 0x71d   :  { %v6722_v20 = vadd.f32 %v6721_v1, %v14047_v17  ;;  %v6871_v62 = vadd.f32 %v6870_v32, %v14049_v60  ;;  %7237 = vmatprep.mubr.f32.mxu0 %v7040_v5  ;;  %v7042_v25 = vsel %vm6930_vm11, %v6861_v27, %v6986_v47  ;;  %v7039_v11 = vsel %vm6927_vm5, %v6710_v24, %v6983_v18 }
 0x71e   :  { %v6988_v6 = vmul.f32 0.01, %v6718_v8  ;;  %v6990_v21 = vmul.f32 0.01, %v6867_v15  ;;  %7372 = vmatprep.mubr.f32.mxu1 %v7042_v25  ;;  %7238 = vmatmul.mubr.f32.gmra.mxu0 %v7039_v11  ;;  %v7041_v29 = vsel %vm6929_vm6, %v6859_v33, %v6985_v30  ;;  %v6723_v2 = vpop.f32.mrf.mxu0  ;;  %v6872_v4 = vpop.f32.mrf.mxu1  ;;  %vm6932_vm12 = vcmp.gt.f32.partialorder %v6718_v8, 0.0 }
 0x71f   :  { %vm6935_vm13 = vcmp.gt.f32.partialorder %v6722_v20, 0.0  ;;  %v6991_v19 = vmul.f32 0.01, %v6722_v20  ;;  %vm6937_vm14 = vcmp.gt.f32.partialorder %v6871_v62, 0.0  ;;  %v6993_v42 = vmul.f32 0.01, %v6871_v62  ;;  %7373 = vmatmul.mubr.f32.gmra.mxu1 %v7041_v29 }
 0x720   :  { %v6724_v28 = vadd.f32 %v6723_v2, %v14051_v46  ;;  %v6873_v3 = vadd.f32 %v6872_v4, %v14053_v43  ;;  %v6727_v51 = vpop.f32.mrf.mxu0  ;;  %v6876_v7 = vpop.f32.mrf.mxu1  ;;  %v7044_v26 = vsel %vm6932_vm12, %v6718_v8, %v6988_v6  ;;  %vm6934_vm15 = vcmp.gt.f32.partialorder %v6867_v15, 0.0 }
 0x721   :  { %v6728_v53 = vadd.f32 %v6727_v51, %v14047_v17  ;;  %v6877_v36 = vadd.f32 %v6876_v7, %v14049_v60  ;;  %7242 = vmatprep.mubr.f32.mxu0 %v7044_v26  ;;  %v7046_v54 = vsel %vm6934_vm15, %v6867_v15, %v6990_v21  ;;  %v7043_v58 = vsel %vm6931_vm2, %v6716_v16, %v6987_v13 }
 0x722   :  { %v6992_v35 = vmul.f32 0.01, %v6724_v28  ;;  %v6994_v22 = vmul.f32 0.01, %v6873_v3  ;;  %7377 = vmatprep.mubr.f32.mxu1 %v7046_v54  ;;  %7243 = vmatmul.mubr.f32.gmra.mxu0 %v7043_v58  ;;  %v7045_v56 = vsel %vm6933_vm10, %v6865_v49, %v6989_v41  ;;  %v6729_v31 = vpop.f32.mrf.mxu0  ;;  %v6878_v63 = vpop.f32.mrf.mxu1  ;;  %vm6936_vm0 = vcmp.gt.f32.partialorder %v6724_v28, 0.0 }
 0x723   :  { %vm6939_vm1 = vcmp.gt.f32.partialorder %v6728_v53, 0.0  ;;  %v6995_v61 = vmul.f32 0.01, %v6728_v53  ;;  %vm6941_vm3 = vcmp.gt.f32.partialorder %v6877_v36, 0.0  ;;  %v6997_v40 = vmul.f32 0.01, %v6877_v36  ;;  %7378 = vmatmul.mubr.f32.gmra.mxu1 %v7045_v56 }
 0x724   :  { %v6730_v24 = vadd.f32 %v6729_v31, %v14051_v46  ;;  %v6879_v33 = vadd.f32 %v6878_v63, %v14053_v43  ;;  %v6733_v44 = vpop.f32.mrf.mxu0  ;;  %v6882_v34 = vpop.f32.mrf.mxu1  ;;  %v7048_v45 = vsel %vm6936_vm0, %v6724_v28, %v6992_v35  ;;  %vm6938_vm4 = vcmp.gt.f32.partialorder %v6873_v3, 0.0 }
 0x725   :  { %v6734_v37 = vadd.f32 %v6733_v44, %v14047_v17  ;;  %v6883_v12 = vadd.f32 %v6882_v34, %v14049_v60  ;;  %7247 = vmatprep.mubr.f32.mxu0 %v7048_v45  ;;  %v7050_v0 = vsel %vm6938_vm4, %v6873_v3, %v6994_v22  ;;  %v7047_v14 = vsel %vm6935_vm13, %v6722_v20, %v6991_v19 }
 0x726   :  { %v6996_v18 = vmul.f32 0.01, %v6730_v24  ;;  %v6998_v30 = vmul.f32 0.01, %v6879_v33  ;;  %7382 = vmatprep.mubr.f32.mxu1 %v7050_v0  ;;  %7248 = vmatmul.mubr.f32.gmra.mxu0 %v7047_v14  ;;  %v7049_v23 = vsel %vm6937_vm14, %v6871_v62, %v6993_v42  ;;  %v6735_v27 = vpop.f32.mrf.mxu0  ;;  %v6884_v55 = vpop.f32.mrf.mxu1  ;;  %vm6940_vm5 = vcmp.gt.f32.partialorder %v6730_v24, 0.0 }
 0x727   :  { %vm6943_vm6 = vcmp.gt.f32.partialorder %v6734_v37, 0.0  ;;  %v6999_v38 = vmul.f32 0.01, %v6734_v37  ;;  %vm6945_vm7 = vcmp.gt.f32.partialorder %v6883_v12, 0.0  ;;  %v7001_v10 = vmul.f32 0.01, %v6883_v12  ;;  %7383 = vmatmul.mubr.f32.gmra.mxu1 %v7049_v23 }
 0x728   :  { %v6736_v16 = vadd.f32 %v6735_v27, %v14051_v46  ;;  %v6885_v49 = vadd.f32 %v6884_v55, %v14053_v43  ;;  %v6739_v39 = vpop.f32.mrf.mxu0  ;;  %v6888_v48 = vpop.f32.mrf.mxu1  ;;  %v7052_v52 = vsel %vm6940_vm5, %v6730_v24, %v6996_v18  ;;  %vm6942_vm9 = vcmp.gt.f32.partialorder %v6879_v33, 0.0 }
 0x729   :  { %v6740_v47 = vadd.f32 %v6739_v39, %v14047_v17  ;;  %v6889_v9 = vadd.f32 %v6888_v48, %v14049_v60  ;;  %7252 = vmatprep.mubr.f32.mxu0 %v7052_v52  ;;  %v7054_v59 = vsel %vm6942_vm9, %v6879_v33, %v6998_v30  ;;  %v7051_v50 = vsel %vm6939_vm1, %v6728_v53, %v6995_v61 }
 0x72a   :  { %v7000_v13 = vmul.f32 0.01, %v6736_v16  ;;  %v7002_v41 = vmul.f32 0.01, %v6885_v49  ;;  %7387 = vmatprep.mubr.f32.mxu1 %v7054_v59  ;;  %7253 = vmatmul.mubr.f32.gmra.mxu0 %v7051_v50  ;;  %v7053_v8 = vsel %vm6941_vm3, %v6877_v36, %v6997_v40  ;;  %v6741_v15 = vpop.f32.mrf.mxu0  ;;  %v6890_v1 = vpop.f32.mrf.mxu1  ;;  %vm6944_vm2 = vcmp.gt.f32.partialorder %v6736_v16, 0.0 }
 0x72b   :  { %vm6947_vm10 = vcmp.gt.f32.partialorder %v6740_v47, 0.0  ;;  %v7003_v32 = vmul.f32 0.01, %v6740_v47  ;;  %vm6949_vm11 = vcmp.gt.f32.partialorder %v6889_v9, 0.0  ;;  %v7005_v5 = vmul.f32 0.01, %v6889_v9  ;;  %7388 = vmatmul.mubr.f32.gmra.mxu1 %v7053_v8 }
 0x72c   :  { %v6742_v20 = vadd.f32 %v6741_v15, %v14051_v46  ;;  %v6891_v62 = vadd.f32 %v6890_v1, %v14053_v43  ;;  %v6745_v25 = vpop.f32.mrf.mxu0  ;;  %v6894_v11 = vpop.f32.mrf.mxu1  ;;  %v7056_v6 = vsel %vm6944_vm2, %v6736_v16, %v7000_v13  ;;  %vm6946_vm12 = vcmp.gt.f32.partialorder %v6885_v49, 0.0 }
 0x72d   :  { %v6746_v21 = vadd.f32 %v6745_v25, %v14047_v17  ;;  %v6895_v29 = vadd.f32 %v6894_v11, %v14049_v60  ;;  %7257 = vmatprep.mubr.f32.mxu0 %v7056_v6  ;;  %v7058_v2 = vsel %vm6946_vm12, %v6885_v49, %v7002_v41  ;;  %v7055_v4 = vsel %vm6943_vm6, %v6734_v37, %v6999_v38 }
 0x72e   :  { %v7004_v19 = vmul.f32 0.01, %v6742_v20  ;;  %v7006_v42 = vmul.f32 0.01, %v6891_v62  ;;  %7392 = vmatprep.mubr.f32.mxu1 %v7058_v2  ;;  %7258 = vmatmul.mubr.f32.gmra.mxu0 %v7055_v4  ;;  %v7057_v28 = vsel %vm6945_vm7, %v6883_v12, %v7001_v10  ;;  %v6747_v3 = vpop.f32.mrf.mxu0  ;;  %v6896_v51 = vpop.f32.mrf.mxu1  ;;  %vm6948_vm13 = vcmp.gt.f32.partialorder %v6742_v20, 0.0 }
 0x72f   :  { %vm6951_vm14 = vcmp.gt.f32.partialorder %v6746_v21, 0.0  ;;  %v7007_v7 = vmul.f32 0.01, %v6746_v21  ;;  %7393 = vmatmul.mubr.f32.gmra.mxu1 %v7057_v28  ;;  %v6748_v17 = vadd.f32 %v6747_v3, %v14051_v46  ;;  %v6897_v60 = vadd.f32 %v6896_v51, %v14053_v43 }
 0x730   :  { %v7060_v26 = vsel %vm6948_vm13, %v6742_v20, %v7004_v19  ;;  %vm6950_vm15 = vcmp.gt.f32.partialorder %v6891_v62, 0.0  ;;  %v7009_v53 = vmul.f32 0.01, %v6895_v29  ;;  %v7059_v54 = vsel %vm6947_vm10, %v6740_v47, %v7003_v32 }
 0x731   :  { %7262 = vmatprep.mubr.f32.mxu0 %v7060_v26  ;;  %v7062_v36 = vsel %vm6950_vm15, %v6891_v62, %v7006_v42  ;;  %v7061_v58 = vsel %vm6949_vm11, %v6889_v9, %v7005_v5  ;;  %v7008_v35 = vmul.f32 0.01, %v6748_v17  ;;  %v7010_v22 = vmul.f32 0.01, %v6897_v60 }
 0x732   :  { %7397 = vmatprep.mubr.f32.mxu1 %v7062_v36  ;;  %7263 = vmatmul.mubr.f32.gmra.mxu0 %v7059_v54  ;;  %vm6952_vm0 = vcmp.gt.f32.partialorder %v6748_v17, 0.0  ;;  %vm6954_vm1 = vcmp.gt.f32.partialorder %v6897_v60, 0.0  ;;  %vm6953_vm3 = vcmp.gt.f32.partialorder %v6895_v29, 0.0  ;;  %v7063_v43 = vsel %vm6951_vm14, %v6746_v21, %v7007_v7  ;;  %v14195_v36 = vld [vmem:[%s14979_s12] ss:$0 sm:$0xff]  ;;  %s10539_s12 = smov [#allocation2]  }
 0x733   :  { %7398 = vmatmul.mubr.f32.gmra.mxu1 %v7061_v58  ;;  %v7064_v46 = vsel %vm6952_vm0, %v6748_v17, %v7008_v35  ;;  %v7066_v56 = vsel %vm6954_vm1, %v6897_v60, %v7010_v22  ;;  %v7065_v31 = vsel %vm6953_vm3, %v6895_v29, %v7009_v53  ;;  %v7648_v63 = vadd.s32 8, %v14038_v57  ;;  %s8001_s5 = sshll.u32 %s10539_s12, 4  ;;  %s8002_s5 = int_to_ptr.vmem [resolvable:$true] %s8001_s5 }
 0x734   :  { %7267 = vmatprep.mubr.f32.mxu0 %v7064_v46  ;;  %7402 = vmatprep.mubr.f32.mxu1 %v7066_v56  ;;  %v14138_v61 = vmul.u32.u64.low 2454267026, %v14038_v57  ;;  %v14139_v40 = vmul.u32.u64.high 2454267026, %v14038_v57, %v14138_v61  ;;  %v7649_v24 = vadd.s32 16, %v14038_v57  ;;  %v14146_v34 = vadd.s32 24, %v14038_v57  ;;  %s10514_s9 = scalar_lea.vmem %s8002_s5, 16  ;;  %s10518_s21 = scalar_lea.vmem %s8002_s5, 32 }
 0x735   :  { %v14142_v33 = vmul.u32.u64.low 2454267026, %v7648_v63  ;;  %v14143_v44 = vmul.u32.u64.high 2454267026, %v7648_v63, %v14142_v33  ;;  %v14987_v12 = vmov 0   ;;  %v14157_v30 = vadd.s32 32, %v14038_v57  ;;  %p10515_p0 = scmp.ne.s32.totalorder %s8002_s5, %s10514_s9  ;;  %p10519_p1 = scmp.lt.s32.totalorder %s8002_s5, %s8002_s5 }
 0x736   :  { %7268 = vmatmul.mubr.f32.gmra.mxu0 %v7063_v43  ;;  %vm7667_vm4 = vc.u32 %v14138_v61, 2454267026  ;;  %v14148_v45 = vmul.u32.u64.low 2454267026, %v7649_v24  ;;  %v14149_v37 = vmul.u32.u64.high 2454267026, %v7649_v24, %v14148_v45  ;;  %v14168_v49 = vadd.s32 40, %v14038_v57  ;;  %p10520_p2 = scmp.lt.s32.totalorder %s10518_s21, %s10514_s9 }
 0x737   :  { %7403 = vmatmul.mubr.f32.gmra.mxu1 %v7065_v31  ;;  %vm7681_vm5 = vc.u32 %v14142_v33, 2454267026  ;;  %v7668_v0 = vsel %vm7667_vm4, 1, %v14987_v12  ;;  %v14153_v14 = vmul.u32.u64.low 2454267026, %v14146_v34  ;;  %v14154_v18 = vmul.u32.u64.high 2454267026, %v14146_v34, %v14153_v14 }
 0x738   :  { %vm7695_vm6 = vc.u32 %v14148_v45, 2454267026  ;;  %v7682_v23 = vsel %vm7681_vm5, 1, %v14987_v12  ;;  %v7669_v27 = vadd.s32 %v14139_v40, %v7668_v0  ;;  %v14179_v11 = vadd.s32 48, %v14038_v57  ;;  %p10521_p3 = por %p10520_p2, %p10519_p1 }
 0x739   :  { %v7696_v55 = vsel %vm7695_vm6, 1, %v14987_v12  ;;  %vm7709_vm7 = vc.u32 %v14153_v14, 2454267026  ;;  %v14163_v38 = vmul.u32.u64.low 2454267026, %v14157_v30  ;;  %v14164_v10 = vmul.u32.u64.high 2454267026, %v14157_v30, %v14163_v38 }
 0x73a   :  { %v7683_v16 = vadd.s32 %v14143_v44, %v7682_v23  ;;  %v7697_v39 = vadd.s32 %v14149_v37, %v7696_v55  ;;  %v7710_v48 = vsel %vm7709_vm7, 1, %v14987_v12  ;;  %v7670_v52 = vshrl.u32 %v7669_v27, 5  ;;  %p10522_p4 = pnand %p10521_p3, %p10515_p0 }
 0x73b   :  { %vm7723_vm9 = vc.u32 %v14163_v38, 2454267026  ;;  %v14173_v50 = vmul.u32.u64.low 2454267026, %v14168_v49  ;;  %v14174_v13 = vmul.u32.u64.high 2454267026, %v14168_v49, %v14173_v50  ;;  %v7711_v41 = vadd.s32 %v14154_v18, %v7710_v48 }
 0x73c   :  { %v7684_v59 = vshrl.u32 %v7683_v16, 5  ;;  %v7698_v1 = vshrl.u32 %v7697_v39, 5  ;;  %v7724_v32 = vsel %vm7723_vm9, 1, %v14987_v12  ;;  %v7671_v5 = vmul.u32 56, %v7670_v52 }
 0x73d   :  { %vm7737_vm2 = vc.u32 %v14173_v50, 2454267026  ;;  %v7712_v6 = vshrl.u32 %v7711_v41, 5  ;;  %v7725_v21 = vadd.s32 %v14164_v10, %v7724_v32  ;;  %v14202_v56 = vadd.s32 56, %v14038_v57 }
 0x73e   :  { %v7685_v25 = vmul.u32 56, %v7684_v59  ;;  %v7699_v4 = vmul.u32 56, %v7698_v1  ;;  %v14183_v19 = vsub.s32 %v14038_v57, %v7671_v5  ;;  %v7738_v42 = vsel %vm7737_vm2, 1, %v14987_v12 }
 0x73f   :  { %v14189_v51 = vmul.u32.u64.low 2454267026, %v14179_v11  ;;  %v14190_v7 = vmul.u32.u64.high 2454267026, %v14179_v11, %v14189_v51  ;;  %v7713_v26 = vmul.u32 56, %v7712_v6  ;;  %v7726_v53 = vshrl.u32 %v7725_v21, 5 }
 0x740   :  { %v14186_v28 = vsub.s32 %v7648_v63, %v7685_v25  ;;  %v14197_v35 = vsub.s32 %v7649_v24, %v7699_v4  ;;  %v7739_v22 = vadd.s32 %v14174_v13, %v7738_v42  ;;  %vm7857_vm10 = vcmp.ne.s32.totalorder %v14183_v19, 0 }
 0x741   :  { %vm7871_vm11 = vcmp.lt.s32.totalorder %v14183_v19, 0  ;;  %vm7751_vm14 = vc.u32 %v14189_v51, 2454267026  ;;  %v14209_v40 = vsub.s32 %v14146_v34, %v7713_v26  ;;  %v7727_v24 = vmul.u32 56, %v7726_v53 }
 0x742   :  { %vm7858_vm12 = vcmp.ne.s32.totalorder %v14186_v28, 0  ;;  %vm7872_vm13 = vcmp.lt.s32.totalorder %v14186_v28, 0  ;;  %vm7859_vm15 = vcmp.ne.s32.totalorder %v14197_v35, 0  ;;  %vm7873_vm0 = vcmp.lt.s32.totalorder %v14197_v35, 0  ;;  %vm14223_vm1 = vmand %vm7871_vm11, %vm7857_vm10 }
 0x743   :  { %15078 = vst [vmem:[#allocation15_spill] sm:$0xff] %v14209_v40  ;;  %v7740_v45 = vshrl.u32 %v7739_v22, 5  ;;  %v7752_v14 = vsel %vm7751_vm14, 1, %v14987_v12  ;;  %v14216_v18 = vmul.u32.u64.low 2454267026, %v14202_v56  ;;  %v14217_v23 = vmul.u32.u64.high 2454267026, %v14202_v56, %v14216_v18  ;;  %vm14242_vm3 = vmand %vm7872_vm13, %vm7858_vm12 }
 0x744   :  { %v14228_v27 = vadd.s32 56, %v14183_v19  ;;  %v14231_v38 = vadd.s32 56, %v14186_v28  ;;  %v14234_v10 = vadd.s32 56, %v14197_v35  ;;  %vm7860_vm4 = vcmp.ne.s32.totalorder %v14209_v40, 0  ;;  %vm14257_vm5 = vmand %vm7873_vm0, %vm7859_vm15 }
 0x745   :  { %vm7874_vm6 = vcmp.lt.s32.totalorder %v14209_v40, 0  ;;  %vm7765_vm7 = vc.u32 %v14216_v18, 2454267026  ;;  %v14264_v32 = vadd.s32 64, %v14038_v57 }
 0x746   :  { %vm14288_vm9 = vmand %vm7874_vm6, %vm7860_vm4 }
 0x7c2   :  { %v9299_v47 = vpop.f32.mrf.mxu0  ;;  %v9373_v9 = vpop.f32.mrf.mxu1 }
 0x7c4   :  { %v9300_v8 = vpop.f32.mrf.mxu0  ;;  %v9374_v15 = vpop.f32.mrf.mxu1 }
 0x7c5   :  { %v9301_v17 = vadd.f32 %v9300_v8, %v9299_v47  ;;  %v9375_v37 = vadd.f32 %v9374_v15, %v9373_v9  ;;  %v14249_v9 = vsub.s32 %v14157_v30, %v7727_v24  ;;  %v7753_v8 = vadd.s32 %v14190_v7, %v7752_v14 }
 0x7c6   :  { %v9302_v20 = vpop.f32.mrf.mxu0  ;;  %v9376_v62 = vpop.f32.mrf.mxu1  ;;  %v7741_v30 = vmul.u32 56, %v7740_v45  ;;  %v15090_v14 = vmov 0 }
 0x7c7   :  { %v7205_v31 = vadd.f32 %v9301_v17, %v14195_v36  ;;  %15083 = vst [vmem:[#allocation11_spill] sm:$0xff] %v14249_v9  ;;  %vm7861_vm2 = vcmp.ne.s32.totalorder %v14249_v9, 0  ;;  %v7754_v17 = vshrl.u32 %v7753_v8, 5  ;;  %vm7875_vm10 = vcmp.lt.s32.totalorder %v14249_v9, 0 }
 0x7c8   :  { %v9303_v29 = vpop.f32.mrf.mxu0  ;;  %v9377_v2 = vpop.f32.mrf.mxu1  ;;  %v14299_v53 = vsub.s32 %v14168_v49, %v7741_v30  ;;  %vm14330_vm11 = vmand %vm7875_vm10, %vm7861_vm2 }
 0x7c9   :  { %v9304_v54 = vadd.f32 %v9303_v29, %v9302_v20  ;;  %v9378_v55 = vadd.f32 %v9377_v2, %v9376_v62  ;;  %v14236_v39 = vadd.f32 %v9375_v37, %v7205_v31  ;;  %v14275_v62 = vadd.s32 56, %v14209_v40 }
 0x7ca   :  { %v9305_v3 = vpop.f32.mrf.mxu0  ;;  %v9379_v60 = vpop.f32.mrf.mxu1  ;;  %15088 = vst [vmem:[#allocation21_spill] sm:$0xff] %v14299_v53  ;;  %v15091_v14 = vsel %vm14330_vm11, 4294967295, %v15090_v14  ;;  %vm7862_vm12 = vcmp.ne.s32.totalorder %v14299_v53, 0  ;;  %vm7876_vm13 = vcmp.lt.s32.totalorder %v14299_v53, 0 }
 0x7cb   :  { %v7210_v33 = vadd.f32 %v9304_v54, %v14195_v36  ;;  %v14986_v21 = vsub.f32 0.0, %v14236_v39  ;;  %15092 = vst [vmem:[#allocation16_spill] sm:$0xff] %v15091_v14  ;;  %vm14357_vm15 = vmand %vm7876_vm13, %vm7862_vm12 }
 0x7cc   :  { %v9306_v58 = vpop.f32.mrf.mxu0  ;;  %v9380_v46 = vpop.f32.mrf.mxu1 }
 0x7cd   :  { %v9307_v63 = vadd.f32 %v9306_v58, %v9305_v3  ;;  %v14251_v59 = vadd.f32 %v9378_v55, %v7210_v33  ;;  %v9381_v15 = vadd.f32 %v9380_v46, %v9379_v60  ;;  %v7766_v60 = vsel %vm7765_vm7, 1, %v14987_v12 }
 0x7ce   :  { %v9308_v43 = vpop.f32.mrf.mxu0  ;;  %v9382_v61 = vpop.f32.mrf.mxu1  ;;  %v14302_v54 = vmul.u32.u64.low 2454267026, %v14264_v32  ;;  %v14303_v58 = vmul.u32.u64.high 2454267026, %v14264_v32, %v14302_v54  ;;  %v7436_v49 = vand.u32 2147483647, %v14986_v21  ;;  %v14317_v33 = vadd.s32 56, %v14249_v9 }
 0x7cf   :  { %v7215_v52 = vadd.f32 %v9307_v63, %v14195_v36  ;;  %v14985_v3 = vsub.f32 0.0, %v14251_v59  ;;  %v14311_v63 = vadd.s32 72, %v14038_v57  ;;  %v7755_v55 = vmul.u32 56, %v7754_v17 }
 0x7d0   :  { %v9309_v44 = vpop.f32.mrf.mxu0  ;;  %v9383_v0 = vpop.f32.mrf.mxu1  ;;  %15089 = vst [vmem:[#allocation7_spill] sm:$0xff] %v14317_v33  ;;  %vm7779_vm14 = vc.u32 %v14302_v54, 2454267026  ;;  %v15094_v17 = vmov 0 }
 0x7d1   :  { %v9310_v13 = vadd.f32 %v9309_v44, %v9308_v43  ;;  %v14278_v29 = vadd.f32 %v9381_v15, %v7215_v52  ;;  %v9384_v22 = vadd.f32 %v9383_v0, %v9382_v61  ;;  %v7767_v44 = vadd.s32 %v14217_v23, %v7766_v60 }
 0x7d2   :  { %v9311_v16 = vpop.f32.mrf.mxu0  ;;  %v9385_v47 = vpop.f32.mrf.mxu1  ;;  %v7437_v45 = vand.u32 2147483647, %v14985_v3  ;;  %v14337_v52 = vadd.s32 80, %v14038_v57  ;;  %v7450_v15 = vsub.f32 0.0, %v7436_v49  ;;  %v15095_v17 = vsel %vm14357_vm15, 4294967295, %v15094_v17 }
 0x7d3   :  { %v7220_v51 = vadd.f32 %v9310_v13, %v14195_v36  ;;  %v14984_v24 = vsub.f32 0.0, %v14278_v29  ;;  %15096 = vst [vmem:[#allocation25_spill] sm:$0xff] %v15095_v17  ;;  %v14362_v60 = vsub.s32 %v14179_v11, %v7755_v55  ;;  %v7780_v30 = vsel %vm7779_vm14, 1, %v14987_v12 }
 0x7d4   :  { %v9312_v41 = vpop.f32.mrf.mxu0  ;;  %v9386_v1 = vpop.f32.mrf.mxu1  ;;  %v14373_v11 = vadd.s32 88, %v14038_v57  ;;  %v7464_v55 = vmul.f32 1.442695, %v7450_v15 }
 0x7d5   :  { %v9313_v25 = vadd.f32 %v9312_v41, %v9311_v16  ;;  %v14324_v37 = vadd.f32 %v9384_v22, %v7220_v51  ;;  %v9387_v0 = vadd.f32 %v9386_v1, %v9385_v47  ;;  %v7438_v1 = vand.u32 2147483647, %v14984_v24 }
 0x7d6   :  { %v9314_v6 = vpop.f32.mrf.mxu0  ;;  %v14342_v41 = vmul.u32.u64.low 2454267026, %v14311_v63  ;;  %v14343_v8 = vmul.u32.u64.high 2454267026, %v14311_v63, %v14342_v41  ;;  %v7451_v51 = vsub.f32 0.0, %v7437_v45  ;;  %v14385_v15 = vadd.s32 56, %v14362_v60 }
 0x7d7   :  { %v9388_v42 = vpop.f32.mrf.mxu1  ;;  %v7225_v43 = vadd.f32 %v9313_v25, %v14195_v36  ;;  %v14352_v25 = vadd.s32 56, %v14299_v53  ;;  %v14368_v45 = vmul.u32.u64.low 2454267026, %v14337_v52  ;;  %v14369_v46 = vmul.u32.u64.high 2454267026, %v14337_v52, %v14368_v45 }
 0x7d8   :  { %v9315_v7 = vpop.f32.mrf.mxu0  ;;  %vm7793_vm0 = vc.u32 %v14342_v41, 2454267026  ;;  %v7466_v3 = vmul.f32 1.442695, %v7451_v51  ;;  %10458 = vpow2.f32 %v7464_v55  ;;  %vm7863_vm2 = vcmp.ne.s32.totalorder %v14362_v60, 0 }
 0x7d9   :  { %v9389_v26 = vpop.f32.mrf.mxu1  ;;  %v9316_v16 = vadd.f32 %v9315_v7, %v9314_v6  ;;  %v14339_v47 = vadd.f32 %v9387_v0, %v7225_v43  ;;  %15093 = vst [vmem:[#allocation23_spill] sm:$0xff] %v14352_v25  ;;  %v14991_v7 = vsub.f32 0.0, %v14324_v37  ;;  %v7768_v43 = vshrl.u32 %v7767_v44, 5 }
 0x7da   :  { %v9317_v31 = vpop.f32.mrf.mxu0  ;;  %v7452_v44 = vsub.f32 0.0, %v7438_v1  ;;  %v9390_v24 = vadd.f32 %v9389_v26, %v9388_v42  ;;  %v15097_v1 = vmov 0   ;;  %vm7807_vm4 = vc.u32 %v14368_v45, 2454267026 }
 0x7db   :  { %v14319_v61 = vpop.f32.mrf.mxu1  ;;  %v7230_v49 = vadd.f32 %v9316_v16, %v14195_v36  ;;  %v7439_v21 = vand.u32 2147483647, %v14991_v7  ;;  %v7769_v2 = vmul.u32 56, %v7768_v43  ;;  %v7794_v17 = vsel %vm7793_vm0, 1, %v15097_v1 }
 0x7dc   :  { %v9318_v18 = vpop.f32.mrf.mxu0  ;;  %v15098_v54 = vsub.f32 0.0, %v14339_v47  ;;  %v14393_v43 = vmul.u32.u64.low 2454267026, %v14373_v11  ;;  %v14394_v25 = vmul.u32.u64.high 2454267026, %v14373_v11, %v14393_v43  ;;  %10460 = vpow2.f32 %v7466_v3 }
 0x7dd   :  { %v9392_v23 = vpop.f32.mrf.mxu1  ;;  %v9319_v5 = vadd.f32 %v9318_v18, %v9317_v31  ;;  %v7781_v18 = vadd.s32 %v14303_v58, %v7780_v30  ;;  %v14382_v12 = vadd.f32 %v9390_v24, %v7230_v49  ;;  %v7468_v58 = vmul.f32 1.442695, %v7452_v44 }
 0x7de   :  { %v9320_v13 = vpop.f32.mrf.mxu0  ;;  %v7440_v51 = vand.u32 2147483647, %v15098_v54  ;;  %v9393_v41 = vadd.f32 %v9392_v23, %v14319_v61  ;;  %v14398_v49 = vadd.s32 96, %v14038_v57  ;;  %v7795_v55 = vadd.s32 %v14343_v8, %v7794_v17 }
 0x7df   :  { %v9394_v6 = vpop.f32.mrf.mxu1  ;;  %v7235_v53 = vadd.f32 %v9319_v5, %v14195_v36  ;;  %v7782_v9 = vshrl.u32 %v7781_v18, 5  ;;  %v7808_v61 = vsel %vm7807_vm4, 1, %v15097_v1  ;;  %10462 = vpow2.f32 %v7468_v58 }
 0x7e0   :  { %v9321_v22 = vpop.f32.mrf.mxu0  ;;  %v7454_v44 = vsub.f32 0.0, %v7440_v51  ;;  %vm7821_vm6 = vc.u32 %v14393_v43, 2454267026  ;;  %v14408_v18 = vmul.u32.u64.low 2454267026, %v14398_v49  ;;  %v14409_v40 = vmul.u32.u64.high 2454267026, %v14398_v49, %v14408_v18 }
 0x7e1   :  { %v9395_v0 = vpop.f32.mrf.mxu1  ;;  %v9322_v42 = vadd.f32 %v9321_v22, %v9320_v13  ;;  %v7453_v13 = vsub.f32 0.0, %v7439_v21  ;;  %vm7877_vm10 = vcmp.lt.s32.totalorder %v14362_v60, 0 }
 0x7e2   :  { %v9323_v20 = vpop.f32.mrf.mxu0  ;;  %v9396_v23 = vadd.f32 %v9395_v0, %v9394_v6  ;;  %v7472_v58 = vmul.f32 1.442695, %v7454_v44  ;;  %v7783_v0 = vmul.u32 56, %v7782_v9  ;;  %v7822_v44 = vsel %vm7821_vm6, 1, %v15097_v1  ;;  %vm14491_vm8 = vmand %vm7877_vm10, %vm7863_vm2 }
 0x7e3   :  { %v9397_v16 = vpop.f32.mrf.mxu1  ;;  %v7240_v54 = vadd.f32 %v9322_v42, %v14195_v36  ;;  %vm7835_vm7 = vc.u32 %v14408_v18, 2454267026 }
 0x7e4   :  { %v9324_v31 = vpop.f32.mrf.mxu0 }
 0x7e5   :  { %v9398_v26 = vpop.f32.mrf.mxu1  ;;  %v9325_v24 = vadd.f32 %v9324_v31, %v9323_v20  ;;  %v14403_v20 = vadd.f32 %v9393_v41, %v7235_v53  ;;  %v7470_v31 = vmul.f32 1.442695, %v7453_v13  ;;  %v15099_v53 = vsub.f32 0.0, %v14382_v12 }
 0x7e6   :  { %v9326_v7 = vpop.f32.mrf.mxu0  ;;  %v9399_v5 = vadd.f32 %v9398_v26, %v9397_v16  ;;  %v14413_v17 = vadd.f32 %v9396_v23, %v7240_v54  ;;  %v14420_v16 = vsub.s32 %v14202_v56, %v7769_v2  ;;  %v7796_v13 = vshrl.u32 %v7795_v55, 5 }
 0x7e7   :  { %v9400_v30 = vpop.f32.mrf.mxu1  ;;  %v7245_v3 = vadd.f32 %v9325_v24, %v14195_v36  ;;  %v7441_v8 = vand.u32 2147483647, %v15099_v53  ;;  %v15002_v6 = vsub.f32 0.0, %v14403_v20  ;;  %v7809_v41 = vadd.s32 %v14369_v46, %v7808_v61 }
 0x7e8   :  { %v9327_v22 = vpop.f32.mrf.mxu0  ;;  %15100 = vst [vmem:[#allocation26_spill] sm:$0xff] %v14420_v16  ;;  %10464 = vpow2.f32 %v7470_v31  ;;  %v14424_v54 = vadd.s32 104, %v14038_v57  ;;  %v14438_v46 = vsub.s32 %v14264_v32, %v7783_v0  ;;  %v7836_v55 = vsel %vm7835_vm7, 1, %v15097_v1 }
 0x7e9   :  { %v9401_v33 = vpop.f32.mrf.mxu1  ;;  %v9328_v45 = vadd.f32 %v9327_v22, %v9326_v7  ;;  %v14417_v7 = vadd.f32 %v9399_v5, %v7245_v3  ;;  %v15001_v5 = vsub.f32 0.0, %v14413_v17  ;;  %10466 = vpow2.f32 %v7472_v58  ;;  %v14441_v3 = vpop.eup %10458 }
 0x7ea   :  { %v9329_v21 = vpop.f32.mrf.mxu0  ;;  %v9402_v26 = vadd.f32 %v9401_v33, %v9400_v30  ;;  %15101 = vst [vmem:[#allocation10_spill] sm:$0xff] %v14424_v54  ;;  %v7442_v2 = vand.u32 2147483647, %v15002_v6  ;;  %15102 = vst [vmem:[#allocation9_spill] sm:$0xff] %v14438_v46  ;;  %v7797_v33 = vmul.u32 56, %v7796_v13  ;;  %v7810_v30 = vshrl.u32 %v7809_v41, 5 }
 0x7eb   :  { %v9403_v14 = vpop.f32.mrf.mxu1  ;;  %v7250_v51 = vadd.f32 %v9328_v45, %v14195_v36  ;;  %v14999_v57 = vsub.f32 0.0, %v14417_v7  ;;  %vm7864_vm12 = vcmp.ne.s32.totalorder %v14420_v16, 0  ;;  %v7823_v23 = vadd.s32 %v14394_v25, %v7822_v44 }
 0x7ec   :  { %v9330_v42 = vpop.f32.mrf.mxu0  ;;  %v14446_v45 = vmul.u32.u64.low 2454267026, %v14424_v54  ;;  %v14447_v31 = vmul.u32.u64.high 2454267026, %v14424_v54, %v14446_v45  ;;  %vm7878_vm13 = vcmp.lt.s32.totalorder %v14420_v16, 0  ;;  %vm7865_vm14 = vcmp.ne.s32.totalorder %v14438_v46, 0 }
 0x7ed   :  { %v9331_v24 = vadd.f32 %v9330_v42, %v9329_v21  ;;  %v9404_v22 = vpop.f32.mrf.mxu1  ;;  %v7455_v21 = vsub.f32 0.0, %v7441_v8  ;;  %v14429_v9 = vadd.f32 %v9402_v26, %v7250_v51  ;;  %v14449_v42 = vpop.eup %10460  ;;  %v7456_v8 = vsub.f32 0.0, %v7442_v2  ;;  %vm14504_vm2 = vmand %vm7878_vm13, %vm7864_vm12 }
 0x7ee   :  { %v9405_v43 = vadd.f32 %v9404_v22, %v9403_v14  ;;  %v9332_v61 = vpop.f32.mrf.mxu0  ;;  %v7443_v14 = vand.u32 2147483647, %v15001_v5  ;;  %v7444_v25 = vand.u32 2147483647, %v14999_v57  ;;  %v7837_v51 = vadd.s32 %v14409_v40, %v7836_v55  ;;  %v14467_v26 = vpop.eup %10462 }
 0x7ef   :  { %v7255_v56 = vadd.f32 %v9331_v24, %v14195_v36  ;;  %v7474_v32 = vmul.f32 1.442695, %v7455_v21  ;;  %v14998_v18 = vsub.f32 0.0, %v14429_v9  ;;  %v14461_v24 = vadd.s32 56, %v14420_v16 }
 0x7f0   :  { %v14465_v58 = vsub.s32 %v14311_v63, %v7797_v33  ;;  %v7811_v0 = vmul.u32 56, %v7810_v30  ;;  %v7492_v13 = vadd.f32 1.0, %v14441_v3  ;;  %v7501_v41 = vadd.f32 1.0, %v14449_v42  ;;  %v9333_v22 = vpop.f32.mrf.mxu0  ;;  %v9406_v33 = vpop.f32.mrf.mxu1 }
 0x7f1   :  { %v14454_v53 = vadd.f32 %v9405_v43, %v7255_v56  ;;  %v7824_v44 = vshrl.u32 %v7823_v23, 5  ;;  %vm7849_vm0 = vc.u32 %v14446_v45, 2454267026  ;;  %10468 = vpow2.f32 %v7474_v32 }
 0x7f2   :  { %15103 = vst [vmem:[#allocation18_spill] sm:$0xff] %v14465_v58  ;;  %v7457_v40 = vsub.f32 0.0, %v7443_v14  ;;  %v7445_v21 = vand.u32 2147483647, %v14998_v18  ;;  %v7476_v2 = vmul.f32 1.442695, %v7456_v8  ;;  %v14480_v23 = vsub.s32 %v14337_v52, %v7811_v0  ;;  %v9335_v32 = vpop.f32.mrf.mxu0 }
 0x7f3   :  { %v15000_v56 = vsub.f32 0.0, %v14454_v53  ;;  %v7458_v63 = vsub.f32 0.0, %v7444_v25  ;;  %vm7879_vm4 = vcmp.lt.s32.totalorder %v14438_v46, 0  ;;  %v7838_v43 = vshrl.u32 %v7837_v51, 5 }
 0x7f4   :  { %v7510_v30 = vadd.f32 1.0, %v14467_v26  ;;  %v14477_v55 = vadd.s32 56, %v14438_v46  ;;  %15105 = vst [vmem:[#allocation28_spill] sm:$0xff] %v14480_v23  ;;  %v7850_v45 = vsel %vm7849_vm0, 1, %v15097_v1  ;;  %10470 = vlog2.f32 %v7492_v13  ;;  %v9407_v13 = vpop.f32.mrf.mxu1  ;;  %vm14519_vm12 = vmand %vm7879_vm4, %vm7865_vm14 }
 0x7f5   :  { %vm7866_vm6 = vcmp.ne.s32.totalorder %v14465_v58, 0  ;;  %vm7880_vm7 = vcmp.lt.s32.totalorder %v14465_v58, 0  ;;  %v7825_v14 = vmul.u32 56, %v7824_v44  ;;  %v14485_v8 = vpop.eup %10464  ;;  %10472 = vlog2.f32 %v7501_v41 }
 0x7f6   :  { %15104 = vst [vmem:[#allocation27_spill] sm:$0xff] %v14477_v55  ;;  %v7478_v52 = vmul.f32 1.442695, %v7457_v40  ;;  %v7459_v1 = vsub.f32 0.0, %v7445_v21  ;;  %v7446_v51 = vand.u32 2147483647, %v15000_v56  ;;  %10474 = vpow2.f32 %v7476_v2  ;;  %v14498_v41 = vpop.eup %10466  ;;  %vm14530_vm13 = vmand %vm7880_vm7, %vm7866_vm6 }
 0x7f7   :  { %v7480_v0 = vmul.f32 1.442695, %v7458_v63  ;;  %v7839_v44 = vmul.u32 56, %v7838_v43  ;;  %v7851_v18 = vadd.s32 %v14447_v31, %v7850_v45  ;;  %10476 = vlog2.f32 %v7510_v30  ;;  %v9336_v30 = vpop.f32.mrf.mxu0 }
 0x7f8   :  { %v7460_v40 = vsub.f32 0.0, %v7446_v51  ;;  %vm7867_vm10 = vcmp.ne.s32.totalorder %v14480_v23, 0  ;;  %vm7881_vm0 = vcmp.lt.s32.totalorder %v14480_v23, 0  ;;  %v7519_v21 = vadd.f32 1.0, %v14485_v8 }
 0x7f9   :  { %v14524_v63 = vadd.s32 56, %v14465_v58  ;;  %v9334_v43 = vadd.f32 %v9333_v22, %v9332_v61  ;;  %10478 = vpow2.f32 %v7478_v52  ;;  %v7482_v45 = vmul.f32 1.442695, %v7459_v1  ;;  %v9409_v61 = vpop.f32.mrf.mxu1  ;;  %vm14548_vm14 = vmand %vm7881_vm0, %vm7867_vm10  ;;  %v9338_v54 = vpop.f32.mrf.mxu0 }
 0x7fa   :  { %v15113_v51 = vmov 0  ;;  %v14535_v31 = vsub.s32 %v14373_v11, %v7825_v14  ;;  %v14538_v56 = vadd.s32 56, %v14480_v23  ;;  %v7528_v5 = vadd.f32 1.0, %v14498_v41 }
 0x7fb   :  { %15112 = vst [vmem:[#allocation29_spill] sm:$0xff] %v14524_v63  ;;  %v15114_v51 = vsel %vm14530_vm13, 4294967295, %v15113_v51  ;;  %10480 = vpow2.f32 %v7480_v0  ;;  %v14542_v22 = vsub.s32 %v14398_v49, %v7839_v44  ;;  %v7852_v52 = vshrl.u32 %v7851_v18, 5 }
 0x7fc   :  { %15115 = vst [vmem:[#allocation20_spill] sm:$0xff] %v15114_v51  ;;  %15116 = vst [vmem:[#allocation22_spill] sm:$0xff] %v14538_v56  ;;  %v15117_v1 = vmov 0  ;;  %v7484_v14 = vmul.f32 1.442695, %v7460_v40  ;;  %v7260_v18 = vadd.f32 %v9334_v43, %v14195_v36  ;;  %v7495_v0 = vmul.f32 -0.5, %v14441_v3 }
 0x7fd   :  { %v15118_v1 = vsel %vm14548_vm14, 4294967295, %v15117_v1  ;;  %10482 = vlog2.f32 %v7519_v21  ;;  %v9408_v44 = vadd.f32 %v9407_v13, %v9406_v33  ;;  %v9337_v6 = vadd.f32 %v9336_v30, %v9335_v32  ;;  %v9410_v32 = vpop.f32.mrf.mxu1 }
 0x7fe   :  { %15119 = vst [vmem:[#allocation30_spill] sm:$0xff] %v15118_v1  ;;  %10484 = vpow2.f32 %v7482_v45  ;;  %v14567_v16 = vadd.s32 56, %v14535_v31  ;;  %v14573_v43 = vpop.eup %10468  ;;  %v14577_v13 = vmul.u32 56, %v7852_v52  ;;  %v14580_v21 = vadd.s32 56, %v14542_v22 }
 0x7ff   :  { %10486 = vlog2.f32 %v7528_v5  ;;  %v14575_v33 = vadd.f32 %v9408_v44, %v7260_v18  ;;  %v15124_v30 = vsub.f32 0.0, %v14236_v39  ;;  %v7498_v11 = vand.u32 2147483647, %v14441_v3  ;;  %v9339_v44 = vpop.f32.mrf.mxu0  ;;  %v9412_v63 = vpop.f32.mrf.mxu1 }
 0x800   :  { %15120 = vst [vmem:[#allocation8_spill] sm:$0xff] %v14567_v16  ;;  %15122 = vst [vmem:[#allocation24_spill] sm:$0xff] %v14577_v13  ;;  %v7504_v49 = vmul.f32 -0.5, %v14449_v42  ;;  %10488 = vpow2.f32 %v7484_v14  ;;  %v7496_v40 = vadd.f32 1.0, %v7495_v0  ;;  %v7513_v5 = vmul.f32 -0.5, %v14467_v26 }
 0x801   :  { %15121 = vst [vmem:[#allocation17_spill] sm:$0xff] %v14575_v33  ;;  %15123 = vst [vmem:[#allocation19_spill] sm:$0xff] %v14580_v21  ;;  %v14584_v45 = vmax.f32 %v15124_v30, 0.0  ;;  %v7265_v52 = vadd.f32 %v9337_v6, %v14195_v36  ;;  %v10471_v23 = vpop.eup %10470  ;;  %v15125_v56 = vsub.f32 0.0, %v14251_v59  ;;  %v7507_v39 = vand.u32 2147483647, %v14449_v42 }
 0x802   :  { %v15126_v30 = vsub.f32 0.0, %v14278_v29  ;;  %v7537_v14 = vadd.f32 1.0, %v14573_v43  ;;  %v10473_v0 = vpop.eup %10472  ;;  %v15127_v16 = vsub.f32 0.0, %v14324_v37  ;;  %v15128_v6 = vsub.f32 0.0, %v14339_v47 }
 0x803   :  { %v7423_v1 = vmax.f32 %v15125_v56, 0.0  ;;  %v15129_v59 = vsub.f32 0.0, %v14575_v33  ;;  %v9411_v58 = vadd.f32 %v9410_v32, %v9409_v61  ;;  %v14609_v51 = vpop.eup %10474  ;;  %vm14611_vm4 = vcmp.lt.f32.partialorder %v7498_v11, 0.0004427343 }
 0x804   :  { %v14596_v21 = vmax.f32 %v15126_v30, 0.0  ;;  %v14601_v13 = vmax.f32 %v15127_v16, 0.0  ;;  %v14605_v18 = vmax.f32 %v15128_v6, 0.0  ;;  %v7505_v30 = vadd.f32 1.0, %v7504_v49  ;;  %v10477_v47 = vpop.eup %10476 }
 0x805   :  { %v7447_v56 = vand.u32 2147483647, %v15129_v59  ;;  %v15132_v37 = vsub.f32 0.0, %v14382_v12  ;;  %v9340_v46 = vadd.f32 %v9339_v44, %v9338_v54  ;;  %v7497_v6 = vmul.f32 %v14441_v3, %v7496_v40  ;;  %v9413_v40 = vpop.f32.mrf.mxu1 }
 0x806   :  { %v7514_v55 = vadd.f32 1.0, %v7513_v5  ;;  %v14620_v59 = vadd.f32 %v9411_v58, %v7265_v52  ;;  %v7494_v61 = vmul.f32 0.6931472, %v10471_v23  ;;  %v7503_v32 = vmul.f32 0.6931472, %v10473_v0  ;;  %v14626_v49 = vpop.eup %10478 }
 0x807   :  { %v14617_v16 = vmax.f32 %v15132_v37, 0.0  ;;  %v7461_v33 = vsub.f32 0.0, %v7447_v56  ;;  %vm14622_vm6 = vcmp.lt.f32.partialorder %v7507_v39, 0.0004427343  ;;  %10490 = vlog2.f32 %v7537_v14 }
 0x808   :  { %v7516_v12 = vand.u32 2147483647, %v14467_v26  ;;  %v7546_v54 = vadd.f32 1.0, %v14609_v51  ;;  %v7420_v3 = vsub.f32 0.0, %v14620_v59  ;;  %v14631_v5 = vpop.eup %10480  ;;  %v7506_v58 = vmul.f32 %v14449_v42, %v7505_v30 }
 0x809   :  { %v7486_v44 = vmul.f32 1.442695, %v7461_v33  ;;  %v7512_v23 = vmul.f32 0.6931472, %v10477_v47  ;;  %v7522_v52 = vmul.f32 -0.5, %v14485_v8  ;;  %v7270_v39 = vadd.f32 %v9340_v46, %v14195_v36 }
 0x80a   :  { %v7515_v14 = vmul.f32 %v14467_v26, %v7514_v55  ;;  %v7531_v0 = vmul.f32 -0.5, %v14498_v41  ;;  %v7448_v33 = vand.u32 2147483647, %v7420_v3  ;;  %v10483_v56 = vpop.eup %10482  ;;  %v7500_v37 = vsel %vm14611_vm4, %v7497_v6, %v7494_v61 }
 0x80b   :  { %10492 = vpow2.f32 %v7486_v44  ;;  %v7509_v42 = vsel %vm14622_vm6, %v7506_v58, %v7503_v32  ;;  %v15135_v36 = vsel %vm14242_vm3, %v14231_v38, %v14186_v28  ;;  %v7555_v26 = vadd.f32 1.0, %v14626_v49  ;;  %v14654_v30 = vpop.eup %10484 }
 0x80c   :  { %vm14649_vm7 = vcmp.lt.s32.totalorder %v15135_v36, 49  ;;  %v9414_v55 = vadd.f32 %v9413_v40, %v9412_v63  ;;  %v15138_v29 = vsel %vm14223_vm1, %v14228_v27, %v14183_v19  ;;  %vm14665_vm0 = vcmp.lt.f32.partialorder %v7516_v12, 0.0004427343  ;;  %v10487_v63 = vpop.eup %10486 }
 0x80d   :  { %vm14661_vm10 = vcmp.lt.s32.totalorder %v15138_v29, 49  ;;  %v7525_v38 = vand.u32 2147483647, %v14485_v8  ;;  %10494 = vlog2.f32 %v7546_v54  ;;  %v7564_v48 = vadd.f32 1.0, %v14631_v5  ;;  %v14684_v11 = vpop.eup %10488 }
 0x80e   :  { %v7518_v34 = vsel %vm14665_vm0, %v7515_v14, %v7512_v23  ;;  %v15143_v19 = vsel %vm14257_vm5, %v14234_v10, %v14197_v35  ;;  %v7523_v6 = vadd.f32 1.0, %v7522_v52  ;;  %v7462_v61 = vsub.f32 0.0, %v7448_v33 }
 0x80f   :  { %vm14678_vm1 = vcmp.lt.s32.totalorder %v15143_v19, 49  ;;  %v14682_v32 = vadd.f32 %v9414_v55, %v7270_v39  ;;  %v7618_v12 = vadd.f32 %v7500_v37, %v14584_v45  ;;  %v7619_v54 = vadd.f32 %v7509_v42, %v7423_v1 }
 0x810   :  { %v7532_v44 = vadd.f32 1.0, %v7531_v0  ;;  %v7540_v40 = vmul.f32 -0.5, %v14573_v43  ;;  %v7521_v50 = vmul.f32 0.6931472, %v10483_v56  ;;  %10496 = vlog2.f32 %v7555_v26 }
 0x811   :  { %v7573_v35 = vadd.f32 1.0, %v14654_v30  ;;  %v7488_v10 = vmul.f32 1.442695, %v7462_v61  ;;  %v7620_v58 = vadd.f32 %v7518_v34, %v14596_v21  ;;  %v7534_v23 = vand.u32 2147483647, %v14498_v41  ;;  %v15156_v34 = vld [vmem:[#allocation7_spill] sm:$0xff] }
 0x812   :  { %10498 = vlog2.f32 %v7564_v48  ;;  %v7421_v52 = vsub.f32 0.0, %v14682_v32  ;;  %v7524_v39 = vmul.f32 %v14485_v8, %v7523_v6  ;;  %v7530_v14 = vmul.f32 0.6931472, %v10487_v63  ;;  %v15148_v8 = vld [vmem:[#allocation15_spill] sm:$0xff] }
 0x813   :  { %v7582_v1 = vadd.f32 1.0, %v14684_v11  ;;  %10500 = vpow2.f32 %v7488_v10  ;;  %v7632_v45 = vmin.f32 %v7618_v12, 100.0  ;;  %v7633_v0 = vmin.f32 %v7619_v54, 100.0 }
 0x814   :  { %vm14694_vm3 = vcmp.lt.f32.partialorder %v7525_v38, 0.0004427343  ;;  %v7449_v21 = vand.u32 2147483647, %v7421_v52  ;;  %v15149_v37 = vsel %vm14288_vm9, %v14275_v62, %v15148_v8  ;;  %v7533_v36 = vmul.f32 %v14498_v41, %v7532_v44  ;;  %v10491_v55 = vpop.eup %10490  ;;  %v15157_v41 = vld [vmem:[#allocation11_spill] sm:$0xff] }
 0x815   :  { %v7527_v56 = vsel %vm14694_vm3, %v7524_v39, %v7521_v50  ;;  %vm14707_vm5 = vcmp.lt.s32.totalorder %v15149_v37, 49  ;;  %v7541_v26 = vadd.f32 1.0, %v7540_v40  ;;  %10502 = vlog2.f32 %v7573_v35 }
 0x816   :  { %v7634_v29 = vmin.f32 %v7620_v58, 100.0  ;;  %vm14712_vm4 = vcmp.lt.f32.partialorder %v7534_v23, 0.0004427343  ;;  %v15154_v38 = vsub.f32 0.0, %v14403_v20  ;;  %v7463_v48 = vsub.f32 0.0, %v7449_v21 }
 0x817   :  { %v7536_v62 = vsel %vm14712_vm4, %v7533_v36, %v7530_v14  ;;  %v15158_v19 = vsel %vm14330_vm11, %v15156_v34, %v15157_v41  ;;  %v7549_v61 = vmul.f32 -0.5, %v14609_v51  ;;  %v15161_v12 = vsub.f32 0.0, %v14413_v17  ;;  %v15170_v36 = vld [vmem:[#allocation23_spill] sm:$0xff] }
 0x818   :  { %v14718_v4 = vmax.f32 %v15154_v38, 0.0  ;;  %vm14727_vm9 = vcmp.lt.s32.totalorder %v15158_v19, 49  ;;  %10504 = vlog2.f32 %v7582_v1  ;;  %v7942_v54 = vsel %vm14649_vm7, %v7633_v0, 0.0  ;;  %v14740_v35 = vpop.eup %10492 }
 0x819   :  { %v14734_v20 = vmax.f32 %v15161_v12, 0.0  ;;  %v7621_v44 = vadd.f32 %v7527_v56, %v14601_v13  ;;  %v7543_v40 = vand.u32 2147483647, %v14573_v43  ;;  %v7490_v50 = vmul.f32 1.442695, %v7463_v48 }
 0x81a   :  { %v7941_v10 = vsel %vm14661_vm10, %v7632_v45, 0.0  ;;  %v7539_v58 = vmul.f32 0.6931472, %v10491_v55  ;;  %v7542_v23 = vmul.f32 %v14573_v43, %v7541_v26  ;;  %v15162_v17 = vsub.f32 0.0, %v14417_v7  ;;  %v10495_v0 = vpop.eup %10494  ;;  %v15171_v26 = vld [vmem:[#allocation21_spill] sm:$0xff] }
 0x81b   :  { %v7943_v46 = vsel %vm14678_vm1, %v7634_v29, 0.0  ;;  %v7622_v13 = vadd.f32 %v7536_v62, %v14605_v18  ;;  %v7558_v14 = vmul.f32 -0.5, %v14626_v49  ;;  %v7591_v1 = vadd.f32 1.0, %v14740_v35 }
 0x81c   :  { %v14747_v39 = vmax.f32 %v15162_v17, 0.0  ;;  %vm15163_vm11 = vcmask 261120   ;;  %v7550_v45 = vadd.f32 1.0, %v7549_v61  ;;  %v7552_v33 = vand.u32 2147483647, %v14609_v51 }
 0x81d   :  { %v7956_v47 = vsel %vm15163_vm11, %v7942_v54, 0.0  ;;  %10506 = vpow2.f32 %v7490_v50  ;;  %v7635_v43 = vmin.f32 %v7621_v44, 100.0  ;;  %vm14756_vm6 = vcmp.lt.f32.partialorder %v7543_v40, 0.0004427343  ;;  %vm15167_vm7 = vmmov %vm15163_vm11  ;;  %v10497_v28 = vpop.eup %10496 }
 0x81e   :  { %v15166_v27 = vsub.f32 0.0, %v14429_v9  ;;  %10508 = vlog2.f32 %v7591_v1  ;;  %v7955_v18 = vsel %vm15167_vm7, %v7941_v10, 0.0  ;;  %vm15168_vm10 = vmmov %vm15167_vm7  ;;  %v7545_v8 = vsel %vm14756_vm6, %v7542_v23, %v7539_v58 }
 0x81f   :  { %v7958_v56 = vsel %vm15168_vm10, %v7943_v46, 0.0  ;;  %v15172_v55 = vsel %vm14357_vm15, %v15170_v36, %v15171_v26  ;;  %v7567_v9 = vmul.f32 -0.5, %v14631_v5  ;;  %v7957_v38 = vadd.f32 %v7956_v47, %v7955_v18  ;;  %v10499_v34 = vpop.eup %10498 }
 0x820   :  { %v14762_v21 = vmax.f32 %v15166_v27, 0.0  ;;  %vm14773_vm0 = vcmp.lt.s32.totalorder %v15172_v55, 49  ;;  %v7636_v48 = vmin.f32 %v7622_v13, 100.0  ;;  %v7548_v62 = vmul.f32 0.6931472, %v10495_v0  ;;  %v14788_v44 = vpop.eup %10500 }
 0x821   :  { %v7559_v63 = vadd.f32 1.0, %v7558_v14  ;;  %v7551_v41 = vmul.f32 %v14609_v51, %v7550_v45  ;;  %vm14779_vm1 = vcmp.lt.f32.partialorder %v7552_v33, 0.0004427343  ;;  %v7576_v61 = vmul.f32 -0.5, %v14654_v30 }
 0x822   :  { %v15177_v12 = vsub.f32 0.0, %v14454_v53  ;;  %v7959_v40 = vadd.f32 %v7958_v56, %v7957_v38  ;;  %v7944_v50 = vsel %vm14707_vm5, %v7635_v43, 0.0  ;;  %v7623_v10 = vadd.f32 %v7545_v8, %v14617_v16  ;;  %v10503_v42 = vpop.eup %10502 }
 0x823   :  { %v7561_v51 = vand.u32 2147483647, %v14626_v49  ;;  %vm7868_vm15 = vcmp.ne.s32.totalorder %v14535_v31, 0  ;;  %vm7882_vm3 = vcmp.lt.s32.totalorder %v14535_v31, 0  ;;  %v7557_v58 = vmul.f32 0.6931472, %v10497_v28 }
 0x824   :  { %v14786_v54 = vmax.f32 %v15177_v12, 0.0  ;;  %v7568_v23 = vadd.f32 1.0, %v7567_v9  ;;  %v7585_v53 = vmul.f32 -0.5, %v14684_v11  ;;  %v7600_v17 = vadd.f32 1.0, %v14788_v44  ;;  %v15190_v9 = vld [vmem:[#allocation27_spill] sm:$0xff]  ;;  %v15191_v28 = vld [vmem:[#allocation9_spill] sm:$0xff] }
 0x825   :  { %vm7869_vm4 = vcmp.ne.s32.totalorder %v14542_v22, 0  ;;  %vm7883_vm11 = vcmp.lt.s32.totalorder %v14542_v22, 0  ;;  %v7945_v16 = vsel %vm14727_vm9, %v7636_v48, 0.0  ;;  %v7554_v46 = vsel %vm14779_vm1, %v7551_v41, %v7548_v62  ;;  %v10505_v33 = vpop.eup %10504  ;;  %vm15181_vm9 = vmmov %vm15167_vm7 }
 0x826   :  { %v7560_v13 = vmul.f32 %v14626_v49, %v7559_v63  ;;  %v7570_v14 = vand.u32 2147483647, %v14631_v5  ;;  %v15178_v1 = vsel %vm14491_vm8, %v14385_v15, %v14362_v60  ;;  %v7566_v47 = vmul.f32 0.6931472, %v10499_v34  ;;  %v15184_v15 = vld [vmem:[#allocation26_spill] sm:$0xff] }
 0x827   :  { %vm14811_vm5 = vcmp.lt.s32.totalorder %v15178_v1, 49  ;;  %v7577_v45 = vadd.f32 1.0, %v7576_v61  ;;  %v7594_v6 = vmul.f32 -0.5, %v14740_v35  ;;  %10510 = vlog2.f32 %v7600_v17 }
 0x828   :  { %v7960_v43 = vsel %vm15181_vm9, %v7944_v50, 0.0  ;;  %v7637_v49 = vmin.f32 %v7623_v10, 100.0  ;;  %vm14817_vm6 = vcmp.lt.f32.partialorder %v7561_v51, 0.0004427343  ;;  %v7579_v25 = vand.u32 2147483647, %v14654_v30 }
 0x829   :  { %v7563_v60 = vsel %vm14817_vm6, %v7560_v13, %v7557_v58  ;;  %v15185_v27 = vsel %vm14504_vm2, %v14461_v24, %v15184_v15  ;;  %v7569_v56 = vmul.f32 %v14631_v5, %v7568_v23  ;;  %v7575_v8 = vmul.f32 0.6931472, %v10503_v42  ;;  %v15198_v50 = vld [vmem:[#allocation29_spill] sm:$0xff]  ;;  %v15199_v10 = vld [vmem:[#allocation18_spill] sm:$0xff]  ;;  %vm14904_vm6 = vmand %vm7883_vm11, %vm7869_vm4 }
 0x82a   :  { %vm14829_vm8 = vcmp.lt.s32.totalorder %v15185_v27, 49  ;;  %v7586_v37 = vadd.f32 1.0, %v7585_v53  ;;  %v7962_v36 = vsel %vm15167_vm7, %v7945_v16, 0.0  ;;  %v7624_v26 = vadd.f32 %v7554_v46, %v14718_v4  ;;  %v14853_v63 = vpop.eup %10506  ;;  %v15214_v27 = vld [vmem:[#allocation24_spill] sm:$0xff]  ;;  %vm15224_vm4 = vmmov %vm15167_vm7 }
 0x82b   :  { %vm14836_vm10 = vcmp.lt.f32.partialorder %v7570_v14, 0.0004427343  ;;  %v7588_v57 = vand.u32 2147483647, %v14684_v11  ;;  %v15192_v5 = vsel %vm14519_vm12, %v15190_v9, %v15191_v28  ;;  %v7578_v4 = vmul.f32 %v14654_v30, %v7577_v45  ;;  %v10509_v61 = vpop.eup %10508  ;;  %vm15225_vm11 = vmmov %vm15224_vm4 }
 0x82c   :  { %v7572_v24 = vsel %vm14836_vm10, %v7569_v56, %v7566_v47  ;;  %vm14848_vm2 = vcmp.lt.s32.totalorder %v15192_v5, 49  ;;  %v7584_v48 = vmul.f32 0.6931472, %v10505_v33  ;;  %v7595_v62 = vadd.f32 1.0, %v7594_v6  ;;  %v15207_v47 = vld [vmem:[#allocation17_spill] sm:$0xff]  ;;  %v15215_v56 = vld [vmem:[#allocation10_spill] sm:$0xff] }
 0x82d   :  { %v7946_v34 = vsel %vm14773_vm0, %v7637_v49, 0.0  ;;  %v7625_v41 = vadd.f32 %v7563_v60, %v14734_v20  ;;  %vm14858_vm1 = vcmp.lt.f32.partialorder %v7579_v25, 0.0004427343  ;;  %v7597_v19 = vand.u32 2147483647, %v14740_v35 }
 0x82e   :  { %v7581_v12 = vsel %vm14858_vm1, %v7578_v4, %v7575_v8  ;;  %v15200_v51 = vsel %vm14530_vm13, %v15198_v50, %v15199_v10  ;;  %v7587_v20 = vmul.f32 %v14684_v11, %v7586_v37  ;;  %v7603_v58 = vmul.f32 -0.5, %v14788_v44  ;;  %vm14889_vm13 = vmand %vm7882_vm3, %vm7868_vm15  ;;  %v15216_v37 = vld [vmem:[#allocation8_spill] sm:$0xff] }
 0x82f   :  { %vm14870_vm12 = vcmp.lt.s32.totalorder %v15200_v51, 49  ;;  %v7609_v23 = vadd.f32 1.0, %v14853_v63  ;;  %v7638_v53 = vmin.f32 %v7624_v26, 100.0  ;;  %v7626_v17 = vadd.f32 %v7572_v24, %v14747_v39  ;;  %vm15213_vm15 = vmmov %vm15167_vm7  ;;  %v15217_v26 = vld [vmem:[#allocation19_spill] sm:$0xff]  ;;  %v15220_v24 = vld [vmem:[#allocation28_spill] sm:$0xff] }
 0x830   :  { %vm14878_vm0 = vcmp.lt.f32.partialorder %v7588_v57, 0.0004427343  ;;  %v7593_v16 = vmul.f32 0.6931472, %v10509_v61  ;;  %v7961_v46 = vadd.f32 %v7960_v43, %v7959_v40  ;;  %v7596_v14 = vmul.f32 %v14740_v35, %v7595_v62  ;;  %v15219_v57 = vld [vmem:[#allocation22_spill] sm:$0xff]  ;;  %vm15226_vm7 = vmmov %vm15224_vm4 }
 0x831   :  { %v7590_v13 = vsel %vm14878_vm0, %v7587_v20, %v7584_v48  ;;  %10512 = vlog2.f32 %v7609_v23  ;;  %v7639_v39 = vmin.f32 %v7625_v41, 100.0  ;;  %v7627_v1 = vadd.f32 %v7581_v12, %v14762_v21  ;;  %vm15230_vm0 = vmmov %vm15224_vm4 }
 0x832   :  { %v15208_v45 = vsub.f32 0.0, %v15207_v47  ;;  %vm14896_vm9 = vcmp.lt.f32.partialorder %v7597_v19, 0.0004427343  ;;  %v7963_v33 = vadd.f32 %v7962_v36, %v7961_v46  ;;  %v7964_v43 = vsel %vm15213_vm15, %v7946_v34, 0.0  ;;  %vm15232_vm15 = vmmov %vm15230_vm0 }
 0x833   :  { %v7599_v21 = vsel %vm14896_vm9, %v7596_v14, %v7593_v16  ;;  %v7604_v49 = vadd.f32 1.0, %v7603_v58  ;;  %v7947_v7 = vsel %vm14811_vm5, %v7638_v53, 0.0  ;;  %v7640_v25 = vmin.f32 %v7626_v17, 100.0  ;;  %vm15231_vm9 = vmmov %vm15230_vm0 }
 0x834   :  { %v7433_v40 = vmax.f32 %v15208_v45, 0.0  ;;  %v7628_v60 = vadd.f32 %v7590_v13, %v14786_v54  ;;  %v7606_v15 = vand.u32 2147483647, %v14788_v44  ;;  %v7854_v8 = vsub.s32 %v15215_v56, %v15214_v27  ;;  %v10511_v28 = vpop.eup %10510 }
 0x835   :  { %v7924_v36 = vsel %vm14889_vm13, %v15216_v37, %v14535_v31  ;;  %v7925_v55 = vsel %vm14904_vm6, %v15217_v26, %v14542_v22  ;;  %v15221_v54 = vsel %vm14548_vm14, %v15219_v57, %v15220_v24  ;;  %v7965_v5 = vadd.f32 %v7964_v43, %v7963_v33 }
 0x836   :  { %vm14930_vm3 = vcmp.lt.s32.totalorder %v15221_v54, 49  ;;  %v7948_v4 = vsel %vm14829_vm8, %v7639_v39, 0.0  ;;  %v7641_v31 = vmin.f32 %v7627_v1, 100.0  ;;  %v7629_v48 = vadd.f32 %v7599_v21, %v7433_v40 }
 0x837   :  { %v7966_v62 = vsel %vm15224_vm4, %v7947_v7, 0.0  ;;  %v7602_v34 = vmul.f32 0.6931472, %v10511_v28  ;;  %v7605_v22 = vmul.f32 %v14788_v44, %v7604_v49  ;;  %v7612_v41 = vmul.f32 -0.5, %v14853_v63 }
 0x838   :  { %v7949_v2 = vsel %vm14848_vm2, %v7640_v25, 0.0  ;;  %v7642_v19 = vmin.f32 %v7628_v60, 100.0  ;;  %v7434_v61 = vmax.f32 %v7420_v3, 0.0  ;;  %vm7607_vm14 = vcmp.lt.f32.partialorder %v7606_v15, 0.0004427343 }
 0x839   :  { %v7968_v18 = vsel %vm15225_vm11, %v7948_v4, 0.0  ;;  %v7608_v12 = vsel %vm7607_vm14, %v7605_v22, %v7602_v34  ;;  %vm7870_vm5 = vcmp.ne.s32.totalorder %v7854_v8, 0  ;;  %vm7884_vm8 = vcmp.lt.s32.totalorder %v7854_v8, 0 }
 0x83a   :  { %v7967_v30 = vadd.f32 %v7966_v62, %v7965_v5  ;;  %v7950_v50 = vsel %vm14870_vm12, %v7641_v31, 0.0  ;;  %v7643_v44 = vmin.f32 %v7629_v48, 100.0  ;;  %v7630_v10 = vadd.f32 %v7608_v12, %v7434_v61  ;;  %vm14948_vm2 = vmand %vm7884_vm8, %vm7870_vm5 }
 0x83b   :  { %v7970_v51 = vsel %vm15226_vm7, %v7949_v2, 0.0  ;;  %v7613_v38 = vadd.f32 1.0, %v7612_v41  ;;  %v7912_v20 = vadd.s32 56, %v7854_v8  ;;  %vm7938_vm10 = vcmp.lt.s32.totalorder %v7924_v36, 49  ;;  %vm15229_vm12 = vmmov %vm15224_vm4 }
 0x83c   :  { %v7969_v58 = vadd.f32 %v7968_v18, %v7967_v30  ;;  %v7615_v59 = vand.u32 2147483647, %v14853_v63  ;;  %v7644_v3 = vmin.f32 %v7630_v10, 100.0  ;;  %v7951_v53 = vsel %vm14930_vm3, %v7642_v19, 0.0  ;;  %vm15233_vm3 = vmmov %vm15230_vm0 }
 0x83d   :  { %vm7939_vm1 = vcmp.lt.s32.totalorder %v7925_v55, 49  ;;  %v7972_v29 = vsel %vm15229_vm12, %v7950_v50, 0.0  ;;  %v7952_v42 = vsel %vm7938_vm10, %v7643_v44, 0.0  ;;  %v7614_v13 = vmul.f32 %v14853_v63, %v7613_v38 }
 0x83e   :  { %v10513_v17 = vpop.eup %10512  ;;  %v7971_v16 = vadd.f32 %v7970_v51, %v7969_v58  ;;  %v7926_v14 = vsel %vm14948_vm2, %v7912_v20, %v7854_v8  ;;  %v7974_v11 = vsel %vm15230_vm0, %v7951_v53, 0.0  ;;  %v7435_v39 = vmax.f32 %v7421_v52, 0.0 }
 0x83f   :  { %v7611_v46 = vmul.f32 0.6931472, %v10513_v17  ;;  %vm7616_vm13 = vcmp.lt.f32.partialorder %v7615_v59, 0.0004427343  ;;  %v7953_v1 = vsel %vm7939_vm1, %v7644_v3, 0.0  ;;  %v7976_v40 = vsel %vm15231_vm9, %v7952_v42, 0.0 }
 0x840   :  { %v7973_v47 = vadd.f32 %v7972_v29, %v7971_v16  ;;  %vm7940_vm6 = vcmp.lt.s32.totalorder %v7926_v14, 49  ;;  %v7978_v33 = vsel %vm15232_vm15, %v7953_v1, 0.0  ;;  %vm7993_vm4 = vcmask 0  }
 0x841   :  { %v7617_v45 = vsel %vm7616_vm13, %v7614_v13, %v7611_v46 }
 0x842   :  { %v7631_v6 = vadd.f32 %v7617_v45, %v7435_v39  ;;  %v7975_v35 = vadd.f32 %v7974_v11, %v7973_v47 }
 0x844   :  { %v7645_v63 = vmin.f32 %v7631_v6, 100.0  ;;  %v7977_v43 = vadd.f32 %v7976_v40, %v7975_v35 }
 0x846   :  { %v7954_v21 = vsel %vm7940_vm6, %v7645_v63, 0.0  ;;  %v7979_v49 = vadd.f32 %v7978_v33, %v7977_v43 }
 0x847   :  { %v7980_v7 = vsel %vm15233_vm3, %v7954_v21, 0.0 }
 0x848   :  { %v7981_v25 = vadd.f32 %v7980_v7, %v7979_v49 }
 0x84a   :  { %7982 = vadd.xlane.f32.xlu0 %v7981_v25 }
 0x8d3   :  { %v7983_v32 = vpop.xlane.xlu0 %7982 }
 0x8d4   :  { %v7984_v52 = vrot.slane %v7983_v32, 4 }
 0x8d6   :  { %v7985_v60 = vadd.f32 %v7984_v52, %v7983_v32 }
 0x8d8   :  { %v7986_v15 = vrot.slane %v7985_v60, 2 }
 0x8da   :  { %v7987_v27 = vadd.f32 %v7986_v15, %v7985_v60 }
 0x8dc   :  { %v7988_v56 = vrot.slane %v7987_v27, 1 }
 0x8de   :  { %v7989_v8 = vadd.f32 %v7988_v56, %v7987_v27 }
 0x8e0   :  { %10452 = vpush %v7989_v8 }
 0x911   :  { %s10453_s3 = spop %10452 }
 0x912   :  { %s7991_s6 = smul.f32 0.0006377551, %s10453_s3 }
 0x914   :  { %v7992_v37 = vstv %s7991_s6 }
 0x915   :  { %7994 = vst.msk [vmem:[#allocation2] sm:$0x1] %vm7993_vm4, %v7992_v37 }
 0x916   :  { %10525 = shalt.err (!%p10522_p4)
}
 0x917   :  { %8004 = dma.vmem_to_hbm [thread:$0]  %s8002_s5, 16, %s14980_s13, [#allocation3]  }
 0x918   :  { %10534 = dma.done.wait [#allocation3], 16  }
 0x919   :  { %10535 = vsyncadd [#allocation3], 4294967280 }
 0x91a   :  { %8008 = vsyncpa [#allocation3], 1 }

</bundles_post_ra>
